<compile_context>
chip_gen: v5e
topology: v5e:2x2
jax: 0.10.0
libtpu: 0.0.40
codegen_flags: <defaults>
</compile_context>

<pallas_src>
import functools

import jax
import jax.numpy as jnp
from jax import lax
from jax.experimental import pallas as pl
from jax.experimental.pallas import tpu as pltpu

LRELU_SLOPE = 0.1
_LANE = 128


def get_padding(kernel_size, dilation=1):
    return int((kernel_size * dilation - dilation) / 2)


def _round_up(x, m):
    return ((x + m - 1) // m) * m


def _pick_t_tile(t_needed, per_col_bytes, max_tile=1024, budget=8 * 1024 * 1024):
    """Largest multiple-of-128 tile <= max_tile whose rough footprint fits budget."""
    tile = min(_round_up(max(int(t_needed), 1), _LANE), max_tile)
    while tile > _LANE and tile * per_col_bytes > budget:
        tile -= _LANE
    return max(tile, _LANE)


def _mask_time(v, abs_start, t_total):
    """Zero columns whose absolute time position falls outside [0, t_total)."""
    w = v.shape[-1]
    pos = abs_start + lax.broadcasted_iota(jnp.int32, (1, w), 1)
    return jnp.where(jnp.logical_and(pos >= 0, pos < t_total), v, 0.0)


# ----------------------------------------------------------------------------
# Weight preparation (host-side, once)
# ----------------------------------------------------------------------------
def _flatten_conv_w(w):
    """(C_out, C_in, K) torch Conv1d weight -> (C_out, K*C_in) bf16, tap-major."""
    c_out, c_in, k = w.shape
    return jnp.transpose(w, (0, 2, 1)).reshape(c_out, k * c_in).astype(jnp.bfloat16)


def _build_polyphase(w_t, stride, padding):
    """(C_in, C_out, K) torch ConvTranspose1d weight -> polyphase filters.

    Returns Wp (stride, C_out, ntaps*C_in) bf16, per-phase input shifts, left pad PL,
    ntaps.  Phase r computes out[q*stride + r] = sum_j Wp[r,:,j*C_in:(j+1)*C_in] @
    x_pad[q + shifts[r] + j] with x_pad = pad(x, left=PL).
    """
    c_in, c_out, K = w_t.shape
    tapsets, m0s = [], []
    for r in range(stride):
        km = (r + padding) % stride
        ks_list = list(range(km, K, stride))
        if ks_list:
            k_max = ks_list[-1]
            m0 = (r + padding - k_max) // stride
            taps = list(reversed(ks_list))  # decreasing k -> offsets m0, m0+1, ...
        else:
            m0, taps = 0, []
        m0s.append(m0)
        tapsets.append(taps)
    ntaps = max(1, max(len(t) for t in tapsets))
    PL = max(0, -min(m0s))
    shifts = tuple(m0 + PL for m0 in m0s)
    zeros = jnp.zeros((c_out, c_in), w_t.dtype)
    rows = []
    for r in range(stride):
        blocks = []
        for j in range(ntaps):
            if j < len(tapsets[r]):
                blocks.append(jnp.transpose(w_t[:, :, tapsets[r][j]], (1, 0)))
            else:
                blocks.append(zeros)
        rows.append(jnp.concatenate(blocks, axis=1))
    Wp = jnp.stack(rows, axis=0).astype(jnp.bfloat16)
    return Wp, shifts, PL, ntaps


# ----------------------------------------------------------------------------
# Plain Conv1d (stride 1, any dilation), tap-folded, time-tiled
# ----------------------------------------------------------------------------
def _conv1d_kernel(xm_ref, xh_ref, w_ref, b_ref, o_ref, *, K, dilation, t_tile,
                   pre_lrelu, post_tanh):
    x = jnp.concatenate([xm_ref[0], xh_ref[0]], axis=-1)  # (C_in, t_tile + halo)
    if pre_lrelu is not None:
        x = jnp.where(x >= 0, x, x * pre_lrelu)
    cols = jnp.concatenate(
        [x[:, k * dilation:k * dilation + t_tile] for k in range(K)], axis=0)
    acc = jnp.dot(w_ref[...], cols.astype(jnp.bfloat16),
                  preferred_element_type=jnp.float32)
    acc = acc + b_ref[...]
    if post_tanh:
        acc = jnp.tanh(acc)
    o_ref[0] = acc.astype(o_ref.dtype)


def conv1d_tiled(x, w_flat, bias, *, K, padding, dilation=1, pre_lrelu=None,
                 post_tanh=False):
    """x: (B, C_in, T) f32, w_flat: (C_out, K*C_in) bf16, bias: (C_out, 1) f32."""
    B, C_in, T = x.shape
    C_out = w_flat.shape[0]
    T_out = T + 2 * padding - dilation * (K - 1)
    halo = dilation * (K - 1)
    halo_pad = _round_up(max(halo, 1), _LANE)
    per_col = 4 * (4 * C_in + 4 * C_out + 2 * C_in * K)
    t_tile = _round_up(_pick_t_tile(T_out, per_col), halo_pad)
    num_tiles = -(-T_out // t_tile)
    T_out_pad = num_tiles * t_tile
    padded_len = T_out_pad + halo_pad
    pad_right = padded_len - (T + padding)
    assert pad_right >= 0
    x_pad = jnp.pad(x, ((0, 0), (0, 0), (padding, pad_right)))
    ratio = t_tile // halo_pad

    kernel = functools.partial(_conv1d_kernel, K=K, dilation=dilation,
                               t_tile=t_tile, pre_lrelu=pre_lrelu,
                               post_tanh=post_tanh)
    out = pl.pallas_call(
        kernel,
        out_shape=jax.ShapeDtypeStruct((B, C_out, T_out_pad), jnp.float32),
        grid=(num_tiles, B),
        in_specs=[
            pl.BlockSpec((1, C_in, t_tile), lambda t, bb: (bb, 0, t)),
            pl.BlockSpec((1, C_in, halo_pad),
                         lambda t, bb, r=ratio: (bb, 0, (t + 1) * r)),
            pl.BlockSpec(w_flat.shape, lambda t, bb: (0, 0)),
            pl.BlockSpec(bias.shape, lambda t, bb: (0, 0)),
        ],
        out_specs=pl.BlockSpec((1, C_out, t_tile), lambda t, bb: (bb, 0, t)),
        compiler_params=pltpu.CompilerParams(
            dimension_semantics=("parallel", "parallel")),
    )(x_pad, x_pad, w_flat, bias)
    return out[:, :, :T_out]


# ----------------------------------------------------------------------------
# Polyphase ConvTranspose1d, time-tiled (no zero-insertion)
# ----------------------------------------------------------------------------
def _convtrans_kernel(xm_ref, xh_ref, w_ref, b_ref, o_ref, *, stride, ntaps,
                      t_tile, shifts, pre_lrelu):
    x = jnp.concatenate([xm_ref[0], xh_ref[0]], axis=-1)  # (C_in, t_tile + halo)
    if pre_lrelu is not None:
        x = jnp.where(x >= 0, x, x * pre_lrelu)
    bias = b_ref[...]
    for r in range(stride):
        sh = shifts[r]
        cols = jnp.concatenate(
            [x[:, sh + j:sh + j + t_tile] for j in range(ntaps)], axis=0)
        acc = jnp.dot(w_ref[r], cols.astype(jnp.bfloat16),
                      preferred_element_type=jnp.float32) + bias
        o_ref[0, r] = acc.astype(o_ref.dtype)


def conv_transpose1d_tiled(x, up, *, pre_lrelu=LRELU_SLOPE):
    B, C_in, T = x.shape
    stride, K, padding = up['stride'], up['K'], up['padding']
    ntaps, shifts, PL = up['ntaps'], up['shifts'], up['PL']
    Wp, bias = up['w'], up['b']
    C_out = Wp.shape[1]
    T_out = (T - 1) * stride - 2 * padding + K
    T_phase = -(-T_out // stride)
    halo = max(shifts) + ntaps - 1
    halo_pad = _round_up(max(halo, 1), _LANE)
    per_col = 4 * (4 * C_in + 4 * C_out * stride + 2 * C_in * ntaps)
    t_tile = _round_up(_pick_t_tile(T_phase, per_col), halo_pad)
    num_tiles = -(-T_phase // t_tile)
    T_phase_pad = num_tiles * t_tile
    padded_len = T_phase_pad + halo_pad
    pad_right = padded_len - (T + PL)
    assert pad_right >= 0
    x_pad = jnp.pad(x, ((0, 0), (0, 0), (PL, pad_right)))
    ratio = t_tile // halo_pad

    kernel = functools.partial(_convtrans_kernel, stride=stride, ntaps=ntaps,
                               t_tile=t_tile, shifts=shifts, pre_lrelu=pre_lrelu)
    out4 = pl.pallas_call(
        kernel,
        out_shape=jax.ShapeDtypeStruct((B, stride, C_out, T_phase_pad),
                                       jnp.float32),
        grid=(num_tiles, B),
        in_specs=[
            pl.BlockSpec((1, C_in, t_tile), lambda t, bb: (bb, 0, t)),
            pl.BlockSpec((1, C_in, halo_pad),
                         lambda t, bb, r=ratio: (bb, 0, (t + 1) * r)),
            pl.BlockSpec(Wp.shape, lambda t, bb: (0, 0, 0)),
            pl.BlockSpec(bias.shape, lambda t, bb: (0, 0)),
        ],
        out_specs=pl.BlockSpec((1, stride, C_out, t_tile),
                               lambda t, bb: (bb, 0, 0, t)),
        compiler_params=pltpu.CompilerParams(
            dimension_semantics=("parallel", "parallel")),
    )(x_pad, x_pad, Wp, bias)
    # interleave phases: out[t = q*stride + r] = out4[:, r, :, q]
    out = out4.transpose(0, 2, 3, 1).reshape(B, C_out, T_phase_pad * stride)
    return out[:, :, :T_out]


# ----------------------------------------------------------------------------
# Fused resblock stage: xs = mean_j ResBlock1_j(x), one pallas_call per stage
# ----------------------------------------------------------------------------
def _resblock_stage_kernel(*refs, t_tile, T_true, PL_stage, meta, num_kernels):
    xm_ref, xh_ref = refs[0], refs[1]
    o_ref = refs[-1]
    w_refs = refs[2:-1]
    x_full = jnp.concatenate([xm_ref[0], xh_ref[0]], axis=-1)  # (C, t_tile + halo)
    t0 = pl.program_id(0) * t_tile
    xs = None
    widx = 0
    for (ks, dils, PLj) in meta:
        L1 = (ks - 1) // 2
        off = PL_stage - PLj
        W = t_tile + 2 * PLj
        y = x_full[:, off:off + W]          # residual carrier, f32
        abs_start = t0 - PLj                # absolute time of y[:, 0]
        for d in dils:
            w1, b1, w2, b2 = w_refs[widx:widx + 4]
            widx += 4
            W_mid = W - 2 * d * L1
            W_out = W - 2 * (d + 1) * L1
            xr = jnp.where(y >= 0, y, y * LRELU_SLOPE)
            cols1 = jnp.concatenate(
                [xr[:, j * d:j * d + W_mid] for j in range(ks)], axis=0)
            t1 = jnp.dot(w1[...], cols1.astype(jnp.bfloat16),
                         preferred_element_type=jnp.float32) + b1[...]
            # match zero-padding semantics of the unfused c2 at signal boundaries
            t1 = _mask_time(t1, abs_start + d * L1, T_true)
            t1 = jnp.where(t1 >= 0, t1, t1 * LRELU_SLOPE)
            cols2 = jnp.concatenate(
                [t1[:, j:j + W_out] for j in range(ks)], axis=0)
            t2 = jnp.dot(w2[...], cols2.astype(jnp.bfloat16),
                         preferred_element_type=jnp.float32) + b2[...]
            shrink = (d + 1) * L1
            y = t2 + y[:, shrink:shrink + W_out]
            abs_start = abs_start + shrink
            W = W_out
            y = _mask_time(y, abs_start, T_true)
        xs = y if xs is None else xs + y
    o_ref[0] = (xs * (1.0 / num_kernels)).astype(o_ref.dtype)


def resblock_stage_tiled(x, stage, num_kernels):
    B, C, T = x.shape
    PLs = []
    for blk in stage:
        L1 = (blk['ks'] - 1) // 2
        PLs.append(sum((d + 1) * L1 for d in blk['dilations']))
    PL_stage = max(PLs)
    halo = 2 * PL_stage
    halo_pad = _round_up(max(halo, 1), _LANE)
    max_ks = max(blk['ks'] for blk in stage)
    per_col = 4 * C * (8 + 3 * max_ks)
    t_tile = _round_up(_pick_t_tile(T, per_col), halo_pad)
    num_tiles = -(-T // t_tile)
    T_pad = num_tiles * t_tile
    padded_len = T_pad + halo_pad
    pad_right = padded_len - (T + PL_stage)
    assert pad_right >= 0
    x_pad = jnp.pad(x, ((0, 0), (0, 0), (PL_stage, pad_right)))
    ratio = t_tile // halo_pad

    operands = [x_pad, x_pad]
    in_specs = [
        pl.BlockSpec((1, C, t_tile), lambda t, bb: (bb, 0, t)),
        pl.BlockSpec((1, C, halo_pad),
                     lambda t, bb, r=ratio: (bb, 0, (t + 1) * r)),
    ]
    meta = []
    for blk, PLj in zip(stage, PLs):
        meta.append((blk['ks'], tuple(blk['dilations']), PLj))
        for (w1, b1, w2, b2) in blk['convs']:
            for arr in (w1, b1, w2, b2):
                operands.append(arr)
                in_specs.append(pl.BlockSpec(arr.shape, lambda t, bb: (0, 0)))

    kernel = functools.partial(_resblock_stage_kernel, t_tile=t_tile, T_true=T,
                               PL_stage=PL_stage, meta=tuple(meta),
                               num_kernels=num_kernels)
    out = pl.pallas_call(
        kernel,
        out_shape=jax.ShapeDtypeStruct((B, C, T_pad), jnp.float32),
        grid=(num_tiles, B),
        in_specs=in_specs,
        out_specs=pl.BlockSpec((1, C, t_tile), lambda t, bb: (bb, 0, t)),
        compiler_params=pltpu.CompilerParams(
            dimension_semantics=("parallel", "parallel")),
    )(*operands)
    return out[:, :, :T]


# ----------------------------------------------------------------------------
# Parameters (deterministic synthetic init; weight_norm at init == raw weight)
# ----------------------------------------------------------------------------
def _normal(key, shape, std=0.01):
    return std * jax.random.normal(key, shape, dtype=jnp.float32)


def make_params(h, c_out, key):
    keys = iter(jax.random.split(key, 512))
    C0 = h['upsample_initial_channel']
    num_up = len(h['upsample_rates'])
    p = {}

    w = _normal(next(keys), (C0, 80, 7))
    b = _normal(next(keys), (C0,))
    p['conv_pre'] = {'w': _flatten_conv_w(w), 'b': b.reshape(C0, 1)}

    p['ups'] = []
    ch_list = []
    for i, (u, k) in enumerate(zip(h['upsample_rates'],
                                   h['upsample_kernel_sizes'])):
        c_cur = C0 // 2 ** (i + 1)
        ch_list.append(c_cur)
        w = _normal(next(keys), (c_cur * 2, c_cur, k))  # torch (C_in, C_out, K)
        b = _normal(next(keys), (c_cur,))
        Wp, shifts, PL, ntaps = _build_polyphase(w, u, (k - u) // 2)
        p['ups'].append({'w': Wp, 'b': b.reshape(c_cur, 1), 'stride': u, 'K': k,
                         'padding': (k - u) // 2, 'shifts': shifts, 'PL': PL,
                         'ntaps': ntaps})

    p['stages'] = []
    for i in range(num_up):
        ch = ch_list[i]
        stage = []
        for (ks, ds) in zip(h['resblock_kernel_sizes'],
                            h['resblock_dilation_sizes']):
            convs = []
            for _ in ds:
                w1 = _normal(next(keys), (ch, ch, ks))
                b1 = _normal(next(keys), (ch,))
                w2 = _normal(next(keys), (ch, ch, ks))
                b2 = _normal(next(keys), (ch,))
                convs.append((_flatten_conv_w(w1), b1.reshape(ch, 1),
                              _flatten_conv_w(w2), b2.reshape(ch, 1)))
            stage.append({'ks': ks, 'dilations': tuple(ds), 'convs': convs})
        p['stages'].append(stage)

    ch = ch_list[-1]
    w = _normal(next(keys), (c_out, ch, 7))
    b = _normal(next(keys), (c_out,))
    p['conv_post'] = {'w': _flatten_conv_w(w), 'b': b.reshape(c_out, 1)}
    return p


# ----------------------------------------------------------------------------
# Forward pass (f0=None path)
# ----------------------------------------------------------------------------
def hifigan_forward(params, h, x, f0=None):
    # TODO(synk): f0 path (SourceModuleHnNSF + noise_convs) not implemented.
    num_kernels = len(h['resblock_kernel_sizes'])
    x = conv1d_tiled(x, params['conv_pre']['w'], params['conv_pre']['b'],
                     K=7, padding=3)
    for i, up in enumerate(params['ups']):
        # leaky_relu(x, 0.1) fused as pre-activation of the polyphase transposed conv
        x = conv_transpose1d_tiled(x, up, pre_lrelu=LRELU_SLOPE)
        # whole "mean over resblocks" stage fused into one kernel
        x = resblock_stage_tiled(x, params['stages'][i], num_kernels)
    # final leaky_relu (torch default slope 0.01) + conv_post + tanh, fused
    x = conv1d_tiled(x, params['conv_post']['w'], params['conv_post']['b'],
                     K=7, padding=3, pre_lrelu=0.01, post_tanh=True)
    return x


# ----------------------------------------------------------------------------
if __name__ == "__main__":
    h = {
        'resblock': '1',
        'resblock_kernel_sizes': [3, 5],
        'resblock_dilation_sizes': [[1, 3, 5], [1, 3, 5]],
        'upsample_rates': [2, 2],
        'upsample_kernel_sizes': [4, 4],
        'upsample_initial_channel': 32,
        'audio_sample_rate': 16000,
        'use_pitch_embed': True,
    }
    c_out = 1

    key = jax.random.PRNGKey(0)
    k_param, k_x = jax.random.split(key)
    params = make_params(h, c_out, k_param)

    B, T = 2, 8
    x = jax.random.normal(k_x, (B, 80, T), dtype=jnp.float32)  # mel input (B, 80, T)

    fwd = jax.jit(functools.partial(hifigan_forward, params, h))
    out = fwd(x)
    jax.block_until_ready(out)

    expected_T = T
    for u in h['upsample_rates']:
        expected_T *= u
    assert out.shape == (B, c_out, expected_T), out.shape
    assert bool(jnp.all(jnp.isfinite(out)))
    print("KERNEL_OK")
</pallas_src>

<mosaic_0001>
module attributes {stable_mosaic.version = 11 : i64} {
  func.func @_conv1d_kernel(%arg0: i32, %arg1: i32, %arg2: memref<1x80x128xf32, #tpu.memory_space<vmem>>, %arg3: memref<1x80x128xf32, #tpu.memory_space<vmem>>, %arg4: memref<32x560xbf16, #tpu.memory_space<vmem>>, %arg5: memref<32x1xf32, #tpu.memory_space<vmem>>, %arg6: memref<1x32x128xf32, #tpu.memory_space<vmem>>) attributes {dimension_semantics = [#tpu.dimension_semantics<parallel>, #tpu.dimension_semantics<parallel>], iteration_bounds = array<i64: 1, 2>, scalar_prefetch = 0 : i64, scratch_operands = 0 : i64, tpu.core_type = #tpu.core_type<tc>, window_params = [{transform_indices = @transform_0, window_bounds = array<i64: 1, 80, 128>}, {transform_indices = @transform_1, window_bounds = array<i64: 1, 80, 128>}, {pipeline_mode = #tpu.pipeline_mode<synchronous>, transform_indices = @transform_2, window_bounds = array<i64: 32, 560>}, {pipeline_mode = #tpu.pipeline_mode<synchronous>, transform_indices = @transform_3, window_bounds = array<i64: 32, 1>}, {transform_indices = @transform_4, window_bounds = array<i64: 1, 32, 128>}]} {
    %c0 = arith.constant 0 : index
    %c0_0 = arith.constant 0 : index
    %c0_1 = arith.constant 0 : index
    %0 = vector.load %arg2[%c0, %c0_0, %c0_1] : memref<1x80x128xf32, #tpu.memory_space<vmem>>, vector<1x80x128xf32>
    %1 = vector.shape_cast %0 : vector<1x80x128xf32> to vector<80x128xf32>
    %c0_2 = arith.constant 0 : index
    %c0_3 = arith.constant 0 : index
    %c0_4 = arith.constant 0 : index
    %2 = vector.load %arg3[%c0_2, %c0_3, %c0_4] : memref<1x80x128xf32, #tpu.memory_space<vmem>>, vector<1x80x128xf32>
    %3 = vector.shape_cast %2 : vector<1x80x128xf32> to vector<80x128xf32>
    %4 = tpu.concatenate %1, %3 in 1 : vector<80x128xf32>, vector<80x128xf32> -> vector<80x256xf32>
    %5 = vector.extract_strided_slice %4 {offsets = [0, 0], sizes = [80, 128], strides = [1, 1]} : vector<80x256xf32> to vector<80x128xf32>
    %6 = vector.extract_strided_slice %4 {offsets = [0, 1], sizes = [80, 128], strides = [1, 1]} : vector<80x256xf32> to vector<80x128xf32>
    %7 = vector.extract_strided_slice %4 {offsets = [0, 2], sizes = [80, 128], strides = [1, 1]} : vector<80x256xf32> to vector<80x128xf32>
    %8 = vector.extract_strided_slice %4 {offsets = [0, 3], sizes = [80, 128], strides = [1, 1]} : vector<80x256xf32> to vector<80x128xf32>
    %9 = vector.extract_strided_slice %4 {offsets = [0, 4], sizes = [80, 128], strides = [1, 1]} : vector<80x256xf32> to vector<80x128xf32>
    %10 = vector.extract_strided_slice %4 {offsets = [0, 5], sizes = [80, 128], strides = [1, 1]} : vector<80x256xf32> to vector<80x128xf32>
    %11 = vector.extract_strided_slice %4 {offsets = [0, 6], sizes = [80, 128], strides = [1, 1]} : vector<80x256xf32> to vector<80x128xf32>
    %12 = tpu.concatenate %5, %6, %7, %8, %9, %10, %11 in 0 : vector<80x128xf32>, vector<80x128xf32>, vector<80x128xf32>, vector<80x128xf32>, vector<80x128xf32>, vector<80x128xf32>, vector<80x128xf32> -> vector<560x128xf32>
    %c0_5 = arith.constant 0 : index
    %c0_6 = arith.constant 0 : index
    %13 = vector.load %arg4[%c0_5, %c0_6] : memref<32x560xbf16, #tpu.memory_space<vmem>>, vector<32x560xbf16>
    %14 = arith.truncf %12 : vector<560x128xf32> to vector<560x128xbf16>
    %cst = arith.constant dense<0.000000e+00> : vector<32x128xf32>
    %15 = tpu.matmul %13, %14, %cst {dimension_numbers = #tpu.dot_dimension_numbers<[1], [0], [0], [1], [0, 0, 1, 1], [], []>} : vector<32x560xbf16>, vector<560x128xbf16>, vector<32x128xf32> -> vector<32x128xf32>
    %c0_7 = arith.constant 0 : index
    %c0_8 = arith.constant 0 : index
    %16 = vector.load %arg5[%c0_7, %c0_8] : memref<32x1xf32, #tpu.memory_space<vmem>>, vector<32x1xf32>
    %17 = vector.broadcast %16 : vector<32x1xf32> to vector<32x128xf32>
    %18 = arith.addf %15, %17 : vector<32x128xf32>
    %c0_9 = arith.constant 0 : index
    %c0_10 = arith.constant 0 : index
    %c0_11 = arith.constant 0 : index
    %19 = vector.load %arg6[%c0_9, %c0_10, %c0_11] : memref<1x32x128xf32, #tpu.memory_space<vmem>>, vector<1x32x128xf32>
    %20 = vector.shape_cast %19 : vector<1x32x128xf32> to vector<32x128xf32>
    %21 = vector.shape_cast %18 : vector<32x128xf32> to vector<1x32x128xf32>
    tpu.vector_store %arg6[%c0_9, %c0_10, %c0_11], %21 {strides = array<i32>} : memref<1x32x128xf32, #tpu.memory_space<vmem>>, vector<1x32x128xf32>,
    return
  }
  func.func @transform_0(%arg0: i32, %arg1: i32) -> (i32, i32, i32) {
    %c0_i32 = arith.constant 0 : i32
    %c0_i32_0 = arith.constant 0 : i32
    return %arg1, %c0_i32, %arg0 : i32, i32, i32
  }
  func.func @transform_1(%arg0: i32, %arg1: i32) -> (i32, i32, i32) {
    %c1_i32 = arith.constant 1 : i32
    %0 = arith.addi %arg0, %c1_i32 : i32
    %c1_i32_0 = arith.constant 1 : i32
    %1 = arith.muli %0, %c1_i32_0 : i32
    %c0_i32 = arith.constant 0 : i32
    %c0_i32_1 = arith.constant 0 : i32
    return %arg1, %c0_i32, %1 : i32, i32, i32
  }
  func.func @transform_2(%arg0: i32, %arg1: i32) -> (i32, i32) {
    %c0_i32 = arith.constant 0 : i32
    %c0_i32_0 = arith.constant 0 : i32
    %c0_i32_1 = arith.constant 0 : i32
    return %c0_i32, %c0_i32_0 : i32, i32
  }
  func.func @transform_3(%arg0: i32, %arg1: i32) -> (i32, i32) {
    %c0_i32 = arith.constant 0 : i32
    %c0_i32_0 = arith.constant 0 : i32
    %c0_i32_1 = arith.constant 0 : i32
    return %c0_i32, %c0_i32_0 : i32, i32
  }
  func.func @transform_4(%arg0: i32, %arg1: i32) -> (i32, i32, i32) {
    %c0_i32 = arith.constant 0 : i32
    %c0_i32_0 = arith.constant 0 : i32
    return %arg1, %c0_i32, %arg0 : i32, i32, i32
  }
}

module attributes {stable_mosaic.version = 11 : i64} {
  func.func @_convtrans_kernel(%arg0: i32, %arg1: i32, %arg2: memref<1x32x128xf32, #tpu.memory_space<vmem>>, %arg3: memref<1x32x128xf32, #tpu.memory_space<vmem>>, %arg4: memref<2x16x64xbf16, #tpu.memory_space<vmem>>, %arg5: memref<16x1xf32, #tpu.memory_space<vmem>>, %arg6: memref<1x2x16x128xf32, #tpu.memory_space<vmem>>) attributes {dimension_semantics = [#tpu.dimension_semantics<parallel>, #tpu.dimension_semantics<parallel>], iteration_bounds = array<i64: 1, 2>, scalar_prefetch = 0 : i64, scratch_operands = 0 : i64, tpu.core_type = #tpu.core_type<tc>, window_params = [{transform_indices = @transform_0, window_bounds = array<i64: 1, 32, 128>}, {transform_indices = @transform_1, window_bounds = array<i64: 1, 32, 128>}, {pipeline_mode = #tpu.pipeline_mode<synchronous>, transform_indices = @transform_2, window_bounds = array<i64: 2, 16, 64>}, {pipeline_mode = #tpu.pipeline_mode<synchronous>, transform_indices = @transform_3, window_bounds = array<i64: 16, 1>}, {transform_indices = @transform_4, window_bounds = array<i64: 1, 2, 16, 128>}]} {
    %c0 = arith.constant 0 : index
    %c0_0 = arith.constant 0 : index
    %c0_1 = arith.constant 0 : index
    %0 = vector.load %arg2[%c0, %c0_0, %c0_1] : memref<1x32x128xf32, #tpu.memory_space<vmem>>, vector<1x32x128xf32>
    %1 = vector.shape_cast %0 : vector<1x32x128xf32> to vector<32x128xf32>
    %c0_2 = arith.constant 0 : index
    %c0_3 = arith.constant 0 : index
    %c0_4 = arith.constant 0 : index
    %2 = vector.load %arg3[%c0_2, %c0_3, %c0_4] : memref<1x32x128xf32, #tpu.memory_space<vmem>>, vector<1x32x128xf32>
    %3 = vector.shape_cast %2 : vector<1x32x128xf32> to vector<32x128xf32>
    %4 = tpu.concatenate %1, %3 in 1 : vector<32x128xf32>, vector<32x128xf32> -> vector<32x256xf32>
    %cst = arith.constant 0.000000e+00 : f32
    %5 = vector.broadcast %cst : f32 to vector<32x256xf32>
    %6 = arith.cmpf oge, %4, %5 : vector<32x256xf32>
    %cst_5 = arith.constant 1.000000e-01 : f32
    %7 = vector.broadcast %cst_5 : f32 to vector<32x256xf32>
    %8 = arith.mulf %4, %7 : vector<32x256xf32>
    %9 = arith.select %6, %4, %8 : vector<32x256xi1>, vector<32x256xf32>
    %c0_6 = arith.constant 0 : index
    %c0_7 = arith.constant 0 : index
    %10 = vector.load %arg5[%c0_6, %c0_7] : memref<16x1xf32, #tpu.memory_space<vmem>>, vector<16x1xf32>
    %11 = vector.extract_strided_slice %9 {offsets = [0, 0], sizes = [32, 128], strides = [1, 1]} : vector<32x256xf32> to vector<32x128xf32>
    %12 = vector.extract_strided_slice %9 {offsets = [0, 1], sizes = [32, 128], strides = [1, 1]} : vector<32x256xf32> to vector<32x128xf32>
    %13 = tpu.concatenate %11, %12 in 0 : vector<32x128xf32>, vector<32x128xf32> -> vector<64x128xf32>
    %c0_8 = arith.constant 0 : index
    %c0_9 = arith.constant 0 : index
    %c0_10 = arith.constant 0 : index
    %14 = vector.load %arg4[%c0_8, %c0_9, %c0_10] : memref<2x16x64xbf16, #tpu.memory_space<vmem>>, vector<1x16x64xbf16>
    %15 = vector.shape_cast %14 : vector<1x16x64xbf16> to vector<16x64xbf16>
    %16 = arith.truncf %13 : vector<64x128xf32> to vector<64x128xbf16>
    %cst_11 = arith.constant dense<0.000000e+00> : vector<16x128xf32>
    %17 = tpu.matmul %15, %16, %cst_11 {dimension_numbers = #tpu.dot_dimension_numbers<[1], [0], [0], [1], [0, 0, 1, 1], [], []>} : vector<16x64xbf16>, vector<64x128xbf16>, vector<16x128xf32> -> vector<16x128xf32>
    %18 = vector.broadcast %10 : vector<16x1xf32> to vector<16x128xf32>
    %19 = arith.addf %17, %18 : vector<16x128xf32>
    %c0_12 = arith.constant 0 : index
    %c0_13 = arith.constant 0 : index
    %c0_14 = arith.constant 0 : index
    %c0_15 = arith.constant 0 : index
    %20 = vector.load %arg6[%c0_12, %c0_13, %c0_14, %c0_15] : memref<1x2x16x128xf32, #tpu.memory_space<vmem>>, vector<1x1x16x128xf32>
    %21 = vector.shape_cast %20 : vector<1x1x16x128xf32> to vector<16x128xf32>
    %22 = vector.shape_cast %19 : vector<16x128xf32> to vector<1x1x16x128xf32>
    tpu.vector_store %arg6[%c0_12, %c0_13, %c0_14, %c0_15], %22 {strides = array<i32>} : memref<1x2x16x128xf32, #tpu.memory_space<vmem>>, vector<1x1x16x128xf32>,
    %23 = vector.extract_strided_slice %9 {offsets = [0, 1], sizes = [32, 128], strides = [1, 1]} : vector<32x256xf32> to vector<32x128xf32>
    %24 = vector.extract_strided_slice %9 {offsets = [0, 2], sizes = [32, 128], strides = [1, 1]} : vector<32x256xf32> to vector<32x128xf32>
    %25 = tpu.concatenate %23, %24 in 0 : vector<32x128xf32>, vector<32x128xf32> -> vector<64x128xf32>
    %c1 = arith.constant 1 : index
    %c0_16 = arith.constant 0 : index
    %c0_17 = arith.constant 0 : index
    %26 = vector.load %arg4[%c1, %c0_16, %c0_17] : memref<2x16x64xbf16, #tpu.memory_space<vmem>>, vector<1x16x64xbf16>
    %27 = vector.shape_cast %26 : vector<1x16x64xbf16> to vector<16x64xbf16>
    %28 = arith.truncf %25 : vector<64x128xf32> to vector<64x128xbf16>
    %cst_18 = arith.constant dense<0.000000e+00> : vector<16x128xf32>
    %29 = tpu.matmul %27, %28, %cst_18 {dimension_numbers = #tpu.dot_dimension_numbers<[1], [0], [0], [1], [0, 0, 1, 1], [], []>} : vector<16x64xbf16>, vector<64x128xbf16>, vector<16x128xf32> -> vector<16x128xf32>
    %30 = vector.broadcast %10 : vector<16x1xf32> to vector<16x128xf32>
    %31 = arith.addf %29, %30 : vector<16x128xf32>
    %c0_19 = arith.constant 0 : index
    %c1_20 = arith.constant 1 : index
    %c0_21 = arith.constant 0 : index
    %c0_22 = arith.constant 0 : index
    %32 = vector.load %arg6[%c0_19, %c1_20, %c0_21, %c0_22] : memref<1x2x16x128xf32, #tpu.memory_space<vmem>>, vector<1x1x16x128xf32>
    %33 = vector.shape_cast %32 : vector<1x1x16x128xf32> to vector<16x128xf32>
    %34 = vector.shape_cast %31 : vector<16x128xf32> to vector<1x1x16x128xf32>
    tpu.vector_store %arg6[%c0_19, %c1_20, %c0_21, %c0_22], %34 {strides = array<i32>} : memref<1x2x16x128xf32, #tpu.memory_space<vmem>>, vector<1x1x16x128xf32>,
    return
  }
  func.func @transform_0(%arg0: i32, %arg1: i32) -> (i32, i32, i32) {
    %c0_i32 = arith.constant 0 : i32
    %c0_i32_0 = arith.constant 0 : i32
    return %arg1, %c0_i32, %arg0 : i32, i32, i32
  }
  func.func @transform_1(%arg0: i32, %arg1: i32) -> (i32, i32, i32) {
    %c1_i32 = arith.constant 1 : i32
    %0 = arith.addi %arg0, %c1_i32 : i32
    %c1_i32_0 = arith.constant 1 : i32
    %1 = arith.muli %0, %c1_i32_0 : i32
    %c0_i32 = arith.constant 0 : i32
    %c0_i32_1 = arith.constant 0 : i32
    return %arg1, %c0_i32, %1 : i32, i32, i32
  }
  func.func @transform_2(%arg0: i32, %arg1: i32) -> (i32, i32, i32) {
    %c0_i32 = arith.constant 0 : i32
    %c0_i32_0 = arith.constant 0 : i32
    %c0_i32_1 = arith.constant 0 : i32
    %c0_i32_2 = arith.constant 0 : i32
    return %c0_i32, %c0_i32_0, %c0_i32_1 : i32, i32, i32
  }
  func.func @transform_3(%arg0: i32, %arg1: i32) -> (i32, i32) {
    %c0_i32 = arith.constant 0 : i32
    %c0_i32_0 = arith.constant 0 : i32
    %c0_i32_1 = arith.constant 0 : i32
    return %c0_i32, %c0_i32_0 : i32, i32
  }
  func.func @transform_4(%arg0: i32, %arg1: i32) -> (i32, i32, i32, i32) {
    %c0_i32 = arith.constant 0 : i32
    %c0_i32_0 = arith.constant 0 : i32
    %c0_i32_1 = arith.constant 0 : i32
    return %arg1, %c0_i32, %c0_i32_0, %arg0 : i32, i32, i32, i32
  }
}

module attributes {stable_mosaic.version = 11 : i64} {
  func.func @_resblock_stage_kernel(%arg0: i32, %arg1: i32, %arg2: memref<1x16x128xf32, #tpu.memory_space<vmem>>, %arg3: memref<1x16x128xf32, #tpu.memory_space<vmem>>, %arg4: memref<16x48xbf16, #tpu.memory_space<vmem>>, %arg5: memref<16x1xf32, #tpu.memory_space<vmem>>, %arg6: memref<16x48xbf16, #tpu.memory_space<vmem>>, %arg7: memref<16x1xf32, #tpu.memory_space<vmem>>, %arg8: memref<16x48xbf16, #tpu.memory_space<vmem>>, %arg9: memref<16x1xf32, #tpu.memory_space<vmem>>, %arg10: memref<16x48xbf16, #tpu.memory_space<vmem>>, %arg11: memref<16x1xf32, #tpu.memory_space<vmem>>, %arg12: memref<16x48xbf16, #tpu.memory_space<vmem>>, %arg13: memref<16x1xf32, #tpu.memory_space<vmem>>, %arg14: memref<16x48xbf16, #tpu.memory_space<vmem>>, %arg15: memref<16x1xf32, #tpu.memory_space<vmem>>, %arg16: memref<16x80xbf16, #tpu.memory_space<vmem>>, %arg17: memref<16x1xf32, #tpu.memory_space<vmem>>, %arg18: memref<16x80xbf16, #tpu.memory_space<vmem>>, %arg19: memref<16x1xf32, #tpu.memory_space<vmem>>, %arg20: memref<16x80xbf16, #tpu.memory_space<vmem>>, %arg21: memref<16x1xf32, #tpu.memory_space<vmem>>, %arg22: memref<16x80xbf16, #tpu.memory_space<vmem>>, %arg23: memref<16x1xf32, #tpu.memory_space<vmem>>, %arg24: memref<16x80xbf16, #tpu.memory_space<vmem>>, %arg25: memref<16x1xf32, #tpu.memory_space<vmem>>, %arg26: memref<16x80xbf16, #tpu.memory_space<vmem>>, %arg27: memref<16x1xf32, #tpu.memory_space<vmem>>, %arg28: memref<1x16x128xf32, #tpu.memory_space<vmem>>) attributes {dimension_semantics = [#tpu.dimension_semantics<parallel>, #tpu.dimension_semantics<parallel>], iteration_bounds = array<i64: 1, 2>, scalar_prefetch = 0 : i64, scratch_operands = 0 : i64, tpu.core_type = #tpu.core_type<tc>, window_params = [{transform_indices = @transform_0, window_bounds = array<i64: 1, 16, 128>}, {transform_indices = @transform_1, window_bounds = array<i64: 1, 16, 128>}, {pipeline_mode = #tpu.pipeline_mode<synchronous>, transform_indices = @transform_2, window_bounds = array<i64: 16, 48>}, {pipeline_mode = #tpu.pipeline_mode<synchronous>, transform_indices = @transform_3, window_bounds = array<i64: 16, 1>}, {pipeline_mode = #tpu.pipeline_mode<synchronous>, transform_indices = @transform_4, window_bounds = array<i64: 16, 48>}, {pipeline_mode = #tpu.pipeline_mode<synchronous>, transform_indices = @transform_5, window_bounds = array<i64: 16, 1>}, {pipeline_mode = #tpu.pipeline_mode<synchronous>, transform_indices = @transform_6, window_bounds = array<i64: 16, 48>}, {pipeline_mode = #tpu.pipeline_mode<synchronous>, transform_indices = @transform_7, window_bounds = array<i64: 16, 1>}, {pipeline_mode = #tpu.pipeline_mode<synchronous>, transform_indices = @transform_8, window_bounds = array<i64: 16, 48>}, {pipeline_mode = #tpu.pipeline_mode<synchronous>, transform_indices = @transform_9, window_bounds = array<i64: 16, 1>}, {pipeline_mode = #tpu.pipeline_mode<synchronous>, transform_indices = @transform_10, window_bounds = array<i64: 16, 48>}, {pipeline_mode = #tpu.pipeline_mode<synchronous>, transform_indices = @transform_11, window_bounds = array<i64: 16, 1>}, {pipeline_mode = #tpu.pipeline_mode<synchronous>, transform_indices = @transform_12, window_bounds = array<i64: 16, 48>}, {pipeline_mode = #tpu.pipeline_mode<synchronous>, transform_indices = @transform_13, window_bounds = array<i64: 16, 1>}, {pipeline_mode = #tpu.pipeline_mode<synchronous>, transform_indices = @transform_14, window_bounds = array<i64: 16, 80>}, {pipeline_mode = #tpu.pipeline_mode<synchronous>, transform_indices = @transform_15, window_bounds = array<i64: 16, 1>}, {pipeline_mode = #tpu.pipeline_mode<synchronous>, transform_indices = @transform_16, window_bounds = array<i64: 16, 80>}, {pipeline_mode = #tpu.pipeline_mode<synchronous>, transform_indices = @transform_17, window_bounds = array<i64: 16, 1>}, {pipeline_mode = #tpu.pipeline_mode<synchronous>, transform_indices = @transform_18, window_bounds = array<i64: 16, 80>}, {pipeline_mode = #tpu.pipeline_mode<synchronous>, transform_indices = @transform_19, window_bounds = array<i64: 16, 1>}, {pipeline_mode = #tpu.pipeline_mode<synchronous>, transform_indices = @transform_20, window_bounds = array<i64: 16, 80>}, {pipeline_mode = #tpu.pipeline_mode<synchronous>, transform_indices = @transform_21, window_bounds = array<i64: 16, 1>}, {pipeline_mode = #tpu.pipeline_mode<synchronous>, transform_indices = @transform_22, window_bounds = array<i64: 16, 80>}, {pipeline_mode = #tpu.pipeline_mode<synchronous>, transform_indices = @transform_23, window_bounds = array<i64: 16, 1>}, {pipeline_mode = #tpu.pipeline_mode<synchronous>, transform_indices = @transform_24, window_bounds = array<i64: 16, 80>}, {pipeline_mode = #tpu.pipeline_mode<synchronous>, transform_indices = @transform_25, window_bounds = array<i64: 16, 1>}, {transform_indices = @transform_26, window_bounds = array<i64: 1, 16, 128>}]} {
    %c0 = arith.constant 0 : index
    %c0_0 = arith.constant 0 : index
    %c0_1 = arith.constant 0 : index
    %0 = vector.load %arg2[%c0, %c0_0, %c0_1] : memref<1x16x128xf32, #tpu.memory_space<vmem>>, vector<1x16x128xf32>
    %1 = vector.shape_cast %0 : vector<1x16x128xf32> to vector<16x128xf32>
    %c0_2 = arith.constant 0 : index
    %c0_3 = arith.constant 0 : index
    %c0_4 = arith.constant 0 : index
    %2 = vector.load %arg3[%c0_2, %c0_3, %c0_4] : memref<1x16x128xf32, #tpu.memory_space<vmem>>, vector<1x16x128xf32>
    %3 = vector.shape_cast %2 : vector<1x16x128xf32> to vector<16x128xf32>
    %4 = tpu.concatenate %1, %3 in 1 : vector<16x128xf32>, vector<16x128xf32> -> vector<16x256xf32>
    %c128_i32 = arith.constant 128 : i32
    %5 = arith.muli %arg0, %c128_i32 : i32
    %6 = vector.extract_strided_slice %4 {offsets = [0, 12], sizes = [16, 152], strides = [1, 1]} : vector<16x256xf32> to vector<16x152xf32>
    %c12_i32 = arith.constant 12 : i32
    %7 = arith.subi %5, %c12_i32 : i32
    %cst = arith.constant 0.000000e+00 : f32
    %8 = vector.broadcast %cst : f32 to vector<16x152xf32>
    %9 = arith.cmpf oge, %6, %8 : vector<16x152xf32>
    %cst_5 = arith.constant 1.000000e-01 : f32
    %10 = vector.broadcast %cst_5 : f32 to vector<16x152xf32>
    %11 = arith.mulf %6, %10 : vector<16x152xf32>
    %12 = arith.select %9, %6, %11 : vector<16x152xi1>, vector<16x152xf32>
    %13 = vector.extract_strided_slice %12 {offsets = [0, 0], sizes = [16, 150], strides = [1, 1]} : vector<16x152xf32> to vector<16x150xf32>
    %14 = vector.extract_strided_slice %12 {offsets = [0, 1], sizes = [16, 150], strides = [1, 1]} : vector<16x152xf32> to vector<16x150xf32>
    %15 = vector.extract_strided_slice %12 {offsets = [0, 2], sizes = [16, 150], strides = [1, 1]} : vector<16x152xf32> to vector<16x150xf32>
    %16 = tpu.concatenate %13, %14, %15 in 0 : vector<16x150xf32>, vector<16x150xf32>, vector<16x150xf32> -> vector<48x150xf32>
    %c0_6 = arith.constant 0 : index
    %c0_7 = arith.constant 0 : index
    %17 = vector.load %arg4[%c0_6, %c0_7] : memref<16x48xbf16, #tpu.memory_space<vmem>>, vector<16x48xbf16>
    %18 = arith.truncf %16 : vector<48x150xf32> to vector<48x150xbf16>
    %cst_8 = arith.constant dense<0.000000e+00> : vector<16x150xf32>
    %19 = tpu.matmul %17, %18, %cst_8 {dimension_numbers = #tpu.dot_dimension_numbers<[1], [0], [0], [1], [0, 0, 1, 1], [], []>} : vector<16x48xbf16>, vector<48x150xbf16>, vector<16x150xf32> -> vector<16x150xf32>
    %c0_9 = arith.constant 0 : index
    %c0_10 = arith.constant 0 : index
    %20 = vector.load %arg5[%c0_9, %c0_10] : memref<16x1xf32, #tpu.memory_space<vmem>>, vector<16x1xf32>
    %21 = vector.broadcast %20 : vector<16x1xf32> to vector<16x150xf32>
    %22 = arith.addf %19, %21 : vector<16x150xf32>
    %c1_i32 = arith.constant 1 : i32
    %23 = arith.addi %7, %c1_i32 : i32
    %24 = tpu.iota {dimensions = array<i32: 1>} : vector<1x150xi32>
    %25 = vector.broadcast %23 : i32 to vector<1x150xi32>
    %26 = arith.addi %25, %24 : vector<1x150xi32>
    %c0_i32 = arith.constant 0 : i32
    %27 = vector.broadcast %c0_i32 : i32 to vector<1x150xi32>
    %28 = arith.cmpi sge, %26, %27 : vector<1x150xi32>
    %c16_i32 = arith.constant 16 : i32
    %29 = vector.broadcast %c16_i32 : i32 to vector<1x150xi32>
    %30 = arith.cmpi slt, %26, %29 : vector<1x150xi32>
    %31 = arith.andi %28, %30 : vector<1x150xi1>
    %cst_11 = arith.constant 0.000000e+00 : f32
    %32 = vector.shape_cast %31 : vector<1x150xi1> to vector<1x150xi1>
    %33 = vector.broadcast %32 : vector<1x150xi1> to vector<16x150xi1>
    %34 = vector.broadcast %cst_11 : f32 to vector<16x150xf32>
    %35 = arith.select %33, %22, %34 : vector<16x150xi1>, vector<16x150xf32>
    %cst_12 = arith.constant 0.000000e+00 : f32
    %36 = vector.broadcast %cst_12 : f32 to vector<16x150xf32>
    %37 = arith.cmpf oge, %35, %36 : vector<16x150xf32>
    %cst_13 = arith.constant 1.000000e-01 : f32
    %38 = vector.broadcast %cst_13 : f32 to vector<16x150xf32>
    %39 = arith.mulf %35, %38 : vector<16x150xf32>
    %40 = arith.select %37, %35, %39 : vector<16x150xi1>, vector<16x150xf32>
    %41 = vector.extract_strided_slice %40 {offsets = [0, 0], sizes = [16, 148], strides = [1, 1]} : vector<16x150xf32> to vector<16x148xf32>
    %42 = vector.extract_strided_slice %40 {offsets = [0, 1], sizes = [16, 148], strides = [1, 1]} : vector<16x150xf32> to vector<16x148xf32>
    %43 = vector.extract_strided_slice %40 {offsets = [0, 2], sizes = [16, 148], strides = [1, 1]} : vector<16x150xf32> to vector<16x148xf32>
    %44 = tpu.concatenate %41, %42, %43 in 0 : vector<16x148xf32>, vector<16x148xf32>, vector<16x148xf32> -> vector<48x148xf32>
    %c0_14 = arith.constant 0 : index
    %c0_15 = arith.constant 0 : index
    %45 = vector.load %arg6[%c0_14, %c0_15] : memref<16x48xbf16, #tpu.memory_space<vmem>>, vector<16x48xbf16>
    %46 = arith.truncf %44 : vector<48x148xf32> to vector<48x148xbf16>
    %cst_16 = arith.constant dense<0.000000e+00> : vector<16x148xf32>
    %47 = tpu.matmul %45, %46, %cst_16 {dimension_numbers = #tpu.dot_dimension_numbers<[1], [0], [0], [1], [0, 0, 1, 1], [], []>} : vector<16x48xbf16>, vector<48x148xbf16>, vector<16x148xf32> -> vector<16x148xf32>
    %c0_17 = arith.constant 0 : index
    %c0_18 = arith.constant 0 : index
    %48 = vector.load %arg7[%c0_17, %c0_18] : memref<16x1xf32, #tpu.memory_space<vmem>>, vector<16x1xf32>
    %49 = vector.broadcast %48 : vector<16x1xf32> to vector<16x148xf32>
    %50 = arith.addf %47, %49 : vector<16x148xf32>
    %51 = vector.extract_strided_slice %6 {offsets = [0, 2], sizes = [16, 148], strides = [1, 1]} : vector<16x152xf32> to vector<16x148xf32>
    %52 = arith.addf %50, %51 : vector<16x148xf32>
    %c2_i32 = arith.constant 2 : i32
    %53 = arith.addi %7, %c2_i32 : i32
    %54 = tpu.iota {dimensions = array<i32: 1>} : vector<1x148xi32>
    %55 = vector.broadcast %53 : i32 to vector<1x148xi32>
    %56 = arith.addi %55, %54 : vector<1x148xi32>
    %c0_i32_19 = arith.constant 0 : i32
    %57 = vector.broadcast %c0_i32_19 : i32 to vector<1x148xi32>
    %58 = arith.cmpi sge, %56, %57 : vector<1x148xi32>
    %c16_i32_20 = arith.constant 16 : i32
    %59 = vector.broadcast %c16_i32_20 : i32 to vector<1x148xi32>
    %60 = arith.cmpi slt, %56, %59 : vector<1x148xi32>
    %61 = arith.andi %58, %60 : vector<1x148xi1>
    %cst_21 = arith.constant 0.000000e+00 : f32
    %62 = vector.shape_cast %61 : vector<1x148xi1> to vector<1x148xi1>
    %63 = vector.broadcast %62 : vector<1x148xi1> to vector<16x148xi1>
    %64 = vector.broadcast %cst_21 : f32 to vector<16x148xf32>
    %65 = arith.select %63, %52, %64 : vector<16x148xi1>, vector<16x148xf32>
    %cst_22 = arith.constant 0.000000e+00 : f32
    %66 = vector.broadcast %cst_22 : f32 to vector<16x148xf32>
    %67 = arith.cmpf oge, %65, %66 : vector<16x148xf32>
    %cst_23 = arith.constant 1.000000e-01 : f32
    %68 = vector.broadcast %cst_23 : f32 to vector<16x148xf32>
    %69 = arith.mulf %65, %68 : vector<16x148xf32>
    %70 = arith.select %67, %65, %69 : vector<16x148xi1>, vector<16x148xf32>
    %71 = vector.extract_strided_slice %70 {offsets = [0, 0], sizes = [16, 142], strides = [1, 1]} : vector<16x148xf32> to vector<16x142xf32>
    %72 = vector.extract_strided_slice %70 {offsets = [0, 3], sizes = [16, 142], strides = [1, 1]} : vector<16x148xf32> to vector<16x142xf32>
    %73 = vector.extract_strided_slice %70 {offsets = [0, 6], sizes = [16, 142], strides = [1, 1]} : vector<16x148xf32> to vector<16x142xf32>
    %74 = tpu.concatenate %71, %72, %73 in 0 : vector<16x142xf32>, vector<16x142xf32>, vector<16x142xf32> -> vector<48x142xf32>
    %c0_24 = arith.constant 0 : index
    %c0_25 = arith.constant 0 : index
    %75 = vector.load %arg8[%c0_24, %c0_25] : memref<16x48xbf16, #tpu.memory_space<vmem>>, vector<16x48xbf16>
    %76 = arith.truncf %74 : vector<48x142xf32> to vector<48x142xbf16>
    %cst_26 = arith.constant dense<0.000000e+00> : vector<16x142xf32>
    %77 = tpu.matmul %75, %76, %cst_26 {dimension_numbers = #tpu.dot_dimension_numbers<[1], [0], [0], [1], [0, 0, 1, 1], [], []>} : vector<16x48xbf16>, vector<48x142xbf16>, vector<16x142xf32> -> vector<16x142xf32>
    %c0_27 = arith.constant 0 : index
    %c0_28 = arith.constant 0 : index
    %78 = vector.load %arg9[%c0_27, %c0_28] : memref<16x1xf32, #tpu.memory_space<vmem>>, vector<16x1xf32>
    %79 = vector.broadcast %78 : vector<16x1xf32> to vector<16x142xf32>
    %80 = arith.addf %77, %79 : vector<16x142xf32>
    %c3_i32 = arith.constant 3 : i32
    %81 = arith.addi %53, %c3_i32 : i32
    %82 = tpu.iota {dimensions = array<i32: 1>} : vector<1x142xi32>
    %83 = vector.broadcast %81 : i32 to vector<1x142xi32>
    %84 = arith.addi %83, %82 : vector<1x142xi32>
    %c0_i32_29 = arith.constant 0 : i32
    %85 = vector.broadcast %c0_i32_29 : i32 to vector<1x142xi32>
    %86 = arith.cmpi sge, %84, %85 : vector<1x142xi32>
    %c16_i32_30 = arith.constant 16 : i32
    %87 = vector.broadcast %c16_i32_30 : i32 to vector<1x142xi32>
    %88 = arith.cmpi slt, %84, %87 : vector<1x142xi32>
    %89 = arith.andi %86, %88 : vector<1x142xi1>
    %cst_31 = arith.constant 0.000000e+00 : f32
    %90 = vector.shape_cast %89 : vector<1x142xi1> to vector<1x142xi1>
    %91 = vector.broadcast %90 : vector<1x142xi1> to vector<16x142xi1>
    %92 = vector.broadcast %cst_31 : f32 to vector<16x142xf32>
    %93 = arith.select %91, %80, %92 : vector<16x142xi1>, vector<16x142xf32>
    %cst_32 = arith.constant 0.000000e+00 : f32
    %94 = vector.broadcast %cst_32 : f32 to vector<16x142xf32>
    %95 = arith.cmpf oge, %93, %94 : vector<16x142xf32>
    %cst_33 = arith.constant 1.000000e-01 : f32
    %96 = vector.broadcast %cst_33 : f32 to vector<16x142xf32>
    %97 = arith.mulf %93, %96 : vector<16x142xf32>
    %98 = arith.select %95, %93, %97 : vector<16x142xi1>, vector<16x142xf32>
    %99 = vector.extract_strided_slice %98 {offsets = [0, 0], sizes = [16, 140], strides = [1, 1]} : vector<16x142xf32> to vector<16x140xf32>
    %100 = vector.extract_strided_slice %98 {offsets = [0, 1], sizes = [16, 140], strides = [1, 1]} : vector<16x142xf32> to vector<16x140xf32>
    %101 = vector.extract_strided_slice %98 {offsets = [0, 2], sizes = [16, 140], strides = [1, 1]} : vector<16x142xf32> to vector<16x140xf32>
    %102 = tpu.concatenate %99, %100, %101 in 0 : vector<16x140xf32>, vector<16x140xf32>, vector<16x140xf32> -> vector<48x140xf32>
    %c0_34 = arith.constant 0 : index
    %c0_35 = arith.constant 0 : index
    %103 = vector.load %arg10[%c0_34, %c0_35] : memref<16x48xbf16, #tpu.memory_space<vmem>>, vector<16x48xbf16>
    %104 = arith.truncf %102 : vector<48x140xf32> to vector<48x140xbf16>
    %cst_36 = arith.constant dense<0.000000e+00> : vector<16x140xf32>
    %105 = tpu.matmul %103, %104, %cst_36 {dimension_numbers = #tpu.dot_dimension_numbers<[1], [0], [0], [1], [0, 0, 1, 1], [], []>} : vector<16x48xbf16>, vector<48x140xbf16>, vector<16x140xf32> -> vector<16x140xf32>
    %c0_37 = arith.constant 0 : index
    %c0_38 = arith.constant 0 : index
    %106 = vector.load %arg11[%c0_37, %c0_38] : memref<16x1xf32, #tpu.memory_space<vmem>>, vector<16x1xf32>
    %107 = vector.broadcast %106 : vector<16x1xf32> to vector<16x140xf32>
    %108 = arith.addf %105, %107 : vector<16x140xf32>
    %109 = vector.extract_strided_slice %65 {offsets = [0, 4], sizes = [16, 140], strides = [1, 1]} : vector<16x148xf32> to vector<16x140xf32>
    %110 = arith.addf %108, %109 : vector<16x140xf32>
    %c4_i32 = arith.constant 4 : i32
    %111 = arith.addi %53, %c4_i32 : i32
    %112 = tpu.iota {dimensions = array<i32: 1>} : vector<1x140xi32>
    %113 = vector.broadcast %111 : i32 to vector<1x140xi32>
    %114 = arith.addi %113, %112 : vector<1x140xi32>
    %c0_i32_39 = arith.constant 0 : i32
    %115 = vector.broadcast %c0_i32_39 : i32 to vector<1x140xi32>
    %116 = arith.cmpi sge, %114, %115 : vector<1x140xi32>
    %c16_i32_40 = arith.constant 16 : i32
    %117 = vector.broadcast %c16_i32_40 : i32 to vector<1x140xi32>
    %118 = arith.cmpi slt, %114, %117 : vector<1x140xi32>
    %119 = arith.andi %116, %118 : vector<1x140xi1>
    %cst_41 = arith.constant 0.000000e+00 : f32
    %120 = vector.shape_cast %119 : vector<1x140xi1> to vector<1x140xi1>
    %121 = vector.broadcast %120 : vector<1x140xi1> to vector<16x140xi1>
    %122 = vector.broadcast %cst_41 : f32 to vector<16x140xf32>
    %123 = arith.select %121, %110, %122 : vector<16x140xi1>, vector<16x140xf32>
    %cst_42 = arith.constant 0.000000e+00 : f32
    %124 = vector.broadcast %cst_42 : f32 to vector<16x140xf32>
    %125 = arith.cmpf oge, %123, %124 : vector<16x140xf32>
    %cst_43 = arith.constant 1.000000e-01 : f32
    %126 = vector.broadcast %cst_43 : f32 to vector<16x140xf32>
    %127 = arith.mulf %123, %126 : vector<16x140xf32>
    %128 = arith.select %125, %123, %127 : vector<16x140xi1>, vector<16x140xf32>
    %129 = vector.extract_strided_slice %128 {offsets = [0, 0], sizes = [16, 130], strides = [1, 1]} : vector<16x140xf32> to vector<16x130xf32>
    %130 = vector.extract_strided_slice %128 {offsets = [0, 5], sizes = [16, 130], strides = [1, 1]} : vector<16x140xf32> to vector<16x130xf32>
    %131 = vector.extract_strided_slice %128 {offsets = [0, 10], sizes = [16, 130], strides = [1, 1]} : vector<16x140xf32> to vector<16x130xf32>
    %132 = tpu.concatenate %129, %130, %131 in 0 : vector<16x130xf32>, vector<16x130xf32>, vector<16x130xf32> -> vector<48x130xf32>
    %c0_44 = arith.constant 0 : index
    %c0_45 = arith.constant 0 : index
    %133 = vector.load %arg12[%c0_44, %c0_45] : memref<16x48xbf16, #tpu.memory_space<vmem>>, vector<16x48xbf16>
    %134 = arith.truncf %132 : vector<48x130xf32> to vector<48x130xbf16>
    %cst_46 = arith.constant dense<0.000000e+00> : vector<16x130xf32>
    %135 = tpu.matmul %133, %134, %cst_46 {dimension_numbers = #tpu.dot_dimension_numbers<[1], [0], [0], [1], [0, 0, 1, 1], [], []>} : vector<16x48xbf16>, vector<48x130xbf16>, vector<16x130xf32> -> vector<16x130xf32>
    %c0_47 = arith.constant 0 : index
    %c0_48 = arith.constant 0 : index
    %136 = vector.load %arg13[%c0_47, %c0_48] : memref<16x1xf32, #tpu.memory_space<vmem>>, vector<16x1xf32>
    %137 = vector.broadcast %136 : vector<16x1xf32> to vector<16x130xf32>
    %138 = arith.addf %135, %137 : vector<16x130xf32>
    %c5_i32 = arith.constant 5 : i32
    %139 = arith.addi %111, %c5_i32 : i32
    %140 = tpu.iota {dimensions = array<i32: 1>} : vector<1x130xi32>
    %141 = vector.broadcast %139 : i32 to vector<1x130xi32>
    %142 = arith.addi %141, %140 : vector<1x130xi32>
    %c0_i32_49 = arith.constant 0 : i32
    %143 = vector.broadcast %c0_i32_49 : i32 to vector<1x130xi32>
    %144 = arith.cmpi sge, %142, %143 : vector<1x130xi32>
    %c16_i32_50 = arith.constant 16 : i32
    %145 = vector.broadcast %c16_i32_50 : i32 to vector<1x130xi32>
    %146 = arith.cmpi slt, %142, %145 : vector<1x130xi32>
    %147 = arith.andi %144, %146 : vector<1x130xi1>
    %cst_51 = arith.constant 0.000000e+00 : f32
    %148 = vector.shape_cast %147 : vector<1x130xi1> to vector<1x130xi1>
    %149 = vector.broadcast %148 : vector<1x130xi1> to vector<16x130xi1>
    %150 = vector.broadcast %cst_51 : f32 to vector<16x130xf32>
    %151 = arith.select %149, %138, %150 : vector<16x130xi1>, vector<16x130xf32>
    %cst_52 = arith.constant 0.000000e+00 : f32
    %152 = vector.broadcast %cst_52 : f32 to vector<16x130xf32>
    %153 = arith.cmpf oge, %151, %152 : vector<16x130xf32>
    %cst_53 = arith.constant 1.000000e-01 : f32
    %154 = vector.broadcast %cst_53 : f32 to vector<16x130xf32>
    %155 = arith.mulf %151, %154 : vector<16x130xf32>
    %156 = arith.select %153, %151, %155 : vector<16x130xi1>, vector<16x130xf32>
    %157 = vector.extract_strided_slice %156 {offsets = [0, 0], sizes = [16, 128], strides = [1, 1]} : vector<16x130xf32> to vector<16x128xf32>
    %158 = vector.extract_strided_slice %156 {offsets = [0, 1], sizes = [16, 128], strides = [1, 1]} : vector<16x130xf32> to vector<16x128xf32>
    %159 = vector.extract_strided_slice %156 {offsets = [0, 2], sizes = [16, 128], strides = [1, 1]} : vector<16x130xf32> to vector<16x128xf32>
    %160 = tpu.concatenate %157, %158, %159 in 0 : vector<16x128xf32>, vector<16x128xf32>, vector<16x128xf32> -> vector<48x128xf32>
    %c0_54 = arith.constant 0 : index
    %c0_55 = arith.constant 0 : index
    %161 = vector.load %arg14[%c0_54, %c0_55] : memref<16x48xbf16, #tpu.memory_space<vmem>>, vector<16x48xbf16>
    %162 = arith.truncf %160 : vector<48x128xf32> to vector<48x128xbf16>
    %cst_56 = arith.constant dense<0.000000e+00> : vector<16x128xf32>
    %163 = tpu.matmul %161, %162, %cst_56 {dimension_numbers = #tpu.dot_dimension_numbers<[1], [0], [0], [1], [0, 0, 1, 1], [], []>} : vector<16x48xbf16>, vector<48x128xbf16>, vector<16x128xf32> -> vector<16x128xf32>
    %c0_57 = arith.constant 0 : index
    %c0_58 = arith.constant 0 : index
    %164 = vector.load %arg15[%c0_57, %c0_58] : memref<16x1xf32, #tpu.memory_space<vmem>>, vector<16x1xf32>
    %165 = vector.broadcast %164 : vector<16x1xf32> to vector<16x128xf32>
    %166 = arith.addf %163, %165 : vector<16x128xf32>
    %167 = vector.extract_strided_slice %123 {offsets = [0, 6], sizes = [16, 128], strides = [1, 1]} : vector<16x140xf32> to vector<16x128xf32>
    %168 = arith.addf %166, %167 : vector<16x128xf32>
    %c6_i32 = arith.constant 6 : i32
    %169 = arith.addi %111, %c6_i32 : i32
    %170 = tpu.iota {dimensions = array<i32: 1>} : vector<1x128xi32>
    %171 = vector.broadcast %169 : i32 to vector<1x128xi32>
    %172 = arith.addi %171, %170 : vector<1x128xi32>
    %c0_i32_59 = arith.constant 0 : i32
    %173 = vector.broadcast %c0_i32_59 : i32 to vector<1x128xi32>
    %174 = arith.cmpi sge, %172, %173 : vector<1x128xi32>
    %c16_i32_60 = arith.constant 16 : i32
    %175 = vector.broadcast %c16_i32_60 : i32 to vector<1x128xi32>
    %176 = arith.cmpi slt, %172, %175 : vector<1x128xi32>
    %177 = arith.andi %174, %176 : vector<1x128xi1>
    %cst_61 = arith.constant 0.000000e+00 : f32
    %178 = vector.shape_cast %177 : vector<1x128xi1> to vector<1x128xi1>
    %179 = vector.broadcast %178 : vector<1x128xi1> to vector<16x128xi1>
    %180 = vector.broadcast %cst_61 : f32 to vector<16x128xf32>
    %181 = arith.select %179, %168, %180 : vector<16x128xi1>, vector<16x128xf32>
    %182 = vector.extract_strided_slice %4 {offsets = [0, 0], sizes = [16, 176], strides = [1, 1]} : vector<16x256xf32> to vector<16x176xf32>
    %c24_i32 = arith.constant 24 : i32
    %183 = arith.subi %5, %c24_i32 : i32
    %cst_62 = arith.constant 0.000000e+00 : f32
    %184 = vector.broadcast %cst_62 : f32 to vector<16x176xf32>
    %185 = arith.cmpf oge, %182, %184 : vector<16x176xf32>
    %cst_63 = arith.constant 1.000000e-01 : f32
    %186 = vector.broadcast %cst_63 : f32 to vector<16x176xf32>
    %187 = arith.mulf %182, %186 : vector<16x176xf32>
    %188 = arith.select %185, %182, %187 : vector<16x176xi1>, vector<16x176xf32>
    %189 = vector.extract_strided_slice %188 {offsets = [0, 0], sizes = [16, 172], strides = [1, 1]} : vector<16x176xf32> to vector<16x172xf32>
    %190 = vector.extract_strided_slice %188 {offsets = [0, 1], sizes = [16, 172], strides = [1, 1]} : vector<16x176xf32> to vector<16x172xf32>
    %191 = vector.extract_strided_slice %188 {offsets = [0, 2], sizes = [16, 172], strides = [1, 1]} : vector<16x176xf32> to vector<16x172xf32>
    %192 = vector.extract_strided_slice %188 {offsets = [0, 3], sizes = [16, 172], strides = [1, 1]} : vector<16x176xf32> to vector<16x172xf32>
    %193 = vector.extract_strided_slice %188 {offsets = [0, 4], sizes = [16, 172], strides = [1, 1]} : vector<16x176xf32> to vector<16x172xf32>
    %194 = tpu.concatenate %189, %190, %191, %192, %193 in 0 : vector<16x172xf32>, vector<16x172xf32>, vector<16x172xf32>, vector<16x172xf32>, vector<16x172xf32> -> vector<80x172xf32>
    %c0_64 = arith.constant 0 : index
    %c0_65 = arith.constant 0 : index
    %195 = vector.load %arg16[%c0_64, %c0_65] : memref<16x80xbf16, #tpu.memory_space<vmem>>, vector<16x80xbf16>
    %196 = arith.truncf %194 : vector<80x172xf32> to vector<80x172xbf16>
    %cst_66 = arith.constant dense<0.000000e+00> : vector<16x172xf32>
    %197 = tpu.matmul %195, %196, %cst_66 {dimension_numbers = #tpu.dot_dimension_numbers<[1], [0], [0], [1], [0, 0, 1, 1], [], []>} : vector<16x80xbf16>, vector<80x172xbf16>, vector<16x172xf32> -> vector<16x172xf32>
    %c0_67 = arith.constant 0 : index
    %c0_68 = arith.constant 0 : index
    %198 = vector.load %arg17[%c0_67, %c0_68] : memref<16x1xf32, #tpu.memory_space<vmem>>, vector<16x1xf32>
    %199 = vector.broadcast %198 : vector<16x1xf32> to vector<16x172xf32>
    %200 = arith.addf %197, %199 : vector<16x172xf32>
    %c2_i32_69 = arith.constant 2 : i32
    %201 = arith.addi %183, %c2_i32_69 : i32
    %202 = tpu.iota {dimensions = array<i32: 1>} : vector<1x172xi32>
    %203 = vector.broadcast %201 : i32 to vector<1x172xi32>
    %204 = arith.addi %203, %202 : vector<1x172xi32>
    %c0_i32_70 = arith.constant 0 : i32
    %205 = vector.broadcast %c0_i32_70 : i32 to vector<1x172xi32>
    %206 = arith.cmpi sge, %204, %205 : vector<1x172xi32>
    %c16_i32_71 = arith.constant 16 : i32
    %207 = vector.broadcast %c16_i32_71 : i32 to vector<1x172xi32>
    %208 = arith.cmpi slt, %204, %207 : vector<1x172xi32>
    %209 = arith.andi %206, %208 : vector<1x172xi1>
    %cst_72 = arith.constant 0.000000e+00 : f32
    %210 = vector.shape_cast %209 : vector<1x172xi1> to vector<1x172xi1>
    %211 = vector.broadcast %210 : vector<1x172xi1> to vector<16x172xi1>
    %212 = vector.broadcast %cst_72 : f32 to vector<16x172xf32>
    %213 = arith.select %211, %200, %212 : vector<16x172xi1>, vector<16x172xf32>
    %cst_73 = arith.constant 0.000000e+00 : f32
    %214 = vector.broadcast %cst_73 : f32 to vector<16x172xf32>
    %215 = arith.cmpf oge, %213, %214 : vector<16x172xf32>
    %cst_74 = arith.constant 1.000000e-01 : f32
    %216 = vector.broadcast %cst_74 : f32 to vector<16x172xf32>
    %217 = arith.mulf %213, %216 : vector<16x172xf32>
    %218 = arith.select %215, %213, %217 : vector<16x172xi1>, vector<16x172xf32>
    %219 = vector.extract_strided_slice %218 {offsets = [0, 0], sizes = [16, 168], strides = [1, 1]} : vector<16x172xf32> to vector<16x168xf32>
    %220 = vector.extract_strided_slice %218 {offsets = [0, 1], sizes = [16, 168], strides = [1, 1]} : vector<16x172xf32> to vector<16x168xf32>
    %221 = vector.extract_strided_slice %218 {offsets = [0, 2], sizes = [16, 168], strides = [1, 1]} : vector<16x172xf32> to vector<16x168xf32>
    %222 = vector.extract_strided_slice %218 {offsets = [0, 3], sizes = [16, 168], strides = [1, 1]} : vector<16x172xf32> to vector<16x168xf32>
    %223 = vector.extract_strided_slice %218 {offsets = [0, 4], sizes = [16, 168], strides = [1, 1]} : vector<16x172xf32> to vector<16x168xf32>
    %224 = tpu.concatenate %219, %220, %221, %222, %223 in 0 : vector<16x168xf32>, vector<16x168xf32>, vector<16x168xf32>, vector<16x168xf32>, vector<16x168xf32> -> vector<80x168xf32>
    %c0_75 = arith.constant 0 : index
    %c0_76 = arith.constant 0 : index
    %225 = vector.load %arg18[%c0_75, %c0_76] : memref<16x80xbf16, #tpu.memory_space<vmem>>, vector<16x80xbf16>
    %226 = arith.truncf %224 : vector<80x168xf32> to vector<80x168xbf16>
    %cst_77 = arith.constant dense<0.000000e+00> : vector<16x168xf32>
    %227 = tpu.matmul %225, %226, %cst_77 {dimension_numbers = #tpu.dot_dimension_numbers<[1], [0], [0], [1], [0, 0, 1, 1], [], []>} : vector<16x80xbf16>, vector<80x168xbf16>, vector<16x168xf32> -> vector<16x168xf32>
    %c0_78 = arith.constant 0 : index
    %c0_79 = arith.constant 0 : index
    %228 = vector.load %arg19[%c0_78, %c0_79] : memref<16x1xf32, #tpu.memory_space<vmem>>, vector<16x1xf32>
    %229 = vector.broadcast %228 : vector<16x1xf32> to vector<16x168xf32>
    %230 = arith.addf %227, %229 : vector<16x168xf32>
    %231 = vector.extract_strided_slice %182 {offsets = [0, 4], sizes = [16, 168], strides = [1, 1]} : vector<16x176xf32> to vector<16x168xf32>
    %232 = arith.addf %230, %231 : vector<16x168xf32>
    %c4_i32_80 = arith.constant 4 : i32
    %233 = arith.addi %183, %c4_i32_80 : i32
    %234 = tpu.iota {dimensions = array<i32: 1>} : vector<1x168xi32>
    %235 = vector.broadcast %233 : i32 to vector<1x168xi32>
    %236 = arith.addi %235, %234 : vector<1x168xi32>
    %c0_i32_81 = arith.constant 0 : i32
    %237 = vector.broadcast %c0_i32_81 : i32 to vector<1x168xi32>
    %238 = arith.cmpi sge, %236, %237 : vector<1x168xi32>
    %c16_i32_82 = arith.constant 16 : i32
    %239 = vector.broadcast %c16_i32_82 : i32 to vector<1x168xi32>
    %240 = arith.cmpi slt, %236, %239 : vector<1x168xi32>
    %241 = arith.andi %238, %240 : vector<1x168xi1>
    %cst_83 = arith.constant 0.000000e+00 : f32
    %242 = vector.shape_cast %241 : vector<1x168xi1> to vector<1x168xi1>
    %243 = vector.broadcast %242 : vector<1x168xi1> to vector<16x168xi1>
    %244 = vector.broadcast %cst_83 : f32 to vector<16x168xf32>
    %245 = arith.select %243, %232, %244 : vector<16x168xi1>, vector<16x168xf32>
    %cst_84 = arith.constant 0.000000e+00 : f32
    %246 = vector.broadcast %cst_84 : f32 to vector<16x168xf32>
    %247 = arith.cmpf oge, %245, %246 : vector<16x168xf32>
    %cst_85 = arith.constant 1.000000e-01 : f32
    %248 = vector.broadcast %cst_85 : f32 to vector<16x168xf32>
    %249 = arith.mulf %245, %248 : vector<16x168xf32>
    %250 = arith.select %247, %245, %249 : vector<16x168xi1>, vector<16x168xf32>
    %251 = vector.extract_strided_slice %250 {offsets = [0, 0], sizes = [16, 156], strides = [1, 1]} : vector<16x168xf32> to vector<16x156xf32>
    %252 = vector.extract_strided_slice %250 {offsets = [0, 3], sizes = [16, 156], strides = [1, 1]} : vector<16x168xf32> to vector<16x156xf32>
    %253 = vector.extract_strided_slice %250 {offsets = [0, 6], sizes = [16, 156], strides = [1, 1]} : vector<16x168xf32> to vector<16x156xf32>
    %254 = vector.extract_strided_slice %250 {offsets = [0, 9], sizes = [16, 156], strides = [1, 1]} : vector<16x168xf32> to vector<16x156xf32>
    %255 = vector.extract_strided_slice %250 {offsets = [0, 12], sizes = [16, 156], strides = [1, 1]} : vector<16x168xf32> to vector<16x156xf32>
    %256 = tpu.concatenate %251, %252, %253, %254, %255 in 0 : vector<16x156xf32>, vector<16x156xf32>, vector<16x156xf32>, vector<16x156xf32>, vector<16x156xf32> -> vector<80x156xf32>
    %c0_86 = arith.constant 0 : index
    %c0_87 = arith.constant 0 : index
    %257 = vector.load %arg20[%c0_86, %c0_87] : memref<16x80xbf16, #tpu.memory_space<vmem>>, vector<16x80xbf16>
    %258 = arith.truncf %256 : vector<80x156xf32> to vector<80x156xbf16>
    %cst_88 = arith.constant dense<0.000000e+00> : vector<16x156xf32>
    %259 = tpu.matmul %257, %258, %cst_88 {dimension_numbers = #tpu.dot_dimension_numbers<[1], [0], [0], [1], [0, 0, 1, 1], [], []>} : vector<16x80xbf16>, vector<80x156xbf16>, vector<16x156xf32> -> vector<16x156xf32>
    %c0_89 = arith.constant 0 : index
    %c0_90 = arith.constant 0 : index
    %260 = vector.load %arg21[%c0_89, %c0_90] : memref<16x1xf32, #tpu.memory_space<vmem>>, vector<16x1xf32>
    %261 = vector.broadcast %260 : vector<16x1xf32> to vector<16x156xf32>
    %262 = arith.addf %259, %261 : vector<16x156xf32>
    %c6_i32_91 = arith.constant 6 : i32
    %263 = arith.addi %233, %c6_i32_91 : i32
    %264 = tpu.iota {dimensions = array<i32: 1>} : vector<1x156xi32>
    %265 = vector.broadcast %263 : i32 to vector<1x156xi32>
    %266 = arith.addi %265, %264 : vector<1x156xi32>
    %c0_i32_92 = arith.constant 0 : i32
    %267 = vector.broadcast %c0_i32_92 : i32 to vector<1x156xi32>
    %268 = arith.cmpi sge, %266, %267 : vector<1x156xi32>
    %c16_i32_93 = arith.constant 16 : i32
    %269 = vector.broadcast %c16_i32_93 : i32 to vector<1x156xi32>
    %270 = arith.cmpi slt, %266, %269 : vector<1x156xi32>
    %271 = arith.andi %268, %270 : vector<1x156xi1>
    %cst_94 = arith.constant 0.000000e+00 : f32
    %272 = vector.shape_cast %271 : vector<1x156xi1> to vector<1x156xi1>
    %273 = vector.broadcast %272 : vector<1x156xi1> to vector<16x156xi1>
    %274 = vector.broadcast %cst_94 : f32 to vector<16x156xf32>
    %275 = arith.select %273, %262, %274 : vector<16x156xi1>, vector<16x156xf32>
    %cst_95 = arith.constant 0.000000e+00 : f32
    %276 = vector.broadcast %cst_95 : f32 to vector<16x156xf32>
    %277 = arith.cmpf oge, %275, %276 : vector<16x156xf32>
    %cst_96 = arith.constant 1.000000e-01 : f32
    %278 = vector.broadcast %cst_96 : f32 to vector<16x156xf32>
    %279 = arith.mulf %275, %278 : vector<16x156xf32>
    %280 = arith.select %277, %275, %279 : vector<16x156xi1>, vector<16x156xf32>
    %281 = vector.extract_strided_slice %280 {offsets = [0, 0], sizes = [16, 152], strides = [1, 1]} : vector<16x156xf32> to vector<16x152xf32>
    %282 = vector.extract_strided_slice %280 {offsets = [0, 1], sizes = [16, 152], strides = [1, 1]} : vector<16x156xf32> to vector<16x152xf32>
    %283 = vector.extract_strided_slice %280 {offsets = [0, 2], sizes = [16, 152], strides = [1, 1]} : vector<16x156xf32> to vector<16x152xf32>
    %284 = vector.extract_strided_slice %280 {offsets = [0, 3], sizes = [16, 152], strides = [1, 1]} : vector<16x156xf32> to vector<16x152xf32>
    %285 = vector.extract_strided_slice %280 {offsets = [0, 4], sizes = [16, 152], strides = [1, 1]} : vector<16x156xf32> to vector<16x152xf32>
    %286 = tpu.concatenate %281, %282, %283, %284, %285 in 0 : vector<16x152xf32>, vector<16x152xf32>, vector<16x152xf32>, vector<16x152xf32>, vector<16x152xf32> -> vector<80x152xf32>
    %c0_97 = arith.constant 0 : index
    %c0_98 = arith.constant 0 : index
    %287 = vector.load %arg22[%c0_97, %c0_98] : memref<16x80xbf16, #tpu.memory_space<vmem>>, vector<16x80xbf16>
    %288 = arith.truncf %286 : vector<80x152xf32> to vector<80x152xbf16>
    %cst_99 = arith.constant dense<0.000000e+00> : vector<16x152xf32>
    %289 = tpu.matmul %287, %288, %cst_99 {dimension_numbers = #tpu.dot_dimension_numbers<[1], [0], [0], [1], [0, 0, 1, 1], [], []>} : vector<16x80xbf16>, vector<80x152xbf16>, vector<16x152xf32> -> vector<16x152xf32>
    %c0_100 = arith.constant 0 : index
    %c0_101 = arith.constant 0 : index
    %290 = vector.load %arg23[%c0_100, %c0_101] : memref<16x1xf32, #tpu.memory_space<vmem>>, vector<16x1xf32>
    %291 = vector.broadcast %290 : vector<16x1xf32> to vector<16x152xf32>
    %292 = arith.addf %289, %291 : vector<16x152xf32>
    %293 = vector.extract_strided_slice %245 {offsets = [0, 8], sizes = [16, 152], strides = [1, 1]} : vector<16x168xf32> to vector<16x152xf32>
    %294 = arith.addf %292, %293 : vector<16x152xf32>
    %c8_i32 = arith.constant 8 : i32
    %295 = arith.addi %233, %c8_i32 : i32
    %296 = tpu.iota {dimensions = array<i32: 1>} : vector<1x152xi32>
    %297 = vector.broadcast %295 : i32 to vector<1x152xi32>
    %298 = arith.addi %297, %296 : vector<1x152xi32>
    %c0_i32_102 = arith.constant 0 : i32
    %299 = vector.broadcast %c0_i32_102 : i32 to vector<1x152xi32>
    %300 = arith.cmpi sge, %298, %299 : vector<1x152xi32>
    %c16_i32_103 = arith.constant 16 : i32
    %301 = vector.broadcast %c16_i32_103 : i32 to vector<1x152xi32>
    %302 = arith.cmpi slt, %298, %301 : vector<1x152xi32>
    %303 = arith.andi %300, %302 : vector<1x152xi1>
    %cst_104 = arith.constant 0.000000e+00 : f32
    %304 = vector.shape_cast %303 : vector<1x152xi1> to vector<1x152xi1>
    %305 = vector.broadcast %304 : vector<1x152xi1> to vector<16x152xi1>
    %306 = vector.broadcast %cst_104 : f32 to vector<16x152xf32>
    %307 = arith.select %305, %294, %306 : vector<16x152xi1>, vector<16x152xf32>
    %cst_105 = arith.constant 0.000000e+00 : f32
    %308 = vector.broadcast %cst_105 : f32 to vector<16x152xf32>
    %309 = arith.cmpf oge, %307, %308 : vector<16x152xf32>
    %cst_106 = arith.constant 1.000000e-01 : f32
    %310 = vector.broadcast %cst_106 : f32 to vector<16x152xf32>
    %311 = arith.mulf %307, %310 : vector<16x152xf32>
    %312 = arith.select %309, %307, %311 : vector<16x152xi1>, vector<16x152xf32>
    %313 = vector.extract_strided_slice %312 {offsets = [0, 0], sizes = [16, 132], strides = [1, 1]} : vector<16x152xf32> to vector<16x132xf32>
    %314 = vector.extract_strided_slice %312 {offsets = [0, 5], sizes = [16, 132], strides = [1, 1]} : vector<16x152xf32> to vector<16x132xf32>
    %315 = vector.extract_strided_slice %312 {offsets = [0, 10], sizes = [16, 132], strides = [1, 1]} : vector<16x152xf32> to vector<16x132xf32>
    %316 = vector.extract_strided_slice %312 {offsets = [0, 15], sizes = [16, 132], strides = [1, 1]} : vector<16x152xf32> to vector<16x132xf32>
    %317 = vector.extract_strided_slice %312 {offsets = [0, 20], sizes = [16, 132], strides = [1, 1]} : vector<16x152xf32> to vector<16x132xf32>
    %318 = tpu.concatenate %313, %314, %315, %316, %317 in 0 : vector<16x132xf32>, vector<16x132xf32>, vector<16x132xf32>, vector<16x132xf32>, vector<16x132xf32> -> vector<80x132xf32>
    %c0_107 = arith.constant 0 : index
    %c0_108 = arith.constant 0 : index
    %319 = vector.load %arg24[%c0_107, %c0_108] : memref<16x80xbf16, #tpu.memory_space<vmem>>, vector<16x80xbf16>
    %320 = arith.truncf %318 : vector<80x132xf32> to vector<80x132xbf16>
    %cst_109 = arith.constant dense<0.000000e+00> : vector<16x132xf32>
    %321 = tpu.matmul %319, %320, %cst_109 {dimension_numbers = #tpu.dot_dimension_numbers<[1], [0], [0], [1], [0, 0, 1, 1], [], []>} : vector<16x80xbf16>, vector<80x132xbf16>, vector<16x132xf32> -> vector<16x132xf32>
    %c0_110 = arith.constant 0 : index
    %c0_111 = arith.constant 0 : index
    %322 = vector.load %arg25[%c0_110, %c0_111] : memref<16x1xf32, #tpu.memory_space<vmem>>, vector<16x1xf32>
    %323 = vector.broadcast %322 : vector<16x1xf32> to vector<16x132xf32>
    %324 = arith.addf %321, %323 : vector<16x132xf32>
    %c10_i32 = arith.constant 10 : i32
    %325 = arith.addi %295, %c10_i32 : i32
    %326 = tpu.iota {dimensions = array<i32: 1>} : vector<1x132xi32>
    %327 = vector.broadcast %325 : i32 to vector<1x132xi32>
    %328 = arith.addi %327, %326 : vector<1x132xi32>
    %c0_i32_112 = arith.constant 0 : i32
    %329 = vector.broadcast %c0_i32_112 : i32 to vector<1x132xi32>
    %330 = arith.cmpi sge, %328, %329 : vector<1x132xi32>
    %c16_i32_113 = arith.constant 16 : i32
    %331 = vector.broadcast %c16_i32_113 : i32 to vector<1x132xi32>
    %332 = arith.cmpi slt, %328, %331 : vector<1x132xi32>
    %333 = arith.andi %330, %332 : vector<1x132xi1>
    %cst_114 = arith.constant 0.000000e+00 : f32
    %334 = vector.shape_cast %333 : vector<1x132xi1> to vector<1x132xi1>
    %335 = vector.broadcast %334 : vector<1x132xi1> to vector<16x132xi1>
    %336 = vector.broadcast %cst_114 : f32 to vector<16x132xf32>
    %337 = arith.select %335, %324, %336 : vector<16x132xi1>, vector<16x132xf32>
    %cst_115 = arith.constant 0.000000e+00 : f32
    %338 = vector.broadcast %cst_115 : f32 to vector<16x132xf32>
    %339 = arith.cmpf oge, %337, %338 : vector<16x132xf32>
    %cst_116 = arith.constant 1.000000e-01 : f32
    %340 = vector.broadcast %cst_116 : f32 to vector<16x132xf32>
    %341 = arith.mulf %337, %340 : vector<16x132xf32>
    %342 = arith.select %339, %337, %341 : vector<16x132xi1>, vector<16x132xf32>
    %343 = vector.extract_strided_slice %342 {offsets = [0, 0], sizes = [16, 128], strides = [1, 1]} : vector<16x132xf32> to vector<16x128xf32>
    %344 = vector.extract_strided_slice %342 {offsets = [0, 1], sizes = [16, 128], strides = [1, 1]} : vector<16x132xf32> to vector<16x128xf32>
    %345 = vector.extract_strided_slice %342 {offsets = [0, 2], sizes = [16, 128], strides = [1, 1]} : vector<16x132xf32> to vector<16x128xf32>
    %346 = vector.extract_strided_slice %342 {offsets = [0, 3], sizes = [16, 128], strides = [1, 1]} : vector<16x132xf32> to vector<16x128xf32>
    %347 = vector.extract_strided_slice %342 {offsets = [0, 4], sizes = [16, 128], strides = [1, 1]} : vector<16x132xf32> to vector<16x128xf32>
    %348 = tpu.concatenate %343, %344, %345, %346, %347 in 0 : vector<16x128xf32>, vector<16x128xf32>, vector<16x128xf32>, vector<16x128xf32>, vector<16x128xf32> -> vector<80x128xf32>
    %c0_117 = arith.constant 0 : index
    %c0_118 = arith.constant 0 : index
    %349 = vector.load %arg26[%c0_117, %c0_118] : memref<16x80xbf16, #tpu.memory_space<vmem>>, vector<16x80xbf16>
    %350 = arith.truncf %348 : vector<80x128xf32> to vector<80x128xbf16>
    %cst_119 = arith.constant dense<0.000000e+00> : vector<16x128xf32>
    %351 = tpu.matmul %349, %350, %cst_119 {dimension_numbers = #tpu.dot_dimension_numbers<[1], [0], [0], [1], [0, 0, 1, 1], [], []>} : vector<16x80xbf16>, vector<80x128xbf16>, vector<16x128xf32> -> vector<16x128xf32>
    %c0_120 = arith.constant 0 : index
    %c0_121 = arith.constant 0 : index
    %352 = vector.load %arg27[%c0_120, %c0_121] : memref<16x1xf32, #tpu.memory_space<vmem>>, vector<16x1xf32>
    %353 = vector.broadcast %352 : vector<16x1xf32> to vector<16x128xf32>
    %354 = arith.addf %351, %353 : vector<16x128xf32>
    %355 = vector.extract_strided_slice %307 {offsets = [0, 12], sizes = [16, 128], strides = [1, 1]} : vector<16x152xf32> to vector<16x128xf32>
    %356 = arith.addf %354, %355 : vector<16x128xf32>
    %c12_i32_122 = arith.constant 12 : i32
    %357 = arith.addi %295, %c12_i32_122 : i32
    %358 = tpu.iota {dimensions = array<i32: 1>} : vector<1x128xi32>
    %359 = vector.broadcast %357 : i32 to vector<1x128xi32>
    %360 = arith.addi %359, %358 : vector<1x128xi32>
    %c0_i32_123 = arith.constant 0 : i32
    %361 = vector.broadcast %c0_i32_123 : i32 to vector<1x128xi32>
    %362 = arith.cmpi sge, %360, %361 : vector<1x128xi32>
    %c16_i32_124 = arith.constant 16 : i32
    %363 = vector.broadcast %c16_i32_124 : i32 to vector<1x128xi32>
    %364 = arith.cmpi slt, %360, %363 : vector<1x128xi32>
    %365 = arith.andi %362, %364 : vector<1x128xi1>
    %cst_125 = arith.constant 0.000000e+00 : f32
    %366 = vector.shape_cast %365 : vector<1x128xi1> to vector<1x128xi1>
    %367 = vector.broadcast %366 : vector<1x128xi1> to vector<16x128xi1>
    %368 = vector.broadcast %cst_125 : f32 to vector<16x128xf32>
    %369 = arith.select %367, %356, %368 : vector<16x128xi1>, vector<16x128xf32>
    %370 = arith.addf %181, %369 : vector<16x128xf32>
    %cst_126 = arith.constant 5.000000e-01 : f32
    %371 = vector.broadcast %cst_126 : f32 to vector<16x128xf32>
    %372 = arith.mulf %370, %371 : vector<16x128xf32>
    %c0_127 = arith.constant 0 : index
    %c0_128 = arith.constant 0 : index
    %c0_129 = arith.constant 0 : index
    %373 = vector.load %arg28[%c0_127, %c0_128, %c0_129] : memref<1x16x128xf32, #tpu.memory_space<vmem>>, vector<1x16x128xf32>
    %374 = vector.shape_cast %373 : vector<1x16x128xf32> to vector<16x128xf32>
    %375 = vector.shape_cast %372 : vector<16x128xf32> to vector<1x16x128xf32>
    tpu.vector_store %arg28[%c0_127, %c0_128, %c0_129], %375 {strides = array<i32>} : memref<1x16x128xf32, #tpu.memory_space<vmem>>, vector<1x16x128xf32>,
    return
  }
  func.func @transform_0(%arg0: i32, %arg1: i32) -> (i32, i32, i32) {
    %c0_i32 = arith.constant 0 : i32
    %c0_i32_0 = arith.constant 0 : i32
    return %arg1, %c0_i32, %arg0 : i32, i32, i32
  }
  func.func @transform_1(%arg0: i32, %arg1: i32) -> (i32, i32, i32) {
    %c1_i32 = arith.constant 1 : i32
    %0 = arith.addi %arg0, %c1_i32 : i32
    %c1_i32_0 = arith.constant 1 : i32
    %1 = arith.muli %0, %c1_i32_0 : i32
    %c0_i32 = arith.constant 0 : i32
    %c0_i32_1 = arith.constant 0 : i32
    return %arg1, %c0_i32, %1 : i32, i32, i32
  }
  func.func @transform_2(%arg0: i32, %arg1: i32) -> (i32, i32) {
    %c0_i32 = arith.constant 0 : i32
    %c0_i32_0 = arith.constant 0 : i32
    %c0_i32_1 = arith.constant 0 : i32
    return %c0_i32, %c0_i32_0 : i32, i32
  }
  func.func @transform_3(%arg0: i32, %arg1: i32) -> (i32, i32) {
    %c0_i32 = arith.constant 0 : i32
    %c0_i32_0 = arith.constant 0 : i32
    %c0_i32_1 = arith.constant 0 : i32
    return %c0_i32, %c0_i32_0 : i32, i32
  }
  func.func @transform_4(%arg0: i32, %arg1: i32) -> (i32, i32) {
    %c0_i32 = arith.constant 0 : i32
    %c0_i32_0 = arith.constant 0 : i32
    %c0_i32_1 = arith.constant 0 : i32
    return %c0_i32, %c0_i32_0 : i32, i32
  }
  func.func @transform_5(%arg0: i32, %arg1: i32) -> (i32, i32) {
    %c0_i32 = arith.constant 0 : i32
    %c0_i32_0 = arith.constant 0 : i32
    %c0_i32_1 = arith.constant 0 : i32
    return %c0_i32, %c0_i32_0 : i32, i32
  }
  func.func @transform_6(%arg0: i32, %arg1: i32) -> (i32, i32) {
    %c0_i32 = arith.constant 0 : i32
    %c0_i32_0 = arith.constant 0 : i32
    %c0_i32_1 = arith.constant 0 : i32
    return %c0_i32, %c0_i32_0 : i32, i32
  }
  func.func @transform_7(%arg0: i32, %arg1: i32) -> (i32, i32) {
    %c0_i32 = arith.constant 0 : i32
    %c0_i32_0 = arith.constant 0 : i32
    %c0_i32_1 = arith.constant 0 : i32
    return %c0_i32, %c0_i32_0 : i32, i32
  }
  func.func @transform_8(%arg0: i32, %arg1: i32) -> (i32, i32) {
    %c0_i32 = arith.constant 0 : i32
    %c0_i32_0 = arith.constant 0 : i32
    %c0_i32_1 = arith.constant 0 : i32
    return %c0_i32, %c0_i32_0 : i32, i32
  }
  func.func @transform_9(%arg0: i32, %arg1: i32) -> (i32, i32) {
    %c0_i32 = arith.constant 0 : i32
    %c0_i32_0 = arith.constant 0 : i32
    %c0_i32_1 = arith.constant 0 : i32
    return %c0_i32, %c0_i32_0 : i32, i32
  }
  func.func @transform_10(%arg0: i32, %arg1: i32) -> (i32, i32) {
    %c0_i32 = arith.constant 0 : i32
    %c0_i32_0 = arith.constant 0 : i32
    %c0_i32_1 = arith.constant 0 : i32
    return %c0_i32, %c0_i32_0 : i32, i32
  }
  func.func @transform_11(%arg0: i32, %arg1: i32) -> (i32, i32) {
    %c0_i32 = arith.constant 0 : i32
    %c0_i32_0 = arith.constant 0 : i32
    %c0_i32_1 = arith.constant 0 : i32
    return %c0_i32, %c0_i32_0 : i32, i32
  }
  func.func @transform_12(%arg0: i32, %arg1: i32) -> (i32, i32) {
    %c0_i32 = arith.constant 0 : i32
    %c0_i32_0 = arith.constant 0 : i32
    %c0_i32_1 = arith.constant 0 : i32
    return %c0_i32, %c0_i32_0 : i32, i32
  }
  func.func @transform_13(%arg0: i32, %arg1: i32) -> (i32, i32) {
    %c0_i32 = arith.constant 0 : i32
    %c0_i32_0 = arith.constant 0 : i32
    %c0_i32_1 = arith.constant 0 : i32
    return %c0_i32, %c0_i32_0 : i32, i32
  }
  func.func @transform_14(%arg0: i32, %arg1: i32) -> (i32, i32) {
    %c0_i32 = arith.constant 0 : i32
    %c0_i32_0 = arith.constant 0 : i32
    %c0_i32_1 = arith.constant 0 : i32
    return %c0_i32, %c0_i32_0 : i32, i32
  }
  func.func @transform_15(%arg0: i32, %arg1: i32) -> (i32, i32) {
    %c0_i32 = arith.constant 0 : i32
    %c0_i32_0 = arith.constant 0 : i32
    %c0_i32_1 = arith.constant 0 : i32
    return %c0_i32, %c0_i32_0 : i32, i32
  }
  func.func @transform_16(%arg0: i32, %arg1: i32) -> (i32, i32) {
    %c0_i32 = arith.constant 0 : i32
    %c0_i32_0 = arith.constant 0 : i32
    %c0_i32_1 = arith.constant 0 : i32
    return %c0_i32, %c0_i32_0 : i32, i32
  }
  func.func @transform_17(%arg0: i32, %arg1: i32) -> (i32, i32) {
    %c0_i32 = arith.constant 0 : i32
    %c0_i32_0 = arith.constant 0 : i32
    %c0_i32_1 = arith.constant 0 : i32
    return %c0_i32, %c0_i32_0 : i32, i32
  }
  func.func @transform_18(%arg0: i32, %arg1: i32) -> (i32, i32) {
    %c0_i32 = arith.constant 0 : i32
    %c0_i32_0 = arith.constant 0 : i32
    %c0_i32_1 = arith.constant 0 : i32
    return %c0_i32, %c0_i32_0 : i32, i32
  }
  func.func @transform_19(%arg0: i32, %arg1: i32) -> (i32, i32) {
    %c0_i32 = arith.constant 0 : i32
    %c0_i32_0 = arith.constant 0 : i32
    %c0_i32_1 = arith.constant 0 : i32
    return %c0_i32, %c0_i32_0 : i32, i32
  }
  func.func @transform_20(%arg0: i32, %arg1: i32) -> (i32, i32) {
    %c0_i32 = arith.constant 0 : i32
    %c0_i32_0 = arith.constant 0 : i32
    %c0_i32_1 = arith.constant 0 : i32
    return %c0_i32, %c0_i32_0 : i32, i32
  }
  func.func @transform_21(%arg0: i32, %arg1: i32) -> (i32, i32) {
    %c0_i32 = arith.constant 0 : i32
    %c0_i32_0 = arith.constant 0 : i32
    %c0_i32_1 = arith.constant 0 : i32
    return %c0_i32, %c0_i32_0 : i32, i32
  }
  func.func @transform_22(%arg0: i32, %arg1: i32) -> (i32, i32) {
    %c0_i32 = arith.constant 0 : i32
    %c0_i32_0 = arith.constant 0 : i32
    %c0_i32_1 = arith.constant 0 : i32
    return %c0_i32, %c0_i32_0 : i32, i32
  }
  func.func @transform_23(%arg0: i32, %arg1: i32) -> (i32, i32) {
    %c0_i32 = arith.constant 0 : i32
    %c0_i32_0 = arith.constant 0 : i32
    %c0_i32_1 = arith.constant 0 : i32
    return %c0_i32, %c0_i32_0 : i32, i32
  }
  func.func @transform_24(%arg0: i32, %arg1: i32) -> (i32, i32) {
    %c0_i32 = arith.constant 0 : i32
    %c0_i32_0 = arith.constant 0 : i32
    %c0_i32_1 = arith.constant 0 : i32
    return %c0_i32, %c0_i32_0 : i32, i32
  }
  func.func @transform_25(%arg0: i32, %arg1: i32) -> (i32, i32) {
    %c0_i32 = arith.constant 0 : i32
    %c0_i32_0 = arith.constant 0 : i32
    %c0_i32_1 = arith.constant 0 : i32
    return %c0_i32, %c0_i32_0 : i32, i32
  }
  func.func @transform_26(%arg0: i32, %arg1: i32) -> (i32, i32, i32) {
    %c0_i32 = arith.constant 0 : i32
    %c0_i32_0 = arith.constant 0 : i32
    return %arg1, %c0_i32, %arg0 : i32, i32, i32
  }
}

module attributes {stable_mosaic.version = 11 : i64} {
  func.func @_convtrans_kernel(%arg0: i32, %arg1: i32, %arg2: memref<1x16x128xf32, #tpu.memory_space<vmem>>, %arg3: memref<1x16x128xf32, #tpu.memory_space<vmem>>, %arg4: memref<2x8x32xbf16, #tpu.memory_space<vmem>>, %arg5: memref<8x1xf32, #tpu.memory_space<vmem>>, %arg6: memref<1x2x8x128xf32, #tpu.memory_space<vmem>>) attributes {dimension_semantics = [#tpu.dimension_semantics<parallel>, #tpu.dimension_semantics<parallel>], iteration_bounds = array<i64: 1, 2>, scalar_prefetch = 0 : i64, scratch_operands = 0 : i64, tpu.core_type = #tpu.core_type<tc>, window_params = [{transform_indices = @transform_0, window_bounds = array<i64: 1, 16, 128>}, {transform_indices = @transform_1, window_bounds = array<i64: 1, 16, 128>}, {pipeline_mode = #tpu.pipeline_mode<synchronous>, transform_indices = @transform_2, window_bounds = array<i64: 2, 8, 32>}, {pipeline_mode = #tpu.pipeline_mode<synchronous>, transform_indices = @transform_3, window_bounds = array<i64: 8, 1>}, {transform_indices = @transform_4, window_bounds = array<i64: 1, 2, 8, 128>}]} {
    %c0 = arith.constant 0 : index
    %c0_0 = arith.constant 0 : index
    %c0_1 = arith.constant 0 : index
    %0 = vector.load %arg2[%c0, %c0_0, %c0_1] : memref<1x16x128xf32, #tpu.memory_space<vmem>>, vector<1x16x128xf32>
    %1 = vector.shape_cast %0 : vector<1x16x128xf32> to vector<16x128xf32>
    %c0_2 = arith.constant 0 : index
    %c0_3 = arith.constant 0 : index
    %c0_4 = arith.constant 0 : index
    %2 = vector.load %arg3[%c0_2, %c0_3, %c0_4] : memref<1x16x128xf32, #tpu.memory_space<vmem>>, vector<1x16x128xf32>
    %3 = vector.shape_cast %2 : vector<1x16x128xf32> to vector<16x128xf32>
    %4 = tpu.concatenate %1, %3 in 1 : vector<16x128xf32>, vector<16x128xf32> -> vector<16x256xf32>
    %cst = arith.constant 0.000000e+00 : f32
    %5 = vector.broadcast %cst : f32 to vector<16x256xf32>
    %6 = arith.cmpf oge, %4, %5 : vector<16x256xf32>
    %cst_5 = arith.constant 1.000000e-01 : f32
    %7 = vector.broadcast %cst_5 : f32 to vector<16x256xf32>
    %8 = arith.mulf %4, %7 : vector<16x256xf32>
    %9 = arith.select %6, %4, %8 : vector<16x256xi1>, vector<16x256xf32>
    %c0_6 = arith.constant 0 : index
    %c0_7 = arith.constant 0 : index
    %10 = vector.load %arg5[%c0_6, %c0_7] : memref<8x1xf32, #tpu.memory_space<vmem>>, vector<8x1xf32>
    %11 = vector.extract_strided_slice %9 {offsets = [0, 0], sizes = [16, 128], strides = [1, 1]} : vector<16x256xf32> to vector<16x128xf32>
    %12 = vector.extract_strided_slice %9 {offsets = [0, 1], sizes = [16, 128], strides = [1, 1]} : vector<16x256xf32> to vector<16x128xf32>
    %13 = tpu.concatenate %11, %12 in 0 : vector<16x128xf32>, vector<16x128xf32> -> vector<32x128xf32>
    %c0_8 = arith.constant 0 : index
    %c0_9 = arith.constant 0 : index
    %c0_10 = arith.constant 0 : index
    %14 = vector.load %arg4[%c0_8, %c0_9, %c0_10] : memref<2x8x32xbf16, #tpu.memory_space<vmem>>, vector<1x8x32xbf16>
    %15 = vector.shape_cast %14 : vector<1x8x32xbf16> to vector<8x32xbf16>
    %16 = arith.truncf %13 : vector<32x128xf32> to vector<32x128xbf16>
    %cst_11 = arith.constant dense<0.000000e+00> : vector<8x128xf32>
    %17 = tpu.matmul %15, %16, %cst_11 {dimension_numbers = #tpu.dot_dimension_numbers<[1], [0], [0], [1], [0, 0, 1, 1], [], []>} : vector<8x32xbf16>, vector<32x128xbf16>, vector<8x128xf32> -> vector<8x128xf32>
    %18 = vector.broadcast %10 : vector<8x1xf32> to vector<8x128xf32>
    %19 = arith.addf %17, %18 : vector<8x128xf32>
    %c0_12 = arith.constant 0 : index
    %c0_13 = arith.constant 0 : index
    %c0_14 = arith.constant 0 : index
    %c0_15 = arith.constant 0 : index
    %20 = vector.load %arg6[%c0_12, %c0_13, %c0_14, %c0_15] : memref<1x2x8x128xf32, #tpu.memory_space<vmem>>, vector<1x1x8x128xf32>
    %21 = vector.shape_cast %20 : vector<1x1x8x128xf32> to vector<8x128xf32>
    %22 = vector.shape_cast %19 : vector<8x128xf32> to vector<1x1x8x128xf32>
    tpu.vector_store %arg6[%c0_12, %c0_13, %c0_14, %c0_15], %22 {strides = array<i32>} : memref<1x2x8x128xf32, #tpu.memory_space<vmem>>, vector<1x1x8x128xf32>,
    %23 = vector.extract_strided_slice %9 {offsets = [0, 1], sizes = [16, 128], strides = [1, 1]} : vector<16x256xf32> to vector<16x128xf32>
    %24 = vector.extract_strided_slice %9 {offsets = [0, 2], sizes = [16, 128], strides = [1, 1]} : vector<16x256xf32> to vector<16x128xf32>
    %25 = tpu.concatenate %23, %24 in 0 : vector<16x128xf32>, vector<16x128xf32> -> vector<32x128xf32>
    %c1 = arith.constant 1 : index
    %c0_16 = arith.constant 0 : index
    %c0_17 = arith.constant 0 : index
    %26 = vector.load %arg4[%c1, %c0_16, %c0_17] : memref<2x8x32xbf16, #tpu.memory_space<vmem>>, vector<1x8x32xbf16>
    %27 = vector.shape_cast %26 : vector<1x8x32xbf16> to vector<8x32xbf16>
    %28 = arith.truncf %25 : vector<32x128xf32> to vector<32x128xbf16>
    %cst_18 = arith.constant dense<0.000000e+00> : vector<8x128xf32>
    %29 = tpu.matmul %27, %28, %cst_18 {dimension_numbers = #tpu.dot_dimension_numbers<[1], [0], [0], [1], [0, 0, 1, 1], [], []>} : vector<8x32xbf16>, vector<32x128xbf16>, vector<8x128xf32> -> vector<8x128xf32>
    %30 = vector.broadcast %10 : vector<8x1xf32> to vector<8x128xf32>
    %31 = arith.addf %29, %30 : vector<8x128xf32>
    %c0_19 = arith.constant 0 : index
    %c1_20 = arith.constant 1 : index
    %c0_21 = arith.constant 0 : index
    %c0_22 = arith.constant 0 : index
    %32 = vector.load %arg6[%c0_19, %c1_20, %c0_21, %c0_22] : memref<1x2x8x128xf32, #tpu.memory_space<vmem>>, vector<1x1x8x128xf32>
    %33 = vector.shape_cast %32 : vector<1x1x8x128xf32> to vector<8x128xf32>
    %34 = vector.shape_cast %31 : vector<8x128xf32> to vector<1x1x8x128xf32>
    tpu.vector_store %arg6[%c0_19, %c1_20, %c0_21, %c0_22], %34 {strides = array<i32>} : memref<1x2x8x128xf32, #tpu.memory_space<vmem>>, vector<1x1x8x128xf32>,
    return
  }
  func.func @transform_0(%arg0: i32, %arg1: i32) -> (i32, i32, i32) {
    %c0_i32 = arith.constant 0 : i32
    %c0_i32_0 = arith.constant 0 : i32
    return %arg1, %c0_i32, %arg0 : i32, i32, i32
  }
  func.func @transform_1(%arg0: i32, %arg1: i32) -> (i32, i32, i32) {
    %c1_i32 = arith.constant 1 : i32
    %0 = arith.addi %arg0, %c1_i32 : i32
    %c1_i32_0 = arith.constant 1 : i32
    %1 = arith.muli %0, %c1_i32_0 : i32
    %c0_i32 = arith.constant 0 : i32
    %c0_i32_1 = arith.constant 0 : i32
    return %arg1, %c0_i32, %1 : i32, i32, i32
  }
  func.func @transform_2(%arg0: i32, %arg1: i32) -> (i32, i32, i32) {
    %c0_i32 = arith.constant 0 : i32
    %c0_i32_0 = arith.constant 0 : i32
    %c0_i32_1 = arith.constant 0 : i32
    %c0_i32_2 = arith.constant 0 : i32
    return %c0_i32, %c0_i32_0, %c0_i32_1 : i32, i32, i32
  }
  func.func @transform_3(%arg0: i32, %arg1: i32) -> (i32, i32) {
    %c0_i32 = arith.constant 0 : i32
    %c0_i32_0 = arith.constant 0 : i32
    %c0_i32_1 = arith.constant 0 : i32
    return %c0_i32, %c0_i32_0 : i32, i32
  }
  func.func @transform_4(%arg0: i32, %arg1: i32) -> (i32, i32, i32, i32) {
    %c0_i32 = arith.constant 0 : i32
    %c0_i32_0 = arith.constant 0 : i32
    %c0_i32_1 = arith.constant 0 : i32
    return %arg1, %c0_i32, %c0_i32_0, %arg0 : i32, i32, i32, i32
  }
}

module attributes {stable_mosaic.version = 11 : i64} {
  func.func @_conv1d_kernel(%arg0: i32, %arg1: i32, %arg2: memref<1x8x128xf32, #tpu.memory_space<vmem>>, %arg3: memref<1x8x128xf32, #tpu.memory_space<vmem>>, %arg4: memref<1x56xbf16, #tpu.memory_space<vmem>>, %arg5: memref<1x1xf32, #tpu.memory_space<vmem>>, %arg6: memref<1x1x128xf32, #tpu.memory_space<vmem>>) attributes {dimension_semantics = [#tpu.dimension_semantics<parallel>, #tpu.dimension_semantics<parallel>], iteration_bounds = array<i64: 1, 2>, scalar_prefetch = 0 : i64, scratch_operands = 0 : i64, tpu.core_type = #tpu.core_type<tc>, window_params = [{transform_indices = @transform_0, window_bounds = array<i64: 1, 8, 128>}, {transform_indices = @transform_1, window_bounds = array<i64: 1, 8, 128>}, {pipeline_mode = #tpu.pipeline_mode<synchronous>, transform_indices = @transform_2, window_bounds = array<i64: 1, 56>}, {pipeline_mode = #tpu.pipeline_mode<synchronous>, transform_indices = @transform_3, window_bounds = array<i64: 1, 1>}, {transform_indices = @transform_4, window_bounds = array<i64: 1, 1, 128>}]} {
    %c0 = arith.constant 0 : index
    %c0_0 = arith.constant 0 : index
    %c0_1 = arith.constant 0 : index
    %0 = vector.load %arg2[%c0, %c0_0, %c0_1] : memref<1x8x128xf32, #tpu.memory_space<vmem>>, vector<1x8x128xf32>
    %1 = vector.shape_cast %0 : vector<1x8x128xf32> to vector<8x128xf32>
    %c0_2 = arith.constant 0 : index
    %c0_3 = arith.constant 0 : index
    %c0_4 = arith.constant 0 : index
    %2 = vector.load %arg3[%c0_2, %c0_3, %c0_4] : memref<1x8x128xf32, #tpu.memory_space<vmem>>, vector<1x8x128xf32>
    %3 = vector.shape_cast %2 : vector<1x8x128xf32> to vector<8x128xf32>
    %4 = tpu.concatenate %1, %3 in 1 : vector<8x128xf32>, vector<8x128xf32> -> vector<8x256xf32>
    %cst = arith.constant 0.000000e+00 : f32
    %5 = vector.broadcast %cst : f32 to vector<8x256xf32>
    %6 = arith.cmpf oge, %4, %5 : vector<8x256xf32>
    %cst_5 = arith.constant 0.00999999977 : f32
    %7 = vector.broadcast %cst_5 : f32 to vector<8x256xf32>
    %8 = arith.mulf %4, %7 : vector<8x256xf32>
    %9 = arith.select %6, %4, %8 : vector<8x256xi1>, vector<8x256xf32>
    %10 = vector.extract_strided_slice %9 {offsets = [0, 0], sizes = [8, 128], strides = [1, 1]} : vector<8x256xf32> to vector<8x128xf32>
    %11 = vector.extract_strided_slice %9 {offsets = [0, 1], sizes = [8, 128], strides = [1, 1]} : vector<8x256xf32> to vector<8x128xf32>
    %12 = vector.extract_strided_slice %9 {offsets = [0, 2], sizes = [8, 128], strides = [1, 1]} : vector<8x256xf32> to vector<8x128xf32>
    %13 = vector.extract_strided_slice %9 {offsets = [0, 3], sizes = [8, 128], strides = [1, 1]} : vector<8x256xf32> to vector<8x128xf32>
    %14 = vector.extract_strided_slice %9 {offsets = [0, 4], sizes = [8, 128], strides = [1, 1]} : vector<8x256xf32> to vector<8x128xf32>
    %15 = vector.extract_strided_slice %9 {offsets = [0, 5], sizes = [8, 128], strides = [1, 1]} : vector<8x256xf32> to vector<8x128xf32>
    %16 = vector.extract_strided_slice %9 {offsets = [0, 6], sizes = [8, 128], strides = [1, 1]} : vector<8x256xf32> to vector<8x128xf32>
    %17 = tpu.concatenate %10, %11, %12, %13, %14, %15, %16 in 0 : vector<8x128xf32>, vector<8x128xf32>, vector<8x128xf32>, vector<8x128xf32>, vector<8x128xf32>, vector<8x128xf32>, vector<8x128xf32> -> vector<56x128xf32>
    %c0_6 = arith.constant 0 : index
    %c0_7 = arith.constant 0 : index
    %18 = vector.load %arg4[%c0_6, %c0_7] : memref<1x56xbf16, #tpu.memory_space<vmem>>, vector<1x56xbf16>
    %19 = arith.truncf %17 : vector<56x128xf32> to vector<56x128xbf16>
    %cst_8 = arith.constant dense<0.000000e+00> : vector<1x128xf32>
    %20 = tpu.matmul %18, %19, %cst_8 {dimension_numbers = #tpu.dot_dimension_numbers<[1], [0], [0], [1], [0, 0, 1, 1], [], []>} : vector<1x56xbf16>, vector<56x128xbf16>, vector<1x128xf32> -> vector<1x128xf32>
    %c0_9 = arith.constant 0 : index
    %c0_10 = arith.constant 0 : index
    %21 = vector.load %arg5[%c0_9, %c0_10] : memref<1x1xf32, #tpu.memory_space<vmem>>, vector<1x1xf32>
    %22 = vector.broadcast %21 : vector<1x1xf32> to vector<1x128xf32>
    %23 = arith.addf %20, %22 : vector<1x128xf32>
    %24 = math.tanh %23 : vector<1x128xf32>
    %c0_11 = arith.constant 0 : index
    %c0_12 = arith.constant 0 : index
    %c0_13 = arith.constant 0 : index
    %25 = vector.load %arg6[%c0_11, %c0_12, %c0_13] : memref<1x1x128xf32, #tpu.memory_space<vmem>>, vector<1x1x128xf32>
    %26 = vector.shape_cast %25 : vector<1x1x128xf32> to vector<1x128xf32>
    %27 = vector.shape_cast %24 : vector<1x128xf32> to vector<1x1x128xf32>
    tpu.vector_store %arg6[%c0_11, %c0_12, %c0_13], %27 {strides = array<i32>} : memref<1x1x128xf32, #tpu.memory_space<vmem>>, vector<1x1x128xf32>,
    return
  }
  func.func @transform_0(%arg0: i32, %arg1: i32) -> (i32, i32, i32) {
    %c0_i32 = arith.constant 0 : i32
    %c0_i32_0 = arith.constant 0 : i32
    return %arg1, %c0_i32, %arg0 : i32, i32, i32
  }
  func.func @transform_1(%arg0: i32, %arg1: i32) -> (i32, i32, i32) {
    %c1_i32 = arith.constant 1 : i32
    %0 = arith.addi %arg0, %c1_i32 : i32
    %c1_i32_0 = arith.constant 1 : i32
    %1 = arith.muli %0, %c1_i32_0 : i32
    %c0_i32 = arith.constant 0 : i32
    %c0_i32_1 = arith.constant 0 : i32
    return %arg1, %c0_i32, %1 : i32, i32, i32
  }
  func.func @transform_2(%arg0: i32, %arg1: i32) -> (i32, i32) {
    %c0_i32 = arith.constant 0 : i32
    %c0_i32_0 = arith.constant 0 : i32
    %c0_i32_1 = arith.constant 0 : i32
    return %c0_i32, %c0_i32_0 : i32, i32
  }
  func.func @transform_3(%arg0: i32, %arg1: i32) -> (i32, i32) {
    %c0_i32 = arith.constant 0 : i32
    %c0_i32_0 = arith.constant 0 : i32
    %c0_i32_1 = arith.constant 0 : i32
    return %c0_i32, %c0_i32_0 : i32, i32
  }
  func.func @transform_4(%arg0: i32, %arg1: i32) -> (i32, i32, i32) {
    %c0_i32 = arith.constant 0 : i32
    %c0_i32_0 = arith.constant 0 : i32
    return %arg1, %c0_i32, %arg0 : i32, i32, i32
  }
}

module attributes {stable_mosaic.version = 11 : i64} {
  func.func @_resblock_stage_kernel(%arg0: i32, %arg1: i32, %arg2: memref<1x8x128xf32, #tpu.memory_space<vmem>>, %arg3: memref<1x8x128xf32, #tpu.memory_space<vmem>>, %arg4: memref<8x24xbf16, #tpu.memory_space<vmem>>, %arg5: memref<8x1xf32, #tpu.memory_space<vmem>>, %arg6: memref<8x24xbf16, #tpu.memory_space<vmem>>, %arg7: memref<8x1xf32, #tpu.memory_space<vmem>>, %arg8: memref<8x24xbf16, #tpu.memory_space<vmem>>, %arg9: memref<8x1xf32, #tpu.memory_space<vmem>>, %arg10: memref<8x24xbf16, #tpu.memory_space<vmem>>, %arg11: memref<8x1xf32, #tpu.memory_space<vmem>>, %arg12: memref<8x24xbf16, #tpu.memory_space<vmem>>, %arg13: memref<8x1xf32, #tpu.memory_space<vmem>>, %arg14: memref<8x24xbf16, #tpu.memory_space<vmem>>, %arg15: memref<8x1xf32, #tpu.memory_space<vmem>>, %arg16: memref<8x40xbf16, #tpu.memory_space<vmem>>, %arg17: memref<8x1xf32, #tpu.memory_space<vmem>>, %arg18: memref<8x40xbf16, #tpu.memory_space<vmem>>, %arg19: memref<8x1xf32, #tpu.memory_space<vmem>>, %arg20: memref<8x40xbf16, #tpu.memory_space<vmem>>, %arg21: memref<8x1xf32, #tpu.memory_space<vmem>>, %arg22: memref<8x40xbf16, #tpu.memory_space<vmem>>, %arg23: memref<8x1xf32, #tpu.memory_space<vmem>>, %arg24: memref<8x40xbf16, #tpu.memory_space<vmem>>, %arg25: memref<8x1xf32, #tpu.memory_space<vmem>>, %arg26: memref<8x40xbf16, #tpu.memory_space<vmem>>, %arg27: memref<8x1xf32, #tpu.memory_space<vmem>>, %arg28: memref<1x8x128xf32, #tpu.memory_space<vmem>>) attributes {dimension_semantics = [#tpu.dimension_semantics<parallel>, #tpu.dimension_semantics<parallel>], iteration_bounds = array<i64: 1, 2>, scalar_prefetch = 0 : i64, scratch_operands = 0 : i64, tpu.core_type = #tpu.core_type<tc>, window_params = [{transform_indices = @transform_0, window_bounds = array<i64: 1, 8, 128>}, {transform_indices = @transform_1, window_bounds = array<i64: 1, 8, 128>}, {pipeline_mode = #tpu.pipeline_mode<synchronous>, transform_indices = @transform_2, window_bounds = array<i64: 8, 24>}, {pipeline_mode = #tpu.pipeline_mode<synchronous>, transform_indices = @transform_3, window_bounds = array<i64: 8, 1>}, {pipeline_mode = #tpu.pipeline_mode<synchronous>, transform_indices = @transform_4, window_bounds = array<i64: 8, 24>}, {pipeline_mode = #tpu.pipeline_mode<synchronous>, transform_indices = @transform_5, window_bounds = array<i64: 8, 1>}, {pipeline_mode = #tpu.pipeline_mode<synchronous>, transform_indices = @transform_6, window_bounds = array<i64: 8, 24>}, {pipeline_mode = #tpu.pipeline_mode<synchronous>, transform_indices = @transform_7, window_bounds = array<i64: 8, 1>}, {pipeline_mode = #tpu.pipeline_mode<synchronous>, transform_indices = @transform_8, window_bounds = array<i64: 8, 24>}, {pipeline_mode = #tpu.pipeline_mode<synchronous>, transform_indices = @transform_9, window_bounds = array<i64: 8, 1>}, {pipeline_mode = #tpu.pipeline_mode<synchronous>, transform_indices = @transform_10, window_bounds = array<i64: 8, 24>}, {pipeline_mode = #tpu.pipeline_mode<synchronous>, transform_indices = @transform_11, window_bounds = array<i64: 8, 1>}, {pipeline_mode = #tpu.pipeline_mode<synchronous>, transform_indices = @transform_12, window_bounds = array<i64: 8, 24>}, {pipeline_mode = #tpu.pipeline_mode<synchronous>, transform_indices = @transform_13, window_bounds = array<i64: 8, 1>}, {pipeline_mode = #tpu.pipeline_mode<synchronous>, transform_indices = @transform_14, window_bounds = array<i64: 8, 40>}, {pipeline_mode = #tpu.pipeline_mode<synchronous>, transform_indices = @transform_15, window_bounds = array<i64: 8, 1>}, {pipeline_mode = #tpu.pipeline_mode<synchronous>, transform_indices = @transform_16, window_bounds = array<i64: 8, 40>}, {pipeline_mode = #tpu.pipeline_mode<synchronous>, transform_indices = @transform_17, window_bounds = array<i64: 8, 1>}, {pipeline_mode = #tpu.pipeline_mode<synchronous>, transform_indices = @transform_18, window_bounds = array<i64: 8, 40>}, {pipeline_mode = #tpu.pipeline_mode<synchronous>, transform_indices = @transform_19, window_bounds = array<i64: 8, 1>}, {pipeline_mode = #tpu.pipeline_mode<synchronous>, transform_indices = @transform_20, window_bounds = array<i64: 8, 40>}, {pipeline_mode = #tpu.pipeline_mode<synchronous>, transform_indices = @transform_21, window_bounds = array<i64: 8, 1>}, {pipeline_mode = #tpu.pipeline_mode<synchronous>, transform_indices = @transform_22, window_bounds = array<i64: 8, 40>}, {pipeline_mode = #tpu.pipeline_mode<synchronous>, transform_indices = @transform_23, window_bounds = array<i64: 8, 1>}, {pipeline_mode = #tpu.pipeline_mode<synchronous>, transform_indices = @transform_24, window_bounds = array<i64: 8, 40>}, {pipeline_mode = #tpu.pipeline_mode<synchronous>, transform_indices = @transform_25, window_bounds = array<i64: 8, 1>}, {transform_indices = @transform_26, window_bounds = array<i64: 1, 8, 128>}]} {
    %c0 = arith.constant 0 : index
    %c0_0 = arith.constant 0 : index
    %c0_1 = arith.constant 0 : index
    %0 = vector.load %arg2[%c0, %c0_0, %c0_1] : memref<1x8x128xf32, #tpu.memory_space<vmem>>, vector<1x8x128xf32>
    %1 = vector.shape_cast %0 : vector<1x8x128xf32> to vector<8x128xf32>
    %c0_2 = arith.constant 0 : index
    %c0_3 = arith.constant 0 : index
    %c0_4 = arith.constant 0 : index
    %2 = vector.load %arg3[%c0_2, %c0_3, %c0_4] : memref<1x8x128xf32, #tpu.memory_space<vmem>>, vector<1x8x128xf32>
    %3 = vector.shape_cast %2 : vector<1x8x128xf32> to vector<8x128xf32>
    %4 = tpu.concatenate %1, %3 in 1 : vector<8x128xf32>, vector<8x128xf32> -> vector<8x256xf32>
    %c128_i32 = arith.constant 128 : i32
    %5 = arith.muli %arg0, %c128_i32 : i32
    %6 = vector.extract_strided_slice %4 {offsets = [0, 12], sizes = [8, 152], strides = [1, 1]} : vector<8x256xf32> to vector<8x152xf32>
    %c12_i32 = arith.constant 12 : i32
    %7 = arith.subi %5, %c12_i32 : i32
    %cst = arith.constant 0.000000e+00 : f32
    %8 = vector.broadcast %cst : f32 to vector<8x152xf32>
    %9 = arith.cmpf oge, %6, %8 : vector<8x152xf32>
    %cst_5 = arith.constant 1.000000e-01 : f32
    %10 = vector.broadcast %cst_5 : f32 to vector<8x152xf32>
    %11 = arith.mulf %6, %10 : vector<8x152xf32>
    %12 = arith.select %9, %6, %11 : vector<8x152xi1>, vector<8x152xf32>
    %13 = vector.extract_strided_slice %12 {offsets = [0, 0], sizes = [8, 150], strides = [1, 1]} : vector<8x152xf32> to vector<8x150xf32>
    %14 = vector.extract_strided_slice %12 {offsets = [0, 1], sizes = [8, 150], strides = [1, 1]} : vector<8x152xf32> to vector<8x150xf32>
    %15 = vector.extract_strided_slice %12 {offsets = [0, 2], sizes = [8, 150], strides = [1, 1]} : vector<8x152xf32> to vector<8x150xf32>
    %16 = tpu.concatenate %13, %14, %15 in 0 : vector<8x150xf32>, vector<8x150xf32>, vector<8x150xf32> -> vector<24x150xf32>
    %c0_6 = arith.constant 0 : index
    %c0_7 = arith.constant 0 : index
    %17 = vector.load %arg4[%c0_6, %c0_7] : memref<8x24xbf16, #tpu.memory_space<vmem>>, vector<8x24xbf16>
    %18 = arith.truncf %16 : vector<24x150xf32> to vector<24x150xbf16>
    %cst_8 = arith.constant dense<0.000000e+00> : vector<8x150xf32>
    %19 = tpu.matmul %17, %18, %cst_8 {dimension_numbers = #tpu.dot_dimension_numbers<[1], [0], [0], [1], [0, 0, 1, 1], [], []>} : vector<8x24xbf16>, vector<24x150xbf16>, vector<8x150xf32> -> vector<8x150xf32>
    %c0_9 = arith.constant 0 : index
    %c0_10 = arith.constant 0 : index
    %20 = vector.load %arg5[%c0_9, %c0_10] : memref<8x1xf32, #tpu.memory_space<vmem>>, vector<8x1xf32>
    %21 = vector.broadcast %20 : vector<8x1xf32> to vector<8x150xf32>
    %22 = arith.addf %19, %21 : vector<8x150xf32>
    %c1_i32 = arith.constant 1 : i32
    %23 = arith.addi %7, %c1_i32 : i32
    %24 = tpu.iota {dimensions = array<i32: 1>} : vector<1x150xi32>
    %25 = vector.broadcast %23 : i32 to vector<1x150xi32>
    %26 = arith.addi %25, %24 : vector<1x150xi32>
    %c0_i32 = arith.constant 0 : i32
    %27 = vector.broadcast %c0_i32 : i32 to vector<1x150xi32>
    %28 = arith.cmpi sge, %26, %27 : vector<1x150xi32>
    %c32_i32 = arith.constant 32 : i32
    %29 = vector.broadcast %c32_i32 : i32 to vector<1x150xi32>
    %30 = arith.cmpi slt, %26, %29 : vector<1x150xi32>
    %31 = arith.andi %28, %30 : vector<1x150xi1>
    %cst_11 = arith.constant 0.000000e+00 : f32
    %32 = vector.shape_cast %31 : vector<1x150xi1> to vector<1x150xi1>
    %33 = vector.broadcast %32 : vector<1x150xi1> to vector<8x150xi1>
    %34 = vector.broadcast %cst_11 : f32 to vector<8x150xf32>
    %35 = arith.select %33, %22, %34 : vector<8x150xi1>, vector<8x150xf32>
    %cst_12 = arith.constant 0.000000e+00 : f32
    %36 = vector.broadcast %cst_12 : f32 to vector<8x150xf32>
    %37 = arith.cmpf oge, %35, %36 : vector<8x150xf32>
    %cst_13 = arith.constant 1.000000e-01 : f32
    %38 = vector.broadcast %cst_13 : f32 to vector<8x150xf32>
    %39 = arith.mulf %35, %38 : vector<8x150xf32>
    %40 = arith.select %37, %35, %39 : vector<8x150xi1>, vector<8x150xf32>
    %41 = vector.extract_strided_slice %40 {offsets = [0, 0], sizes = [8, 148], strides = [1, 1]} : vector<8x150xf32> to vector<8x148xf32>
    %42 = vector.extract_strided_slice %40 {offsets = [0, 1], sizes = [8, 148], strides = [1, 1]} : vector<8x150xf32> to vector<8x148xf32>
    %43 = vector.extract_strided_slice %40 {offsets = [0, 2], sizes = [8, 148], strides = [1, 1]} : vector<8x150xf32> to vector<8x148xf32>
    %44 = tpu.concatenate %41, %42, %43 in 0 : vector<8x148xf32>, vector<8x148xf32>, vector<8x148xf32> -> vector<24x148xf32>
    %c0_14 = arith.constant 0 : index
    %c0_15 = arith.constant 0 : index
    %45 = vector.load %arg6[%c0_14, %c0_15] : memref<8x24xbf16, #tpu.memory_space<vmem>>, vector<8x24xbf16>
    %46 = arith.truncf %44 : vector<24x148xf32> to vector<24x148xbf16>
    %cst_16 = arith.constant dense<0.000000e+00> : vector<8x148xf32>
    %47 = tpu.matmul %45, %46, %cst_16 {dimension_numbers = #tpu.dot_dimension_numbers<[1], [0], [0], [1], [0, 0, 1, 1], [], []>} : vector<8x24xbf16>, vector<24x148xbf16>, vector<8x148xf32> -> vector<8x148xf32>
    %c0_17 = arith.constant 0 : index
    %c0_18 = arith.constant 0 : index
    %48 = vector.load %arg7[%c0_17, %c0_18] : memref<8x1xf32, #tpu.memory_space<vmem>>, vector<8x1xf32>
    %49 = vector.broadcast %48 : vector<8x1xf32> to vector<8x148xf32>
    %50 = arith.addf %47, %49 : vector<8x148xf32>
    %51 = vector.extract_strided_slice %6 {offsets = [0, 2], sizes = [8, 148], strides = [1, 1]} : vector<8x152xf32> to vector<8x148xf32>
    %52 = arith.addf %50, %51 : vector<8x148xf32>
    %c2_i32 = arith.constant 2 : i32
    %53 = arith.addi %7, %c2_i32 : i32
    %54 = tpu.iota {dimensions = array<i32: 1>} : vector<1x148xi32>
    %55 = vector.broadcast %53 : i32 to vector<1x148xi32>
    %56 = arith.addi %55, %54 : vector<1x148xi32>
    %c0_i32_19 = arith.constant 0 : i32
    %57 = vector.broadcast %c0_i32_19 : i32 to vector<1x148xi32>
    %58 = arith.cmpi sge, %56, %57 : vector<1x148xi32>
    %c32_i32_20 = arith.constant 32 : i32
    %59 = vector.broadcast %c32_i32_20 : i32 to vector<1x148xi32>
    %60 = arith.cmpi slt, %56, %59 : vector<1x148xi32>
    %61 = arith.andi %58, %60 : vector<1x148xi1>
    %cst_21 = arith.constant 0.000000e+00 : f32
    %62 = vector.shape_cast %61 : vector<1x148xi1> to vector<1x148xi1>
    %63 = vector.broadcast %62 : vector<1x148xi1> to vector<8x148xi1>
    %64 = vector.broadcast %cst_21 : f32 to vector<8x148xf32>
    %65 = arith.select %63, %52, %64 : vector<8x148xi1>, vector<8x148xf32>
    %cst_22 = arith.constant 0.000000e+00 : f32
    %66 = vector.broadcast %cst_22 : f32 to vector<8x148xf32>
    %67 = arith.cmpf oge, %65, %66 : vector<8x148xf32>
    %cst_23 = arith.constant 1.000000e-01 : f32
    %68 = vector.broadcast %cst_23 : f32 to vector<8x148xf32>
    %69 = arith.mulf %65, %68 : vector<8x148xf32>
    %70 = arith.select %67, %65, %69 : vector<8x148xi1>, vector<8x148xf32>
    %71 = vector.extract_strided_slice %70 {offsets = [0, 0], sizes = [8, 142], strides = [1, 1]} : vector<8x148xf32> to vector<8x142xf32>
    %72 = vector.extract_strided_slice %70 {offsets = [0, 3], sizes = [8, 142], strides = [1, 1]} : vector<8x148xf32> to vector<8x142xf32>
    %73 = vector.extract_strided_slice %70 {offsets = [0, 6], sizes = [8, 142], strides = [1, 1]} : vector<8x148xf32> to vector<8x142xf32>
    %74 = tpu.concatenate %71, %72, %73 in 0 : vector<8x142xf32>, vector<8x142xf32>, vector<8x142xf32> -> vector<24x142xf32>
    %c0_24 = arith.constant 0 : index
    %c0_25 = arith.constant 0 : index
    %75 = vector.load %arg8[%c0_24, %c0_25] : memref<8x24xbf16, #tpu.memory_space<vmem>>, vector<8x24xbf16>
    %76 = arith.truncf %74 : vector<24x142xf32> to vector<24x142xbf16>
    %cst_26 = arith.constant dense<0.000000e+00> : vector<8x142xf32>
    %77 = tpu.matmul %75, %76, %cst_26 {dimension_numbers = #tpu.dot_dimension_numbers<[1], [0], [0], [1], [0, 0, 1, 1], [], []>} : vector<8x24xbf16>, vector<24x142xbf16>, vector<8x142xf32> -> vector<8x142xf32>
    %c0_27 = arith.constant 0 : index
    %c0_28 = arith.constant 0 : index
    %78 = vector.load %arg9[%c0_27, %c0_28] : memref<8x1xf32, #tpu.memory_space<vmem>>, vector<8x1xf32>
    %79 = vector.broadcast %78 : vector<8x1xf32> to vector<8x142xf32>
    %80 = arith.addf %77, %79 : vector<8x142xf32>
    %c3_i32 = arith.constant 3 : i32
    %81 = arith.addi %53, %c3_i32 : i32
    %82 = tpu.iota {dimensions = array<i32: 1>} : vector<1x142xi32>
    %83 = vector.broadcast %81 : i32 to vector<1x142xi32>
    %84 = arith.addi %83, %82 : vector<1x142xi32>
    %c0_i32_29 = arith.constant 0 : i32
    %85 = vector.broadcast %c0_i32_29 : i32 to vector<1x142xi32>
    %86 = arith.cmpi sge, %84, %85 : vector<1x142xi32>
    %c32_i32_30 = arith.constant 32 : i32
    %87 = vector.broadcast %c32_i32_30 : i32 to vector<1x142xi32>
    %88 = arith.cmpi slt, %84, %87 : vector<1x142xi32>
    %89 = arith.andi %86, %88 : vector<1x142xi1>
    %cst_31 = arith.constant 0.000000e+00 : f32
    %90 = vector.shape_cast %89 : vector<1x142xi1> to vector<1x142xi1>
    %91 = vector.broadcast %90 : vector<1x142xi1> to vector<8x142xi1>
    %92 = vector.broadcast %cst_31 : f32 to vector<8x142xf32>
    %93 = arith.select %91, %80, %92 : vector<8x142xi1>, vector<8x142xf32>
    %cst_32 = arith.constant 0.000000e+00 : f32
    %94 = vector.broadcast %cst_32 : f32 to vector<8x142xf32>
    %95 = arith.cmpf oge, %93, %94 : vector<8x142xf32>
    %cst_33 = arith.constant 1.000000e-01 : f32
    %96 = vector.broadcast %cst_33 : f32 to vector<8x142xf32>
    %97 = arith.mulf %93, %96 : vector<8x142xf32>
    %98 = arith.select %95, %93, %97 : vector<8x142xi1>, vector<8x142xf32>
    %99 = vector.extract_strided_slice %98 {offsets = [0, 0], sizes = [8, 140], strides = [1, 1]} : vector<8x142xf32> to vector<8x140xf32>
    %100 = vector.extract_strided_slice %98 {offsets = [0, 1], sizes = [8, 140], strides = [1, 1]} : vector<8x142xf32> to vector<8x140xf32>
    %101 = vector.extract_strided_slice %98 {offsets = [0, 2], sizes = [8, 140], strides = [1, 1]} : vector<8x142xf32> to vector<8x140xf32>
    %102 = tpu.concatenate %99, %100, %101 in 0 : vector<8x140xf32>, vector<8x140xf32>, vector<8x140xf32> -> vector<24x140xf32>
    %c0_34 = arith.constant 0 : index
    %c0_35 = arith.constant 0 : index
    %103 = vector.load %arg10[%c0_34, %c0_35] : memref<8x24xbf16, #tpu.memory_space<vmem>>, vector<8x24xbf16>
    %104 = arith.truncf %102 : vector<24x140xf32> to vector<24x140xbf16>
    %cst_36 = arith.constant dense<0.000000e+00> : vector<8x140xf32>
    %105 = tpu.matmul %103, %104, %cst_36 {dimension_numbers = #tpu.dot_dimension_numbers<[1], [0], [0], [1], [0, 0, 1, 1], [], []>} : vector<8x24xbf16>, vector<24x140xbf16>, vector<8x140xf32> -> vector<8x140xf32>
    %c0_37 = arith.constant 0 : index
    %c0_38 = arith.constant 0 : index
    %106 = vector.load %arg11[%c0_37, %c0_38] : memref<8x1xf32, #tpu.memory_space<vmem>>, vector<8x1xf32>
    %107 = vector.broadcast %106 : vector<8x1xf32> to vector<8x140xf32>
    %108 = arith.addf %105, %107 : vector<8x140xf32>
    %109 = vector.extract_strided_slice %65 {offsets = [0, 4], sizes = [8, 140], strides = [1, 1]} : vector<8x148xf32> to vector<8x140xf32>
    %110 = arith.addf %108, %109 : vector<8x140xf32>
    %c4_i32 = arith.constant 4 : i32
    %111 = arith.addi %53, %c4_i32 : i32
    %112 = tpu.iota {dimensions = array<i32: 1>} : vector<1x140xi32>
    %113 = vector.broadcast %111 : i32 to vector<1x140xi32>
    %114 = arith.addi %113, %112 : vector<1x140xi32>
    %c0_i32_39 = arith.constant 0 : i32
    %115 = vector.broadcast %c0_i32_39 : i32 to vector<1x140xi32>
    %116 = arith.cmpi sge, %114, %115 : vector<1x140xi32>
    %c32_i32_40 = arith.constant 32 : i32
    %117 = vector.broadcast %c32_i32_40 : i32 to vector<1x140xi32>
    %118 = arith.cmpi slt, %114, %117 : vector<1x140xi32>
    %119 = arith.andi %116, %118 : vector<1x140xi1>
    %cst_41 = arith.constant 0.000000e+00 : f32
    %120 = vector.shape_cast %119 : vector<1x140xi1> to vector<1x140xi1>
    %121 = vector.broadcast %120 : vector<1x140xi1> to vector<8x140xi1>
    %122 = vector.broadcast %cst_41 : f32 to vector<8x140xf32>
    %123 = arith.select %121, %110, %122 : vector<8x140xi1>, vector<8x140xf32>
    %cst_42 = arith.constant 0.000000e+00 : f32
    %124 = vector.broadcast %cst_42 : f32 to vector<8x140xf32>
    %125 = arith.cmpf oge, %123, %124 : vector<8x140xf32>
    %cst_43 = arith.constant 1.000000e-01 : f32
    %126 = vector.broadcast %cst_43 : f32 to vector<8x140xf32>
    %127 = arith.mulf %123, %126 : vector<8x140xf32>
    %128 = arith.select %125, %123, %127 : vector<8x140xi1>, vector<8x140xf32>
    %129 = vector.extract_strided_slice %128 {offsets = [0, 0], sizes = [8, 130], strides = [1, 1]} : vector<8x140xf32> to vector<8x130xf32>
    %130 = vector.extract_strided_slice %128 {offsets = [0, 5], sizes = [8, 130], strides = [1, 1]} : vector<8x140xf32> to vector<8x130xf32>
    %131 = vector.extract_strided_slice %128 {offsets = [0, 10], sizes = [8, 130], strides = [1, 1]} : vector<8x140xf32> to vector<8x130xf32>
    %132 = tpu.concatenate %129, %130, %131 in 0 : vector<8x130xf32>, vector<8x130xf32>, vector<8x130xf32> -> vector<24x130xf32>
    %c0_44 = arith.constant 0 : index
    %c0_45 = arith.constant 0 : index
    %133 = vector.load %arg12[%c0_44, %c0_45] : memref<8x24xbf16, #tpu.memory_space<vmem>>, vector<8x24xbf16>
    %134 = arith.truncf %132 : vector<24x130xf32> to vector<24x130xbf16>
    %cst_46 = arith.constant dense<0.000000e+00> : vector<8x130xf32>
    %135 = tpu.matmul %133, %134, %cst_46 {dimension_numbers = #tpu.dot_dimension_numbers<[1], [0], [0], [1], [0, 0, 1, 1], [], []>} : vector<8x24xbf16>, vector<24x130xbf16>, vector<8x130xf32> -> vector<8x130xf32>
    %c0_47 = arith.constant 0 : index
    %c0_48 = arith.constant 0 : index
    %136 = vector.load %arg13[%c0_47, %c0_48] : memref<8x1xf32, #tpu.memory_space<vmem>>, vector<8x1xf32>
    %137 = vector.broadcast %136 : vector<8x1xf32> to vector<8x130xf32>
    %138 = arith.addf %135, %137 : vector<8x130xf32>
    %c5_i32 = arith.constant 5 : i32
    %139 = arith.addi %111, %c5_i32 : i32
    %140 = tpu.iota {dimensions = array<i32: 1>} : vector<1x130xi32>
    %141 = vector.broadcast %139 : i32 to vector<1x130xi32>
    %142 = arith.addi %141, %140 : vector<1x130xi32>
    %c0_i32_49 = arith.constant 0 : i32
    %143 = vector.broadcast %c0_i32_49 : i32 to vector<1x130xi32>
    %144 = arith.cmpi sge, %142, %143 : vector<1x130xi32>
    %c32_i32_50 = arith.constant 32 : i32
    %145 = vector.broadcast %c32_i32_50 : i32 to vector<1x130xi32>
    %146 = arith.cmpi slt, %142, %145 : vector<1x130xi32>
    %147 = arith.andi %144, %146 : vector<1x130xi1>
    %cst_51 = arith.constant 0.000000e+00 : f32
    %148 = vector.shape_cast %147 : vector<1x130xi1> to vector<1x130xi1>
    %149 = vector.broadcast %148 : vector<1x130xi1> to vector<8x130xi1>
    %150 = vector.broadcast %cst_51 : f32 to vector<8x130xf32>
    %151 = arith.select %149, %138, %150 : vector<8x130xi1>, vector<8x130xf32>
    %cst_52 = arith.constant 0.000000e+00 : f32
    %152 = vector.broadcast %cst_52 : f32 to vector<8x130xf32>
    %153 = arith.cmpf oge, %151, %152 : vector<8x130xf32>
    %cst_53 = arith.constant 1.000000e-01 : f32
    %154 = vector.broadcast %cst_53 : f32 to vector<8x130xf32>
    %155 = arith.mulf %151, %154 : vector<8x130xf32>
    %156 = arith.select %153, %151, %155 : vector<8x130xi1>, vector<8x130xf32>
    %157 = vector.extract_strided_slice %156 {offsets = [0, 0], sizes = [8, 128], strides = [1, 1]} : vector<8x130xf32> to vector<8x128xf32>
    %158 = vector.extract_strided_slice %156 {offsets = [0, 1], sizes = [8, 128], strides = [1, 1]} : vector<8x130xf32> to vector<8x128xf32>
    %159 = vector.extract_strided_slice %156 {offsets = [0, 2], sizes = [8, 128], strides = [1, 1]} : vector<8x130xf32> to vector<8x128xf32>
    %160 = tpu.concatenate %157, %158, %159 in 0 : vector<8x128xf32>, vector<8x128xf32>, vector<8x128xf32> -> vector<24x128xf32>
    %c0_54 = arith.constant 0 : index
    %c0_55 = arith.constant 0 : index
    %161 = vector.load %arg14[%c0_54, %c0_55] : memref<8x24xbf16, #tpu.memory_space<vmem>>, vector<8x24xbf16>
    %162 = arith.truncf %160 : vector<24x128xf32> to vector<24x128xbf16>
    %cst_56 = arith.constant dense<0.000000e+00> : vector<8x128xf32>
    %163 = tpu.matmul %161, %162, %cst_56 {dimension_numbers = #tpu.dot_dimension_numbers<[1], [0], [0], [1], [0, 0, 1, 1], [], []>} : vector<8x24xbf16>, vector<24x128xbf16>, vector<8x128xf32> -> vector<8x128xf32>
    %c0_57 = arith.constant 0 : index
    %c0_58 = arith.constant 0 : index
    %164 = vector.load %arg15[%c0_57, %c0_58] : memref<8x1xf32, #tpu.memory_space<vmem>>, vector<8x1xf32>
    %165 = vector.broadcast %164 : vector<8x1xf32> to vector<8x128xf32>
    %166 = arith.addf %163, %165 : vector<8x128xf32>
    %167 = vector.extract_strided_slice %123 {offsets = [0, 6], sizes = [8, 128], strides = [1, 1]} : vector<8x140xf32> to vector<8x128xf32>
    %168 = arith.addf %166, %167 : vector<8x128xf32>
    %c6_i32 = arith.constant 6 : i32
    %169 = arith.addi %111, %c6_i32 : i32
    %170 = tpu.iota {dimensions = array<i32: 1>} : vector<1x128xi32>
    %171 = vector.broadcast %169 : i32 to vector<1x128xi32>
    %172 = arith.addi %171, %170 : vector<1x128xi32>
    %c0_i32_59 = arith.constant 0 : i32
    %173 = vector.broadcast %c0_i32_59 : i32 to vector<1x128xi32>
    %174 = arith.cmpi sge, %172, %173 : vector<1x128xi32>
    %c32_i32_60 = arith.constant 32 : i32
    %175 = vector.broadcast %c32_i32_60 : i32 to vector<1x128xi32>
    %176 = arith.cmpi slt, %172, %175 : vector<1x128xi32>
    %177 = arith.andi %174, %176 : vector<1x128xi1>
    %cst_61 = arith.constant 0.000000e+00 : f32
    %178 = vector.shape_cast %177 : vector<1x128xi1> to vector<1x128xi1>
    %179 = vector.broadcast %178 : vector<1x128xi1> to vector<8x128xi1>
    %180 = vector.broadcast %cst_61 : f32 to vector<8x128xf32>
    %181 = arith.select %179, %168, %180 : vector<8x128xi1>, vector<8x128xf32>
    %182 = vector.extract_strided_slice %4 {offsets = [0, 0], sizes = [8, 176], strides = [1, 1]} : vector<8x256xf32> to vector<8x176xf32>
    %c24_i32 = arith.constant 24 : i32
    %183 = arith.subi %5, %c24_i32 : i32
    %cst_62 = arith.constant 0.000000e+00 : f32
    %184 = vector.broadcast %cst_62 : f32 to vector<8x176xf32>
    %185 = arith.cmpf oge, %182, %184 : vector<8x176xf32>
    %cst_63 = arith.constant 1.000000e-01 : f32
    %186 = vector.broadcast %cst_63 : f32 to vector<8x176xf32>
    %187 = arith.mulf %182, %186 : vector<8x176xf32>
    %188 = arith.select %185, %182, %187 : vector<8x176xi1>, vector<8x176xf32>
    %189 = vector.extract_strided_slice %188 {offsets = [0, 0], sizes = [8, 172], strides = [1, 1]} : vector<8x176xf32> to vector<8x172xf32>
    %190 = vector.extract_strided_slice %188 {offsets = [0, 1], sizes = [8, 172], strides = [1, 1]} : vector<8x176xf32> to vector<8x172xf32>
    %191 = vector.extract_strided_slice %188 {offsets = [0, 2], sizes = [8, 172], strides = [1, 1]} : vector<8x176xf32> to vector<8x172xf32>
    %192 = vector.extract_strided_slice %188 {offsets = [0, 3], sizes = [8, 172], strides = [1, 1]} : vector<8x176xf32> to vector<8x172xf32>
    %193 = vector.extract_strided_slice %188 {offsets = [0, 4], sizes = [8, 172], strides = [1, 1]} : vector<8x176xf32> to vector<8x172xf32>
    %194 = tpu.concatenate %189, %190, %191, %192, %193 in 0 : vector<8x172xf32>, vector<8x172xf32>, vector<8x172xf32>, vector<8x172xf32>, vector<8x172xf32> -> vector<40x172xf32>
    %c0_64 = arith.constant 0 : index
    %c0_65 = arith.constant 0 : index
    %195 = vector.load %arg16[%c0_64, %c0_65] : memref<8x40xbf16, #tpu.memory_space<vmem>>, vector<8x40xbf16>
    %196 = arith.truncf %194 : vector<40x172xf32> to vector<40x172xbf16>
    %cst_66 = arith.constant dense<0.000000e+00> : vector<8x172xf32>
    %197 = tpu.matmul %195, %196, %cst_66 {dimension_numbers = #tpu.dot_dimension_numbers<[1], [0], [0], [1], [0, 0, 1, 1], [], []>} : vector<8x40xbf16>, vector<40x172xbf16>, vector<8x172xf32> -> vector<8x172xf32>
    %c0_67 = arith.constant 0 : index
    %c0_68 = arith.constant 0 : index
    %198 = vector.load %arg17[%c0_67, %c0_68] : memref<8x1xf32, #tpu.memory_space<vmem>>, vector<8x1xf32>
    %199 = vector.broadcast %198 : vector<8x1xf32> to vector<8x172xf32>
    %200 = arith.addf %197, %199 : vector<8x172xf32>
    %c2_i32_69 = arith.constant 2 : i32
    %201 = arith.addi %183, %c2_i32_69 : i32
    %202 = tpu.iota {dimensions = array<i32: 1>} : vector<1x172xi32>
    %203 = vector.broadcast %201 : i32 to vector<1x172xi32>
    %204 = arith.addi %203, %202 : vector<1x172xi32>
    %c0_i32_70 = arith.constant 0 : i32
    %205 = vector.broadcast %c0_i32_70 : i32 to vector<1x172xi32>
    %206 = arith.cmpi sge, %204, %205 : vector<1x172xi32>
    %c32_i32_71 = arith.constant 32 : i32
    %207 = vector.broadcast %c32_i32_71 : i32 to vector<1x172xi32>
    %208 = arith.cmpi slt, %204, %207 : vector<1x172xi32>
    %209 = arith.andi %206, %208 : vector<1x172xi1>
    %cst_72 = arith.constant 0.000000e+00 : f32
    %210 = vector.shape_cast %209 : vector<1x172xi1> to vector<1x172xi1>
    %211 = vector.broadcast %210 : vector<1x172xi1> to vector<8x172xi1>
    %212 = vector.broadcast %cst_72 : f32 to vector<8x172xf32>
    %213 = arith.select %211, %200, %212 : vector<8x172xi1>, vector<8x172xf32>
    %cst_73 = arith.constant 0.000000e+00 : f32
    %214 = vector.broadcast %cst_73 : f32 to vector<8x172xf32>
    %215 = arith.cmpf oge, %213, %214 : vector<8x172xf32>
    %cst_74 = arith.constant 1.000000e-01 : f32
    %216 = vector.broadcast %cst_74 : f32 to vector<8x172xf32>
    %217 = arith.mulf %213, %216 : vector<8x172xf32>
    %218 = arith.select %215, %213, %217 : vector<8x172xi1>, vector<8x172xf32>
    %219 = vector.extract_strided_slice %218 {offsets = [0, 0], sizes = [8, 168], strides = [1, 1]} : vector<8x172xf32> to vector<8x168xf32>
    %220 = vector.extract_strided_slice %218 {offsets = [0, 1], sizes = [8, 168], strides = [1, 1]} : vector<8x172xf32> to vector<8x168xf32>
    %221 = vector.extract_strided_slice %218 {offsets = [0, 2], sizes = [8, 168], strides = [1, 1]} : vector<8x172xf32> to vector<8x168xf32>
    %222 = vector.extract_strided_slice %218 {offsets = [0, 3], sizes = [8, 168], strides = [1, 1]} : vector<8x172xf32> to vector<8x168xf32>
    %223 = vector.extract_strided_slice %218 {offsets = [0, 4], sizes = [8, 168], strides = [1, 1]} : vector<8x172xf32> to vector<8x168xf32>
    %224 = tpu.concatenate %219, %220, %221, %222, %223 in 0 : vector<8x168xf32>, vector<8x168xf32>, vector<8x168xf32>, vector<8x168xf32>, vector<8x168xf32> -> vector<40x168xf32>
    %c0_75 = arith.constant 0 : index
    %c0_76 = arith.constant 0 : index
    %225 = vector.load %arg18[%c0_75, %c0_76] : memref<8x40xbf16, #tpu.memory_space<vmem>>, vector<8x40xbf16>
    %226 = arith.truncf %224 : vector<40x168xf32> to vector<40x168xbf16>
    %cst_77 = arith.constant dense<0.000000e+00> : vector<8x168xf32>
    %227 = tpu.matmul %225, %226, %cst_77 {dimension_numbers = #tpu.dot_dimension_numbers<[1], [0], [0], [1], [0, 0, 1, 1], [], []>} : vector<8x40xbf16>, vector<40x168xbf16>, vector<8x168xf32> -> vector<8x168xf32>
    %c0_78 = arith.constant 0 : index
    %c0_79 = arith.constant 0 : index
    %228 = vector.load %arg19[%c0_78, %c0_79] : memref<8x1xf32, #tpu.memory_space<vmem>>, vector<8x1xf32>
    %229 = vector.broadcast %228 : vector<8x1xf32> to vector<8x168xf32>
    %230 = arith.addf %227, %229 : vector<8x168xf32>
    %231 = vector.extract_strided_slice %182 {offsets = [0, 4], sizes = [8, 168], strides = [1, 1]} : vector<8x176xf32> to vector<8x168xf32>
    %232 = arith.addf %230, %231 : vector<8x168xf32>
    %c4_i32_80 = arith.constant 4 : i32
    %233 = arith.addi %183, %c4_i32_80 : i32
    %234 = tpu.iota {dimensions = array<i32: 1>} : vector<1x168xi32>
    %235 = vector.broadcast %233 : i32 to vector<1x168xi32>
    %236 = arith.addi %235, %234 : vector<1x168xi32>
    %c0_i32_81 = arith.constant 0 : i32
    %237 = vector.broadcast %c0_i32_81 : i32 to vector<1x168xi32>
    %238 = arith.cmpi sge, %236, %237 : vector<1x168xi32>
    %c32_i32_82 = arith.constant 32 : i32
    %239 = vector.broadcast %c32_i32_82 : i32 to vector<1x168xi32>
    %240 = arith.cmpi slt, %236, %239 : vector<1x168xi32>
    %241 = arith.andi %238, %240 : vector<1x168xi1>
    %cst_83 = arith.constant 0.000000e+00 : f32
    %242 = vector.shape_cast %241 : vector<1x168xi1> to vector<1x168xi1>
    %243 = vector.broadcast %242 : vector<1x168xi1> to vector<8x168xi1>
    %244 = vector.broadcast %cst_83 : f32 to vector<8x168xf32>
    %245 = arith.select %243, %232, %244 : vector<8x168xi1>, vector<8x168xf32>
    %cst_84 = arith.constant 0.000000e+00 : f32
    %246 = vector.broadcast %cst_84 : f32 to vector<8x168xf32>
    %247 = arith.cmpf oge, %245, %246 : vector<8x168xf32>
    %cst_85 = arith.constant 1.000000e-01 : f32
    %248 = vector.broadcast %cst_85 : f32 to vector<8x168xf32>
    %249 = arith.mulf %245, %248 : vector<8x168xf32>
    %250 = arith.select %247, %245, %249 : vector<8x168xi1>, vector<8x168xf32>
    %251 = vector.extract_strided_slice %250 {offsets = [0, 0], sizes = [8, 156], strides = [1, 1]} : vector<8x168xf32> to vector<8x156xf32>
    %252 = vector.extract_strided_slice %250 {offsets = [0, 3], sizes = [8, 156], strides = [1, 1]} : vector<8x168xf32> to vector<8x156xf32>
    %253 = vector.extract_strided_slice %250 {offsets = [0, 6], sizes = [8, 156], strides = [1, 1]} : vector<8x168xf32> to vector<8x156xf32>
    %254 = vector.extract_strided_slice %250 {offsets = [0, 9], sizes = [8, 156], strides = [1, 1]} : vector<8x168xf32> to vector<8x156xf32>
    %255 = vector.extract_strided_slice %250 {offsets = [0, 12], sizes = [8, 156], strides = [1, 1]} : vector<8x168xf32> to vector<8x156xf32>
    %256 = tpu.concatenate %251, %252, %253, %254, %255 in 0 : vector<8x156xf32>, vector<8x156xf32>, vector<8x156xf32>, vector<8x156xf32>, vector<8x156xf32> -> vector<40x156xf32>
    %c0_86 = arith.constant 0 : index
    %c0_87 = arith.constant 0 : index
    %257 = vector.load %arg20[%c0_86, %c0_87] : memref<8x40xbf16, #tpu.memory_space<vmem>>, vector<8x40xbf16>
    %258 = arith.truncf %256 : vector<40x156xf32> to vector<40x156xbf16>
    %cst_88 = arith.constant dense<0.000000e+00> : vector<8x156xf32>
    %259 = tpu.matmul %257, %258, %cst_88 {dimension_numbers = #tpu.dot_dimension_numbers<[1], [0], [0], [1], [0, 0, 1, 1], [], []>} : vector<8x40xbf16>, vector<40x156xbf16>, vector<8x156xf32> -> vector<8x156xf32>
    %c0_89 = arith.constant 0 : index
    %c0_90 = arith.constant 0 : index
    %260 = vector.load %arg21[%c0_89, %c0_90] : memref<8x1xf32, #tpu.memory_space<vmem>>, vector<8x1xf32>
    %261 = vector.broadcast %260 : vector<8x1xf32> to vector<8x156xf32>
    %262 = arith.addf %259, %261 : vector<8x156xf32>
    %c6_i32_91 = arith.constant 6 : i32
    %263 = arith.addi %233, %c6_i32_91 : i32
    %264 = tpu.iota {dimensions = array<i32: 1>} : vector<1x156xi32>
    %265 = vector.broadcast %263 : i32 to vector<1x156xi32>
    %266 = arith.addi %265, %264 : vector<1x156xi32>
    %c0_i32_92 = arith.constant 0 : i32
    %267 = vector.broadcast %c0_i32_92 : i32 to vector<1x156xi32>
    %268 = arith.cmpi sge, %266, %267 : vector<1x156xi32>
    %c32_i32_93 = arith.constant 32 : i32
    %269 = vector.broadcast %c32_i32_93 : i32 to vector<1x156xi32>
    %270 = arith.cmpi slt, %266, %269 : vector<1x156xi32>
    %271 = arith.andi %268, %270 : vector<1x156xi1>
    %cst_94 = arith.constant 0.000000e+00 : f32
    %272 = vector.shape_cast %271 : vector<1x156xi1> to vector<1x156xi1>
    %273 = vector.broadcast %272 : vector<1x156xi1> to vector<8x156xi1>
    %274 = vector.broadcast %cst_94 : f32 to vector<8x156xf32>
    %275 = arith.select %273, %262, %274 : vector<8x156xi1>, vector<8x156xf32>
    %cst_95 = arith.constant 0.000000e+00 : f32
    %276 = vector.broadcast %cst_95 : f32 to vector<8x156xf32>
    %277 = arith.cmpf oge, %275, %276 : vector<8x156xf32>
    %cst_96 = arith.constant 1.000000e-01 : f32
    %278 = vector.broadcast %cst_96 : f32 to vector<8x156xf32>
    %279 = arith.mulf %275, %278 : vector<8x156xf32>
    %280 = arith.select %277, %275, %279 : vector<8x156xi1>, vector<8x156xf32>
    %281 = vector.extract_strided_slice %280 {offsets = [0, 0], sizes = [8, 152], strides = [1, 1]} : vector<8x156xf32> to vector<8x152xf32>
    %282 = vector.extract_strided_slice %280 {offsets = [0, 1], sizes = [8, 152], strides = [1, 1]} : vector<8x156xf32> to vector<8x152xf32>
    %283 = vector.extract_strided_slice %280 {offsets = [0, 2], sizes = [8, 152], strides = [1, 1]} : vector<8x156xf32> to vector<8x152xf32>
    %284 = vector.extract_strided_slice %280 {offsets = [0, 3], sizes = [8, 152], strides = [1, 1]} : vector<8x156xf32> to vector<8x152xf32>
    %285 = vector.extract_strided_slice %280 {offsets = [0, 4], sizes = [8, 152], strides = [1, 1]} : vector<8x156xf32> to vector<8x152xf32>
    %286 = tpu.concatenate %281, %282, %283, %284, %285 in 0 : vector<8x152xf32>, vector<8x152xf32>, vector<8x152xf32>, vector<8x152xf32>, vector<8x152xf32> -> vector<40x152xf32>
    %c0_97 = arith.constant 0 : index
    %c0_98 = arith.constant 0 : index
    %287 = vector.load %arg22[%c0_97, %c0_98] : memref<8x40xbf16, #tpu.memory_space<vmem>>, vector<8x40xbf16>
    %288 = arith.truncf %286 : vector<40x152xf32> to vector<40x152xbf16>
    %cst_99 = arith.constant dense<0.000000e+00> : vector<8x152xf32>
    %289 = tpu.matmul %287, %288, %cst_99 {dimension_numbers = #tpu.dot_dimension_numbers<[1], [0], [0], [1], [0, 0, 1, 1], [], []>} : vector<8x40xbf16>, vector<40x152xbf16>, vector<8x152xf32> -> vector<8x152xf32>
    %c0_100 = arith.constant 0 : index
    %c0_101 = arith.constant 0 : index
    %290 = vector.load %arg23[%c0_100, %c0_101] : memref<8x1xf32, #tpu.memory_space<vmem>>, vector<8x1xf32>
    %291 = vector.broadcast %290 : vector<8x1xf32> to vector<8x152xf32>
    %292 = arith.addf %289, %291 : vector<8x152xf32>
    %293 = vector.extract_strided_slice %245 {offsets = [0, 8], sizes = [8, 152], strides = [1, 1]} : vector<8x168xf32> to vector<8x152xf32>
    %294 = arith.addf %292, %293 : vector<8x152xf32>
    %c8_i32 = arith.constant 8 : i32
    %295 = arith.addi %233, %c8_i32 : i32
    %296 = tpu.iota {dimensions = array<i32: 1>} : vector<1x152xi32>
    %297 = vector.broadcast %295 : i32 to vector<1x152xi32>
    %298 = arith.addi %297, %296 : vector<1x152xi32>
    %c0_i32_102 = arith.constant 0 : i32
    %299 = vector.broadcast %c0_i32_102 : i32 to vector<1x152xi32>
    %300 = arith.cmpi sge, %298, %299 : vector<1x152xi32>
    %c32_i32_103 = arith.constant 32 : i32
    %301 = vector.broadcast %c32_i32_103 : i32 to vector<1x152xi32>
    %302 = arith.cmpi slt, %298, %301 : vector<1x152xi32>
    %303 = arith.andi %300, %302 : vector<1x152xi1>
    %cst_104 = arith.constant 0.000000e+00 : f32
    %304 = vector.shape_cast %303 : vector<1x152xi1> to vector<1x152xi1>
    %305 = vector.broadcast %304 : vector<1x152xi1> to vector<8x152xi1>
    %306 = vector.broadcast %cst_104 : f32 to vector<8x152xf32>
    %307 = arith.select %305, %294, %306 : vector<8x152xi1>, vector<8x152xf32>
    %cst_105 = arith.constant 0.000000e+00 : f32
    %308 = vector.broadcast %cst_105 : f32 to vector<8x152xf32>
    %309 = arith.cmpf oge, %307, %308 : vector<8x152xf32>
    %cst_106 = arith.constant 1.000000e-01 : f32
    %310 = vector.broadcast %cst_106 : f32 to vector<8x152xf32>
    %311 = arith.mulf %307, %310 : vector<8x152xf32>
    %312 = arith.select %309, %307, %311 : vector<8x152xi1>, vector<8x152xf32>
    %313 = vector.extract_strided_slice %312 {offsets = [0, 0], sizes = [8, 132], strides = [1, 1]} : vector<8x152xf32> to vector<8x132xf32>
    %314 = vector.extract_strided_slice %312 {offsets = [0, 5], sizes = [8, 132], strides = [1, 1]} : vector<8x152xf32> to vector<8x132xf32>
    %315 = vector.extract_strided_slice %312 {offsets = [0, 10], sizes = [8, 132], strides = [1, 1]} : vector<8x152xf32> to vector<8x132xf32>
    %316 = vector.extract_strided_slice %312 {offsets = [0, 15], sizes = [8, 132], strides = [1, 1]} : vector<8x152xf32> to vector<8x132xf32>
    %317 = vector.extract_strided_slice %312 {offsets = [0, 20], sizes = [8, 132], strides = [1, 1]} : vector<8x152xf32> to vector<8x132xf32>
    %318 = tpu.concatenate %313, %314, %315, %316, %317 in 0 : vector<8x132xf32>, vector<8x132xf32>, vector<8x132xf32>, vector<8x132xf32>, vector<8x132xf32> -> vector<40x132xf32>
    %c0_107 = arith.constant 0 : index
    %c0_108 = arith.constant 0 : index
    %319 = vector.load %arg24[%c0_107, %c0_108] : memref<8x40xbf16, #tpu.memory_space<vmem>>, vector<8x40xbf16>
    %320 = arith.truncf %318 : vector<40x132xf32> to vector<40x132xbf16>
    %cst_109 = arith.constant dense<0.000000e+00> : vector<8x132xf32>
    %321 = tpu.matmul %319, %320, %cst_109 {dimension_numbers = #tpu.dot_dimension_numbers<[1], [0], [0], [1], [0, 0, 1, 1], [], []>} : vector<8x40xbf16>, vector<40x132xbf16>, vector<8x132xf32> -> vector<8x132xf32>
    %c0_110 = arith.constant 0 : index
    %c0_111 = arith.constant 0 : index
    %322 = vector.load %arg25[%c0_110, %c0_111] : memref<8x1xf32, #tpu.memory_space<vmem>>, vector<8x1xf32>
    %323 = vector.broadcast %322 : vector<8x1xf32> to vector<8x132xf32>
    %324 = arith.addf %321, %323 : vector<8x132xf32>
    %c10_i32 = arith.constant 10 : i32
    %325 = arith.addi %295, %c10_i32 : i32
    %326 = tpu.iota {dimensions = array<i32: 1>} : vector<1x132xi32>
    %327 = vector.broadcast %325 : i32 to vector<1x132xi32>
    %328 = arith.addi %327, %326 : vector<1x132xi32>
    %c0_i32_112 = arith.constant 0 : i32
    %329 = vector.broadcast %c0_i32_112 : i32 to vector<1x132xi32>
    %330 = arith.cmpi sge, %328, %329 : vector<1x132xi32>
    %c32_i32_113 = arith.constant 32 : i32
    %331 = vector.broadcast %c32_i32_113 : i32 to vector<1x132xi32>
    %332 = arith.cmpi slt, %328, %331 : vector<1x132xi32>
    %333 = arith.andi %330, %332 : vector<1x132xi1>
    %cst_114 = arith.constant 0.000000e+00 : f32
    %334 = vector.shape_cast %333 : vector<1x132xi1> to vector<1x132xi1>
    %335 = vector.broadcast %334 : vector<1x132xi1> to vector<8x132xi1>
    %336 = vector.broadcast %cst_114 : f32 to vector<8x132xf32>
    %337 = arith.select %335, %324, %336 : vector<8x132xi1>, vector<8x132xf32>
    %cst_115 = arith.constant 0.000000e+00 : f32
    %338 = vector.broadcast %cst_115 : f32 to vector<8x132xf32>
    %339 = arith.cmpf oge, %337, %338 : vector<8x132xf32>
    %cst_116 = arith.constant 1.000000e-01 : f32
    %340 = vector.broadcast %cst_116 : f32 to vector<8x132xf32>
    %341 = arith.mulf %337, %340 : vector<8x132xf32>
    %342 = arith.select %339, %337, %341 : vector<8x132xi1>, vector<8x132xf32>
    %343 = vector.extract_strided_slice %342 {offsets = [0, 0], sizes = [8, 128], strides = [1, 1]} : vector<8x132xf32> to vector<8x128xf32>
    %344 = vector.extract_strided_slice %342 {offsets = [0, 1], sizes = [8, 128], strides = [1, 1]} : vector<8x132xf32> to vector<8x128xf32>
    %345 = vector.extract_strided_slice %342 {offsets = [0, 2], sizes = [8, 128], strides = [1, 1]} : vector<8x132xf32> to vector<8x128xf32>
    %346 = vector.extract_strided_slice %342 {offsets = [0, 3], sizes = [8, 128], strides = [1, 1]} : vector<8x132xf32> to vector<8x128xf32>
    %347 = vector.extract_strided_slice %342 {offsets = [0, 4], sizes = [8, 128], strides = [1, 1]} : vector<8x132xf32> to vector<8x128xf32>
    %348 = tpu.concatenate %343, %344, %345, %346, %347 in 0 : vector<8x128xf32>, vector<8x128xf32>, vector<8x128xf32>, vector<8x128xf32>, vector<8x128xf32> -> vector<40x128xf32>
    %c0_117 = arith.constant 0 : index
    %c0_118 = arith.constant 0 : index
    %349 = vector.load %arg26[%c0_117, %c0_118] : memref<8x40xbf16, #tpu.memory_space<vmem>>, vector<8x40xbf16>
    %350 = arith.truncf %348 : vector<40x128xf32> to vector<40x128xbf16>
    %cst_119 = arith.constant dense<0.000000e+00> : vector<8x128xf32>
    %351 = tpu.matmul %349, %350, %cst_119 {dimension_numbers = #tpu.dot_dimension_numbers<[1], [0], [0], [1], [0, 0, 1, 1], [], []>} : vector<8x40xbf16>, vector<40x128xbf16>, vector<8x128xf32> -> vector<8x128xf32>
    %c0_120 = arith.constant 0 : index
    %c0_121 = arith.constant 0 : index
    %352 = vector.load %arg27[%c0_120, %c0_121] : memref<8x1xf32, #tpu.memory_space<vmem>>, vector<8x1xf32>
    %353 = vector.broadcast %352 : vector<8x1xf32> to vector<8x128xf32>
    %354 = arith.addf %351, %353 : vector<8x128xf32>
    %355 = vector.extract_strided_slice %307 {offsets = [0, 12], sizes = [8, 128], strides = [1, 1]} : vector<8x152xf32> to vector<8x128xf32>
    %356 = arith.addf %354, %355 : vector<8x128xf32>
    %c12_i32_122 = arith.constant 12 : i32
    %357 = arith.addi %295, %c12_i32_122 : i32
    %358 = tpu.iota {dimensions = array<i32: 1>} : vector<1x128xi32>
    %359 = vector.broadcast %357 : i32 to vector<1x128xi32>
    %360 = arith.addi %359, %358 : vector<1x128xi32>
    %c0_i32_123 = arith.constant 0 : i32
    %361 = vector.broadcast %c0_i32_123 : i32 to vector<1x128xi32>
    %362 = arith.cmpi sge, %360, %361 : vector<1x128xi32>
    %c32_i32_124 = arith.constant 32 : i32
    %363 = vector.broadcast %c32_i32_124 : i32 to vector<1x128xi32>
    %364 = arith.cmpi slt, %360, %363 : vector<1x128xi32>
    %365 = arith.andi %362, %364 : vector<1x128xi1>
    %cst_125 = arith.constant 0.000000e+00 : f32
    %366 = vector.shape_cast %365 : vector<1x128xi1> to vector<1x128xi1>
    %367 = vector.broadcast %366 : vector<1x128xi1> to vector<8x128xi1>
    %368 = vector.broadcast %cst_125 : f32 to vector<8x128xf32>
    %369 = arith.select %367, %356, %368 : vector<8x128xi1>, vector<8x128xf32>
    %370 = arith.addf %181, %369 : vector<8x128xf32>
    %cst_126 = arith.constant 5.000000e-01 : f32
    %371 = vector.broadcast %cst_126 : f32 to vector<8x128xf32>
    %372 = arith.mulf %370, %371 : vector<8x128xf32>
    %c0_127 = arith.constant 0 : index
    %c0_128 = arith.constant 0 : index
    %c0_129 = arith.constant 0 : index
    %373 = vector.load %arg28[%c0_127, %c0_128, %c0_129] : memref<1x8x128xf32, #tpu.memory_space<vmem>>, vector<1x8x128xf32>
    %374 = vector.shape_cast %373 : vector<1x8x128xf32> to vector<8x128xf32>
    %375 = vector.shape_cast %372 : vector<8x128xf32> to vector<1x8x128xf32>
    tpu.vector_store %arg28[%c0_127, %c0_128, %c0_129], %375 {strides = array<i32>} : memref<1x8x128xf32, #tpu.memory_space<vmem>>, vector<1x8x128xf32>,
    return
  }
  func.func @transform_0(%arg0: i32, %arg1: i32) -> (i32, i32, i32) {
    %c0_i32 = arith.constant 0 : i32
    %c0_i32_0 = arith.constant 0 : i32
    return %arg1, %c0_i32, %arg0 : i32, i32, i32
  }
  func.func @transform_1(%arg0: i32, %arg1: i32) -> (i32, i32, i32) {
    %c1_i32 = arith.constant 1 : i32
    %0 = arith.addi %arg0, %c1_i32 : i32
    %c1_i32_0 = arith.constant 1 : i32
    %1 = arith.muli %0, %c1_i32_0 : i32
    %c0_i32 = arith.constant 0 : i32
    %c0_i32_1 = arith.constant 0 : i32
    return %arg1, %c0_i32, %1 : i32, i32, i32
  }
  func.func @transform_2(%arg0: i32, %arg1: i32) -> (i32, i32) {
    %c0_i32 = arith.constant 0 : i32
    %c0_i32_0 = arith.constant 0 : i32
    %c0_i32_1 = arith.constant 0 : i32
    return %c0_i32, %c0_i32_0 : i32, i32
  }
  func.func @transform_3(%arg0: i32, %arg1: i32) -> (i32, i32) {
    %c0_i32 = arith.constant 0 : i32
    %c0_i32_0 = arith.constant 0 : i32
    %c0_i32_1 = arith.constant 0 : i32
    return %c0_i32, %c0_i32_0 : i32, i32
  }
  func.func @transform_4(%arg0: i32, %arg1: i32) -> (i32, i32) {
    %c0_i32 = arith.constant 0 : i32
    %c0_i32_0 = arith.constant 0 : i32
    %c0_i32_1 = arith.constant 0 : i32
    return %c0_i32, %c0_i32_0 : i32, i32
  }
  func.func @transform_5(%arg0: i32, %arg1: i32) -> (i32, i32) {
    %c0_i32 = arith.constant 0 : i32
    %c0_i32_0 = arith.constant 0 : i32
    %c0_i32_1 = arith.constant 0 : i32
    return %c0_i32, %c0_i32_0 : i32, i32
  }
  func.func @transform_6(%arg0: i32, %arg1: i32) -> (i32, i32) {
    %c0_i32 = arith.constant 0 : i32
    %c0_i32_0 = arith.constant 0 : i32
    %c0_i32_1 = arith.constant 0 : i32
    return %c0_i32, %c0_i32_0 : i32, i32
  }
  func.func @transform_7(%arg0: i32, %arg1: i32) -> (i32, i32) {
    %c0_i32 = arith.constant 0 : i32
    %c0_i32_0 = arith.constant 0 : i32
    %c0_i32_1 = arith.constant 0 : i32
    return %c0_i32, %c0_i32_0 : i32, i32
  }
  func.func @transform_8(%arg0: i32, %arg1: i32) -> (i32, i32) {
    %c0_i32 = arith.constant 0 : i32
    %c0_i32_0 = arith.constant 0 : i32
    %c0_i32_1 = arith.constant 0 : i32
    return %c0_i32, %c0_i32_0 : i32, i32
  }
  func.func @transform_9(%arg0: i32, %arg1: i32) -> (i32, i32) {
    %c0_i32 = arith.constant 0 : i32
    %c0_i32_0 = arith.constant 0 : i32
    %c0_i32_1 = arith.constant 0 : i32
    return %c0_i32, %c0_i32_0 : i32, i32
  }
  func.func @transform_10(%arg0: i32, %arg1: i32) -> (i32, i32) {
    %c0_i32 = arith.constant 0 : i32
    %c0_i32_0 = arith.constant 0 : i32
    %c0_i32_1 = arith.constant 0 : i32
    return %c0_i32, %c0_i32_0 : i32, i32
  }
  func.func @transform_11(%arg0: i32, %arg1: i32) -> (i32, i32) {
    %c0_i32 = arith.constant 0 : i32
    %c0_i32_0 = arith.constant 0 : i32
    %c0_i32_1 = arith.constant 0 : i32
    return %c0_i32, %c0_i32_0 : i32, i32
  }
  func.func @transform_12(%arg0: i32, %arg1: i32) -> (i32, i32) {
    %c0_i32 = arith.constant 0 : i32
    %c0_i32_0 = arith.constant 0 : i32
    %c0_i32_1 = arith.constant 0 : i32
    return %c0_i32, %c0_i32_0 : i32, i32
  }
  func.func @transform_13(%arg0: i32, %arg1: i32) -> (i32, i32) {
    %c0_i32 = arith.constant 0 : i32
    %c0_i32_0 = arith.constant 0 : i32
    %c0_i32_1 = arith.constant 0 : i32
    return %c0_i32, %c0_i32_0 : i32, i32
  }
  func.func @transform_14(%arg0: i32, %arg1: i32) -> (i32, i32) {
    %c0_i32 = arith.constant 0 : i32
    %c0_i32_0 = arith.constant 0 : i32
    %c0_i32_1 = arith.constant 0 : i32
    return %c0_i32, %c0_i32_0 : i32, i32
  }
  func.func @transform_15(%arg0: i32, %arg1: i32) -> (i32, i32) {
    %c0_i32 = arith.constant 0 : i32
    %c0_i32_0 = arith.constant 0 : i32
    %c0_i32_1 = arith.constant 0 : i32
    return %c0_i32, %c0_i32_0 : i32, i32
  }
  func.func @transform_16(%arg0: i32, %arg1: i32) -> (i32, i32) {
    %c0_i32 = arith.constant 0 : i32
    %c0_i32_0 = arith.constant 0 : i32
    %c0_i32_1 = arith.constant 0 : i32
    return %c0_i32, %c0_i32_0 : i32, i32
  }
  func.func @transform_17(%arg0: i32, %arg1: i32) -> (i32, i32) {
    %c0_i32 = arith.constant 0 : i32
    %c0_i32_0 = arith.constant 0 : i32
    %c0_i32_1 = arith.constant 0 : i32
    return %c0_i32, %c0_i32_0 : i32, i32
  }
  func.func @transform_18(%arg0: i32, %arg1: i32) -> (i32, i32) {
    %c0_i32 = arith.constant 0 : i32
    %c0_i32_0 = arith.constant 0 : i32
    %c0_i32_1 = arith.constant 0 : i32
    return %c0_i32, %c0_i32_0 : i32, i32
  }
  func.func @transform_19(%arg0: i32, %arg1: i32) -> (i32, i32) {
    %c0_i32 = arith.constant 0 : i32
    %c0_i32_0 = arith.constant 0 : i32
    %c0_i32_1 = arith.constant 0 : i32
    return %c0_i32, %c0_i32_0 : i32, i32
  }
  func.func @transform_20(%arg0: i32, %arg1: i32) -> (i32, i32) {
    %c0_i32 = arith.constant 0 : i32
    %c0_i32_0 = arith.constant 0 : i32
    %c0_i32_1 = arith.constant 0 : i32
    return %c0_i32, %c0_i32_0 : i32, i32
  }
  func.func @transform_21(%arg0: i32, %arg1: i32) -> (i32, i32) {
    %c0_i32 = arith.constant 0 : i32
    %c0_i32_0 = arith.constant 0 : i32
    %c0_i32_1 = arith.constant 0 : i32
    return %c0_i32, %c0_i32_0 : i32, i32
  }
  func.func @transform_22(%arg0: i32, %arg1: i32) -> (i32, i32) {
    %c0_i32 = arith.constant 0 : i32
    %c0_i32_0 = arith.constant 0 : i32
    %c0_i32_1 = arith.constant 0 : i32
    return %c0_i32, %c0_i32_0 : i32, i32
  }
  func.func @transform_23(%arg0: i32, %arg1: i32) -> (i32, i32) {
    %c0_i32 = arith.constant 0 : i32
    %c0_i32_0 = arith.constant 0 : i32
    %c0_i32_1 = arith.constant 0 : i32
    return %c0_i32, %c0_i32_0 : i32, i32
  }
  func.func @transform_24(%arg0: i32, %arg1: i32) -> (i32, i32) {
    %c0_i32 = arith.constant 0 : i32
    %c0_i32_0 = arith.constant 0 : i32
    %c0_i32_1 = arith.constant 0 : i32
    return %c0_i32, %c0_i32_0 : i32, i32
  }
  func.func @transform_25(%arg0: i32, %arg1: i32) -> (i32, i32) {
    %c0_i32 = arith.constant 0 : i32
    %c0_i32_0 = arith.constant 0 : i32
    %c0_i32_1 = arith.constant 0 : i32
    return %c0_i32, %c0_i32_0 : i32, i32
  }
  func.func @transform_26(%arg0: i32, %arg1: i32) -> (i32, i32, i32) {
    %c0_i32 = arith.constant 0 : i32
    %c0_i32_0 = arith.constant 0 : i32
    return %arg1, %c0_i32, %arg0 : i32, i32, i32
  }
}

</mosaic_0001>

<bundles_post_ra>
// kernel: hifigan_forward.7
= control target key start
LH: loop header
LB: loop body
LE: loop exit
PB: predicated region body
PF: predicated region fallthrough
CT: control target
= control target key end

     0   :  { %s799_s15 = smov 0   ;;  %s801_s16 = smov 0   ;;  %s913_s0 = inlined_call_operand.vmem [shape: f32[2,32,256], index: 0, kind: input, shape index: {}, may-alias: {0,1}]   ;;  %s914_s1 = inlined_call_operand.vmem [shape: f32[2,32,256], index: 1, kind: input, shape index: {}, may-alias: {0,1}]   ;;  %s915_s2 = inlined_call_operand.vmem [shape: bf16[2,16,64], index: 2, kind: input, shape index: {}]   ;;  %s916_s3 = inlined_call_operand.vmem [shape: f32[16,1], index: 3, kind: input, shape index: {}]   ;;  %s917_s4 = inlined_call_operand.vmem [shape: f32[2,2,16,128], index: 4, kind: output, shape index: {}]  }
   0x1   :  { %s803_s17 = smov 0   ;;  %s805_s18 = smov 0  }
   0x2   :  { %s807_s19 = smov 0  }
   0x3 LB: > { %s23_s20 = sadd.s32 1, %s766_s18  ;;  %p42_p1 = scmp.ne.s32.totalorder %s758_s16, %s754_s15  ;;  %s770_s19 = sphi %s807_s19, %s14_s19   ;;  %s766_s18 = sphi %s805_s18, %s922_s18   ;;  %s762_s17 = sphi %s803_s17, %s921_s17   ;;  %s758_s16 = sphi %s801_s16, %s920_s16   ;;  %s754_s15 = sphi %s799_s15, %s919_s15  }
   0x4   : > { %p24_p0 = scmp.ge.s32.totalorder %s23_s20, 2  ;;  %p43_p2 = scmp.eq.s32.totalorder %s770_s19, 0 }
   0x5   : > { %s35_s23 = sadd.s32 1, %s758_s16  ;;  %p631_p5 = scmp.ge.s32.totalorder %s770_s19, 2 }
   0x6   : > { %s924_s20 = smov (%p24_p0, %s23_s20), 0  ;;  %p830_p3 = por %p43_p2, %p42_p1 }
   0x7   : > { %s30_s22 = ssub.s32 %s766_s18, %s924_s20  ;;  %174 = sbr.rel (%p631_p5) target bundleno = 28 (0x1c), region = 24 }
   0x8   : > { %p33_p4 = scmp.eq.s32.totalorder %s30_s22, 0 }
   0xa   : > { %s838_s24 = scalar_select %p33_p4, %s758_s16, %s35_s23  }
   0xc   : > { %177 = sbr.rel (!%p830_p3) target bundleno = 20 (0x14), region = 28  ;;  %s179_s25 = sand.u32 (%p830_p3), 1, %s758_s16  }
   0xd   : > { %s663_s26 = sshll.u32 (%p830_p3), %s766_s18, 6  ;;  %s632_s27 = sshll.u32 (%p830_p3), %s179_s25, 5 }
   0xe   : > { %s185_s30 = scalar_lea.vmem (%p830_p3), %s913_s0, %s663_s26  ;;  %s181_s5 = scalar_lea.vmem (%p830_p3), [#allocation2], %s632_s27 }
   0xf   : > { %v220_v0 = vld [vmem:[%s185_s30] sm:$0xff] (%p830_p3)  ;;  %v222_v1 = vld [vmem:[%s185_s30 + $0x10] sm:$0xff] (%p830_p3) }
  0x10   : > { %v224_v2 = vld [vmem:[%s185_s30 + $0x20] sm:$0xff] (%p830_p3)  ;;  %221 = vst [vmem:[%s181_s5] sm:$0xff] (%p830_p3), %v220_v0  ;;  %v226_v3 = vld [vmem:[%s185_s30 + $0x30] sm:$0xff] (%p830_p3) }
  0x11   : > { %223 = vst [vmem:[%s181_s5 + $0x8] sm:$0xff] %v222_v1 }
  0x12   : > { %225 = vst [vmem:[%s181_s5 + $0x10] sm:$0xff] %v224_v2 }
  0x13   : > { %227 = vst [vmem:[%s181_s5 + $0x18] sm:$0xff] %v226_v3 }
  0x14 PF: > { %233 = sbr.rel (!%p830_p3) target bundleno = 28 (0x1c), region = 66  ;;  %s235_s6 = sand.u32 (%p830_p3), 1, %s758_s16  }
  0x15   : > { %s664_s7 = sshll.u32 (%p830_p3), %s766_s18, 6  ;;  %s635_s8 = sshll.u32 (%p830_p3), %s235_s6, 5 }
  0x16   : > { %s560_s11 = scalar_lea.vmem (%p830_p3), %s914_s1, %s664_s7  ;;  %s237_s12 = scalar_lea.vmem (%p830_p3), [#allocation3], %s635_s8 }
  0x17   : > { %v638_v4 = vld [vmem:[%s560_s11 + $0x8] sm:$0xff] (%p830_p3)  ;;  %v639_v5 = vld [vmem:[%s560_s11 + $0x18] sm:$0xff] (%p830_p3) }
  0x18   : > { %v640_v6 = vld [vmem:[%s560_s11 + $0x28] sm:$0xff] (%p830_p3)  ;;  %278 = vst [vmem:[%s237_s12] sm:$0xff] (%p830_p3), %v638_v4  ;;  %v641_v7 = vld [vmem:[%s560_s11 + $0x38] sm:$0xff] (%p830_p3) }
  0x19   : > { %280 = vst [vmem:[%s237_s12 + $0x8] sm:$0xff] %v639_v5 }
  0x1a   : > { %282 = vst [vmem:[%s237_s12 + $0x10] sm:$0xff] %v640_v6 }
  0x1b   : > { %284 = vst [vmem:[%s237_s12 + $0x18] sm:$0xff] %v641_v7 }
  0x1c PF: > { %p642_p6 = scmp.ge.s32.totalorder %s770_s19, 1  ;;  %p289_p7 = scmp.lt.s32.totalorder %s770_s19, 3 }
  0x1e   : > { %p290_p8 = pnand %p642_p6, %p289_p7 }
  0x1f   : > { %s296_s13 = sand.u32 (!%p290_p8), 1, %s754_s15   ;;  %s772_s15 = smov (!%p290_p8), 127  }
  0x20   : > { %293 = sbr.rel (%p290_p8) target bundleno = 444 (0x1bc), region = 104  ;;  %s643_s14 = sshll.u32 (!%p290_p8), %s296_s13, 5 }
  0x21   : > { %s298_s21 = scalar_lea.vmem (!%p290_p8), [#allocation2], %s643_s14  ;;  %s305_s22 = scalar_lea.vmem (!%p290_p8), [#allocation3], %s643_s14 }
  0x22   : > { %p336_p9 = scmp.lt.s32.totalorder (!%p290_p8), %s762_s17, 1 }
  0x25   : > { %v347_v8 = vld [vmem:[%s298_s21 + $0x10] sm:$0xff]  ;;  %v348_v9 = vld [vmem:[%s298_s21 + $0x18] sm:$0xff]  ;;  %v345_v15 = vld [vmem:[%s298_s21] sm:$0xff]  ;;  %vm403_vm8 = vcmask 1039360   ;;  %vm433_vm9 = vcmask 523264   ;;  %v773_v2 = vmov 0  }
  0x26   : > { %v351_v10 = vld [vmem:[%s305_s22 + $0x10] sm:$0xff]  ;;  %v352_v11 = vld [vmem:[%s305_s22 + $0x18] sm:$0xff]  ;;  %vm357_vm0 = vcmp.ge.f32.partialorder %v347_v8, 0.0  ;;  %vm359_vm2 = vcmp.ge.f32.partialorder %v348_v9, 0.0  ;;  %v365_v12 = vmul.f32 0.1, %v347_v8  ;;  %731 = vset.pattern.permute.xlu1 %v773_v2  ;;  %730 = vset.pattern.permute.xlu0 %v773_v2 }
  0x27   : > { %vm358_vm1 = vcmp.ge.f32.partialorder %v351_v10, 0.0  ;;  %vm360_vm3 = vcmp.ge.f32.partialorder %v352_v11, 0.0  ;;  %v366_v13 = vmul.f32 0.1, %v351_v10  ;;  %v367_v14 = vmul.f32 0.1, %v348_v9 }
  0x28   : > { %v368_v16 = vmul.f32 0.1, %v352_v11  ;;  %v373_v17 = vsel %vm357_vm0, %v347_v8, %v365_v12  ;;  %v346_v18 = vld [vmem:[%s298_s21 + $0x8] sm:$0xff]  ;;  %v349_v19 = vld [vmem:[%s305_s22] sm:$0xff]  ;;  %vm353_vm4 = vcmp.ge.f32.partialorder %v345_v15, 0.0  ;;  %s926_s17 = smov (!%p336_p9, %s762_s17), 1 }
  0x29   : > { %v350_v20 = vld [vmem:[%s305_s22 + $0x8] sm:$0xff]  ;;  %v374_v21 = vsel %vm358_vm1, %v351_v10, %v366_v13  ;;  %v375_v22 = vsel %vm359_vm2, %v348_v9, %v367_v14  ;;  %vm354_vm5 = vcmp.ge.f32.partialorder %v349_v19, 0.0  ;;  %vm355_vm6 = vcmp.ge.f32.partialorder %v346_v18, 0.0  ;;  %v666_v61 = vld [vmem:[%s915_s2] sm:$0xff]  ;;  %s665_s6 = sshll.u32 %s926_s17, 5 }
  0x2a   : > { %v376_v23 = vsel %vm360_vm3, %v352_v11, %v368_v16  ;;  %v710_v24 = vpack.i.bf16 %v374_v21, %v373_v17  ;;  %v415_v25 = vpack.c.bf16 %v375_v22, %v373_v17  ;;  %vm356_vm7 = vcmp.ge.f32.partialorder %v350_v20, 0.0  ;;  %v377_v0 = vld [vmem:[%s916_s3] sm:$0xff]  ;;  %v378_v1 = vld [vmem:[%s916_s3 + $0x8] sm:$0xff]  ;;  %s343_s9 = scalar_lea.vmem %s917_s4, %s665_s6 }
  0x2b   : > { %v461_v26 = vpack.c.bf16 %v376_v23, %v374_v21  ;;  %v361_v27 = vmul.f32 0.1, %v345_v15  ;;  %v362_v28 = vmul.f32 0.1, %v349_v19  ;;  %v363_v29 = vmul.f32 0.1, %v346_v18 }
  0x2c   : > { %711 = vrot.lane.b32.xlu0 %v710_v24, %s772_s15  ;;  %v364_v30 = vmul.f32 0.1, %v350_v20  ;;  %v715_v38 = vpack.i.bf16 %v376_v23, %v375_v22  ;;  %v667_v12 = vld [vmem:[%s915_s2 + $0x8] sm:$0xff] }
  0x2d   : > { %v369_v31 = vsel %vm353_vm4, %v345_v15, %v361_v27  ;;  %v370_v32 = vsel %vm354_vm5, %v349_v19, %v362_v28  ;;  %v371_v33 = vsel %vm355_vm6, %v346_v18, %v363_v29 }
  0x2e   : > { %v372_v34 = vsel %vm356_vm7, %v350_v20, %v364_v30  ;;  %v720_v35 = vpack.i.bf16 %v370_v32, %v369_v31  ;;  %v414_v36 = vpack.c.bf16 %v371_v33, %v369_v31 }
  0x2f   : > { %v460_v37 = vpack.c.bf16 %v372_v34, %v370_v32  ;;  %v725_v39 = vpack.i.bf16 %v372_v34, %v371_v33 }
  0x30   : > { %721 = vrot.lane.b32.xlu1 %v720_v35, %s772_s15 }
  0x34   : > { %716 = vrot.lane.b32.xlu0 %v715_v38, %s772_s15 }
  0x38   : > { %726 = vrot.lane.b32.xlu1 %v725_v39, %s772_s15 }
  0x9e   : > { %v712_v40 = vpop.permute.xlu0 %711 }
  0x9f   : > { %v714_v42 = vunpack.i.h.bf16 %v712_v40  ;;  %v713_v43 = vunpack.i.l.bf16 %v712_v40 }
  0xa1   : > { %v406_v47 = vsel %vm403_vm8, %v713_v43, %v714_v42 }
  0xa2   : > { %v722_v41 = vpop.permute.xlu1 %721 }
  0xa3   : > { %v724_v48 = vunpack.i.h.bf16 %v722_v41  ;;  %v723_v49 = vunpack.i.l.bf16 %v722_v41 }
  0xa5   : > { %v404_v57 = vsel %vm403_vm8, %v723_v49, %v724_v48 }
  0xa6   : > { %v717_v44 = vpop.permute.xlu0 %716 }
  0xa7   : > { %v719_v45 = vunpack.i.h.bf16 %v717_v44  ;;  %v718_v46 = vunpack.i.l.bf16 %v717_v44 }
  0xa9   : > { %v463_v50 = vpack.c.bf16 %v719_v45, %v714_v42  ;;  %v407_v51 = vsel %vm403_vm8, %v718_v46, %v719_v45 }
  0xaa   : > { %v727_v52 = vpop.permute.xlu1 %726  ;;  %v417_v53 = vpack.c.bf16 %v407_v51, %v406_v47 }
  0xab   : > { %v729_v54 = vunpack.i.h.bf16 %v727_v52  ;;  %v728_v55 = vunpack.i.l.bf16 %v727_v52  ;;  %491 = vrot.lane.b32.xlu2 %v463_v50, %s772_s15 }
  0xac   : > { %441 = vmatpush.bf16.msra.mxu0 %v417_v53 }
  0xad   : > { %v462_v56 = vpack.c.bf16 %v729_v54, %v724_v48  ;;  %v405_v58 = vsel %vm403_vm8, %v728_v55, %v729_v54 }
  0xae   : > { %v416_v59 = vpack.c.bf16 %v405_v58, %v404_v57 }
  0xaf   : > { %487 = vrot.lane.b32.xlu1 %v462_v56, %s772_s15 }
  0xb0   : > { %485 = vrot.lane.b32.xlu0 %v416_v59, %s772_s15  ;;  %442 = vmatpush.bf16.msra.mxu0 %v416_v59 }
  0xb3   : > { %489 = vrot.lane.b32.xlu2 %v417_v53, %s772_s15 }
  0xb4   : > { %443 = vmatpush.bf16.msra.mxu0 %v415_v25 }
  0xb7   : > { %477 = vrot.lane.b32.xlu1 %v414_v36, %s772_s15 }
  0xb8   : > { %483 = vrot.lane.b32.xlu0 %v461_v26, %s772_s15  ;;  %444 = vmatpush.bf16.msra.mxu0 %v414_v36 }
  0xbb   : > { %481 = vrot.lane.b32.xlu2 %v415_v25, %s772_s15  ;;  %651 = vmatmul.msk.bf16.vlgmr.msra.gmra.mxu0 %vm433_vm9, %v666_v61 }
  0xbf   : > { %425 = vperm.xlu1 %731, %v378_v1  }
  0xc0   : > { %420 = vperm.xlu0 %730, %v377_v0  }
  0xc3   : > { %479 = vrot.lane.b32.xlu2 %v460_v37, %s772_s15 }
 0x105   : > { %v492_v60 = vpop.permute.xlu2 %491 }
 0x10d   : > { %v490_v62 = vpop.permute.xlu2 %489 }
 0x10e   : > { %v497_v63 = vsel %vm403_vm8, %v490_v62, %v492_v60 }
 0x10f   : > { %509 = vmatpush.bf16.msra.mxu1 %v497_v63 }
 0x115   : > { %v482_v3 = vpop.permute.xlu2 %481 }
 0x11d   : > { %v480_v7 = vpop.permute.xlu2 %479 }
 0x121   : > { %v488_v4 = vpop.permute.xlu1 %487 }
 0x122   : > { %v486_v5 = vpop.permute.xlu0 %485 }
 0x123   : > { %v496_v6 = vsel %vm403_vm8, %v486_v5, %v488_v4 }
 0x124   : > { %510 = vmatpush.bf16.msra.mxu1 %v496_v6 }
 0x129   : > { %v478_v9 = vpop.permute.xlu1 %477 }
 0x12a   : > { %v484_v8 = vpop.permute.xlu0 %483  ;;  %v494_v11 = vsel %vm403_vm8, %v478_v9, %v480_v7 }
 0x12b   : > { %v495_v10 = vsel %vm403_vm8, %v482_v3, %v484_v8 }
 0x12c   : > { %511 = vmatpush.bf16.msra.mxu1 %v495_v10 }
 0x130   : > { %512 = vmatpush.bf16.msra.mxu1 %v494_v11 }
 0x131   : > { %v426_v16 = vpop.permute.xlu1 %425 }
 0x132   : > { %v421_v13 = vpop.permute.xlu0 %420 }
 0x133   : > { %658 = vmatmul.msk.bf16.vlgmr.msra.gmra.mxu1 %vm433_vm9, %v667_v12 }
 0x138   : > { %v446_v14 = vpop.f32.mrf.mxu0 }
 0x139   : > { %v447_v15 = vadd.f32 %v446_v14, %v421_v13 }
 0x13b   : > { %451 = vst [vmem:[%s343_s9] sm:$0xff] %v447_v15 }
 0x140   : > { %v448_v17 = vpop.f32.mrf.mxu0 }
 0x141   : > { %v449_v18 = vadd.f32 %v448_v17, %v426_v16 }
 0x143   : > { %452 = vst [vmem:[%s343_s9 + $0x8] sm:$0xff] %v449_v18 }
 0x1b0   : > { %v514_v19 = vpop.f32.mrf.mxu1 }
 0x1b1   : > { %v515_v20 = vadd.f32 %v514_v19, %v421_v13 }
 0x1b3   : > { %659 = vst [vmem:[%s343_s9 + $0x10] sm:$0xff] %v515_v20 }
 0x1b8   : > { %v516_v21 = vpop.f32.mrf.mxu1 }
 0x1b9   : > { %v517_v22 = vadd.f32 %v516_v21, %v426_v16 }
 0x1bb   : > { %660 = vst [vmem:[%s343_s9 + $0x18] sm:$0xff] %v517_v22 }
 0x1bc PF: > { %s14_s19 = sadd.s32 1, %s770_s19   ;;  %s919_s15 = smov %s758_s16 }
 0x1bd   : > { %p11_p10 = scmp.ge.s32.totalorder %s14_s19, 4   ;;  %s920_s16 = smov %s838_s24 }
 0x1be   : > { %s921_s17 = smov %s766_s18  ;;  %s922_s18 = smov %s924_s20 }
 0x1bf   :  { %13 = sbr.rel (!%p11_p10) target bundleno = 3 (0x3), region = 157 }

// kernel: hifigan_forward.6
= control target key start
LH: loop header
LB: loop body
LE: loop exit
PB: predicated region body
PF: predicated region fallthrough
CT: control target
= control target key end

     0   :  { %s1635_s15 = smov 0   ;;  %s1637_s16 = smov 0   ;;  %s2115_s0 = inlined_call_operand.vmem [shape: f32[2,80,256], index: 0, kind: input, shape index: {}, may-alias: {0,1}]   ;;  %s2116_s1 = inlined_call_operand.vmem [shape: f32[2,80,256], index: 1, kind: input, shape index: {}, may-alias: {0,1}]   ;;  %s2117_s2 = inlined_call_operand.vmem [shape: bf16[32,560], index: 2, kind: input, shape index: {}]   ;;  %s2118_s3 = inlined_call_operand.vmem [shape: f32[32,1], index: 3, kind: input, shape index: {}]   ;;  %s2119_s4 = inlined_call_operand.vmem [shape: f32[2,32,128], index: 4, kind: output, shape index: {}]  }
   0x1   :  { %s1639_s17 = smov 0   ;;  %s1641_s18 = smov 0  }
   0x2   :  { %s1643_s19 = smov 0  }
   0x3 LB: > { %s23_s20 = sadd.s32 1, %s1597_s18  ;;  %p42_p1 = scmp.ne.s32.totalorder %s1589_s16, %s1585_s15  ;;  %s1601_s19 = sphi %s1643_s19, %s14_s19   ;;  %s1597_s18 = sphi %s1641_s18, %s2124_s18   ;;  %s1593_s17 = sphi %s1639_s17, %s2123_s17   ;;  %s1589_s16 = sphi %s1637_s16, %s2122_s16   ;;  %s1585_s15 = sphi %s1635_s15, %s2121_s15  }
   0x4   : > { %p24_p0 = scmp.ge.s32.totalorder %s23_s20, 2  ;;  %p43_p2 = scmp.eq.s32.totalorder %s1601_s19, 0 }
   0x5   : > { %s35_s23 = sadd.s32 1, %s1589_s16  ;;  %p1135_p5 = scmp.ge.s32.totalorder %s1601_s19, 2 }
   0x6   : > { %s2126_s20 = smov (%p24_p0, %s23_s20), 0  ;;  %p1666_p3 = por %p43_p2, %p42_p1 }
   0x7   : > { %s30_s22 = ssub.s32 %s1597_s18, %s2126_s20  ;;  %174 = sbr.rel (%p1135_p5) target bundleno = 42 (0x2a), region = 24 }
   0x8   : > { %p33_p4 = scmp.eq.s32.totalorder %s30_s22, 0 }
   0xa   : > { %s1674_s24 = scalar_select %p33_p4, %s1589_s16, %s35_s23  }
   0xc   : > { %177 = sbr.rel (!%p1666_p3) target bundleno = 27 (0x1b), region = 28  ;;  %s179_s25 = sand.u32 (%p1666_p3), 1, %s1589_s16  }
   0xd   : > { %s1210_s26 = smul.u32 (%p1666_p3), 160, %s1597_s18 }
   0xe   : > { %s1209_s27 = smul.u32 (%p1666_p3), 80, %s179_s25 }
   0xf   : > { %s185_s30 = scalar_lea.vmem (%p1666_p3), %s2115_s0, %s1210_s26 }
  0x10   : > { %v232_v0 = vld [vmem:[%s185_s30] sm:$0xff] (%p1666_p3)  ;;  %v234_v1 = vld [vmem:[%s185_s30 + $0x10] sm:$0xff] (%p1666_p3)  ;;  %s181_s5 = scalar_lea.vmem (%p1666_p3), [#allocation2], %s1209_s27 }
  0x11   : > { %v236_v2 = vld [vmem:[%s185_s30 + $0x20] sm:$0xff]  ;;  %233 = vst [vmem:[%s181_s5] sm:$0xff] %v232_v0  ;;  %v238_v3 = vld [vmem:[%s185_s30 + $0x30] sm:$0xff] }
  0x12   : > { %235 = vst [vmem:[%s181_s5 + $0x8] sm:$0xff] %v234_v1  ;;  %v240_v4 = vld [vmem:[%s185_s30 + $0x40] sm:$0xff]  ;;  %v242_v5 = vld [vmem:[%s185_s30 + $0x50] sm:$0xff] }
  0x13   : > { %237 = vst [vmem:[%s181_s5 + $0x10] sm:$0xff] %v236_v2  ;;  %v244_v6 = vld [vmem:[%s185_s30 + $0x60] sm:$0xff]  ;;  %v246_v7 = vld [vmem:[%s185_s30 + $0x70] sm:$0xff] }
  0x14   : > { %239 = vst [vmem:[%s181_s5 + $0x18] sm:$0xff] %v238_v3  ;;  %v248_v8 = vld [vmem:[%s185_s30 + $0x80] sm:$0xff]  ;;  %v250_v9 = vld [vmem:[%s185_s30 + $0x90] sm:$0xff] }
  0x15   : > { %241 = vst [vmem:[%s181_s5 + $0x20] sm:$0xff] %v240_v4 }
  0x16   : > { %243 = vst [vmem:[%s181_s5 + $0x28] sm:$0xff] %v242_v5 }
  0x17   : > { %245 = vst [vmem:[%s181_s5 + $0x30] sm:$0xff] %v244_v6 }
  0x18   : > { %247 = vst [vmem:[%s181_s5 + $0x38] sm:$0xff] %v246_v7 }
  0x19   : > { %249 = vst [vmem:[%s181_s5 + $0x40] sm:$0xff] %v248_v8 }
  0x1a   : > { %251 = vst [vmem:[%s181_s5 + $0x48] sm:$0xff] %v250_v9 }
  0x1b PF: > { %257 = sbr.rel (!%p1666_p3) target bundleno = 42 (0x2a), region = 66  ;;  %s259_s6 = sand.u32 (%p1666_p3), 1, %s1589_s16  }
  0x1c   : > { %s1137_s7 = smul.u32 (%p1666_p3), 160, %s1597_s18 }
  0x1d   : > { %s1211_s8 = smul.u32 (%p1666_p3), 80, %s259_s6 }
  0x1e   : > { %s1064_s11 = scalar_lea.vmem (%p1666_p3), %s2116_s1, %s1137_s7 }
  0x1f   : > { %v1138_v10 = vld [vmem:[%s1064_s11 + $0x8] sm:$0xff] (%p1666_p3)  ;;  %v1139_v11 = vld [vmem:[%s1064_s11 + $0x18] sm:$0xff] (%p1666_p3)  ;;  %s261_s12 = scalar_lea.vmem (%p1666_p3), [#allocation3], %s1211_s8 }
  0x20   : > { %v1140_v12 = vld [vmem:[%s1064_s11 + $0x28] sm:$0xff]  ;;  %314 = vst [vmem:[%s261_s12] sm:$0xff] %v1138_v10  ;;  %v1141_v13 = vld [vmem:[%s1064_s11 + $0x38] sm:$0xff] }
  0x21   : > { %316 = vst [vmem:[%s261_s12 + $0x8] sm:$0xff] %v1139_v11  ;;  %v1142_v14 = vld [vmem:[%s1064_s11 + $0x48] sm:$0xff]  ;;  %v1143_v15 = vld [vmem:[%s1064_s11 + $0x58] sm:$0xff] }
  0x22   : > { %318 = vst [vmem:[%s261_s12 + $0x10] sm:$0xff] %v1140_v12  ;;  %v1144_v16 = vld [vmem:[%s1064_s11 + $0x68] sm:$0xff]  ;;  %v1145_v17 = vld [vmem:[%s1064_s11 + $0x78] sm:$0xff] }
  0x23   : > { %320 = vst [vmem:[%s261_s12 + $0x18] sm:$0xff] %v1141_v13  ;;  %v1146_v18 = vld [vmem:[%s1064_s11 + $0x88] sm:$0xff]  ;;  %v1147_v19 = vld [vmem:[%s1064_s11 + $0x98] sm:$0xff] }
  0x24   : > { %322 = vst [vmem:[%s261_s12 + $0x20] sm:$0xff] %v1142_v14 }
  0x25   : > { %324 = vst [vmem:[%s261_s12 + $0x28] sm:$0xff] %v1143_v15 }
  0x26   : > { %326 = vst [vmem:[%s261_s12 + $0x30] sm:$0xff] %v1144_v16 }
  0x27   : > { %328 = vst [vmem:[%s261_s12 + $0x38] sm:$0xff] %v1145_v17 }
  0x28   : > { %330 = vst [vmem:[%s261_s12 + $0x40] sm:$0xff] %v1146_v18 }
  0x29   : > { %332 = vst [vmem:[%s261_s12 + $0x48] sm:$0xff] %v1147_v19 }
  0x2a PF: > { %p1148_p6 = scmp.ge.s32.totalorder %s1601_s19, 1  ;;  %p337_p7 = scmp.lt.s32.totalorder %s1601_s19, 3 }
  0x2c   : > { %p338_p8 = pnand %p1148_p6, %p337_p7 }
  0x2d   : > { %s344_s13 = sand.u32 (!%p338_p8), 1, %s1585_s15   ;;  %s1603_s15 = smov (!%p338_p8), 127  }
  0x2e   : > { %341 = sbr.rel (%p338_p8) target bundleno = 480 (0x1e0), region = 104  ;;  %s1604_s23 = smov (!%p338_p8), 126  }
  0x2f   : > { %s1212_s14 = smul.u32 (!%p338_p8), 80, %s344_s13  ;;  %s1605_s25 = smov (!%p338_p8), 125  }
  0x30   : > { %s1606_s26 = smov (!%p338_p8), 124   ;;  %s1607_s27 = smov (!%p338_p8), 122  }
  0x31   : > { %s1694_s21 = scalar_lea.vmem (!%p338_p8), [#allocation2], %s1212_s14  ;;  %s1699_s22 = scalar_lea.vmem (!%p338_p8), [#allocation3], %s1212_s14 }
  0x32   : > { %s1608_s28 = smov (!%p338_p8), 123   ;;  %p384_p9 = scmp.lt.s32.totalorder (!%p338_p8), %s1593_s17, 1 }
  0x33   : > { %v1697_v20 = vld [vmem:[%s1694_s21 + $0x10] sm:$0xff]  ;;  %v1703_v22 = vld [vmem:[%s1694_s21] sm:$0xff]  ;;  %v1715_v26 = vld [vmem:[%s1694_s21 + $0x18] sm:$0xff]  ;;  %vm473_vm0 = vcmask 1039360   ;;  %vm595_vm1 = vcmask 1022976   ;;  %vm534_vm2 = vcmask 1031168  }
  0x34   : > { %v405_v21 = vld [vmem:[%s1699_s22 + $0x10] sm:$0xff]  ;;  %v403_v24 = vld [vmem:[%s1699_s22] sm:$0xff]  ;;  %v406_v27 = vld [vmem:[%s1699_s22 + $0x18] sm:$0xff]  ;;  %vm656_vm3 = vcmask 1014784   ;;  %vm778_vm4 = vcmask 998400   ;;  %vm717_vm5 = vcmask 1006592  }
  0x35   : > { %v1706_v23 = vpack.i.bf16 %v405_v21, %v1697_v20  ;;  %v1710_v25 = vpack.i.bf16 %v403_v24, %v1703_v22  ;;  %v1721_v28 = vld [vmem:[%s1694_s21 + $0x20] sm:$0xff]  ;;  %v1725_v30 = vld [vmem:[%s1694_s21 + $0x8] sm:$0xff]  ;;  %v1732_v33 = vpack.i.bf16 %v406_v27, %v1715_v26  ;;  %v1751_v38 = vld [vmem:[%s1694_s21 + $0x38] sm:$0xff]  ;;  %vm920_vm6 = vcmask 392192   ;;  %s2128_s17 = smov (!%p384_p9, %s1593_s17), 1 }
  0x36   : > { %v407_v29 = vld [vmem:[%s1699_s22 + $0x20] sm:$0xff]  ;;  %v404_v31 = vld [vmem:[%s1699_s22 + $0x8] sm:$0xff]  ;;  %v410_v39 = vld [vmem:[%s1699_s22 + $0x38] sm:$0xff]  ;;  %s1195_s11 = sshll.u32 %s2128_s17, 5 }
  0x37   : > { %1271 = vrot.lane.b32.xlu1 %v1706_v23, %s1603_s15  ;;  %1261 = vrot.lane.b32.xlu0 %v1710_v25, %s1603_s15  ;;  %v1729_v32 = vpack.i.bf16 %v407_v29, %v1721_v28  ;;  %v1737_v34 = vpack.i.bf16 %v404_v31, %v1725_v30  ;;  %v1740_v35 = vld [vmem:[%s1694_s21 + $0x28] sm:$0xff]  ;;  %v1755_v40 = vld [vmem:[%s1694_s21 + $0x30] sm:$0xff]  ;;  %v1759_v42 = vpack.i.bf16 %v410_v39, %v1751_v38  ;;  %s391_s14 = scalar_lea.vmem %s2119_s4, %s1195_s11 }
  0x38   : > { %v408_v36 = vld [vmem:[%s1699_s22 + $0x28] sm:$0xff]  ;;  %v409_v41 = vld [vmem:[%s1699_s22 + $0x30] sm:$0xff]  ;;  %v1767_v44 = vld [vmem:[%s1694_s21 + $0x40] sm:$0xff] }
  0x39   : > { %1281 = vrot.lane.b32.xlu2 %v1729_v32, %s1603_s15  ;;  %v1746_v37 = vpack.i.bf16 %v408_v36, %v1740_v35  ;;  %v1764_v43 = vpack.i.bf16 %v409_v41, %v1755_v40  ;;  %v411_v45 = vld [vmem:[%s1699_s22 + $0x40] sm:$0xff]  ;;  %v1778_v47 = vld [vmem:[%s1694_s21 + $0x48] sm:$0xff] }
  0x3a   : > { %v1773_v46 = vpack.i.bf16 %v411_v45, %v1767_v44  ;;  %v412_v48 = vld [vmem:[%s1699_s22 + $0x48] sm:$0xff] }
  0x3b   : > { %v1784_v49 = vpack.i.bf16 %v412_v48, %v1778_v47 }
  0x3f   : > { %1276 = vrot.lane.b32.xlu1 %v1732_v33, %s1603_s15  ;;  %1266 = vrot.lane.b32.xlu0 %v1737_v34, %s1603_s15 }
  0x41   : > { %1286 = vrot.lane.b32.xlu2 %v1746_v37, %s1603_s15 }
  0x47   : > { %1296 = vrot.lane.b32.xlu1 %v1759_v42, %s1603_s15  ;;  %1291 = vrot.lane.b32.xlu0 %v1764_v43, %s1603_s15 }
  0x49   : > { %1301 = vrot.lane.b32.xlu2 %v1773_v46, %s1603_s15 }
  0x4f   : > { %1311 = vrot.lane.b32.xlu1 %v1710_v25, %s1604_s23  ;;  %1306 = vrot.lane.b32.xlu0 %v1784_v49, %s1603_s15 }
  0x51   : > { %1316 = vrot.lane.b32.xlu2 %v1737_v34, %s1604_s23 }
  0x57   : > { %1326 = vrot.lane.b32.xlu1 %v1732_v33, %s1604_s23  ;;  %1321 = vrot.lane.b32.xlu0 %v1706_v23, %s1604_s23 }
  0x59   : > { %1331 = vrot.lane.b32.xlu2 %v1729_v32, %s1604_s23 }
  0x5f   : > { %1341 = vrot.lane.b32.xlu1 %v1764_v43, %s1604_s23  ;;  %1336 = vrot.lane.b32.xlu0 %v1746_v37, %s1604_s23 }
  0x61   : > { %1346 = vrot.lane.b32.xlu2 %v1759_v42, %s1604_s23 }
  0x67   : > { %1356 = vrot.lane.b32.xlu1 %v1784_v49, %s1604_s23  ;;  %1351 = vrot.lane.b32.xlu0 %v1773_v46, %s1604_s23 }
  0x69   : > { %1361 = vrot.lane.b32.xlu2 %v1710_v25, %s1605_s25 }
  0x6f   : > { %1371 = vrot.lane.b32.xlu1 %v1706_v23, %s1605_s25  ;;  %1366 = vrot.lane.b32.xlu0 %v1737_v34, %s1605_s25 }
  0x71   : > { %1376 = vrot.lane.b32.xlu2 %v1732_v33, %s1605_s25 }
  0x77   : > { %1386 = vrot.lane.b32.xlu1 %v1764_v43, %s1606_s26  ;;  %1381 = vrot.lane.b32.xlu0 %v1729_v32, %s1605_s25 }
  0x79   : > { %1391 = vrot.lane.b32.xlu2 %v1759_v42, %s1606_s26 }
  0x7f   : > { %1401 = vrot.lane.b32.xlu1 %v1732_v33, %s1607_s27  ;;  %1396 = vrot.lane.b32.xlu0 %v1706_v23, %s1607_s27 }
  0x81   : > { %1406 = vrot.lane.b32.xlu2 %v1729_v32, %s1606_s26 }
  0x87   : > { %1416 = vrot.lane.b32.xlu1 %v1710_v25, %s1607_s27  ;;  %1411 = vrot.lane.b32.xlu0 %v1746_v37, %s1606_s26 }
  0x89   : > { %1421 = vrot.lane.b32.xlu2 %v1737_v34, %s1607_s27 }
  0x8f   : > { %1431 = vrot.lane.b32.xlu1 %v1732_v33, %s1606_s26  ;;  %1426 = vrot.lane.b32.xlu0 %v1706_v23, %s1606_s26 }
  0x91   : > { %1436 = vrot.lane.b32.xlu2 %v1773_v46, %s1608_s28 }
  0x93   : > { %v1282_v50 = vpop.permute.xlu2 %1281 }
  0x94   : > { %v1284_v51 = vunpack.i.h.bf16 %v1282_v50  ;;  %v1283_v52 = vunpack.i.l.bf16 %v1282_v50 }
  0x96   : > { %v478_v56 = vsel %vm473_vm0, %v1283_v52, %v1284_v51 }
  0x97   : > { %1446 = vrot.lane.b32.xlu1 %v1710_v25, %s1606_s26  ;;  %1441 = vrot.lane.b32.xlu0 %v1784_v49, %s1608_s28 }
  0x99   : > { %1451 = vrot.lane.b32.xlu2 %v1737_v34, %s1606_s26 }
  0x9b   : > { %v1287_v53 = vpop.permute.xlu2 %1286 }
  0x9c   : > { %v1289_v54 = vunpack.i.h.bf16 %v1287_v53  ;;  %v1288_v55 = vunpack.i.l.bf16 %v1287_v53 }
  0x9e   : > { %v479_v57 = vsel %vm473_vm0, %v1288_v55, %v1289_v54 }
  0x9f   : > { %1461 = vrot.lane.b32.xlu1 %v1759_v42, %s1608_s28  ;;  %1456 = vrot.lane.b32.xlu0 %v1764_v43, %s1608_s28  ;;  %v818_v58 = vpack.c.bf16 %v479_v57, %v478_v56 }
  0xa1   : > { %927 = vmatpush.bf16.msra.mxu0 %v818_v58  ;;  %1466 = vrot.lane.b32.xlu2 %v1773_v46, %s1605_s25 }
  0xa3   : > { %v1302_v59 = vpop.permute.xlu2 %1301 }
  0xa4   : > { %v1304_v60 = vunpack.i.h.bf16 %v1302_v59  ;;  %v1303_v61 = vunpack.i.l.bf16 %v1302_v59 }
  0xa6   : > { %v1849_v62 = vsel %vm473_vm0, %v1303_v61, %v1304_v60 }
  0xa7   : > { %1476 = vrot.lane.b32.xlu1 %v1729_v32, %s1608_s28  ;;  %1471 = vrot.lane.b32.xlu0 %v1784_v49, %s1605_s25 }
  0xa9   : > { %v1272_v63 = vpop.permute.xlu1 %1271  ;;  %v1262_v0 = vpop.permute.xlu0 %1261  ;;  %1481 = vrot.lane.b32.xlu2 %v1746_v37, %s1608_s28 }
  0xaa   : > { %v1274_v2 = vunpack.i.h.bf16 %v1272_v63  ;;  %v1273_v3 = vunpack.i.l.bf16 %v1272_v63  ;;  %v1264_v10 = vunpack.i.h.bf16 %v1262_v0  ;;  %v1263_v11 = vunpack.i.l.bf16 %v1262_v0 }
  0xab   : > { %v1853_v1 = vpop.permute.xlu2 %1316 }
  0xac   : > { %v476_v12 = vsel %vm473_vm0, %v1273_v3, %v1274_v2  ;;  %v474_v17 = vsel %vm473_vm0, %v1263_v11, %v1264_v10 }
  0xaf   : > { %1491 = vrot.lane.b32.xlu1 %v1759_v42, %s1605_s25  ;;  %1486 = vrot.lane.b32.xlu0 %v1764_v43, %s1605_s25 }
  0xb1   : > { %v1277_v4 = vpop.permute.xlu1 %1276  ;;  %v1267_v7 = vpop.permute.xlu0 %1266  ;;  %1496 = vrot.lane.b32.xlu2 %v1706_v23, %s1608_s28 }
  0xb2   : > { %v1279_v5 = vunpack.i.h.bf16 %v1277_v4  ;;  %v1278_v6 = vunpack.i.l.bf16 %v1277_v4  ;;  %v1269_v8 = vunpack.i.h.bf16 %v1267_v7  ;;  %v1268_v9 = vunpack.i.l.bf16 %v1267_v7 }
  0xb3   : > { %v1863_v15 = vpop.permute.xlu2 %1331 }
  0xb4   : > { %v477_v13 = vsel %vm473_vm0, %v1278_v6, %v1279_v5  ;;  %v475_v16 = vsel %vm473_vm0, %v1268_v9, %v1269_v8 }
  0xb5   : > { %v817_v14 = vpack.c.bf16 %v477_v13, %v476_v12  ;;  %v816_v19 = vpack.c.bf16 %v475_v16, %v474_v17 }
  0xb7   : > { %928 = vmatpush.bf16.msra.mxu0 %v817_v14  ;;  %1506 = vrot.lane.b32.xlu1 %v1746_v37, %s1605_s25 }
  0xb8   : > { %1501 = vrot.lane.b32.xlu0 %v1732_v33, %s1608_s28 }
  0xb9   : > { %v1297_v18 = vpop.permute.xlu1 %1296  ;;  %v1292_v24 = vpop.permute.xlu0 %1291  ;;  %1511 = vrot.lane.b32.xlu2 %v1710_v25, %s1608_s28 }
  0xba   : > { %v1299_v21 = vunpack.i.h.bf16 %v1297_v18  ;;  %v1298_v23 = vunpack.i.l.bf16 %v1297_v18  ;;  %v1294_v27 = vunpack.i.h.bf16 %v1292_v24  ;;  %v1293_v29 = vunpack.i.l.bf16 %v1292_v24 }
  0xbb   : > { %929 = vmatpush.bf16.msra.mxu0 %v816_v19  ;;  %v1876_v36 = vpop.permute.xlu2 %1346 }
  0xbc   : > { %v1874_v31 = vsel %vm473_vm0, %v1298_v23, %v1299_v21  ;;  %v1879_v33 = vsel %vm473_vm0, %v1293_v29, %v1294_v27  ;;  %v1349_v8 = vunpack.i.h.bf16 %v1876_v36  ;;  %v1348_v10 = vunpack.i.l.bf16 %v1876_v36 }
  0xbd   : > { %v819_v39 = vpack.c.bf16 %v1874_v31, %v1879_v33 }
  0xbf   : > { %1521 = vrot.lane.b32.xlu1 %v1773_v46, %s1606_s26 }
  0xc0   : > { %1516 = vrot.lane.b32.xlu0 %v1737_v34, %s1608_s28 }
  0xc1   : > { %v1887_v41 = vpop.permute.xlu1 %1311  ;;  %v1307_v25 = vpop.permute.xlu0 %1306  ;;  %1526 = vrot.lane.b32.xlu2 %v1784_v49, %s1606_s26 }
  0xc2   : > { %v1309_v45 = vunpack.i.h.bf16 %v1307_v25  ;;  %v1308_v48 = vunpack.i.l.bf16 %v1307_v25 }
  0xc3   : > { %v1362_v50 = vpop.permute.xlu2 %1361 }
  0xc4   : > { %v1892_v51 = vsel %vm473_vm0, %v1308_v48, %v1309_v45  ;;  %v1363_v61 = vunpack.i.l.bf16 %v1362_v50 }
  0xc5   : > { %v820_v52 = vpack.c.bf16 %v1892_v51, %v1849_v62 }
  0xc7   : > { %1536 = vrot.lane.b32.xlu1 %v1784_v49, %s1607_s27 }
  0xc8   : > { %1531 = vrot.lane.b32.xlu0 %v1773_v46, %s1607_s27 }
  0xc9   : > { %v1900_v34 = vpop.permute.xlu1 %1326  ;;  %v1902_v53 = vpop.permute.xlu0 %1321  ;;  %1541 = vrot.lane.b32.xlu2 %v1764_v43, %s1607_s27  ;;  %v1364_v43 = vunpack.i.h.bf16 %v1362_v50 }
  0xcb   : > { %v1377_v54 = vpop.permute.xlu2 %1376  ;;  %v596_v11 = vsel %vm595_vm1, %v1363_v61, %v1364_v43  ;;  %v1329_v43 = vunpack.i.h.bf16 %v1900_v34 }
  0xcc   : > { %v1379_v58 = vunpack.i.h.bf16 %v1377_v54  ;;  %v1378_v59 = vunpack.i.l.bf16 %v1377_v54 }
  0xce   : > { %v1917_v63 = vsel %vm595_vm1, %v1378_v59, %v1379_v58  ;;  %v1333_v58 = vunpack.i.l.bf16 %v1863_v15 }
  0xcf   : > { %1551 = vrot.lane.b32.xlu1 %v1729_v32, %s1607_s27 }
  0xd0   : > { %1546 = vrot.lane.b32.xlu0 %v1759_v42, %s1607_s27 }
  0xd1   : > { %v1342_v55 = vpop.permute.xlu1 %1341  ;;  %v1910_v56 = vpop.permute.xlu0 %1336  ;;  %1556 = vrot.lane.b32.xlu2 %v1746_v37, %s1607_s27 }
  0xd2   : > { %v1344_v19 = vunpack.i.h.bf16 %v1342_v55  ;;  %v1343_v21 = vunpack.i.l.bf16 %v1342_v55  ;;  %v1339_v50 = vunpack.i.h.bf16 %v1910_v56  ;;  %v1338_v54 = vunpack.i.l.bf16 %v1910_v56 }
  0xd3   : > { %v1392_v46 = vpop.permute.xlu2 %1391  ;;  %v542_v55 = vsel %vm534_vm2, %v1348_v10, %v1349_v8  ;;  %v1324_v56 = vunpack.i.h.bf16 %v1902_v53 }
  0xd4   : > { %v1394_v17 = vunpack.i.h.bf16 %v1392_v46  ;;  %v1393_v18 = vunpack.i.l.bf16 %v1392_v46  ;;  %v541_v46 = vsel %vm534_vm2, %v1343_v21, %v1344_v19 }
  0xd5   : > { %v824_v61 = vpack.c.bf16 %v542_v55, %v541_v46 }
  0xd6   : > { %v664_v48 = vsel %vm656_vm3, %v1393_v18, %v1394_v17 }
  0xd9   : > { %v1357_v49 = vpop.permute.xlu1 %1356  ;;  %v1352_v57 = vpop.permute.xlu0 %1351 }
  0xda   : > { %v1359_v42 = vunpack.i.h.bf16 %v1357_v49  ;;  %v1358_v0 = vunpack.i.l.bf16 %v1357_v49  ;;  %v1354_v37 = vunpack.i.h.bf16 %v1352_v57  ;;  %v1353_v5 = vunpack.i.l.bf16 %v1352_v57 }
  0xdb   : > { %v1914_v60 = vpop.permute.xlu2 %1406  ;;  %v1334_v57 = vunpack.i.h.bf16 %v1863_v15  ;;  %v1318_v15 = vunpack.i.l.bf16 %v1853_v1 }
  0xdc   : > { %v543_v23 = vsel %vm534_vm2, %v1353_v5, %v1354_v37  ;;  %v544_v24 = vsel %vm534_vm2, %v1358_v0, %v1359_v42  ;;  %v1328_v42 = vunpack.i.l.bf16 %v1900_v34  ;;  %v1323_v0 = vunpack.i.l.bf16 %v1902_v53 }
  0xdd   : > { %v825_v45 = vpack.c.bf16 %v544_v24, %v543_v23  ;;  %v539_v5 = vsel %vm534_vm2, %v1333_v58, %v1334_v57  ;;  %v1313_v34 = vunpack.i.l.bf16 %v1887_v41  ;;  %v814_v58 = vpack.c.bf16 %v1751_v38, %v1755_v40 }
  0xe1   : > { %v1372_v32 = vpop.permute.xlu1 %1371  ;;  %v1367_v4 = vpop.permute.xlu0 %1366 }
  0xe2   : > { %v1374_v2 = vunpack.i.h.bf16 %v1372_v32  ;;  %v1373_v3 = vunpack.i.l.bf16 %v1372_v32  ;;  %v1369_v6 = vunpack.i.h.bf16 %v1367_v4  ;;  %v1368_v7 = vunpack.i.l.bf16 %v1367_v4 }
  0xe3   : > { %v1926_v13 = vpop.permute.xlu2 %1421  ;;  %v1314_v4 = vunpack.i.h.bf16 %v1887_v41 }
  0xe4   : > { %v1921_v9 = vsel %vm595_vm1, %v1373_v3, %v1374_v2  ;;  %v597_v12 = vsel %vm595_vm1, %v1368_v7, %v1369_v6  ;;  %v540_v2 = vsel %vm534_vm2, %v1338_v54, %v1339_v50  ;;  %v1319_v3 = vunpack.i.h.bf16 %v1853_v1 }
  0xe5   : > { %v827_v14 = vpack.c.bf16 %v1917_v63, %v1921_v9  ;;  %v826_v16 = vpack.c.bf16 %v597_v12, %v596_v11  ;;  %v823_v53 = vpack.c.bf16 %v540_v2, %v539_v5  ;;  %v537_v12 = vsel %vm534_vm2, %v1323_v0, %v1324_v56  ;;  %v1163_v63 = vld [vmem:[%s2117_s2 + $0x1c] sm:$0xf0] }
  0xe6   : > { %v1424_v21 = vunpack.i.h.bf16 %v1926_v13  ;;  %v1423_v41 = vunpack.i.l.bf16 %v1926_v13  ;;  %v535_v23 = vsel %vm534_vm2, %v1313_v34, %v1314_v4  ;;  %v536_v24 = vsel %vm534_vm2, %v1318_v15, %v1319_v3  ;;  %v1153_v34 = vld [vmem:[%s2117_s2] sm:$0xf] }
  0xe7   : > { %946 = vmatpush.bf16.msra.mxu1 %v826_v16  ;;  %v538_v16 = vsel %vm534_vm2, %v1328_v42, %v1329_v43  ;;  %v821_v55 = vpack.c.bf16 %v536_v24, %v535_v23  ;;  %v812_v15 = vpack.c.bf16 %v1715_v26, %v1697_v20  ;;  %v811_v4 = vpack.c.bf16 %v1725_v30, %v1703_v22  ;;  %v1198_v22 = vld [vmem:[%s2117_s2 + $0x10] sm:$0xf0] }
  0xe8   : > { %v822_v18 = vpack.c.bf16 %v538_v16, %v537_v12  ;;  %v780_v13 = vsel %vm778_vm4, %v1423_v41, %v1424_v21 }
  0xe9   : > { %v1387_v27 = vpop.permute.xlu1 %1386  ;;  %v1932_v25 = vpop.permute.xlu0 %1381 }
  0xea   : > { %v1389_v29 = vunpack.i.h.bf16 %v1387_v27  ;;  %v1388_v36 = vunpack.i.l.bf16 %v1387_v27 }
  0xeb   : > { %947 = vmatpush.bf16.msra.mxu1 %v825_v45  ;;  %v1943_v32 = vpop.permute.xlu2 %1436  ;;  %v1408_v45 = vunpack.i.l.bf16 %v1914_v60 }
  0xec   : > { %v663_v49 = vsel %vm656_vm3, %v1388_v36, %v1389_v29  ;;  %v815_v29 = vpack.c.bf16 %v1778_v47, %v1767_v44  ;;  %v1409_v36 = vunpack.i.h.bf16 %v1914_v60  ;;  %v1438_v20 = vunpack.i.l.bf16 %v1943_v32 }
  0xed   : > { %v834_v59 = vpack.c.bf16 %v664_v48, %v663_v49 }
  0xee   : > { %930 = vmatpush.bf16.msra.mxu0 %v815_v29  ;;  %v661_v47 = vsel %vm656_vm3, %v1408_v45, %v1409_v36 }
  0xef   : > { %965 = vmatpush.bf16.msra.mxu2 %v834_v59  ;;  %948 = vmatpush.bf16.msra.mxu1 %v824_v61  ;;  %v813_v61 = vpack.c.bf16 %v1740_v35, %v1721_v28 }
  0xf1   : > { %v1402_v37 = vpop.permute.xlu1 %1401  ;;  %v1397_v8 = vpop.permute.xlu0 %1396 }
  0xf2   : > { %v1404_v6 = vunpack.i.h.bf16 %v1402_v37  ;;  %v1403_v7 = vunpack.i.l.bf16 %v1402_v37  ;;  %v1399_v10 = vunpack.i.h.bf16 %v1397_v8  ;;  %v1398_v11 = vunpack.i.l.bf16 %v1397_v8  ;;  %931 = vmatpush.bf16.msra.mxu0 %v814_v58 }
  0xf3   : > { %949 = vmatpush.bf16.msra.mxu1 %v823_v53  ;;  %v1452_v27 = vpop.permute.xlu2 %1451  ;;  %v1439_v37 = vunpack.i.h.bf16 %v1943_v32  ;;  %v1196_v53 = vld [vmem:[%s2117_s2 + $0x4] sm:$0xf] }
  0xf4   : > { %v782_v1 = vsel %vm778_vm4, %v1403_v7, %v1404_v6  ;;  %v781_v17 = vsel %vm778_vm4, %v1398_v11, %v1399_v10  ;;  %v1454_v51 = vunpack.i.h.bf16 %v1452_v27  ;;  %v1154_v7 = vor.u32 %v1198_v22, %v1153_v34  ;;  %v1155_v10 = vld [vmem:[%s2117_s2 + $0x14] sm:$0xf0] }
  0xf5   : > { %v842_v19 = vpack.c.bf16 %v782_v1, %v781_v17  ;;  %v726_v12 = vsel %vm717_vm5, %v1438_v20, %v1439_v37  ;;  %v1158_v1 = vor.u32 %v1196_v53, %v1155_v10  ;;  %v1383_v34 = vunpack.i.l.bf16 %v1932_v25 }
  0xf6   : > { %932 = vmatpush.bf16.msra.mxu0 %v813_v61 }
  0xf7   : > { %950 = vmatpush.bf16.msra.mxu1 %v822_v18  ;;  %984 = vmatpush.bf16.msra.mxu3 %v842_v19 }
  0xf9   : > { %v1417_v48 = vpop.permute.xlu1 %1416  ;;  %v1412_v46 = vpop.permute.xlu0 %1411 }
  0xfa   : > { %v1419_v50 = vunpack.i.h.bf16 %v1417_v48  ;;  %v1418_v54 = vunpack.i.l.bf16 %v1417_v48  ;;  %v1414_v49 = vunpack.i.h.bf16 %v1412_v46  ;;  %v1413_v57 = vunpack.i.l.bf16 %v1412_v46  ;;  %933 = vmatpush.bf16.msra.mxu0 %v812_v15  ;;  %v847_v15 = vld [vmem:[%s2118_s3 + $0x8] sm:$0xff] }
  0xfb   : > { %951 = vmatpush.bf16.msra.mxu1 %v821_v55  ;;  %v1977_v0 = vpop.permute.xlu2 %1466 }
  0xfc   : > { %v779_v44 = vsel %vm778_vm4, %v1418_v54, %v1419_v50  ;;  %v662_v60 = vsel %vm656_vm3, %v1413_v57, %v1414_v49  ;;  %v1469_v54 = vunpack.i.h.bf16 %v1977_v0  ;;  %v1468_v46 = vunpack.i.l.bf16 %v1977_v0  ;;  %v1175_v0 = vld [vmem:[%s2117_s2 + $0x3c] sm:$0xf0] }
  0xfd   : > { %v841_v59 = vpack.c.bf16 %v780_v13, %v779_v44  ;;  %v833_v43 = vpack.c.bf16 %v662_v60, %v661_v47  ;;  %v1173_v44 = vld [vmem:[%s2117_s2 + $0x28] sm:$0xf]  ;;  %v1203_v47 = vld [vmem:[%s2117_s2 + $0x38] sm:$0xf0] }
  0xfe   : > { %934 = vmatpush.bf16.msra.mxu0 %v811_v4 }
  0xff   : > { %985 = vmatpush.bf16.msra.mxu3 %v841_v59  ;;  %952 = vmatpush.bf16.msra.mxu1 %v820_v52  ;;  %v1453_v52 = vunpack.i.l.bf16 %v1452_v27 }
 0x100   : > { %966 = vmatpush.bf16.msra.mxu2 %v833_v43  ;;  %v1174_v43 = vor.u32 %v1203_v47, %v1173_v44 }
 0x101   : > { %v1432_v38 = vpop.permute.xlu1 %1431  ;;  %v1427_v56 = vpop.permute.xlu0 %1426  ;;  %935 = vmatmul.bf16.vlgmr.msra.gmra.mxu0 %v1154_v7 }
 0x102   : > { %v1434_v40 = vunpack.i.h.bf16 %v1432_v38  ;;  %v1433_v42 = vunpack.i.l.bf16 %v1432_v38  ;;  %v1429_v2 = vunpack.i.h.bf16 %v1427_v56  ;;  %v1428_v3 = vunpack.i.l.bf16 %v1427_v56  ;;  %v1201_v38 = vld [vmem:[%s2117_s2 + $0x2c] sm:$0xf] }
 0x103   : > { %953 = vmatpush.bf16.msra.mxu1 %v819_v39  ;;  %v658_v39 = vsel %vm656_vm3, %v1453_v52, %v1454_v51  ;;  %v1482_v8 = vpop.permute.xlu2 %1481  ;;  %v1609_v51 = vmov 0  }
 0x104   : > { %v660_v62 = vsel %vm656_vm3, %v1433_v42, %v1434_v40  ;;  %v659_v28 = vsel %vm656_vm3, %v1428_v3, %v1429_v2  ;;  %v1484_v45 = vunpack.i.h.bf16 %v1482_v8  ;;  %v1483_v48 = vunpack.i.l.bf16 %v1482_v8  ;;  %1561 = vset.pattern.permute.xlu1 %v1609_v51  ;;  %1560 = vset.pattern.permute.xlu0 %v1609_v51 }
 0x105   : > { %v832_v35 = vpack.c.bf16 %v660_v62, %v659_v28  ;;  %v604_v40 = vsel %vm595_vm1, %v1468_v46, %v1469_v54  ;;  %v1178_v3 = vor.u32 %v1201_v38, %v1175_v0  ;;  %v846_v62 = vld [vmem:[%s2118_s3] sm:$0xff]  ;;  %857 = vperm.xlu1 %1561, %v847_v15   ;;  %1562 = vset.pattern.permute.xlu2 %v1609_v51 }
 0x106   : > { %954 = vmatmul.bf16.vlgmr.msra.gmra.mxu1 %v1158_v1  ;;  %v723_v58 = vsel %vm717_vm5, %v1483_v48, %v1484_v45  ;;  %852 = vperm.xlu0 %1560, %v846_v62   ;;  %v1204_v51 = vld [vmem:[%s2117_s2 + $0x40] sm:$0xf0] }
 0x107   : > { %967 = vmatpush.bf16.msra.mxu2 %v832_v35 }
 0x109   : > { %v1447_v26 = vpop.permute.xlu1 %1446  ;;  %v1442_v33 = vpop.permute.xlu0 %1441 }
 0x10a   : > { %v1449_v5 = vunpack.i.h.bf16 %v1447_v26  ;;  %v1448_v31 = vunpack.i.l.bf16 %v1447_v26  ;;  %v1444_v30 = vunpack.i.h.bf16 %v1442_v33  ;;  %v1443_v6 = vunpack.i.l.bf16 %v1442_v33 }
 0x10b   : > { %v1497_v50 = vpop.permute.xlu2 %1496 }
 0x10c   : > { %v657_v32 = vsel %vm656_vm3, %v1448_v31, %v1449_v5  ;;  %v727_v16 = vsel %vm717_vm5, %v1443_v6, %v1444_v30  ;;  %v1499_v22 = vunpack.i.h.bf16 %v1497_v50  ;;  %v1498_v30 = vunpack.i.l.bf16 %v1497_v50 }
 0x10d   : > { %v831_v11 = vpack.c.bf16 %v658_v39, %v657_v32  ;;  %v840_v17 = vpack.c.bf16 %v727_v16, %v726_v12  ;;  %v1384_v39 = vunpack.i.h.bf16 %v1932_v25 }
 0x10f   : > { %968 = vmatpush.bf16.msra.mxu2 %v831_v11  ;;  %986 = vmatpush.bf16.msra.mxu3 %v840_v17  ;;  %v600_v12 = vsel %vm595_vm1, %v1383_v34, %v1384_v39  ;;  %v720_v17 = vsel %vm717_vm5, %v1498_v30, %v1499_v22 }
 0x111   : > { %v1462_v18 = vpop.permute.xlu1 %1461  ;;  %v1457_v41 = vpop.permute.xlu0 %1456  ;;  %940 = vmatmul.bf16.gmra.mxu0 %v1174_v43  ;;  %v1197_v43 = vld [vmem:[%s2117_s2 + $0xc] sm:$0xf] }
 0x112   : > { %v1464_v19 = vunpack.i.h.bf16 %v1462_v18  ;;  %v1463_v21 = vunpack.i.l.bf16 %v1462_v18  ;;  %v1459_v23 = vunpack.i.h.bf16 %v1457_v41  ;;  %v1458_v24 = vunpack.i.l.bf16 %v1457_v41  ;;  %v849_v41 = vld [vmem:[%s2118_s3 + $0x18] sm:$0xff] }
 0x113   : > { %v1512_v28 = vpop.permute.xlu2 %1511  ;;  %867 = vperm.xlu1 %1561, %v849_v41  }
 0x114   : > { %v725_v27 = vsel %vm717_vm5, %v1463_v21, %v1464_v19  ;;  %v724_v29 = vsel %vm717_vm5, %v1458_v24, %v1459_v23  ;;  %v1161_v19 = vld [vmem:[%s2117_s2 + $0x8] sm:$0xf]  ;;  %v1199_v21 = vld [vmem:[%s2117_s2 + $0x18] sm:$0xf0]  ;;  %v848_v23 = vld [vmem:[%s2118_s3 + $0x10] sm:$0xff]  ;;  %v1514_v24 = vunpack.i.h.bf16 %v1512_v28 }
 0x115   : > { %v839_v36 = vpack.c.bf16 %v725_v27, %v724_v29  ;;  %v1513_v27 = vunpack.i.l.bf16 %v1512_v28  ;;  %862 = vperm.xlu2 %1562, %v848_v23   ;;  %v1162_v46 = vor.u32 %v1199_v21, %v1161_v19 }
 0x116   : > { %959 = vmatmul.bf16.gmra.mxu1 %v1178_v3 }
 0x117   : > { %987 = vmatpush.bf16.msra.mxu3 %v839_v36 }
 0x119   : > { %v1477_v55 = vpop.permute.xlu1 %1476  ;;  %v1472_v57 = vpop.permute.xlu0 %1471 }
 0x11a   : > { %v1479_v13 = vunpack.i.h.bf16 %v1477_v55  ;;  %v1478_v49 = vunpack.i.l.bf16 %v1477_v55  ;;  %v1474_v60 = vunpack.i.h.bf16 %v1472_v57  ;;  %v1473_v59 = vunpack.i.l.bf16 %v1472_v57 }
 0x11b   : > { %v1527_v53 = vpop.permute.xlu2 %1526  ;;  %v718_v57 = vsel %vm717_vm5, %v1513_v27, %v1514_v24 }
 0x11c   : > { %v722_v61 = vsel %vm717_vm5, %v1478_v49, %v1479_v13  ;;  %v605_v42 = vsel %vm595_vm1, %v1473_v59, %v1474_v60  ;;  %v1529_v29 = vunpack.i.h.bf16 %v1527_v53  ;;  %v1528_v36 = vunpack.i.l.bf16 %v1527_v53  ;;  %v1183_v53 = vld [vmem:[%s2117_s2 + $0x44] sm:$0xf0] }
 0x11d   : > { %v838_v56 = vpack.c.bf16 %v723_v58, %v722_v61  ;;  %v830_v2 = vpack.c.bf16 %v605_v42, %v604_v40 }
 0x11e   : > { %v666_v47 = vsel %vm656_vm3, %v1528_v36, %v1529_v29 }
 0x11f   : > { %988 = vmatpush.bf16.msra.mxu3 %v838_v56  ;;  %969 = vmatpush.bf16.msra.mxu2 %v830_v2  ;;  %v1166_v56 = vor.u32 %v1197_v43, %v1163_v63 }
 0x121   : > { %v1492_v35 = vpop.permute.xlu1 %1491  ;;  %v1487_v37 = vpop.permute.xlu0 %1486 }
 0x122   : > { %v1494_v52 = vunpack.i.h.bf16 %v1492_v35  ;;  %v1493_v4 = vunpack.i.l.bf16 %v1492_v35  ;;  %v1489_v20 = vunpack.i.h.bf16 %v1487_v37  ;;  %v1488_v26 = vunpack.i.l.bf16 %v1487_v37  ;;  %v1181_v35 = vld [vmem:[%s2117_s2 + $0x30] sm:$0xf] }
 0x123   : > { %v1542_v49 = vpop.permute.xlu2 %1541 }
 0x124   : > { %v603_v5 = vsel %vm595_vm1, %v1493_v4, %v1494_v52  ;;  %v602_v31 = vsel %vm595_vm1, %v1488_v26, %v1489_v20  ;;  %v1544_v62 = vunpack.i.h.bf16 %v1542_v49  ;;  %v1543_v28 = vunpack.i.l.bf16 %v1542_v49 }
 0x125   : > { %v829_v33 = vpack.c.bf16 %v603_v5, %v602_v31  ;;  %v1182_v31 = vor.u32 %v1204_v51, %v1181_v35 }
 0x126   : > { %v785_v34 = vsel %vm778_vm4, %v1543_v28, %v1544_v62 }
 0x127   : > { %970 = vmatpush.bf16.msra.mxu2 %v829_v33 }
 0x129   : > { %v1507_v6 = vpop.permute.xlu1 %1506 }
 0x12a   : > { %v1509_v7 = vunpack.i.h.bf16 %v1507_v6  ;;  %v1508_v32 = vunpack.i.l.bf16 %v1507_v6  ;;  %v1502_v8 = vpop.permute.xlu0 %1501 }
 0x12b   : > { %v1504_v10 = vunpack.i.h.bf16 %v1502_v8  ;;  %v1503_v11 = vunpack.i.l.bf16 %v1502_v8  ;;  %v1557_v15 = vpop.permute.xlu2 %1556 }
 0x12c   : > { %v601_v16 = vsel %vm595_vm1, %v1508_v32, %v1509_v7  ;;  %v1559_v52 = vunpack.i.h.bf16 %v1557_v15  ;;  %v1558_v4 = vunpack.i.l.bf16 %v1557_v15  ;;  %v1202_v32 = vld [vmem:[%s2117_s2 + $0x34] sm:$0xf] }
 0x12d   : > { %v828_v1 = vpack.c.bf16 %v601_v16, %v600_v12  ;;  %v721_v18 = vsel %vm717_vm5, %v1503_v11, %v1504_v10  ;;  %v1169_v10 = vld [vmem:[%s2117_s2 + $0x10] sm:$0xf]  ;;  %v1200_v11 = vld [vmem:[%s2117_s2 + $0x20] sm:$0xf0]  ;;  %v1189_v12 = vld [vmem:[%s2117_s2 + $0x38] sm:$0xf] }
 0x12e   : > { %v837_v25 = vpack.c.bf16 %v721_v18, %v720_v17  ;;  %v784_v6 = vsel %vm778_vm4, %v1558_v4, %v1559_v52  ;;  %v1205_v16 = vld [vmem:[%s2117_s2 + $0x48] sm:$0xf0]  ;;  %v1170_v17 = vor.u32 %v1200_v11, %v1169_v10 }
 0x12f   : > { %971 = vmatpush.bf16.msra.mxu2 %v828_v1  ;;  %v1186_v1 = vor.u32 %v1202_v32, %v1183_v53  ;;  %v1190_v18 = vor.u32 %v1205_v16, %v1189_v12 }
 0x130   : > { %989 = vmatpush.bf16.msra.mxu3 %v837_v25 }
 0x131   : > { %v1522_v45 = vpop.permute.xlu1 %1521 }
 0x132   : > { %v1524_v48 = vunpack.i.h.bf16 %v1522_v45  ;;  %v1523_v50 = vunpack.i.l.bf16 %v1522_v45  ;;  %v1517_v54 = vpop.permute.xlu0 %1516 }
 0x133   : > { %v1519_v55 = vunpack.i.h.bf16 %v1517_v54  ;;  %v1518_v13 = vunpack.i.l.bf16 %v1517_v54  ;;  %972 = vmatpush.bf16.msra.mxu2 %v827_v14 }
 0x134   : > { %v665_v44 = vsel %vm656_vm3, %v1523_v50, %v1524_v48 }
 0x135   : > { %v719_v58 = vsel %vm717_vm5, %v1518_v13, %v1519_v55  ;;  %v835_v59 = vpack.c.bf16 %v666_v47, %v665_v44 }
 0x136   : > { %973 = vmatmul.bf16.vlgmr.msra.gmra.mxu2 %v1162_v46  ;;  %v836_v60 = vpack.c.bf16 %v719_v58, %v718_v57 }
 0x138   : > { %990 = vmatpush.bf16.msra.mxu3 %v836_v60 }
 0x139   : > { %v1537_v9 = vpop.permute.xlu1 %1536 }
 0x13a   : > { %v1539_v14 = vunpack.i.h.bf16 %v1537_v9  ;;  %v1538_v61 = vunpack.i.l.bf16 %v1537_v9  ;;  %v1532_v38 = vpop.permute.xlu0 %1531 }
 0x13b   : > { %v1534_v40 = vunpack.i.h.bf16 %v1532_v38  ;;  %v1533_v42 = vunpack.i.l.bf16 %v1532_v38 }
 0x13c   : > { %991 = vmatpush.bf16.msra.mxu3 %v835_v59  ;;  %v788_v0 = vsel %vm778_vm4, %v1538_v61, %v1539_v14 }
 0x13d   : > { %v787_v2 = vsel %vm778_vm4, %v1533_v42, %v1534_v40 }
 0x13e   : > { %v845_v3 = vpack.c.bf16 %v788_v0, %v787_v2 }
 0x13f   : > { %992 = vmatmul.bf16.vlgmr.msra.gmra.mxu3 %v1166_v56 }
 0x140   : > { %1008 = vmatpush.bf16.msrb.mxu0 %v845_v3  ;;  %1206 = vmatpush.bf16.msrb.mxu1 %v845_v3 }
 0x141   : > { %v1552_v37 = vpop.permute.xlu1 %1551 }
 0x142   : > { %v1547_v20 = vpop.permute.xlu0 %1546  ;;  %v1554_v26 = vunpack.i.h.bf16 %v1552_v37  ;;  %v1553_v5 = vunpack.i.l.bf16 %v1552_v37 }
 0x143   : > { %v1549_v33 = vunpack.i.h.bf16 %v1547_v20  ;;  %v1548_v39 = vunpack.i.l.bf16 %v1547_v20 }
 0x144   : > { %v783_v30 = vsel %vm778_vm4, %v1553_v5, %v1554_v26 }
 0x145   : > { %v786_v22 = vsel %vm778_vm4, %v1548_v39, %v1549_v33  ;;  %v843_v8 = vpack.c.bf16 %v784_v6, %v783_v30 }
 0x146   : > { %978 = vmatmul.bf16.gmra.mxu2 %v1182_v31  ;;  %v844_v7 = vpack.c.bf16 %v786_v22, %v785_v34 }
 0x148   : > { %1009 = vmatpush.bf16.msrb.mxu0 %v844_v7  ;;  %1207 = vmatpush.bf16.msrb.mxu1 %v844_v7 }
 0x14c   : > { %1010 = vmatpush.bf16.msrb.mxu0 %v843_v8  ;;  %1208 = vmatpush.bf16.msrb.mxu1 %v843_v8 }
 0x14f   : > { %997 = vmatmul.bf16.gmra.mxu3 %v1186_v1  ;;  %1191 = vmatmul.msk.bf16.vlgmr.msrb.gmra.mxu0 %vm920_vm6, %v1170_v17 }
 0x150   : > { %1192 = vmatmul.msk.bf16.vlgmr.msrb.gmra.mxu1 %vm920_vm6, %v1190_v18 }
 0x16f   : > { %v863_v55 = vpop.permute.xlu2 %862 }
 0x177   : > { %v858_v54 = vpop.permute.xlu1 %857 }
 0x178   : > { %v853_v29 = vpop.permute.xlu0 %852 }
 0x17e   : > { %v936_v25 = vpop.f32.mrf.mxu0 }
 0x17f   : > { %v937_v48 = vadd.f32 %v936_v25, %v853_v29 }
 0x183   : > { %v955_v19 = vpop.f32.mrf.mxu1 }
 0x184   : > { %v956_v46 = vadd.f32 %v955_v19, %v937_v48 }
 0x185   : > { %v868_v14 = vpop.permute.xlu1 %867 }
 0x186   : > { %v938_v21 = vpop.f32.mrf.mxu0 }
 0x187   : > { %v939_v58 = vadd.f32 %v938_v21, %v858_v54 }
 0x18b   : > { %v957_v41 = vpop.f32.mrf.mxu1 }
 0x18c   : > { %v958_v63 = vadd.f32 %v957_v41, %v939_v58 }
 0x18e   : > { %v941_v24 = vpop.f32.mrf.mxu0 }
 0x18f   : > { %v942_v47 = vadd.f32 %v941_v24, %v863_v55 }
 0x193   : > { %v960_v27 = vpop.f32.mrf.mxu1 }
 0x194   : > { %v961_v9 = vadd.f32 %v960_v27, %v942_v47 }
 0x196   : > { %v943_v50 = vpop.f32.mrf.mxu0 }
 0x197   : > { %v944_v0 = vadd.f32 %v943_v50, %v868_v14 }
 0x19b   : > { %v962_v13 = vpop.f32.mrf.mxu1 }
 0x19c   : > { %v963_v35 = vadd.f32 %v962_v13, %v944_v0 }
 0x1b9   : > { %v974_v23 = vpop.f32.mrf.mxu2 }
 0x1ba   : > { %v975_v49 = vadd.f32 %v974_v23, %v956_v46 }
 0x1c1   : > { %v976_v36 = vpop.f32.mrf.mxu2 }
 0x1c2   : > { %v993_v45 = vpop.f32.mrf.mxu3  ;;  %v977_v61 = vadd.f32 %v976_v36, %v958_v63 }
 0x1c3   : > { %v994_v44 = vadd.f32 %v993_v45, %v975_v49 }
 0x1c9   : > { %v979_v60 = vpop.f32.mrf.mxu2 }
 0x1ca   : > { %v995_v57 = vpop.f32.mrf.mxu3  ;;  %v980_v38 = vadd.f32 %v979_v60, %v961_v9 }
 0x1cb   : > { %v996_v56 = vadd.f32 %v995_v57, %v977_v61 }
 0x1cc   : > { %v1012_v59 = vpop.f32.mrf.mxu0 }
 0x1cd   : > { %v1013_v43 = vadd.f32 %v1012_v59, %v994_v44  ;;  %v1017_v42 = vpop.f32.mrf.mxu1 }
 0x1cf   : > { %1022 = vst [vmem:[%s391_s14] sm:$0xff] %v1013_v43 }
 0x1d1   : > { %v981_v28 = vpop.f32.mrf.mxu2 }
 0x1d2   : > { %v998_v40 = vpop.f32.mrf.mxu3  ;;  %v982_v51 = vadd.f32 %v981_v28, %v963_v35 }
 0x1d3   : > { %v999_v2 = vadd.f32 %v998_v40, %v980_v38 }
 0x1d4   : > { %v1014_v3 = vpop.f32.mrf.mxu0 }
 0x1d5   : > { %v1015_v15 = vadd.f32 %v1014_v3, %v996_v56  ;;  %v1018_v62 = vadd.f32 %v1017_v42, %v999_v2  ;;  %v1019_v37 = vpop.f32.mrf.mxu1 }
 0x1d7   : > { %1023 = vst [vmem:[%s391_s14 + $0x8] sm:$0xff] %v1015_v15 }
 0x1d8   : > { %1024 = vst [vmem:[%s391_s14 + $0x10] sm:$0xff] %v1018_v62 }
 0x1da   : > { %v1000_v52 = vpop.f32.mrf.mxu3 }
 0x1db   : > { %v1001_v4 = vadd.f32 %v1000_v52, %v982_v51 }
 0x1dd   : > { %v1020_v20 = vadd.f32 %v1019_v37, %v1001_v4 }
 0x1df   : > { %1025 = vst [vmem:[%s391_s14 + $0x18] sm:$0xff] %v1020_v20 }
 0x1e0 PF: > { %s14_s19 = sadd.s32 1, %s1601_s19   ;;  %s2121_s15 = smov %s1589_s16 }
 0x1e1   : > { %p11_p10 = scmp.ge.s32.totalorder %s14_s19, 4   ;;  %s2122_s16 = smov %s1674_s24 }
 0x1e2   : > { %s2123_s17 = smov %s1597_s18  ;;  %s2124_s18 = smov %s2126_s20 }
 0x1e3   :  { %13 = sbr.rel (!%p11_p10) target bundleno = 3 (0x3), region = 155 }

// kernel: hifigan_forward.9
= control target key start
LH: loop header
LB: loop body
LE: loop exit
PB: predicated region body
PF: predicated region fallthrough
CT: control target
= control target key end

     0   :  { %s682_s15 = smov 0   ;;  %s684_s16 = smov 0   ;;  %s774_s0 = inlined_call_operand.vmem [shape: f32[2,16,256], index: 0, kind: input, shape index: {}, may-alias: {0,1}]   ;;  %s775_s1 = inlined_call_operand.vmem [shape: f32[2,16,256], index: 1, kind: input, shape index: {}, may-alias: {0,1}]   ;;  %s776_s2 = inlined_call_operand.vmem [shape: bf16[2,8,32], index: 2, kind: input, shape index: {}]   ;;  %s777_s3 = inlined_call_operand.vmem [shape: f32[8,1], index: 3, kind: input, shape index: {}]   ;;  %s778_s4 = inlined_call_operand.vmem [shape: f32[2,2,8,128], index: 4, kind: output, shape index: {}]  }
   0x1   :  { %s686_s17 = smov 0   ;;  %s688_s18 = smov 0  }
   0x2   :  { %s690_s19 = smov 0  }
   0x3 LB: > { %s23_s20 = sadd.s32 1, %s649_s18  ;;  %p42_p1 = scmp.ne.s32.totalorder %s641_s16, %s637_s15  ;;  %s653_s19 = sphi %s690_s19, %s14_s19   ;;  %s649_s18 = sphi %s688_s18, %s783_s18   ;;  %s645_s17 = sphi %s686_s17, %s782_s17   ;;  %s641_s16 = sphi %s684_s16, %s781_s16   ;;  %s637_s15 = sphi %s682_s15, %s780_s15  }
   0x4   : > { %p24_p0 = scmp.ge.s32.totalorder %s23_s20, 2  ;;  %p43_p2 = scmp.eq.s32.totalorder %s653_s19, 0 }
   0x5   : > { %s35_s23 = sadd.s32 1, %s641_s16  ;;  %p539_p5 = scmp.ge.s32.totalorder %s653_s19, 2 }
   0x6   : > { %s785_s20 = smov (%p24_p0, %s23_s20), 0  ;;  %p713_p3 = por %p43_p2, %p42_p1 }
   0x7   : > { %s30_s22 = ssub.s32 %s649_s18, %s785_s20  ;;  %174 = sbr.rel (%p539_p5) target bundleno = 24 (0x18), region = 24 }
   0x8   : > { %p33_p4 = scmp.eq.s32.totalorder %s30_s22, 0 }
   0xa   : > { %s721_s24 = scalar_select %p33_p4, %s641_s16, %s35_s23  }
   0xc   : > { %177 = sbr.rel (!%p713_p3) target bundleno = 18 (0x12), region = 28  ;;  %s179_s25 = sand.u32 (%p713_p3), 1, %s641_s16  }
   0xd   : > { %s559_s26 = sshll.u32 (%p713_p3), %s649_s18, 5  ;;  %s540_s27 = sshll.u32 (%p713_p3), %s179_s25, 4 }
   0xe   : > { %s185_s30 = scalar_lea.vmem (%p713_p3), %s774_s0, %s559_s26  ;;  %s181_s5 = scalar_lea.vmem (%p713_p3), [#allocation2], %s540_s27 }
   0xf   : > { %v216_v0 = vld [vmem:[%s185_s30] sm:$0xff] (%p713_p3)  ;;  %v218_v1 = vld [vmem:[%s185_s30 + $0x10] sm:$0xff] (%p713_p3) }
  0x10   : > { %217 = vst [vmem:[%s181_s5] sm:$0xff] (%p713_p3), %v216_v0 }
  0x11   : > { %219 = vst [vmem:[%s181_s5 + $0x8] sm:$0xff] %v218_v1 }
  0x12 PF: > { %225 = sbr.rel (!%p713_p3) target bundleno = 24 (0x18), region = 66  ;;  %s227_s6 = sand.u32 (%p713_p3), 1, %s641_s16  }
  0x13   : > { %s560_s7 = sshll.u32 (%p713_p3), %s649_s18, 5  ;;  %s543_s8 = sshll.u32 (%p713_p3), %s227_s6, 4 }
  0x14   : > { %s468_s11 = scalar_lea.vmem (%p713_p3), %s775_s1, %s560_s7  ;;  %s229_s12 = scalar_lea.vmem (%p713_p3), [#allocation3], %s543_s8 }
  0x15   : > { %v546_v2 = vld [vmem:[%s468_s11 + $0x8] sm:$0xff] (%p713_p3)  ;;  %v547_v3 = vld [vmem:[%s468_s11 + $0x18] sm:$0xff] (%p713_p3) }
  0x16   : > { %266 = vst [vmem:[%s229_s12] sm:$0xff] (%p713_p3), %v546_v2 }
  0x17   : > { %268 = vst [vmem:[%s229_s12 + $0x8] sm:$0xff] %v547_v3 }
  0x18 PF: > { %p548_p6 = scmp.ge.s32.totalorder %s653_s19, 1  ;;  %p273_p7 = scmp.lt.s32.totalorder %s653_s19, 3 }
  0x1a   : > { %p274_p8 = pnand %p548_p6, %p273_p7 }
  0x1b   : > { %s280_s13 = sand.u32 (!%p274_p8), 1, %s637_s15   ;;  %s655_s15 = smov (!%p274_p8), 127  }
  0x1c   : > { %277 = sbr.rel (%p274_p8) target bundleno = 433 (0x1b1), region = 104  ;;  %s549_s14 = sshll.u32 (!%p274_p8), %s280_s13, 4 }
  0x1d   : > { %s282_s21 = scalar_lea.vmem (!%p274_p8), [#allocation2], %s549_s14  ;;  %s289_s22 = scalar_lea.vmem (!%p274_p8), [#allocation3], %s549_s14 }
  0x1e   : > { %p320_p9 = scmp.lt.s32.totalorder (!%p274_p8), %s645_s17, 1 }
  0x21   : > { %v329_v4 = vld [vmem:[%s282_s21] sm:$0xff]  ;;  %v330_v6 = vld [vmem:[%s282_s21 + $0x8] sm:$0xff]  ;;  %vm358_vm4 = vcmask 1039360   ;;  %vm371_vm5 = vcmask 261120   ;;  %v656_v32 = vmov 0   ;;  %s787_s17 = smov (!%p320_p9, %s645_s17), 1 }
  0x22   : > { %v331_v5 = vld [vmem:[%s289_s22] sm:$0xff]  ;;  %v332_v7 = vld [vmem:[%s289_s22 + $0x8] sm:$0xff]  ;;  %vm333_vm0 = vcmp.ge.f32.partialorder %v329_v4, 0.0  ;;  %v337_v8 = vmul.f32 0.1, %v329_v4  ;;  %vm335_vm3 = vcmp.ge.f32.partialorder %v330_v6, 0.0  ;;  %614 = vset.pattern.permute.xlu0 %v656_v32 }
  0x23   : > { %vm334_vm1 = vcmp.ge.f32.partialorder %v331_v5, 0.0  ;;  %vm336_vm2 = vcmp.ge.f32.partialorder %v332_v7, 0.0  ;;  %v338_v9 = vmul.f32 0.1, %v331_v5  ;;  %v340_v10 = vmul.f32 0.1, %v332_v7 }
  0x24   : > { %v341_v11 = vsel %vm333_vm0, %v329_v4, %v337_v8  ;;  %v339_v12 = vmul.f32 0.1, %v330_v6  ;;  %v363_v30 = vld [vmem:[%s776_s2] sm:$0xf]  ;;  %v554_v39 = vld [vmem:[%s776_s2 + $0x4] sm:$0xf] }
  0x25   : > { %v342_v13 = vsel %vm334_vm1, %v331_v5, %v338_v9  ;;  %v344_v14 = vsel %vm336_vm2, %v332_v7, %v340_v10  ;;  %v345_v31 = vld [vmem:[%s777_s3] sm:$0xff]  ;;  %s561_s30 = sshll.u32 %s787_s17, 4 }
  0x26   : > { %v604_v15 = vpack.i.bf16 %v342_v13, %v341_v11  ;;  %v393_v16 = vpack.c.bf16 %v344_v14, %v342_v13  ;;  %v343_v17 = vsel %vm335_vm3, %v330_v6, %v339_v12  ;;  %s327_s7 = scalar_lea.vmem %s778_s4, %s561_s30 }
  0x27   : > { %v609_v18 = vpack.i.bf16 %v344_v14, %v343_v17  ;;  %v364_v19 = vpack.c.bf16 %v343_v17, %v341_v11 }
  0x28   : > { %605 = vrot.lane.b32.xlu0 %v604_v15, %s655_s15 }
  0x29   : > { %399 = vrot.lane.b32.xlu2 %v364_v19, %s655_s15 }
  0x30   : > { %610 = vrot.lane.b32.xlu0 %v609_v18, %s655_s15 }
  0x31   : > { %401 = vrot.lane.b32.xlu2 %v393_v16, %s655_s15 }
  0x38   : > { %368 = vperm.xlu0 %614, %v345_v31  }
  0x83   : > { %v400_v33 = vpop.permute.xlu2 %399 }
  0x8b   : > { %v402_v37 = vpop.permute.xlu2 %401 }
  0x8c   : > { %v408_v38 = vsel %vm358_vm4, %v400_v33, %v402_v37 }
  0x9a   : > { %v606_v20 = vpop.permute.xlu0 %605 }
  0x9b   : > { %v608_v21 = vunpack.i.h.bf16 %v606_v20  ;;  %v607_v22 = vunpack.i.l.bf16 %v606_v20 }
  0x9d   : > { %v359_v26 = vsel %vm358_vm4, %v607_v22, %v608_v21 }
  0xa2   : > { %v611_v23 = vpop.permute.xlu0 %610 }
  0xa3   : > { %v613_v24 = vunpack.i.h.bf16 %v611_v23  ;;  %v612_v25 = vunpack.i.l.bf16 %v611_v23 }
  0xa5   : > { %v360_v27 = vsel %vm358_vm4, %v612_v25, %v613_v24  ;;  %v394_v29 = vpack.c.bf16 %v613_v24, %v608_v21 }
  0xa6   : > { %v365_v28 = vpack.c.bf16 %v360_v27, %v359_v26 }
  0xa8   : > { %403 = vrot.lane.b32.xlu1 %v365_v28, %s655_s15  ;;  %381 = vmatpush.bf16.msra.mxu0 %v365_v28 }
  0xaa   : > { %v369_v40 = vpop.permute.xlu0 %368 }
  0xac   : > { %382 = vmatpush.bf16.msra.mxu0 %v364_v19 }
  0xaf   : > { %553 = vmatmul.msk.bf16.vlgmr.msra.gmra.mxu0 %vm371_vm5, %v363_v30 }
  0xb0   : > { %405 = vrot.lane.b32.xlu1 %v394_v29, %s655_s15 }
 0x11a   : > { %v404_v34 = vpop.permute.xlu1 %403 }
 0x122   : > { %v406_v35 = vpop.permute.xlu1 %405 }
 0x123   : > { %v409_v36 = vsel %vm358_vm4, %v404_v34, %v406_v35 }
 0x124   : > { %421 = vmatpush.bf16.msra.mxu1 %v409_v36 }
 0x128   : > { %422 = vmatpush.bf16.msra.mxu1 %v408_v38 }
 0x12b   : > { %555 = vmatmul.msk.bf16.vlgmr.msra.gmra.mxu1 %vm371_vm5, %v554_v39 }
 0x12c   : > { %v384_v41 = vpop.f32.mrf.mxu0 }
 0x12d   : > { %v385_v42 = vadd.f32 %v384_v41, %v369_v40 }
 0x12f   : > { %388 = vst [vmem:[%s327_s7] sm:$0xff] %v385_v42 }
 0x134   : > { %v386_v43 = vpop.f32.mrf.mxu0 }
 0x1a8   : > { %v424_v44 = vpop.f32.mrf.mxu1 }
 0x1a9   : > { %v425_v45 = vadd.f32 %v424_v44, %v369_v40 }
 0x1ab   : > { %556 = vst [vmem:[%s327_s7 + $0x8] sm:$0xff] %v425_v45 }
 0x1b0   : > { %v426_v46 = vpop.f32.mrf.mxu1 }
 0x1b1 PF: > { %s14_s19 = sadd.s32 1, %s653_s19   ;;  %s780_s15 = smov %s641_s16 }
 0x1b2   : > { %p11_p10 = scmp.ge.s32.totalorder %s14_s19, 4   ;;  %s781_s16 = smov %s721_s24 }
 0x1b3   : > { %s782_s17 = smov %s649_s18  ;;  %s783_s18 = smov %s785_s20 }
 0x1b4   :  { %13 = sbr.rel (!%p11_p10) target bundleno = 3 (0x3), region = 157 }

// kernel: hifigan_forward.8
= control target key start
LH: loop header
LB: loop body
LE: loop exit
PB: predicated region body
PF: predicated region fallthrough
CT: control target
= control target key end

     0   :  { %s4244_s0 = inlined_call_operand.vmem [shape: f32[2,16,256], index: 0, kind: input, shape index: {}, may-alias: {0,1}]   ;;  %s4245_s1 = inlined_call_operand.vmem [shape: f32[2,16,256], index: 1, kind: input, shape index: {}, may-alias: {0,1}]   ;;  %s4246_s2 = inlined_call_operand.vmem [shape: bf16[16,48], index: 2, kind: input, shape index: {}]   ;;  %s4247_s3 = inlined_call_operand.vmem [shape: f32[16,1], index: 3, kind: input, shape index: {}]   ;;  %s4248_s4 = inlined_call_operand.vmem [shape: bf16[16,48], index: 4, kind: input, shape index: {}]   ;;  %s4249_s5 = inlined_call_operand.vmem [shape: f32[16,1], index: 5, kind: input, shape index: {}]   ;;  %s4250_s6 = inlined_call_operand.vmem [shape: bf16[16,48], index: 6, kind: input, shape index: {}]   ;;  %s4251_s7 = inlined_call_operand.vmem [shape: f32[16,1], index: 7, kind: input, shape index: {}]   ;;  %s4252_s8 = inlined_call_operand.vmem [shape: bf16[16,48], index: 8, kind: input, shape index: {}]   ;;  %s4253_s9 = inlined_call_operand.vmem [shape: f32[16,1], index: 9, kind: input, shape index: {}]   ;;  %s4254_s10 = inlined_call_operand.vmem [shape: bf16[16,48], index: 10, kind: input, shape index: {}]   ;;  %s4255_s11 = inlined_call_operand.vmem [shape: f32[16,1], index: 11, kind: input, shape index: {}]   ;;  %s4256_s12 = inlined_call_operand.vmem [shape: bf16[16,48], index: 12, kind: input, shape index: {}]   ;;  %s4257_s13 = inlined_call_operand.vmem [shape: f32[16,1], index: 13, kind: input, shape index: {}]   ;;  %s4258_s14 = inlined_call_operand.vmem [shape: bf16[16,80], index: 14, kind: input, shape index: {}]   ;;  %s4259_s15 = inlined_call_operand.vmem [shape: f32[16,1], index: 15, kind: input, shape index: {}]   ;;  %s4260_s16 = inlined_call_operand.vmem [shape: bf16[16,80], index: 16, kind: input, shape index: {}]   ;;  %s4261_s17 = inlined_call_operand.vmem [shape: f32[16,1], index: 17, kind: input, shape index: {}]   ;;  %s4262_s18 = inlined_call_operand.vmem [shape: bf16[16,80], index: 18, kind: input, shape index: {}]   ;;  %s4263_s19 = inlined_call_operand.vmem [shape: f32[16,1], index: 19, kind: input, shape index: {}]   ;;  %s4264_s20 = inlined_call_operand.vmem [shape: bf16[16,80], index: 20, kind: input, shape index: {}]   ;;  %s4265_s21 = inlined_call_operand.vmem [shape: f32[16,1], index: 21, kind: input, shape index: {}]   ;;  %s4266_s22 = inlined_call_operand.vmem [shape: bf16[16,80], index: 22, kind: input, shape index: {}]   ;;  %s4267_s23 = inlined_call_operand.vmem [shape: f32[16,1], index: 23, kind: input, shape index: {}]   ;;  %s4268_s24 = inlined_call_operand.vmem [shape: bf16[16,80], index: 24, kind: input, shape index: {}]   ;;  %s4269_s25 = inlined_call_operand.vmem [shape: f32[16,1], index: 25, kind: input, shape index: {}]   ;;  %s4270_s26 = inlined_call_operand.vmem [shape: f32[2,16,128], index: 26, kind: output, shape index: {}]  }
   0x1   :  { %4293 = sst [smem:[#allocation7_spill]] %s4244_s0 }
   0x2   :  { %4294 = sst [smem:[#allocation8_spill]] %s4245_s1 }
   0x3   :  { %4295 = sst [smem:[#allocation9_spill]] %s4246_s2 }
   0x4   :  { %4296 = sst [smem:[#allocation10_spill]] %s4247_s3 }
   0x5   :  { %4297 = sst [smem:[#allocation11_spill]] %s4248_s4 }
   0x6   :  { %4298 = sst [smem:[#allocation12_spill]] %s4249_s5 }
   0x7   :  { %4299 = sst [smem:[#allocation13_spill]] %s4250_s6 }
   0x8   :  { %4300 = sst [smem:[#allocation14_spill]] %s4251_s7 }
   0x9   :  { %4301 = sst [smem:[#allocation15_spill]] %s4252_s8 }
   0xa   :  { %4302 = sst [smem:[#allocation16_spill]] %s4253_s9 }
   0xb   :  { %4303 = sst [smem:[#allocation17_spill]] %s4254_s10 }
   0xc   :  { %4304 = sst [smem:[#allocation18_spill]] %s4256_s12 }
   0xd   :  { %4305 = sst [smem:[#allocation19_spill]] %s4268_s24 }
   0xe   :  { %4306 = sst [smem:[#allocation20_spill]] %s4269_s25 }
   0xf   :  { %4307 = sst [smem:[#allocation21_spill]] %s4270_s26 }
  0x10   :  { %s3407_s27 = smov 0   ;;  %s3409_s3 = smov 0  }
  0x11   :  { %s3411_s7 = smov 0   ;;  %s3413_s28 = smov 0  }
  0x12   :  { %s3415_s8 = smov 0  }
  0x13 LB: > { %4308 = sst [smem:[#allocation4_spill]] %s3246_s7  ;;  %s45_s4 = sadd.s32 1, %s3250_s28  ;;  %s3254_s8 = sphi %s3415_s8, %s36_s8   ;;  %s3250_s28 = sphi %s3413_s28, %s4351_s28   ;;  %s3246_s7 = sphi %s3411_s7, %s4350_s7   ;;  %s3242_s3 = sphi %s3409_s3, %s4349_s3   ;;  %s3238_s27 = sphi %s3407_s27, %s4348_s27  }
  0x14   : > { %p46_p0 = scmp.ge.s32.totalorder %s45_s4, 2  ;;  %p64_p1 = scmp.ne.s32.totalorder %s3242_s3, %s3238_s27 }
  0x15   : > { %p65_p2 = scmp.eq.s32.totalorder %s3254_s8, 0  ;;  %s57_s9 = sadd.s32 1, %s3242_s3 }
  0x16   : > { %s4353_s4 = smov (%p46_p0, %s45_s4), 0  ;;  %p2694_p5 = scmp.ge.s32.totalorder %s3254_s8, 2 }
  0x17   : > { %4309 = sst [smem:[#allocation5_spill]] %s4353_s4  ;;  %p3438_p3 = por %p65_p2, %p64_p1 }
  0x18   : > { %s52_s0 = ssub.s32 %s3250_s28, %s4353_s4 }
  0x19   : > { %p55_p4 = scmp.eq.s32.totalorder %s52_s0, 0  ;;  %724 = sbr.rel (%p2694_p5) target bundleno = 54 (0x36), region = 112 }
  0x1b   : > { %s3446_s30 = scalar_select %p55_p4, %s3242_s3, %s57_s9  }
  0x1d   : > { %4311 = sst [smem:[#allocation6_spill]] %s3446_s30 }
  0x1e   : > { %727 = sbr.rel (!%p3438_p3) target bundleno = 42 (0x2a), region = 116  ;;  %s729_s2 = sand.u32 (%p3438_p3), 1, %s3242_s3  }
  0x1f   : > { %s2780_s5 = sshll.u32 (%p3438_p3), %s3250_s28, 5  ;;  %s2695_s10 = sshll.u32 (%p3438_p3), %s729_s2, 4 }
  0x20   : > { %s4312_s26 = sld [smem:[#allocation7_spill]] (%p3438_p3)  ;;  %s731_s0 = scalar_lea.vmem (%p3438_p3), [#allocation2], %s2695_s10 }
  0x26   : > { %s735_s7 = scalar_lea.vmem %s4312_s26, %s2780_s5 }
  0x27   : > { %v766_v0 = vld [vmem:[%s735_s7] sm:$0xff]  ;;  %v768_v1 = vld [vmem:[%s735_s7 + $0x10] sm:$0xff] }
  0x28   : > { %767 = vst [vmem:[%s731_s0] sm:$0xff] %v766_v0 }
  0x29   : > { %769 = vst [vmem:[%s731_s0 + $0x8] sm:$0xff] %v768_v1 }
  0x2a PF: > { %775 = sbr.rel (!%p3438_p3) target bundleno = 54 (0x36), region = 154  ;;  %s777_s9 = sand.u32 (%p3438_p3), 1, %s3242_s3  }
  0x2b   : > { %s2781_s4 = sshll.u32 (%p3438_p3), %s3250_s28, 5  ;;  %s2698_s30 = sshll.u32 (%p3438_p3), %s777_s9, 4 }
  0x2c   : > { %s4313_s12 = sld [smem:[#allocation8_spill]] (%p3438_p3)  ;;  %s779_s26 = scalar_lea.vmem (%p3438_p3), [#allocation3], %s2698_s30 }
  0x32   : > { %s2623_s25 = scalar_lea.vmem %s4313_s12, %s2781_s4 }
  0x33   : > { %v2701_v2 = vld [vmem:[%s2623_s25 + $0x8] sm:$0xff]  ;;  %v2702_v3 = vld [vmem:[%s2623_s25 + $0x18] sm:$0xff] }
  0x34   : > { %816 = vst [vmem:[%s779_s26] sm:$0xff] %v2701_v2 }
  0x35   : > { %818 = vst [vmem:[%s779_s26 + $0x8] sm:$0xff] %v2702_v3 }
  0x36 PF: > { %p2703_p6 = scmp.ge.s32.totalorder %s3254_s8, 1  ;;  %p823_p7 = scmp.lt.s32.totalorder %s3254_s8, 3 }
  0x38   : > { %p824_p8 = pnand %p2703_p6, %p823_p7 }
  0x39   : > { %s830_s7 = sand.u32 (!%p824_p8), 1, %s3238_s27   ;;  %s3257_s5 = smov (!%p824_p8), 126  }
  0x3a   : > { %827 = sbr.rel (%p824_p8) target bundleno = 1896 (0x768), region = 192  ;;  %s2704_s29 = sshll.u32 (!%p824_p8), %s830_s7, 4 }
  0x3b   : > { %s832_s12 = scalar_lea.vmem (!%p824_p8), [#allocation2], %s2704_s29  ;;  %s839_s24 = scalar_lea.vmem (!%p824_p8), [#allocation3], %s2704_s29 }
  0x3c   : > { %s3258_s25 = smov (!%p824_p8), 127   ;;  %s4289_s27 = smov (!%p824_p8), 124  }
  0x3d   : > { %s4291_s4 = smov (!%p824_p8), 125   ;;  %s4280_s30 = smov (!%p824_p8), 116  }
  0x3e   : > { %s4314_s1 = sld [smem:[#allocation11_spill]] (!%p824_p8)  ;;  %s4282_s10 = smov (!%p824_p8), 118  }
  0x3f   : > { %v3256_v4 = vmov 0.0   ;;  %v3468_v5 = vld [vmem:[%s832_s12 + $0x8] sm:$0xff]  ;;  %v3470_v6 = vld [vmem:[%s839_s24] sm:$0xff]  ;;  %vm952_vm4 = vcmask 1039360   ;;  %vm967_vm5 = vcmask 1031168   ;;  %v4278_v60 = vmov 0.0|0.0  }
  0x40   : > { %2852 = vrot.lane.b32.xlu0 %v3256_v4, %s3257_s5  ;;  %v3472_v7 = vld [vmem:[%s839_s24 + $0x8] sm:$0xff]  ;;  %vm930_vm0 = vcmp.ge.f32.partialorder %v3468_v5, 0.0  ;;  %v934_v8 = vmul.f32 0.1, %v3468_v5  ;;  %v3478_v10 = vld [vmem:[%s832_s12] sm:$0xff]  ;;  %vm929_vm2 = vcmp.ge.f32.partialorder %v3470_v6, 0.0 }
  0x41   : > { %vm931_vm1 = vcmp.ge.f32.partialorder %v3472_v7, 0.0  ;;  %v935_v9 = vmul.f32 0.1, %v3472_v7  ;;  %v933_v11 = vmul.f32 0.1, %v3470_v6  ;;  %vm928_vm3 = vcmp.ge.f32.partialorder %v3478_v10, 0.0 }
  0x42   : > { %v938_v12 = vsel %vm930_vm0, %v3468_v5, %v934_v8  ;;  %v932_v14 = vmul.f32 0.1, %v3478_v10  ;;  %vm1453_vm6 = vcmask 1014784   ;;  %vm1027_vm7 = vcmask 392192   ;;  %v1743_v3 = vld [vmem:[%s4259_s15 + $0x8] sm:$0xff]  ;;  %s4315_s12 = sld [smem:[#allocation15_spill]] }
  0x43   : > { %v939_v13 = vsel %vm931_vm1, %v3472_v7, %v935_v9  ;;  %v937_v16 = vsel %vm929_vm2, %v3470_v6, %v933_v11  ;;  %vm1245_vm8 = vcmask 1022976   ;;  %vm1759_vm9 = vcmask 654336   ;;  %s4316_s0 = sld [smem:[#allocation10_spill]]  ;;  %s3265_s24 = smov 123  }
  0x44   : > { %v2861_v15 = vpack.i.bf16 %v939_v13, %v938_v12  ;;  %v936_v17 = vsel %vm928_vm3, %v3478_v10, %v932_v14  ;;  %v3522_v42 = vpack.c.bf16 %v939_v13, %v937_v16  ;;  %v3553_v57 = vld [vmem:[%s4314_s1] sm:$0xff]  ;;  %v3263_v13 = vmov 0   ;;  %s4317_s26 = sld [smem:[#allocation9_spill]]  ;;  %s3267_s9 = smov 114  }
  0x45   : > { %v2856_v18 = vpack.i.bf16 %v937_v16, %v936_v17  ;;  %v976_v51 = vpack.c.bf16 %v938_v12, %v936_v17  ;;  %2911 = vset.pattern.permute.xlu0 %v3263_v13  ;;  %v1742_v14 = vld [vmem:[%s4259_s15] sm:$0xff]  ;;  %2912 = vset.pattern.permute.xlu1 %v3263_v13  ;;  %vm1017_vm10 = vcmask 949248   ;;  %s4318_s29 = sld [smem:[#allocation12_spill]]  ;;  %s3268_s7 = smov 119  }
  0x46   : > { %2862 = vrot.lane.b32.xlu1 %v2861_v15, %s3257_s5  ;;  %2913 = vset.pattern.permute.xlu2 %v3263_v13  ;;  %s4322_s1 = sld [smem:[#allocation17_spill]]  ;;  %s3270_s6 = smov 108  }
  0x47   : > { %2872 = vrot.lane.b32.xlu2 %v2856_v18, %s3258_s25  ;;  %s3271_s2 = smov 113  }
  0x48   : > { %2857 = vrot.lane.b32.xlu0 %v2856_v18, %s3257_s5 }
  0x4e   : > { %2867 = vrot.lane.b32.xlu1 %v3256_v4, %s3258_s25 }
  0x4f   : > { %2877 = vrot.lane.b32.xlu2 %v2861_v15, %s3258_s25 }
  0x50   : > { %2882 = vrot.lane.b32.xlu0 %v3256_v4, %s3257_s5 }
  0x56   : > { %2887 = vrot.lane.b32.xlu1 %v3256_v4, %s3258_s25 }
  0x57   : > { %2892 = vrot.lane.b32.xlu2 %v2856_v18, %s4289_s27 }
  0x58   : > { %2897 = vrot.lane.b32.xlu0 %v2861_v15, %s4289_s27 }
  0x5e   : > { %2902 = vrot.lane.b32.xlu1 %v2856_v18, %s4291_s4 }
  0x5f   : > { %2907 = vrot.lane.b32.xlu2 %v2861_v15, %s4291_s4 }
  0xa1   : > { %v2873_v19 = vpop.permute.xlu2 %2872 }
  0xa2   : > { %v2875_v20 = vunpack.i.h.bf16 %v2873_v19  ;;  %v2874_v21 = vunpack.i.l.bf16 %v2873_v19 }
  0xa4   : > { %v953_v25 = vsel %vm952_vm4, %v2874_v21, %v2875_v20 }
  0xa9   : > { %v2878_v22 = vpop.permute.xlu2 %2877 }
  0xaa   : > { %v2880_v23 = vunpack.i.h.bf16 %v2878_v22  ;;  %v2879_v24 = vunpack.i.l.bf16 %v2878_v22 }
  0xac   : > { %v954_v26 = vsel %vm952_vm4, %v2879_v24, %v2880_v23  ;;  %v3539_v52 = vpack.c.bf16 %v2880_v23, %v2875_v20  ;;  %v3582_v23 = vld [vmem:[%s4315_s12] sm:$0xff]  ;;  %s4287_s12 = smov 122  }
  0xad   : > { %v3504_v27 = vpack.c.bf16 %v954_v26, %v953_v25  ;;  %v2789_v24 = vld [vmem:[%s4258_s14] sm:$0xff]  ;;  %v983_v25 = vld [vmem:[%s4316_s0 + $0x8] sm:$0xff] }
  0xaf   : > { %1009 = vrot.lane.b32.xlu2 %v3504_v27, %s4280_s30 }
  0xb1   : > { %v2893_v44 = vpop.permute.xlu2 %2892 }
  0xb2   : > { %v3508_v28 = vpop.permute.xlu0 %2852  ;;  %v2895_v55 = vunpack.i.h.bf16 %v2893_v44  ;;  %v2894_v56 = vunpack.i.l.bf16 %v2893_v44 }
  0xb3   : > { %v2855_v29 = vunpack.i.h.bf16 %v3508_v28  ;;  %v2854_v30 = vunpack.i.l.bf16 %v3508_v28 }
  0xb4   : > { %v1730_v2 = vsel %vm1453_vm6, %v2894_v56, %v2895_v55 }
  0xb5   : > { %v1131_v31 = vpack.c.bf16 %v2855_v29, %v2854_v30 }
  0xb7   : > { %1171 = vmatpush.bf16.msra.mxu3 %v1131_v31  ;;  %1007 = vrot.lane.b32.xlu2 %v3522_v42, %s4280_s30 }
  0xb8   : > { %v2863_v32 = vpop.permute.xlu1 %2862 }
  0xb9   : > { %v2865_v33 = vunpack.i.h.bf16 %v2863_v32  ;;  %v2864_v34 = vunpack.i.l.bf16 %v2863_v32  ;;  %v2908_v62 = vpop.permute.xlu2 %2907 }
  0xba   : > { %v2858_v35 = vpop.permute.xlu0 %2857  ;;  %v2910_v11 = vunpack.i.h.bf16 %v2908_v62  ;;  %v2909_v12 = vunpack.i.l.bf16 %v2908_v62 }
  0xbb   : > { %v2860_v36 = vunpack.i.h.bf16 %v2858_v35  ;;  %v2859_v37 = vunpack.i.l.bf16 %v2858_v35  ;;  %v969_v38 = vsel %vm967_vm5, %v2864_v34, %v2865_v33 }
  0xbc   : > { %v1717_v19 = vsel %vm1245_vm8, %v2909_v12, %v2910_v11 }
  0xbd   : > { %v3517_v39 = vpack.c.bf16 %v2865_v33, %v2860_v36  ;;  %v968_v40 = vsel %vm967_vm5, %v2859_v37, %v2860_v36 }
  0xbe   : > { %v980_v41 = vpack.c.bf16 %v969_v38, %v968_v40  ;;  %v2783_v38 = vld [vmem:[%s4317_s26] sm:$0xff]  ;;  %s4321_s26 = sld [smem:[#allocation13_spill]] }
  0xbf   : > { %1015 = vrot.lane.b32.xlu1 %v3517_v39, %s4280_s30  ;;  %v982_v40 = vld [vmem:[%s4316_s0] sm:$0xff] }
  0xc0   : > { %v3524_v43 = vpop.permute.xlu1 %2867  ;;  %1013 = vrot.lane.b32.xlu0 %v980_v41, %s4280_s30  ;;  %986 = vperm.xlu2 %2913, %v982_v40  }
  0xc1   : > { %v2870_v45 = vunpack.i.h.bf16 %v3524_v43  ;;  %v2869_v46 = vunpack.i.l.bf16 %v3524_v43 }
  0xc2   : > { %v3531_v47 = vpop.permute.xlu0 %2882 }
  0xc3   : > { %v1129_v48 = vpack.c.bf16 %v2870_v45, %v2869_v46  ;;  %v2885_v49 = vunpack.i.h.bf16 %v3531_v47  ;;  %v2884_v50 = vunpack.i.l.bf16 %v3531_v47 }
  0xc5   : > { %1172 = vmatpush.bf16.msra.mxu3 %v1129_v48  ;;  %v1392_v53 = vpack.c.bf16 %v2885_v49, %v2884_v50 }
  0xc7   : > { %1005 = vrot.lane.b32.xlu1 %v976_v51, %s4280_s30 }
  0xc8   : > { %1011 = vrot.lane.b32.xlu0 %v3539_v52, %s4280_s30  ;;  %v3548_v54 = vpop.permute.xlu1 %2887  ;;  %2915 = vrot.lane.b32.xlu2 %v3256_v4, %s4287_s12 }
  0xc9   : > { %v2890_v58 = vunpack.i.h.bf16 %v3548_v54  ;;  %v2889_v59 = vunpack.i.l.bf16 %v3548_v54  ;;  %1173 = vmatpush.bf16.msra.mxu3 %v4278_v60 }
  0xca   : > { %v2898_v61 = vpop.permute.xlu0 %2897 }
  0xcb   : > { %v2900_v63 = vunpack.i.h.bf16 %v2898_v61  ;;  %v2899_v0 = vunpack.i.l.bf16 %v2898_v61  ;;  %v1390_v1 = vpack.c.bf16 %v2890_v58, %v2889_v59 }
  0xcc   : > { %2719 = vmatmul.msk.bf16.vlgmr.msra.gmra.mxu3 %vm1027_vm7, %v3553_v57 }
  0xcd   : > { %1432 = vmatpush.bf16.msrb.mxu3 %v1392_v53  ;;  %v3568_v8 = vpack.c.bf16 %v2900_v63, %v2895_v55  ;;  %v1731_v9 = vsel %vm1453_vm6, %v2899_v0, %v2900_v63 }
  0xce   : > { %v1740_v15 = vpack.c.bf16 %v1731_v9, %v1730_v2 }
  0xcf   : > { %1751 = vperm.xlu1 %2912, %v1743_v3  }
  0xd0   : > { %v2903_v16 = vpop.permute.xlu1 %2902  ;;  %1746 = vperm.xlu0 %2911, %v1742_v14   ;;  %2930 = vrot.lane.b32.xlu2 %v3256_v4, %s3265_s24 }
  0xd1   : > { %1433 = vmatpush.bf16.msrb.mxu3 %v1390_v1  ;;  %v2905_v17 = vunpack.i.h.bf16 %v2903_v16  ;;  %v2904_v18 = vunpack.i.l.bf16 %v2903_v16 }
  0xd3   : > { %v3576_v20 = vpack.c.bf16 %v2910_v11, %v2905_v17  ;;  %v1716_v21 = vsel %vm1245_vm8, %v2904_v18, %v2905_v17  ;;  %v1894_v17 = vld [vmem:[%s4261_s17 + $0x8] sm:$0xff]  ;;  %v1893_v18 = vld [vmem:[%s4261_s17] sm:$0xff] }
  0xd4   : > { %v1738_v22 = vpack.c.bf16 %v1717_v19, %v1716_v21  ;;  %v1133_v21 = vld [vmem:[%s4318_s29 + $0x8] sm:$0xff] }
  0xd5   : > { %1434 = vmatpush.bf16.msrb.mxu3 %v4278_v60 }
  0xd7   : > { %991 = vperm.xlu1 %2912, %v983_v25  }
  0xd8   : > { %2920 = vrot.lane.b32.xlu0 %v3256_v4, %s4291_s4 }
  0xd9   : > { %1766 = vmatpush.bf16.msra.mxu3 %v1740_v15 }
  0xdc   : > { %2731 = vmatmul.msk.bf16.vlgmr.msrb.gmra.mxu3 %vm1027_vm7, %v3582_v23 }
  0xdd   : > { %1767 = vmatpush.bf16.msra.mxu3 %v1738_v22  ;;  %v1132_v22 = vld [vmem:[%s4318_s29] sm:$0xff] }
  0xdf   : > { %2925 = vrot.lane.b32.xlu1 %v3256_v4, %s4282_s10  ;;  %s4337_s10 = smov 124  }
  0xe1   : > { %1768 = vmatpush.bf16.msra.mxu3 %v980_v41 }
  0xe5   : > { %1769 = vmatpush.bf16.msra.mxu3 %v3504_v27 }
  0xe9   : > { %1770 = vmatpush.bf16.msra.mxu3 %v976_v51  ;;  %v1060_v51 = vlaneseq }
  0xeb   : > { %v3613_v53 = vand.u32 127, %v1060_v51 }
  0xec   : > { %2747 = vmatmul.msk.bf16.vlgmr.msra.gmra.mxu3 %vm1759_vm9, %v2789_v24 }
  0xed   : > { %v1793_v56 = vadd.s32 4294967274, %v3613_v53 }
  0xef   : > { %vm1795_vm11 = vcmp.ge.s32.totalorder %v1793_v56, 0  ;;  %vm1797_vm12 = vcmp.lt.s32.totalorder %v1793_v56, 16 }
  0xf0   : > { %vm1799_vm13 = vmand %vm1795_vm11, %vm1797_vm12 }
 0x109   : > { %v1010_v26 = vpop.permute.xlu2 %1009 }
 0x111   : > { %v1008_v33 = vpop.permute.xlu2 %1007 }
 0x11a   : > { %v987_v24 = vpop.permute.xlu2 %986 }
 0x122   : > { %v3648_v25 = vpop.permute.xlu2 %2915 }
 0x131   : > { %v1016_v31 = vpop.permute.xlu1 %1015 }
 0x132   : > { %1050 = vmatpush.bf16.msra.mxu1 %v1016_v31  ;;  %v1014_v32 = vpop.permute.xlu0 %1013 }
 0x133   : > { %v1020_v27 = vsel %vm1017_vm10, %v1014_v32, %v1016_v31  ;;  %v2917_v31 = vunpack.i.l.bf16 %v3648_v25 }
 0x134   : > { %1036 = vmatpush.bf16.msra.mxu2 %v1020_v27 }
 0x139   : > { %v1006_v35 = vpop.permute.xlu1 %1005 }
 0x13a   : > { %v1012_v34 = vpop.permute.xlu0 %1011  ;;  %v1018_v37 = vsel %vm1017_vm10, %v1006_v35, %v1008_v33 }
 0x13b   : > { %1051 = vmatpush.bf16.msra.mxu1 %v1012_v34  ;;  %v1019_v36 = vsel %vm1017_vm10, %v1010_v26, %v1012_v34  ;;  %v2918_v26 = vunpack.i.h.bf16 %v3648_v25  ;;  %v1064_v34 = vadd.s32 4294967285, %v3613_v53  ;;  %v2113_v25 = vadd.s32 4294967282, %v3613_v53 }
 0x13c   : > { %1037 = vmatpush.bf16.msra.mxu2 %v1019_v36 }
 0x13d   : > { %vm1066_vm0 = vcmp.ge.s32.totalorder %v1064_v34, 0  ;;  %vm1068_vm1 = vcmp.lt.s32.totalorder %v1064_v34, 16 }
 0x13e   : > { %vm3665_vm2 = vmand %vm1066_vm0, %vm1068_vm1  ;;  %vm1192_vm1 = vcmask 932864  }
 0x13f   : > { %1052 = vmatpush.bf16.msra.mxu1 %v1008_v33  ;;  %v1274_v33 = vpack.c.bf16 %v2918_v26, %v2917_v31 }
 0x140   : > { %1038 = vmatpush.bf16.msra.mxu2 %v1018_v37 }
 0x141   : > { %v1752_v3 = vpop.permute.xlu1 %1751 }
 0x142   : > { %2713 = vmatmul.msk.bf16.vlgmr.msra.gmra.mxu1 %vm1027_vm7, %v2783_v38  ;;  %v1747_v61 = vpop.permute.xlu0 %1746 }
 0x143   : > { %2712 = vmatmul.msk.bf16.vlgmr.msra.gmra.mxu2 %vm1027_vm7, %v2783_v38  ;;  %1314 = vmatpush.bf16.msrb.mxu1 %v1274_v33 }
 0x149   : > { %v992_v27 = vpop.permute.xlu1 %991 }
 0x14a   : > { %v3657_v35 = vpop.permute.xlu0 %2920 }
 0x14b   : > { %v2923_v36 = vunpack.i.h.bf16 %v3657_v35  ;;  %v2922_v37 = vunpack.i.l.bf16 %v3657_v35 }
 0x14d   : > { %v1272_v40 = vpack.c.bf16 %v2923_v36, %v2922_v37 }
 0x14f   : > { %v1175_v41 = vpop.f32.mrf.mxu3  ;;  %1315 = vmatpush.bf16.msrb.mxu1 %v1272_v40 }
 0x151   : > { %v3669_v51 = vpop.permute.xlu1 %2925 }
 0x152   : > { %v4286_v56 = vunpack.i.h.bf16 %v3669_v51 }
 0x153   : > { %1316 = vmatpush.bf16.msrb.mxu1 %v4278_v60 }
 0x157   : > { %v1177_v44 = vpop.f32.mrf.mxu3 }
 0x15f   : > { %v1436_v48 = vpop.f32.mrf.mxu3 }
 0x167   : > { %v1438_v55 = vpop.f32.mrf.mxu3 }
 0x168   : > { %v3671_v55 = vpop.permute.xlu2 %2930 }
 0x16f   : > { %v1772_v62 = vpop.f32.mrf.mxu3 }
 0x170   : > { %v1773_v63 = vadd.f32 %v1772_v62, %v1747_v61  ;;  %v2927_v61 = vunpack.i.l.bf16 %v3669_v51  ;;  %v3678_v62 = vld [vmem:[%s4321_s26] sm:$0xff]  ;;  %s4326_s26 = sld [smem:[#allocation16_spill]] }
 0x171   : > { %2725 = vmatmul.msk.bf16.vlgmr.msrb.gmra.mxu1 %vm1027_vm7, %v3678_v62 }
 0x172   : > { %v1805_v0 = vsel %vm1799_vm13, %v1773_v63, 0.0  ;;  %v4284_v63 = vunpack.i.h.bf16 %v3671_v55 }
 0x173   : > { %vm1809_vm14 = vcmp.ge.f32.partialorder %v1805_v0, 0.0  ;;  %v1813_v1 = vmul.f32 0.1, %v1805_v0 }
 0x175   : > { %v3616_v2 = vsel %vm1809_vm14, %v1805_v0, %v1813_v1  ;;  %v4285_v0 = vunpack.i.l.bf16 %v3671_v55 }
 0x176   : > { %v2939_v9 = vpack.i.bf16 0.0, %v3616_v2 }
 0x177   : > { %v1774_v11 = vpop.f32.mrf.mxu3 }
 0x178   : > { %v1775_v12 = vadd.f32 %v1774_v11, %v1752_v3  ;;  %2940 = vrot.lane.b32.xlu2 %v2939_v9, %s4291_s4  ;;  %2935 = vrot.lane.b32.xlu0 %v2939_v9, %s4289_s27  ;;  %v1535_v3 = vpack.c.bf16 %v4286_v56, %v2927_v61 }
 0x17a   : > { %v1807_v13 = vsel %vm1799_vm13, %v1775_v12, 0.0  ;;  %1575 = vmatpush.bf16.msra.mxu1 %v1535_v3 }
 0x17b   : > { %vm1811_vm15 = vcmp.ge.f32.partialorder %v1807_v13, 0.0  ;;  %v1815_v14 = vmul.f32 0.1, %v1807_v13 }
 0x17d   : > { %v3621_v15 = vsel %vm1811_vm15, %v1807_v13, %v1815_v14  ;;  %v1533_v13 = vpack.c.bf16 %v4284_v63, %v4285_v0 }
 0x17e   : > { %v2944_v16 = vpack.i.bf16 0.0, %v3621_v15  ;;  %v1883_v19 = vpack.c.bf16 %v3621_v15, %v3616_v2 }
 0x17f   : > { %1576 = vmatpush.bf16.msra.mxu1 %v1533_v13 }
 0x180   : > { %2945 = vrot.lane.b32.xlu1 %v2944_v16, %s4289_s27  ;;  %2965 = vrot.lane.b32.xlu2 %v2944_v16, %s3257_s5 }
 0x181   : > { %2960 = vrot.lane.b32.xlu0 %v2944_v16, %s4291_s4 }
 0x183   : > { %1577 = vmatpush.bf16.msra.mxu1 %v4278_v60 }
 0x188   : > { %2950 = vrot.lane.b32.xlu1 %v2939_v9, %s3257_s5  ;;  %2970 = vrot.lane.b32.xlu2 %v2944_v16, %s3258_s25 }
 0x190   : > { %2955 = vrot.lane.b32.xlu1 %v2939_v9, %s3258_s25  ;;  %1902 = vperm.xlu2 %2913, %v1894_v17  }
 0x198   : > { %1897 = vperm.xlu1 %2912, %v1893_v18   ;;  %1945 = vrot.lane.b32.xlu2 %v3468_v5, %s4289_s27 }
 0x1a0   : > { %1943 = vrot.lane.b32.xlu1 %v3470_v6, %s4289_s27  ;;  %1141 = vperm.xlu2 %2913, %v1133_v21  }
 0x1a8   : > { %1136 = vperm.xlu1 %2912, %v1132_v22   ;;  %1188 = vrot.lane.b32.xlu2 %v3468_v5, %s3267_s9 }
 0x1b0   : > { %1186 = vrot.lane.b32.xlu1 %v3470_v6, %s3267_s9 }
 0x1bf   : > { %v1054_v32 = vpop.f32.mrf.mxu1 }
 0x1c6   : > { %v1040_v38 = vpop.f32.mrf.mxu2 }
 0x1c7   : > { %v1056_v41 = vpop.f32.mrf.mxu1  ;;  %v1041_v44 = vadd.f32 %v1040_v38, %v987_v24  ;;  %v3710_v24 = vld [vmem:[%s4322_s1] sm:$0xff]  ;;  %s4331_s1 = smov 118  }
 0x1c8   : > { %2737 = vmatmul.msk.bf16.vlgmr.msra.gmra.mxu1 %vm1027_vm7, %v3710_v24 }
 0x1c9   : > { %v1076_v1 = vsel %vm3665_vm2, %v1041_v44, 0.0 }
 0x1ca   : > { %v1084_v12 = vmul.f32 0.1, %v1076_v1  ;;  %vm1080_vm3 = vcmp.ge.f32.partialorder %v1076_v1, 0.0 }
 0x1cc   : > { %v3697_v17 = vsel %vm1080_vm3, %v1076_v1, %v1084_v12 }
 0x1ce   : > { %v1042_v9 = vpop.f32.mrf.mxu2 }
 0x1cf   : > { %v1043_v11 = vadd.f32 %v1042_v9, %v992_v27 }
 0x1d1   : > { %v1078_v14 = vsel %vm3665_vm2, %v1043_v11, 0.0 }
 0x1d2   : > { %vm1082_vm11 = vcmp.ge.f32.partialorder %v1078_v14, 0.0  ;;  %v1086_v16 = vmul.f32 0.1, %v1078_v14  ;;  %v2941_v32 = vpop.permute.xlu2 %2940 }
 0x1d3   : > { %v2943_v38 = vunpack.i.h.bf16 %v2941_v32  ;;  %v2942_v40 = vunpack.i.l.bf16 %v2941_v32 }
 0x1d4   : > { %v3699_v18 = vsel %vm1082_vm11, %v1078_v14, %v1086_v16 }
 0x1d5   : > { %v2974_v21 = vpack.i.bf16 %v3699_v18, %v3697_v17  ;;  %v1126_v22 = vpack.c.bf16 %v3699_v18, %v3697_v17  ;;  %v1861_v13 = vsel %vm1245_vm8, %v2942_v40, %v2943_v38 }
 0x1d7   : > { %2975 = vrot.lane.b32.xlu0 %v2974_v21, %s3257_s5 }
 0x1da   : > { %v2966_v3 = vpop.permute.xlu2 %2965 }
 0x1db   : > { %v2968_v32 = vunpack.i.h.bf16 %v2966_v3 }
 0x1df   : > { %2980 = vrot.lane.b32.xlu0 %v2974_v21, %s3258_s25 }
 0x1e2   : > { %v2971_v40 = vpop.permute.xlu2 %2970 }
 0x1e7   : > { %1941 = vrot.lane.b32.xlu0 %v3478_v10, %s4289_s27 }
 0x1ea   : > { %v2936_v27 = vpop.permute.xlu0 %2935 }
 0x1eb   : > { %v2938_v33 = vunpack.i.h.bf16 %v2936_v27  ;;  %v2937_v34 = vunpack.i.l.bf16 %v2936_v27  ;;  %v2967_v27 = vunpack.i.l.bf16 %v2966_v3 }
 0x1ed   : > { %v1875_v6 = vsel %vm1453_vm6, %v2937_v34, %v2938_v33 }
 0x1ef   : > { %1947 = vrot.lane.b32.xlu0 %v3472_v7, %s4289_s27 }
 0x1f2   : > { %v2946_v41 = vpop.permute.xlu1 %2945 }
 0x1f3   : > { %v2948_v44 = vunpack.i.h.bf16 %v2946_v41  ;;  %v2947_v48 = vunpack.i.l.bf16 %v2946_v41  ;;  %v2961_v1 = vpop.permute.xlu0 %2960 }
 0x1f4   : > { %v2963_v5 = vunpack.i.h.bf16 %v2961_v1  ;;  %v2962_v9 = vunpack.i.l.bf16 %v2961_v1 }
 0x1f5   : > { %v1876_v11 = vsel %vm1453_vm6, %v2947_v48, %v2948_v44  ;;  %v3725_v12 = vpack.c.bf16 %v2948_v44, %v2938_v33  ;;  %v1848_v33 = vsel %vm967_vm5, %v2967_v27, %v2968_v32 }
 0x1f6   : > { %v1891_v14 = vpack.c.bf16 %v1876_v11, %v1875_v6  ;;  %v3728_v16 = vpack.c.bf16 %v2963_v5, %v2943_v38  ;;  %v1862_v21 = vsel %vm1245_vm8, %v2962_v9, %v2963_v5  ;;  %v2973_v6 = vunpack.i.h.bf16 %v2971_v40 }
 0x1f7   : > { %1184 = vrot.lane.b32.xlu0 %v3478_v10, %s3267_s9  ;;  %v1889_v34 = vpack.c.bf16 %v1862_v21, %v1861_v13  ;;  %v2972_v5 = vunpack.i.l.bf16 %v2971_v40 }
 0x1f8   : > { %1916 = vmatpush.bf16.msrb.mxu1 %v1891_v14 }
 0x1f9   : > { %v1834_v11 = vsel %vm952_vm4, %v2972_v5, %v2973_v6  ;;  %v1961_v5 = vadd.s32 4294967276, %v3613_v53 }
 0x1fa   : > { %v2951_v41 = vpop.permute.xlu1 %2950 }
 0x1fb   : > { %v2953_v1 = vunpack.i.h.bf16 %v2951_v41  ;;  %v2952_v60 = vunpack.i.l.bf16 %v2951_v41  ;;  %vm1963_vm12 = vcmp.ge.s32.totalorder %v1961_v5, 0  ;;  %vm1965_vm13 = vcmp.lt.s32.totalorder %v1961_v5, 16 }
 0x1fc   : > { %1917 = vmatpush.bf16.msrb.mxu1 %v1889_v34  ;;  %vm3769_vm14 = vmand %vm1963_vm12, %vm1965_vm13 }
 0x1fd   : > { %v3734_v44 = vpack.c.bf16 %v2968_v32, %v2953_v1  ;;  %v1847_v38 = vsel %vm967_vm5, %v2952_v60, %v2953_v1  ;;  %v2790_v60 = vld [vmem:[%s4260_s16] sm:$0xff]  ;;  %v1318_v1 = vpop.f32.mrf.mxu1 }
 0x1fe   : > { %v1887_v48 = vpack.c.bf16 %v1848_v33, %v1847_v38 }
 0x1ff   : > { %1190 = vrot.lane.b32.xlu0 %v3472_v7, %s3267_s9  ;;  %s4325_s9 = sld [smem:[#allocation14_spill]] }
 0x200   : > { %1918 = vmatpush.bf16.msrb.mxu1 %v1887_v48 }
 0x202   : > { %v2956_v10 = vpop.permute.xlu1 %2955 }
 0x203   : > { %v2958_v3 = vunpack.i.h.bf16 %v2956_v10  ;;  %v2957_v9 = vunpack.i.l.bf16 %v2956_v10  ;;  %v1903_v10 = vpop.permute.xlu2 %1902 }
 0x205   : > { %v3740_v13 = vpack.c.bf16 %v2973_v6, %v2958_v3  ;;  %v1833_v14 = vsel %vm952_vm4, %v2957_v9, %v2958_v3  ;;  %v1320_v48 = vpop.f32.mrf.mxu1 }
 0x206   : > { %v1885_v21 = vpack.c.bf16 %v1834_v11, %v1833_v14 }
 0x208   : > { %1919 = vmatpush.bf16.msrb.mxu1 %v1885_v21 }
 0x20a   : > { %v1898_v6 = vpop.permute.xlu1 %1897 }
 0x20b   : > { %v1946_v14 = vpop.permute.xlu2 %1945 }
 0x20c   : > { %1920 = vmatpush.bf16.msrb.mxu1 %v1883_v19 }
 0x20f   : > { %2753 = vmatmul.msk.bf16.vlgmr.msrb.gmra.mxu1 %vm1759_vm9, %v2790_v60 }
 0x212   : > { %v1944_v43 = vpop.permute.xlu1 %1943 }
 0x21a   : > { %v1137_v48 = vpop.permute.xlu1 %1136 }
 0x245   : > { %v1579_v28 = vpop.f32.mrf.mxu1 }
 0x246   : > { %v1142_v28 = vpop.permute.xlu2 %1141 }
 0x249   : > { %v2976_v7 = vpop.permute.xlu0 %2975 }
 0x24a   : > { %v2978_v32 = vunpack.i.h.bf16 %v2976_v7  ;;  %v2977_v27 = vunpack.i.l.bf16 %v2976_v7 }
 0x24c   : > { %v1118_v34 = vsel %vm967_vm5, %v2977_v27, %v2854_v30  ;;  %v1119_v41 = vsel %vm967_vm5, %v2978_v32, %v2855_v29 }
 0x24d   : > { %v1130_v33 = vpack.c.bf16 %v1119_v41, %v1118_v34  ;;  %v1581_v29 = vpop.f32.mrf.mxu1 }
 0x24e   : > { %v1187_v29 = vpop.permute.xlu1 %1186 }
 0x24f   : > { %1157 = vmatpush.bf16.msrb.mxu2 %v1130_v33 }
 0x251   : > { %v2981_v38 = vpop.permute.xlu0 %2980 }
 0x252   : > { %v2983_v40 = vunpack.i.h.bf16 %v2981_v38  ;;  %v2982_v2 = vunpack.i.l.bf16 %v2981_v38 }
 0x254   : > { %v1104_v15 = vsel %vm952_vm4, %v2982_v2, %v2869_v46  ;;  %v1105_v19 = vsel %vm952_vm4, %v2983_v40, %v2870_v45  ;;  %v1276_v2 = vld [vmem:[%s4325_s9 + $0x8] sm:$0xff] }
 0x255   : > { %v1128_v30 = vpack.c.bf16 %v1105_v19, %v1104_v15  ;;  %v1275_v15 = vld [vmem:[%s4325_s9] sm:$0xff]  ;;  %v2064_v19 = vld [vmem:[%s4263_s19 + $0x8] sm:$0xff] }
 0x257   : > { %1158 = vmatpush.bf16.msrb.mxu2 %v1128_v30 }
 0x259   : > { %v1942_v46 = vpop.permute.xlu0 %1941 }
 0x25a   : > { %v1949_v3 = vsel %vm1453_vm6, %v1942_v46, %v1944_v43 }
 0x25b   : > { %1159 = vmatpush.bf16.msrb.mxu2 %v1126_v22 }
 0x25e   : > { %2718 = vmatmul.msk.bf16.vlgmr.msrb.gmra.mxu2 %vm1027_vm7, %v3553_v57 }
 0x261   : > { %v1948_v22 = vpop.permute.xlu0 %1947 }
 0x262   : > { %v1950_v7 = vsel %vm1453_vm6, %v1946_v14, %v1948_v22 }
 0x269   : > { %v1185_v30 = vpop.permute.xlu0 %1184 }
 0x28c   : > { %v1922_v45 = vpop.f32.mrf.mxu1 }
 0x28d   : > { %v1923_v9 = vadd.f32 %v1922_v45, %v1898_v6  ;;  %v1205_v6 = vadd.s32 4294967286, %v3613_v53  ;;  %v1189_v45 = vpop.permute.xlu2 %1188 }
 0x28f   : > { %v1955_v18 = vadd.f32 %v1949_v3, %v1923_v9  ;;  %vm1207_vm2 = vcmp.ge.s32.totalorder %v1205_v6, 0  ;;  %vm1209_vm3 = vcmp.lt.s32.totalorder %v1205_v6, 16  ;;  %v1191_v3 = vpop.permute.xlu0 %1190 }
 0x290   : > { %vm1211_vm11 = vmand %vm1207_vm2, %vm1209_vm3  ;;  %v1194_v17 = vsel %vm1192_vm1, %v1189_v45, %v1191_v3 }
 0x291   : > { %v3775_v57 = vsel %vm3769_vm14, %v1955_v18, 0.0 }
 0x292   : > { %vm1977_vm15 = vcmp.ge.f32.partialorder %v3775_v57, 0.0  ;;  %v1981_v11 = vmul.f32 0.1, %v3775_v57 }
 0x294   : > { %v3780_v21 = vsel %vm1977_vm15, %v3775_v57, %v1981_v11  ;;  %v1924_v60 = vpop.f32.mrf.mxu1  ;;  %vm1260_vm15 = vcmask 998400  }
 0x295   : > { %v1925_v32 = vadd.f32 %v1924_v60, %v1903_v10  ;;  %v2989_v27 = vpack.i.bf16 0.0, %v3780_v21  ;;  %v1193_v10 = vsel %vm1192_vm1, %v1185_v30, %v1187_v29  ;;  %vm2117_vm1 = vcmp.lt.s32.totalorder %v2113_v25, 16 }
 0x297   : > { %v1957_v34 = vadd.f32 %v1950_v7, %v1925_v32  ;;  %2990 = vrot.lane.b32.xlu0 %v2989_v27, %s3268_s7  ;;  %2985 = vrot.lane.b32.xlu1 %v2989_v27, %s4280_s30 }
 0x299   : > { %v3787_v41 = vsel %vm3769_vm14, %v1957_v34, 0.0  ;;  %vm2029_vm14 = vcmask 973824  }
 0x29a   : > { %vm1979_vm0 = vcmp.ge.f32.partialorder %v3787_v41, 0.0  ;;  %v1983_v1 = vmul.f32 0.1, %v3787_v41 }
 0x29c   : > { %v3792_v33 = vsel %vm1979_vm0, %v3787_v41, %v1983_v1  ;;  %vm2115_vm0 = vcmp.ge.s32.totalorder %v2113_v25, 0 }
 0x29d   : > { %v2994_v38 = vpack.i.bf16 0.0, %v3792_v33  ;;  %v2053_v40 = vpack.c.bf16 %v3792_v33, %v3780_v21  ;;  %vm2119_vm2 = vmand %vm2115_vm0, %vm2117_vm1 }
 0x29f   : > { %2995 = vrot.lane.b32.xlu2 %v2994_v38, %s4280_s30  ;;  %3015 = vrot.lane.b32.xlu0 %v2994_v38, %s4287_s12  ;;  %s3269_s30 = smov 120  }
 0x2a0   : > { %3010 = vrot.lane.b32.xlu1 %v2994_v38, %s3268_s7  ;;  %s4345_s7 = sld [smem:[#allocation21_spill]] }
 0x2a7   : > { %3000 = vrot.lane.b32.xlu2 %v2989_v27, %s4287_s12  ;;  %3020 = vrot.lane.b32.xlu0 %v2994_v38, %s4291_s4 }
 0x2af   : > { %3005 = vrot.lane.b32.xlu2 %v2989_v27, %s4291_s4  ;;  %1284 = vperm.xlu0 %2911, %v1276_v2   ;;  %v2063_v2 = vld [vmem:[%s4263_s19] sm:$0xff] }
 0x2b7   : > { %1279 = vperm.xlu2 %2913, %v1275_v15  }
 0x2bf   : > { %2072 = vperm.xlu2 %2913, %v2064_v19  }
 0x2e1   : > { %v1161_v5 = vpop.f32.mrf.mxu2 }
 0x2e2   : > { %v1162_v46 = vadd.f32 %v1161_v5, %v1137_v48 }
 0x2e4   : > { %v1199_v43 = vadd.f32 %v1193_v10, %v1162_v46 }
 0x2e6   : > { %v3812_v18 = vsel %vm1211_vm11, %v1199_v43, 0.0 }
 0x2e7   : > { %v1225_v14 = vmul.f32 0.1, %v3812_v18  ;;  %vm1221_vm12 = vcmp.ge.f32.partialorder %v3812_v18, 0.0 }
 0x2e9   : > { %v1163_v9 = vpop.f32.mrf.mxu2  ;;  %v3821_v32 = vsel %vm1221_vm12, %v3812_v18, %v1225_v14 }
 0x2ea   : > { %v1164_v22 = vadd.f32 %v1163_v9, %v1142_v28 }
 0x2ec   : > { %v1201_v11 = vadd.f32 %v1194_v17, %v1164_v22 }
 0x2ee   : > { %v3815_v60 = vsel %vm1211_vm11, %v1201_v11, 0.0 }
 0x2ef   : > { %v1227_v7 = vmul.f32 0.1, %v3815_v60  ;;  %vm1223_vm13 = vcmp.ge.f32.partialorder %v3815_v60, 0.0 }
 0x2f1   : > { %v3824_v27 = vsel %vm1223_vm13, %v3815_v60, %v1227_v7 }
 0x2f2   : > { %v3024_v34 = vpack.i.bf16 %v3824_v27, %v3821_v32  ;;  %v1269_v1 = vpack.c.bf16 %v3824_v27, %v3821_v32 }
 0x2f4   : > { %3025 = vrot.lane.b32.xlu1 %v3024_v34, %s4287_s12 }
 0x2f9   : > { %v2996_v38 = vpop.permute.xlu2 %2995 }
 0x2fa   : > { %v2998_v15 = vunpack.i.h.bf16 %v2996_v38  ;;  %v2997_v19 = vunpack.i.l.bf16 %v2996_v38 }
 0x2fc   : > { %3030 = vrot.lane.b32.xlu1 %v3024_v34, %s4291_s4  ;;  %v2046_v5 = vsel %vm1017_vm10, %v2997_v19, %v2998_v15 }
 0x301   : > { %v3001_v28 = vpop.permute.xlu2 %3000 }
 0x302   : > { %v3003_v17 = vunpack.i.h.bf16 %v3001_v28 }
 0x304   : > { %2067 = vperm.xlu1 %2912, %v2063_v2   ;;  %v3002_v2 = vunpack.i.l.bf16 %v3001_v28 }
 0x309   : > { %v2991_v48 = vpop.permute.xlu0 %2990  ;;  %v2986_v30 = vpop.permute.xlu1 %2985 }
 0x30a   : > { %v2988_v29 = vunpack.i.h.bf16 %v2986_v30  ;;  %v2987_v6 = vunpack.i.l.bf16 %v2986_v30  ;;  %v2993_v45 = vunpack.i.h.bf16 %v2991_v48  ;;  %v2992_v3 = vunpack.i.l.bf16 %v2991_v48  ;;  %v3006_v19 = vpop.permute.xlu2 %3005 }
 0x30c   : > { %v3836_v46 = vpack.c.bf16 %v2998_v15, %v2988_v29  ;;  %v2045_v10 = vsel %vm1017_vm10, %v2987_v6, %v2988_v29  ;;  %v2030_v30 = vsel %vm2029_vm14, %v2992_v3, %v2993_v45 }
 0x30d   : > { %v2061_v43 = vpack.c.bf16 %v2046_v5, %v2045_v10  ;;  %v3008_v5 = vunpack.i.h.bf16 %v3006_v19  ;;  %v3007_v10 = vunpack.i.l.bf16 %v3006_v19 }
 0x30f   : > { %2086 = vmatpush.bf16.msrb.mxu3 %v2061_v43  ;;  %v2001_v28 = vsel %vm1245_vm8, %v3007_v10, %v3008_v5 }
 0x311   : > { %v3016_v9 = vpop.permute.xlu0 %3015 }
 0x312   : > { %v3018_v22 = vunpack.i.h.bf16 %v3016_v9  ;;  %v3011_v11 = vpop.permute.xlu1 %3010  ;;  %v3017_v14 = vunpack.i.l.bf16 %v3016_v9  ;;  %v2015_v9 = vsel %vm1260_vm15, %v3002_v2, %v3003_v17 }
 0x313   : > { %v3013_v7 = vunpack.i.h.bf16 %v3011_v11  ;;  %v3012_v34 = vunpack.i.l.bf16 %v3011_v11 }
 0x314   : > { %v3839_v38 = vpack.c.bf16 %v3018_v22, %v3003_v17  ;;  %v2016_v48 = vsel %vm1260_vm15, %v3017_v14, %v3018_v22  ;;  %v3852_v22 = vld [vmem:[%s4262_s18] sm:$0xff] }
 0x315   : > { %v3841_v15 = vpack.c.bf16 %v3013_v7, %v2993_v45  ;;  %v2031_v29 = vsel %vm2029_vm14, %v3012_v34, %v3013_v7  ;;  %v2057_v0 = vpack.c.bf16 %v2016_v48, %v2015_v9 }
 0x316   : > { %v2059_v6 = vpack.c.bf16 %v2031_v29, %v2030_v30 }
 0x318   : > { %2087 = vmatpush.bf16.msrb.mxu3 %v2059_v6 }
 0x319   : > { %v3021_v43 = vpop.permute.xlu0 %3020 }
 0x31a   : > { %v3023_v63 = vunpack.i.h.bf16 %v3021_v43  ;;  %v3022_v11 = vunpack.i.l.bf16 %v3021_v43 }
 0x31c   : > { %v3845_v56 = vpack.c.bf16 %v3023_v63, %v3008_v5  ;;  %2088 = vmatpush.bf16.msrb.mxu3 %v2057_v0  ;;  %v2002_v45 = vsel %vm1245_vm8, %v3022_v11, %v3023_v63  ;;  %v1394_v11 = vld [vmem:[%s4326_s26 + $0x8] sm:$0xff] }
 0x31d   : > { %v2055_v3 = vpack.c.bf16 %v2002_v45, %v2001_v28  ;;  %v1325_v28 = vadd.s32 4294967289, %v3613_v53 }
 0x31f   : > { %vm1327_vm12 = vcmp.ge.s32.totalorder %v1325_v28, 0  ;;  %vm1329_vm13 = vcmp.lt.s32.totalorder %v1325_v28, 16 }
 0x320   : > { %2089 = vmatpush.bf16.msrb.mxu3 %v2055_v3  ;;  %vm1331_vm14 = vmand %vm1327_vm12, %vm1329_vm13 }
 0x324   : > { %2090 = vmatpush.bf16.msrb.mxu3 %v2053_v40 }
 0x327   : > { %2759 = vmatmul.msk.bf16.vlgmr.msrb.gmra.mxu3 %vm1759_vm9, %v3852_v22 }
 0x366   : > { %v3026_v17 = vpop.permute.xlu1 %3025 }
 0x367   : > { %v3028_v0 = vunpack.i.h.bf16 %v3026_v17  ;;  %v3027_v14 = vunpack.i.l.bf16 %v3026_v17 }
 0x369   : > { %v1261_v63 = vsel %vm1260_vm15, %v3027_v14, %v2917_v31  ;;  %v1262_v7 = vsel %vm1260_vm15, %v3028_v0, %v2918_v26  ;;  %v1280_v26 = vpop.permute.xlu2 %1279  ;;  %v1285_v0 = vpop.permute.xlu0 %1284 }
 0x36a   : > { %v1273_v34 = vpack.c.bf16 %v1262_v7, %v1261_v63 }
 0x36c   : > { %1300 = vmatpush.bf16.msra.mxu0 %v1273_v34 }
 0x36e   : > { %v3031_v2 = vpop.permute.xlu1 %3030 }
 0x36f   : > { %v3033_v19 = vunpack.i.h.bf16 %v3031_v2  ;;  %v3032_v21 = vunpack.i.l.bf16 %v3031_v2 }
 0x371   : > { %v1246_v33 = vsel %vm1245_vm8, %v3032_v21, %v2922_v37  ;;  %v1247_v40 = vsel %vm1245_vm8, %v3033_v19, %v2923_v36  ;;  %v2073_v27 = vpop.permute.xlu2 %2072 }
 0x372   : > { %v1271_v30 = vpack.c.bf16 %v1247_v40, %v1246_v33  ;;  %v1393_v33 = vld [vmem:[%s4326_s26] sm:$0xff] }
 0x374   : > { %1301 = vmatpush.bf16.msra.mxu0 %v1271_v30 }
 0x376   : > { %v2068_v31 = vpop.permute.xlu1 %2067 }
 0x378   : > { %1302 = vmatpush.bf16.msra.mxu0 %v1269_v1 }
 0x37b   : > { %2724 = vmatmul.msk.bf16.vlgmr.msra.gmra.mxu0 %vm1027_vm7, %v3678_v62 }
 0x3aa   : > { %v2092_v37 = vpop.f32.mrf.mxu3 }
 0x3ab   : > { %v2093_v35 = vadd.f32 %v2092_v37, %v2068_v31  ;;  %v2213_v37 = vld [vmem:[%s4265_s21] sm:$0xff] }
 0x3ad   : > { %v2125_v29 = vsel %vm2119_vm2, %v2093_v35, 0.0  ;;  %v2214_v35 = vld [vmem:[%s4265_s21 + $0x8] sm:$0xff] }
 0x3ae   : > { %vm2129_vm3 = vcmp.ge.f32.partialorder %v2125_v29, 0.0  ;;  %v2133_v36 = vmul.f32 0.1, %v2125_v29 }
 0x3b0   : > { %v3877_v6 = vsel %vm2129_vm3, %v2125_v29, %v2133_v36 }
 0x3b1   : > { %v3039_v32 = vpack.i.bf16 0.0, %v3877_v6 }
 0x3b2   : > { %v2094_v1 = vpop.f32.mrf.mxu3 }
 0x3b3   : > { %v2095_v48 = vadd.f32 %v2094_v1, %v2073_v27  ;;  %3040 = vrot.lane.b32.xlu1 %v3039_v32, %s4291_s4  ;;  %3035 = vrot.lane.b32.xlu2 %v3039_v32, %s4289_s27 }
 0x3b5   : > { %v2127_v62 = vsel %vm2119_vm2, %v2095_v48, 0.0 }
 0x3b6   : > { %vm2131_vm11 = vcmp.ge.f32.partialorder %v2127_v62, 0.0  ;;  %v2135_v5 = vmul.f32 0.1, %v2127_v62 }
 0x3b8   : > { %v3882_v10 = vsel %vm2131_vm11, %v2127_v62, %v2135_v5  ;;  %vm2273_vm11 = vcmask 982016  }
 0x3b9   : > { %v3044_v43 = vpack.i.bf16 0.0, %v3882_v10  ;;  %v2203_v9 = vpack.c.bf16 %v3882_v10, %v3877_v6 }
 0x3bb   : > { %3045 = vrot.lane.b32.xlu0 %v3044_v43, %s4289_s27  ;;  %3050 = vrot.lane.b32.xlu2 %v3044_v43, %s4291_s4 }
 0x3c3   : > { %3075 = vrot.lane.b32.xlu2 %v3039_v32, %s3258_s25 }
 0x3cb   : > { %1402 = vperm.xlu2 %2913, %v1394_v11  }
 0x3d3   : > { %1449 = vrot.lane.b32.xlu2 %v3815_v60, %s4289_s27 }
 0x3db   : > { %2265 = vrot.lane.b32.xlu2 %v3775_v57, %s3269_s30 }
 0x3f8   : > { %v1304_v45 = vpop.f32.mrf.mxu0 }
 0x3f9   : > { %v1305_v3 = vadd.f32 %v1304_v45, %v1280_v26 }
 0x3fb   : > { %v1337_v17 = vsel %vm1331_vm14, %v1305_v3, 0.0 }
 0x3fc   : > { %v1345_v7 = vmul.f32 0.1, %v1337_v17  ;;  %vm1341_vm0 = vcmp.ge.f32.partialorder %v1337_v17, 0.0 }
 0x3fe   : > { %v3898_v2 = vsel %vm1341_vm0, %v1337_v17, %v1345_v7 }
 0x400   : > { %v1306_v14 = vpop.f32.mrf.mxu0 }
 0x401   : > { %v1307_v63 = vadd.f32 %v1306_v14, %v1285_v0 }
 0x403   : > { %v1339_v34 = vsel %vm1331_vm14, %v1307_v63, 0.0 }
 0x404   : > { %vm1343_vm1 = vcmp.ge.f32.partialorder %v1339_v34, 0.0  ;;  %v1347_v60 = vmul.f32 0.1, %v1339_v34 }
 0x406   : > { %v3900_v19 = vsel %vm1343_vm1, %v1339_v34, %v1347_v60 }
 0x407   : > { %v3054_v57 = vpack.i.bf16 %v3900_v19, %v3898_v2  ;;  %v1387_v21 = vpack.c.bf16 %v3900_v19, %v3898_v2 }
 0x409   : > { %3055 = vrot.lane.b32.xlu0 %v3054_v57, %s3257_s5  ;;  %3065 = vrot.lane.b32.xlu1 %v3054_v57, %s3258_s25 }
 0x40d   : > { %v3036_v40 = vpop.permute.xlu2 %3035 }
 0x40e   : > { %v3037_v36 = vunpack.i.l.bf16 %v3036_v40 }
 0x411   : > { %3060 = vrot.lane.b32.xlu0 %v3039_v32, %s3257_s5  ;;  %3070 = vrot.lane.b32.xlu1 %v3044_v43, %s3257_s5 }
 0x415   : > { %v3051_v30 = vpop.permute.xlu2 %3050 }
 0x416   : > { %v3053_v26 = vunpack.i.h.bf16 %v3051_v30  ;;  %v3052_v5 = vunpack.i.l.bf16 %v3051_v30 }
 0x418   : > { %v2182_v3 = vsel %vm1245_vm8, %v3052_v5, %v3053_v26 }
 0x419   : > { %3080 = vrot.lane.b32.xlu0 %v3044_v43, %s3258_s25  ;;  %1397 = vperm.xlu1 %2912, %v1393_v33  }
 0x421   : > { %1445 = vrot.lane.b32.xlu0 %v3812_v18, %s4289_s27  ;;  %3085 = vrot.lane.b32.xlu1 %v3256_v4, %s4289_s27  ;;  %v3038_v18 = vunpack.i.h.bf16 %v3036_v40  ;;  %s4338_s27 = sld [smem:[#allocation20_spill]] }
 0x423   : > { %v2195_v62 = vsel %vm1453_vm6, %v3037_v36, %v3038_v18 }
 0x425   : > { %v3041_v25 = vpop.permute.xlu1 %3040 }
 0x426   : > { %v3043_v31 = vunpack.i.h.bf16 %v3041_v25  ;;  %v3042_v27 = vunpack.i.l.bf16 %v3041_v25 }
 0x427   : > { %s4339_s4 = smov %s4338_s27 }
 0x428   : > { %v3924_v29 = vpack.c.bf16 %v3053_v26, %v3043_v31  ;;  %v2181_v45 = vsel %vm1245_vm8, %v3042_v27, %v3043_v31 }
 0x429   : > { %2217 = vperm.xlu0 %2911, %v2213_v37   ;;  %2222 = vperm.xlu1 %2912, %v2214_v35   ;;  %v2209_v17 = vpack.c.bf16 %v2182_v3, %v2181_v45 }
 0x42d   : > { %v3046_v32 = vpop.permute.xlu0 %3045 }
 0x42e   : > { %v3048_v1 = vunpack.i.h.bf16 %v3046_v32  ;;  %v3047_v48 = vunpack.i.l.bf16 %v3046_v32 }
 0x430   : > { %v2196_v43 = vsel %vm1453_vm6, %v3047_v48, %v3048_v1  ;;  %v3928_v11 = vpack.c.bf16 %v3048_v1, %v3038_v18 }
 0x431   : > { %v2211_v28 = vpack.c.bf16 %v2196_v43, %v2195_v62  ;;  %3090 = vrot.lane.b32.xlu0 %v3256_v4, %s3269_s30  ;;  %2269 = vrot.lane.b32.xlu1 %v3787_v41, %s3269_s30  ;;  %s4341_s30 = smov 116  }
 0x433   : > { %2236 = vmatpush.bf16.msra.mxu1 %v2211_v28 }
 0x437   : > { %2237 = vmatpush.bf16.msra.mxu1 %v2209_v17  ;;  %v1466_v17 = vadd.s32 4294967290, %v3613_v53 }
 0x439   : > { %vm1468_vm2 = vcmp.ge.s32.totalorder %v1466_v17, 0  ;;  %vm1470_vm3 = vcmp.lt.s32.totalorder %v1466_v17, 16 }
 0x43a   : > { %vm3984_vm14 = vmand %vm1468_vm2, %vm1470_vm3 }
 0x47b   : > { %v3056_v0 = vpop.permute.xlu0 %3055  ;;  %v3066_v14 = vpop.permute.xlu1 %3065 }
 0x47c   : > { %v3058_v63 = vunpack.i.h.bf16 %v3056_v0  ;;  %v3057_v7 = vunpack.i.l.bf16 %v3056_v0  ;;  %v3068_v34 = vunpack.i.h.bf16 %v3066_v14  ;;  %v3067_v60 = vunpack.i.l.bf16 %v3066_v14 }
 0x47e   : > { %v1380_v57 = vsel %vm967_vm5, %v3058_v63, %v2885_v49  ;;  %v1379_v41 = vsel %vm967_vm5, %v3057_v7, %v2884_v50  ;;  %v1365_v40 = vsel %vm952_vm4, %v3067_v60, %v2889_v59  ;;  %v1366_v30 = vsel %vm952_vm4, %v3068_v34, %v2890_v58  ;;  %v3952_v59 = vpop.permute.xlu2 %3075 }
 0x47f   : > { %v1391_v33 = vpack.c.bf16 %v1380_v57, %v1379_v41  ;;  %v1389_v31 = vpack.c.bf16 %v1366_v30, %v1365_v40  ;;  %v3078_v58 = vunpack.i.h.bf16 %v3952_v59  ;;  %v3077_v32 = vunpack.i.l.bf16 %v3952_v59  ;;  %v2388_v41 = vld [vmem:[%s4267_s23] sm:$0xff] }
 0x480   : > { %v2286_v34 = vadd.s32 4294967284, %v3613_v53 }
 0x481   : > { %1418 = vmatpush.bf16.msra.mxu2 %v1391_v33  ;;  %v2153_v62 = vsel %vm952_vm4, %v3077_v32, %v3078_v58 }
 0x482   : > { %vm2288_vm12 = vcmp.ge.s32.totalorder %v2286_v34, 0  ;;  %vm2290_vm13 = vcmp.lt.s32.totalorder %v2286_v34, 16 }
 0x483   : > { %v3061_v25 = vpop.permute.xlu0 %3060  ;;  %v3071_v26 = vpop.permute.xlu1 %3070  ;;  %vm3989_vm0 = vmand %vm2288_vm12, %vm2290_vm13  ;;  %vm1521_vm12 = vcmask 965632   ;;  %vm2369_vm13 = vcmask 883712  }
 0x484   : > { %v3063_v37 = vunpack.i.h.bf16 %v3061_v25  ;;  %v3062_v35 = vunpack.i.l.bf16 %v3061_v25  ;;  %v3073_v49 = vunpack.i.h.bf16 %v3071_v26  ;;  %v3072_v18 = vunpack.i.l.bf16 %v3071_v26 }
 0x485   : > { %1419 = vmatpush.bf16.msra.mxu2 %v1389_v31 }
 0x486   : > { %v3948_v47 = vpack.c.bf16 %v3073_v49, %v3063_v37  ;;  %v2167_v50 = vsel %vm967_vm5, %v3062_v35, %v3063_v37  ;;  %v2168_v36 = vsel %vm967_vm5, %v3072_v18, %v3073_v49  ;;  %v1403_v43 = vpop.permute.xlu2 %1402 }
 0x487   : > { %v2207_v54 = vpack.c.bf16 %v2168_v36, %v2167_v50 }
 0x489   : > { %1420 = vmatpush.bf16.msra.mxu2 %v1387_v21  ;;  %2238 = vmatpush.bf16.msra.mxu1 %v2207_v54  ;;  %v3974_v21 = vld [vmem:[%s4264_s20] sm:$0xff] }
 0x48b   : > { %v3959_v27 = vpop.permute.xlu0 %3080  ;;  %v1398_v5 = vpop.permute.xlu1 %1397 }
 0x48c   : > { %v3083_v1 = vunpack.i.h.bf16 %v3959_v27  ;;  %v3082_v48 = vunpack.i.l.bf16 %v3959_v27  ;;  %2730 = vmatmul.msk.bf16.vlgmr.msra.gmra.mxu2 %vm1027_vm7, %v3582_v23 }
 0x48e   : > { %v2154_v2 = vsel %vm952_vm4, %v3082_v48, %v3083_v1  ;;  %v1450_v3 = vpop.permute.xlu2 %1449 }
 0x48f   : > { %v2205_v19 = vpack.c.bf16 %v2154_v2, %v2153_v62 }
 0x491   : > { %2239 = vmatpush.bf16.msra.mxu1 %v2205_v19 }
 0x493   : > { %v1446_v23 = vpop.permute.xlu0 %1445  ;;  %v3086_v45 = vpop.permute.xlu1 %3085 }
 0x494   : > { %v3087_v0 = vunpack.i.l.bf16 %v3086_v45  ;;  %v3088_v57 = vunpack.i.h.bf16 %v3086_v45 }
 0x495   : > { %2240 = vmatpush.bf16.msra.mxu1 %v2203_v9 }
 0x496   : > { %v1454_v10 = vsel %vm1453_vm6, %v1446_v23, %v3087_v0  ;;  %v2266_v40 = vpop.permute.xlu2 %2265  ;;  %v1455_v18 = vsel %vm1453_vm6, %v1450_v3, %v3088_v57  ;;  %v1536_v57 = vld [vmem:[%s4255_s11] sm:$0xff] }
 0x498   : > { %2765 = vmatmul.msk.bf16.vlgmr.msra.gmra.mxu1 %vm1759_vm9, %v3974_v21 }
 0x49b   : > { %v2218_v28 = vpop.permute.xlu0 %2217  ;;  %v2223_v9 = vpop.permute.xlu1 %2222 }
 0x4a3   : > { %v3091_v63 = vpop.permute.xlu0 %3090 }
 0x4a4   : > { %v3092_v6 = vunpack.i.l.bf16 %v3091_v63  ;;  %v3093_v54 = vunpack.i.h.bf16 %v3091_v63 }
 0x4a6   : > { %v2274_v25 = vsel %vm2273_vm11, %v2266_v40, %v3092_v6 }
 0x50f   : > { %v1422_v14 = vpop.f32.mrf.mxu2 }
 0x510   : > { %v1423_v7 = vadd.f32 %v1422_v14, %v1398_v5  ;;  %v2270_v5 = vpop.permute.xlu1 %2269 }
 0x511   : > { %v2275_v45 = vsel %vm2273_vm11, %v2270_v5, %v3093_v54 }
 0x512   : > { %v1460_v60 = vadd.f32 %v1454_v10, %v1423_v7 }
 0x514   : > { %v3995_v37 = vsel %vm3984_vm14, %v1460_v60, 0.0  ;;  %v1537_v60 = vld [vmem:[%s4255_s11 + $0x8] sm:$0xff] }
 0x515   : > { %v2242_v33 = vpop.f32.mrf.mxu1  ;;  %v1486_v32 = vmul.f32 0.1, %v3995_v37  ;;  %vm1482_vm2 = vcmp.ge.f32.partialorder %v3995_v37, 0.0 }
 0x516   : > { %v2243_v30 = vadd.f32 %v2242_v33, %v2218_v28  ;;  %v2389_v33 = vld [vmem:[%s4267_s23 + $0x8] sm:$0xff] }
 0x517   : > { %v1424_v31 = vpop.f32.mrf.mxu2  ;;  %v4018_v3 = vsel %vm1482_vm2, %v3995_v37, %v1486_v32 }
 0x518   : > { %v2280_v35 = vadd.f32 %v2274_v25, %v2243_v30  ;;  %v1425_v49 = vadd.f32 %v1424_v31, %v1403_v43  ;;  %v4332_v31 = vunpack.i.h.bf16 %v3669_v51 }
 0x51a   : > { %v4000_v50 = vsel %vm3989_vm0, %v2280_v35, 0.0  ;;  %v1462_v36 = vadd.f32 %v1455_v18, %v1425_v49 }
 0x51b   : > { %vm2302_vm1 = vcmp.ge.f32.partialorder %v4000_v50, 0.0  ;;  %v2306_v48 = vmul.f32 0.1, %v4000_v50 }
 0x51c   : > { %v4007_v62 = vsel %vm3984_vm14, %v1462_v36, 0.0  ;;  %vm1506_vm14 = vcmask 1006592  }
 0x51d   : > { %v4011_v2 = vsel %vm2302_vm1, %v4000_v50, %v2306_v48  ;;  %v1488_v19 = vmul.f32 0.1, %v4007_v62  ;;  %v2244_v23 = vpop.f32.mrf.mxu1  ;;  %vm1484_vm3 = vcmp.ge.f32.partialorder %v4007_v62, 0.0 }
 0x51e   : > { %v2245_v43 = vadd.f32 %v2244_v23, %v2223_v9  ;;  %v3094_v28 = vpack.i.bf16 0.0, %v4011_v2 }
 0x51f   : > { %v4021_v17 = vsel %vm1484_vm3, %v4007_v62, %v1488_v19 }
 0x520   : > { %v2282_v0 = vadd.f32 %v2275_v45, %v2245_v43  ;;  %3095 = vrot.lane.b32.xlu1 %v3094_v28, %s3270_s6  ;;  %v3109_v14 = vpack.i.bf16 %v4021_v17, %v4018_v3  ;;  %v1530_v63 = vpack.c.bf16 %v4021_v17, %v4018_v3  ;;  %v4333_v45 = vunpack.i.l.bf16 %v3671_v55 }
 0x521   : > { %v4334_v17 = vunpack.i.h.bf16 %v3671_v55 }
 0x522   : > { %v4029_v7 = vsel %vm3989_vm0, %v2282_v0, 0.0  ;;  %3110 = vrot.lane.b32.xlu0 %v3109_v14, %s3265_s24  ;;  %3100 = vrot.lane.b32.xlu2 %v3109_v14, %s4331_s1  ;;  %vm2354_vm0 = vcmask 924672  }
 0x523   : > { %vm2304_vm11 = vcmp.ge.f32.partialorder %v4029_v7, 0.0  ;;  %v2308_v34 = vmul.f32 0.1, %v4029_v7 }
 0x525   : > { %v4036_v6 = vsel %vm2304_vm11, %v4029_v7, %v2308_v34 }
 0x526   : > { %v3119_v10 = vpack.i.bf16 0.0, %v4036_v6  ;;  %v2378_v9 = vpack.c.bf16 %v4036_v6, %v4011_v2 }
 0x528   : > { %3120 = vrot.lane.b32.xlu1 %v3119_v10, %s3271_s2 }
 0x52a   : > { %3105 = vrot.lane.b32.xlu2 %v3119_v10, %s3270_s6  ;;  %3115 = vrot.lane.b32.xlu0 %v3094_v28, %s3271_s2  ;;  %s4342_s6 = sld [smem:[#allocation18_spill]] }
 0x530   : > { %3135 = vrot.lane.b32.xlu1 %v3094_v28, %s3265_s24 }
 0x532   : > { %3125 = vrot.lane.b32.xlu2 %v3094_v28, %s4331_s1  ;;  %3130 = vrot.lane.b32.xlu0 %v3119_v10, %s4331_s1  ;;  %s4336_s1 = smov 125  }
 0x538   : > { %1545 = vperm.xlu1 %2912, %v1537_v60  }
 0x53a   : > { %3140 = vrot.lane.b32.xlu2 %v3119_v10, %s3265_s24  ;;  %1540 = vperm.xlu0 %2911, %v1536_v57  }
 0x542   : > { %2392 = vperm.xlu2 %2913, %v2388_v41   ;;  %2397 = vperm.xlu0 %2911, %v2389_v33  }
 0x57c   : > { %v3101_v40 = vpop.permute.xlu2 %3100 }
 0x57d   : > { %v3103_v30 = vunpack.i.h.bf16 %v3101_v40  ;;  %v3102_v25 = vunpack.i.l.bf16 %v3101_v40 }
 0x57f   : > { %v1522_v26 = vsel %vm1521_vm12, %v3102_v25, %v2927_v61  ;;  %v1523_v35 = vsel %vm1521_vm12, %v3103_v30, %v4332_v31 }
 0x580   : > { %v1534_v49 = vpack.c.bf16 %v1523_v35, %v1522_v26 }
 0x582   : > { %1561 = vmatpush.bf16.msrb.mxu0 %v1534_v49 }
 0x584   : > { %v4063_v18 = vpop.permute.xlu2 %3105 }
 0x585   : > { %v3108_v36 = vunpack.i.h.bf16 %v4063_v18  ;;  %v3107_v54 = vunpack.i.l.bf16 %v4063_v18 }
 0x587   : > { %v2371_v51 = vsel %vm2369_vm13, %v3107_v54, %v3108_v36 }
 0x58c   : > { %v3126_v34 = vpop.permute.xlu2 %3125 }
 0x58d   : > { %v3128_v31 = vunpack.i.h.bf16 %v3126_v34  ;;  %v3127_v35 = vunpack.i.l.bf16 %v3126_v34 }
 0x592   : > { %v4067_v32 = vpop.permute.xlu1 %3095 }
 0x593   : > { %v3098_v48 = vunpack.i.h.bf16 %v4067_v32  ;;  %v3097_v19 = vunpack.i.l.bf16 %v4067_v32 }
 0x594   : > { %v3111_v61 = vpop.permute.xlu0 %3110  ;;  %v3141_v49 = vpop.permute.xlu2 %3140 }
 0x595   : > { %v2370_v23 = vsel %vm2369_vm13, %v3097_v19, %v3098_v48  ;;  %v3113_v5 = vunpack.i.h.bf16 %v3111_v61  ;;  %v3112_v43 = vunpack.i.l.bf16 %v3111_v61 }
 0x596   : > { %v2386_v28 = vpack.c.bf16 %v2371_v51, %v2370_v23  ;;  %v3143_v51 = vunpack.i.h.bf16 %v3141_v49  ;;  %v2340_v23 = vsel %vm1521_vm12, %v3127_v35, %v3128_v31 }
 0x597   : > { %v1507_v3 = vsel %vm1506_vm14, %v3112_v43, %v4333_v45  ;;  %v1508_v0 = vsel %vm1506_vm14, %v3113_v5, %v4334_v17 }
 0x598   : > { %2411 = vmatpush.bf16.msra.mxu3 %v2386_v28  ;;  %v1532_v14 = vpack.c.bf16 %v1508_v0, %v1507_v3 }
 0x59a   : > { %1562 = vmatpush.bf16.msrb.mxu0 %v1532_v14  ;;  %v3121_v10 = vpop.permute.xlu1 %3120 }
 0x59b   : > { %v3123_v60 = vunpack.i.h.bf16 %v3121_v10  ;;  %v3122_v57 = vunpack.i.l.bf16 %v3121_v10 }
 0x59c   : > { %v3116_v41 = vpop.permute.xlu0 %3115 }
 0x59d   : > { %v3118_v33 = vunpack.i.h.bf16 %v3116_v41  ;;  %v3117_v40 = vunpack.i.l.bf16 %v3116_v41  ;;  %v2356_v25 = vsel %vm2354_vm0, %v3122_v57, %v3123_v60 }
 0x59e   : > { %1563 = vmatpush.bf16.msrb.mxu0 %v1530_v63 }
 0x59f   : > { %v2355_v30 = vsel %vm2354_vm0, %v3117_v40, %v3118_v33  ;;  %v2385_v2 = vpack.c.bf16 %v3123_v60, %v3118_v33  ;;  %v2438_v33 = vadd.s32 4294967294, %v3613_v53 }
 0x5a0   : > { %v2384_v26 = vpack.c.bf16 %v2356_v25, %v2355_v30  ;;  %v2393_v30 = vpop.permute.xlu2 %2392 }
 0x5a1   : > { %2736 = vmatmul.msk.bf16.vlgmr.msrb.gmra.mxu0 %vm1027_vm7, %v3710_v24  ;;  %vm2440_vm13 = vcmp.ge.s32.totalorder %v2438_v33, 0 }
 0x5a2   : > { %1780 = vmatpush.bf16.msra.mxu0 %v3568_v8  ;;  %v3136_v55 = vpop.permute.xlu1 %3135  ;;  %2412 = vmatpush.bf16.msra.mxu3 %v2384_v26  ;;  %v3142_v8 = vunpack.i.l.bf16 %v3141_v49 }
 0x5a3   : > { %v3138_v32 = vunpack.i.h.bf16 %v3136_v55  ;;  %v3137_v19 = vunpack.i.l.bf16 %v3136_v55 }
 0x5a4   : > { %v3131_v54 = vpop.permute.xlu0 %3130 }
 0x5a5   : > { %v3133_v61 = vunpack.i.h.bf16 %v3131_v54  ;;  %v3132_v63 = vunpack.i.l.bf16 %v3131_v54  ;;  %v2326_v43 = vsel %vm1506_vm14, %v3137_v19, %v3138_v32 }
 0x5a6   : > { %1781 = vmatpush.bf16.msra.mxu0 %v3576_v20  ;;  %v2327_v20 = vsel %vm1506_vm14, %v3142_v8, %v3143_v51  ;;  %vm2442_vm14 = vcmp.lt.s32.totalorder %v2438_v33, 16 }
 0x5a7   : > { %v2341_v24 = vsel %vm1521_vm12, %v3132_v63, %v3133_v61  ;;  %v2380_v28 = vpack.c.bf16 %v2327_v20, %v2326_v43  ;;  %v2383_v6 = vpack.c.bf16 %v3133_v61, %v3128_v31  ;;  %vm2444_vm0 = vmand %vm2440_vm13, %vm2442_vm14  ;;  %v1647_v43 = vld [vmem:[%s4257_s13] sm:$0xff] }
 0x5a8   : > { %v2382_v5 = vpack.c.bf16 %v2341_v24, %v2340_v23 }
 0x5aa   : > { %1782 = vmatpush.bf16.msra.mxu0 %v3517_v39  ;;  %2413 = vmatpush.bf16.msra.mxu3 %v2382_v5  ;;  %v2793_v39 = vld [vmem:[%s4266_s22] sm:$0xff]  ;;  %v1546_v3 = vpop.permute.xlu1 %1545 }
 0x5ae   : > { %1783 = vmatpush.bf16.msra.mxu0 %v3539_v52  ;;  %2414 = vmatpush.bf16.msra.mxu3 %v2380_v28  ;;  %v3214_v52 = vld [vmem:[%s4258_s14] sm:$0xff]  ;;  %v2526_v28 = vld [vmem:[%s4338_s27 + $0x8] sm:$0xff] }
 0x5b2   : > { %1784 = vmatpush.bf16.msra.mxu0 %v3522_v42  ;;  %2415 = vmatpush.bf16.msra.mxu3 %v2378_v9  ;;  %v2387_v42 = vpack.c.bf16 %v3108_v36, %v3098_v48 }
 0x5b5   : > { %2748 = vmatmul.msk.bf16.vlgmr.msra.gmra.mxu0 %vm1759_vm9, %v3214_v52  ;;  %2771 = vmatmul.msk.bf16.vlgmr.msra.gmra.mxu3 %vm1759_vm9, %v2793_v39 }
 0x5b6   : > { %2100 = vmatpush.bf16.msrb.mxu0 %v3836_v46  ;;  %v4335_v46 = vmov 0.0|0.0  }
 0x5ba   : > { %2101 = vmatpush.bf16.msrb.mxu0 %v3841_v15  ;;  %v2381_v15 = vpack.c.bf16 %v3143_v51, %v3138_v32 }
 0x5be   : > { %2102 = vmatpush.bf16.msrb.mxu0 %v3839_v38  ;;  %v1541_v38 = vpop.permute.xlu0 %1540 }
 0x5c2   : > { %2103 = vmatpush.bf16.msrb.mxu0 %v3845_v56  ;;  %v1586_v56 = vadd.s32 4294967295, %v3613_v53 }
 0x5c4   : > { %vm1588_vm1 = vcmp.ge.s32.totalorder %v1586_v56, 0  ;;  %vm1590_vm2 = vcmp.lt.s32.totalorder %v1586_v56, 16 }
 0x5c5   : > { %vm1592_vm3 = vmand %vm1588_vm1, %vm1590_vm2 }
 0x5c6   : > { %2104 = vmatpush.bf16.msrb.mxu0 %v4335_v46  ;;  %v2398_v49 = vpop.permute.xlu0 %2397 }
 0x5c9   : > { %2760 = vmatmul.msk.bf16.vlgmr.msrb.gmra.mxu0 %vm1759_vm9, %v3852_v22 }
 0x5ca   : > { %2425 = vmatpush.bf16.msra.mxu0 %v2387_v42  ;;  %v2525_v42 = vld [vmem:[%s4339_s4] sm:$0xff] }
 0x5ce   : > { %2426 = vmatpush.bf16.msra.mxu0 %v2385_v2 }
 0x5d2   : > { %2427 = vmatpush.bf16.msra.mxu0 %v2383_v6 }
 0x5d6   : > { %2428 = vmatpush.bf16.msra.mxu0 %v2381_v15 }
 0x5da   : > { %2429 = vmatpush.bf16.msra.mxu0 %v4335_v46 }
 0x5dd   : > { %2772 = vmatmul.msk.bf16.vlgmr.msra.gmra.mxu0 %vm1759_vm9, %v2793_v39  ;;  %v1648_v39 = vld [vmem:[%s4257_s13 + $0x8] sm:$0xff] }
 0x61e   : > { %v1565_v9 = vpop.f32.mrf.mxu0 }
 0x61f   : > { %v1566_v18 = vadd.f32 %v1565_v9, %v1541_v38 }
 0x621   : > { %v1598_v36 = vsel %vm1592_vm3, %v1566_v18, 0.0 }
 0x622   : > { %vm1602_vm11 = vcmp.ge.f32.partialorder %v1598_v36, 0.0  ;;  %v1606_v22 = vmul.f32 0.1, %v1598_v36 }
 0x624   : > { %v4113_v48 = vsel %vm1602_vm11, %v1598_v36, %v1606_v22 }
 0x625   : > { %v3154_v45 = vpack.i.bf16 0.0, %v4113_v48 }
 0x626   : > { %v1567_v17 = vpop.f32.mrf.mxu0 }
 0x627   : > { %v1568_v0 = vadd.f32 %v1567_v17, %v1546_v3  ;;  %3155 = vrot.lane.b32.xlu0 %v3154_v45, %s3258_s25  ;;  %3145 = vrot.lane.b32.xlu1 %v3154_v45, %s3257_s5 }
 0x629   : > { %v1600_v14 = vsel %vm1592_vm3, %v1568_v0, 0.0 }
 0x62a   : > { %vm1604_vm12 = vcmp.ge.f32.partialorder %v1600_v14, 0.0  ;;  %v1608_v34 = vmul.f32 0.1, %v1600_v14 }
 0x62c   : > { %v4118_v10 = vsel %vm1604_vm12, %v1600_v14, %v1608_v34  ;;  %v2788_v14 = vld [vmem:[%s4342_s6] sm:$0xff] }
 0x62d   : > { %v3159_v60 = vpack.i.bf16 0.0, %v4118_v10  ;;  %v1644_v57 = vpack.c.bf16 %v4118_v10, %v4113_v48 }
 0x62f   : > { %3160 = vrot.lane.b32.xlu1 %v3159_v60, %s3258_s25  ;;  %3150 = vrot.lane.b32.xlu2 %v3159_v60, %s3257_s5 }
 0x632   : > { %v1786_v41 = vpop.f32.mrf.mxu0 }
 0x638   : > { %v2417_v25 = vpop.f32.mrf.mxu3 }
 0x639   : > { %v2418_v26 = vadd.f32 %v2417_v25, %v2393_v30 }
 0x63a   : > { %v1788_v40 = vpop.f32.mrf.mxu0 }
 0x63b   : > { %v2450_v55 = vsel %vm2444_vm0, %v2418_v26, 0.0 }
 0x63c   : > { %vm2454_vm1 = vcmp.ge.f32.partialorder %v2450_v55, 0.0  ;;  %v2458_v31 = vmul.f32 0.1, %v2450_v55 }
 0x63e   : > { %v4126_v35 = vsel %vm2454_vm1, %v2450_v55, %v2458_v31  ;;  %v3215_v31 = vld [vmem:[%s4260_s16] sm:$0xff] }
 0x63f   : > { %v3174_v54 = vpack.i.bf16 0.0, %v4126_v35 }
 0x640   : > { %v2419_v32 = vpop.f32.mrf.mxu3 }
 0x641   : > { %v2420_v61 = vadd.f32 %v2419_v32, %v2398_v49  ;;  %3175 = vrot.lane.b32.xlu1 %v3174_v54, %s4336_s1  ;;  %3165 = vrot.lane.b32.xlu2 %v3174_v54, %s4337_s10 }
 0x643   : > { %v2452_v63 = vsel %vm2444_vm0, %v2420_v61, 0.0 }
 0x644   : > { %vm2456_vm2 = vcmp.ge.f32.partialorder %v2452_v63, 0.0  ;;  %v2460_v51 = vmul.f32 0.1, %v2452_v63 }
 0x646   : > { %v2106_v19 = vpop.f32.mrf.mxu0  ;;  %v4131_v8 = vsel %vm2456_vm2, %v2452_v63, %v2460_v51 }
 0x647   : > { %v3169_v23 = vpack.i.bf16 0.0, %v4131_v8  ;;  %v2520_v24 = vpack.c.bf16 %v4131_v8, %v4126_v35 }
 0x649   : > { %3170 = vrot.lane.b32.xlu0 %v3169_v23, %s4337_s10  ;;  %3190 = vrot.lane.b32.xlu1 %v3169_v23, %s3257_s5  ;;  %s4344_s10 = sld [smem:[#allocation4_spill]] }
 0x64a   : > { %3180 = vrot.lane.b32.xlu2 %v3169_v23, %s4336_s1  ;;  %s4343_s1 = sld [smem:[#allocation19_spill]] }
 0x64e   : > { %v2108_v5 = vpop.f32.mrf.mxu0 }
 0x64f   : > { %p914_p9 = scmp.lt.s32.totalorder %s4344_s10, 1 }
 0x650   : > { %v2794_v59 = vld [vmem:[%s4343_s1] sm:$0xff] }
 0x651   : > { %3185 = vrot.lane.b32.xlu0 %v3174_v54, %s3257_s5  ;;  %1651 = vperm.xlu1 %2912, %v1647_v43   ;;  %s4340_s5 = smov 122   ;;  %s4355_s10 = smov (!%p914_p9, %s4344_s10), 1 }
 0x652   : > { %3195 = vrot.lane.b32.xlu2 %v3174_v54, %s3258_s25 }
 0x659   : > { %3200 = vrot.lane.b32.xlu0 %v3169_v23, %s3258_s25  ;;  %2534 = vperm.xlu1 %2912, %v2526_v28  }
 0x65a   : > { %v2431_v20 = vpop.f32.mrf.mxu0  ;;  %1656 = vperm.xlu2 %2913, %v1648_v39  }
 0x661   : > { %2529 = vperm.xlu0 %2911, %v2525_v42   ;;  %1689 = vrot.lane.b32.xlu1 %v4007_v62, %s4340_s5 }
 0x662   : > { %v2433_v52 = vpop.f32.mrf.mxu0  ;;  %1685 = vrot.lane.b32.xlu2 %v3995_v37, %s4340_s5 }
 0x669   : > { %3205 = vrot.lane.b32.xlu0 %v3256_v4, %s4340_s5  ;;  %2567 = vrot.lane.b32.xlu1 %v4029_v7, %s4341_s30  ;;  %s2782_s5 = sshll.u32 %s4355_s10, 4 }
 0x66a   : > { %2563 = vrot.lane.b32.xlu2 %v4000_v50, %s4341_s30  ;;  %s921_s6 = scalar_lea.vmem %s4345_s7, %s2782_s5 }
 0x671   : > { %3210 = vrot.lane.b32.xlu0 %v3256_v4, %s4341_s30 }
 0x689   : > { %v3151_v2 = vpop.permute.xlu2 %3150 }
 0x68a   : > { %v3153_v6 = vunpack.i.h.bf16 %v3151_v2  ;;  %v3152_v15 = vunpack.i.l.bf16 %v3151_v2 }
 0x68c   : > { %v1639_v37 = vsel %vm967_vm5, %v3152_v15, %v3153_v6 }
 0x699   : > { %v3146_v56 = vpop.permute.xlu1 %3145  ;;  %v3156_v18 = vpop.permute.xlu0 %3155 }
 0x69a   : > { %v3148_v62 = vunpack.i.h.bf16 %v3146_v56  ;;  %v3147_v38 = vunpack.i.l.bf16 %v3146_v56  ;;  %v3158_v7 = vunpack.i.h.bf16 %v3156_v18  ;;  %v3157_v22 = vunpack.i.l.bf16 %v3156_v18 }
 0x69b   : > { %v3166_v34 = vpop.permute.xlu2 %3165 }
 0x69c   : > { %v1638_v9 = vsel %vm967_vm5, %v3147_v38, %v3148_v62  ;;  %v1626_v4 = vsel %vm952_vm4, %v3157_v22, %v3158_v7  ;;  %v3168_v41 = vunpack.i.h.bf16 %v3166_v34  ;;  %v3167_v33 = vunpack.i.l.bf16 %v3166_v34 }
 0x69d   : > { %v1646_v36 = vpack.c.bf16 %v1639_v37, %v1638_v9 }
 0x69f   : > { %1672 = vmatpush.bf16.msrb.mxu2 %v1646_v36 }
 0x6a1   : > { %v3161_v45 = vpop.permute.xlu1 %3160 }
 0x6a2   : > { %v3163_v50 = vunpack.i.h.bf16 %v3161_v45  ;;  %v3162_v3 = vunpack.i.l.bf16 %v3161_v45 }
 0x6a4   : > { %v1627_v17 = vsel %vm952_vm4, %v3162_v3, %v3163_v50  ;;  %v3181_v40 = vpop.permute.xlu2 %3180 }
 0x6a5   : > { %v1645_v0 = vpack.c.bf16 %v1627_v17, %v1626_v4 }
 0x6a7   : > { %1673 = vmatpush.bf16.msrb.mxu2 %v1645_v0 }
 0x6ab   : > { %1674 = vmatpush.bf16.msrb.mxu2 %v1644_v57  ;;  %v3182_v57 = vunpack.i.l.bf16 %v3181_v40 }
 0x6ac   : > { %v3196_v43 = vpop.permute.xlu2 %3195 }
 0x6ad   : > { %v3198_v28 = vunpack.i.h.bf16 %v3196_v43  ;;  %v3197_v39 = vunpack.i.l.bf16 %v3196_v43 }
 0x6ae   : > { %2742 = vmatmul.msk.bf16.vlgmr.msrb.gmra.mxu2 %vm1027_vm7, %v2788_v14 }
 0x6af   : > { %1930 = vmatpush.bf16.msra.mxu2 %v3725_v12  ;;  %v2514_v12 = vsel %vm1453_vm6, %v3167_v33, %v3168_v41 }
 0x6b3   : > { %1931 = vmatpush.bf16.msra.mxu2 %v3728_v16  ;;  %v3176_v60 = vpop.permute.xlu1 %3175  ;;  %v3183_v16 = vunpack.i.h.bf16 %v3181_v40 }
 0x6b4   : > { %v3178_v25 = vunpack.i.h.bf16 %v3176_v60  ;;  %v3177_v26 = vunpack.i.l.bf16 %v3176_v60  ;;  %v1657_v56 = vpop.permute.xlu2 %1656 }
 0x6b5   : > { %v2503_v32 = vsel %vm1245_vm8, %v3182_v57, %v3183_v16 }
 0x6b6   : > { %v2502_v49 = vsel %vm1245_vm8, %v3177_v26, %v3178_v25 }
 0x6b7   : > { %1932 = vmatpush.bf16.msra.mxu2 %v3734_v44  ;;  %v2523_v61 = vpack.c.bf16 %v2503_v32, %v2502_v49 }
 0x6bb   : > { %1933 = vmatpush.bf16.msra.mxu2 %v3740_v13  ;;  %v3171_v30 = vpop.permute.xlu0 %3170  ;;  %v3191_v13 = vpop.permute.xlu1 %3190 }
 0x6bc   : > { %v3173_v48 = vunpack.i.h.bf16 %v3171_v30  ;;  %v3172_v10 = vunpack.i.l.bf16 %v3171_v30  ;;  %v3192_v54 = vunpack.i.l.bf16 %v3191_v13  ;;  %v1686_v9 = vpop.permute.xlu2 %1685 }
 0x6be   : > { %v2515_v44 = vsel %vm1453_vm6, %v3172_v10, %v3173_v48 }
 0x6bf   : > { %1934 = vmatpush.bf16.msra.mxu2 %v4335_v46  ;;  %v2524_v55 = vpack.c.bf16 %v2515_v44, %v2514_v12 }
 0x6c1   : > { %2548 = vmatpush.bf16.msrb.mxu1 %v2524_v55 }
 0x6c2   : > { %2754 = vmatmul.msk.bf16.vlgmr.msra.gmra.mxu2 %vm1759_vm9, %v3215_v31 }
 0x6c3   : > { %2250 = vmatpush.bf16.msrb.mxu2 %v3928_v11  ;;  %v3193_v11 = vunpack.i.h.bf16 %v3191_v13  ;;  %v3186_v19 = vpop.permute.xlu0 %3185 }
 0x6c4   : > { %v3188_v63 = vunpack.i.h.bf16 %v3186_v19  ;;  %v3187_v51 = vunpack.i.l.bf16 %v3186_v19  ;;  %v2564_v50 = vpop.permute.xlu2 %2563 }
 0x6c5   : > { %2549 = vmatpush.bf16.msrb.mxu1 %v2523_v61  ;;  %v2491_v5 = vsel %vm967_vm5, %v3192_v54, %v3193_v11 }
 0x6c6   : > { %v2490_v23 = vsel %vm967_vm5, %v3187_v51, %v3188_v63 }
 0x6c7   : > { %2251 = vmatpush.bf16.msrb.mxu2 %v3924_v29  ;;  %v2206_v29 = vpack.c.bf16 %v3083_v1, %v3078_v58  ;;  %v2522_v20 = vpack.c.bf16 %v2491_v5, %v2490_v23 }
 0x6c9   : > { %2550 = vmatpush.bf16.msrb.mxu1 %v2522_v20 }
 0x6cb   : > { %2252 = vmatpush.bf16.msrb.mxu2 %v3948_v47  ;;  %v3201_v52 = vpop.permute.xlu0 %3200  ;;  %v2478_v47 = vsel %vm952_vm4, %v3197_v39, %v3198_v28 }
 0x6cc   : > { %v3203_v42 = vunpack.i.h.bf16 %v3201_v52  ;;  %v3202_v2 = vunpack.i.l.bf16 %v3201_v52 }
 0x6ce   : > { %v2479_v6 = vsel %vm952_vm4, %v3202_v2, %v3203_v42  ;;  %vm1702_vm4 = vcmp.lt.s32.totalorder %v3613_v53, 16 }
 0x6cf   : > { %2253 = vmatpush.bf16.msrb.mxu2 %v2206_v29  ;;  %v2521_v15 = vpack.c.bf16 %v2479_v6, %v2478_v47 }
 0x6d1   : > { %2551 = vmatpush.bf16.msrb.mxu1 %v2521_v15 }
 0x6d3   : > { %2254 = vmatpush.bf16.msrb.mxu2 %v4335_v46  ;;  %v2530_v1 = vpop.permute.xlu0 %2529  ;;  %v1652_v46 = vpop.permute.xlu1 %1651 }
 0x6d5   : > { %2552 = vmatpush.bf16.msrb.mxu1 %v2520_v24 }
 0x6d6   : > { %2766 = vmatmul.msk.bf16.vlgmr.msrb.gmra.mxu2 %vm1759_vm9, %v3974_v21 }
 0x6d8   : > { %2777 = vmatmul.msk.bf16.vlgmr.msrb.gmra.mxu1 %vm1759_vm9, %v2794_v59 }
 0x6db   : > { %v3206_v21 = vpop.permute.xlu0 %3205  ;;  %v2535_v38 = vpop.permute.xlu1 %2534 }
 0x6dc   : > { %v3207_v36 = vunpack.i.l.bf16 %v3206_v21  ;;  %v3208_v14 = vunpack.i.h.bf16 %v3206_v21 }
 0x6de   : > { %v1693_v24 = vsel %vm1260_vm15, %v1686_v9, %v3207_v36 }
 0x6e3   : > { %v3211_v18 = vpop.permute.xlu0 %3210  ;;  %v1690_v8 = vpop.permute.xlu1 %1689 }
 0x6e4   : > { %v3212_v22 = vunpack.i.l.bf16 %v3211_v18  ;;  %v3213_v33 = vunpack.i.h.bf16 %v3211_v18  ;;  %v1694_v25 = vsel %vm1260_vm15, %v1690_v8, %v3208_v14 }
 0x6e6   : > { %v2571_v17 = vsel %vm1017_vm10, %v2564_v50, %v3212_v22 }
 0x6eb   : > { %v2568_v10 = vpop.permute.xlu1 %2567 }
 0x6ec   : > { %v2572_v57 = vsel %vm1017_vm10, %v2568_v10, %v3213_v33 }
 0x731   : > { %v1676_v58 = vpop.f32.mrf.mxu2 }
 0x732   : > { %v1677_v7 = vadd.f32 %v1676_v58, %v1652_v46 }
 0x734   : > { %v1697_v3 = vadd.f32 %v1693_v24, %v1677_v7 }
 0x736   : > { %v1706_v34 = vsel %vm1702_vm4, %v1697_v3, 0.0 }
 0x739   : > { %v1678_v27 = vpop.f32.mrf.mxu2 }
 0x73a   : > { %v1679_v60 = vadd.f32 %v1678_v27, %v1657_v56 }
 0x73c   : > { %v1698_v12 = vadd.f32 %v1694_v25, %v1679_v60 }
 0x73e   : > { %v1707_v55 = vsel %vm1702_vm4, %v1698_v12, 0.0 }
 0x745   : > { %v1936_v62 = vpop.f32.mrf.mxu2 }
 0x74d   : > { %v1938_v37 = vpop.f32.mrf.mxu2 }
 0x755   : > { %v2554_v45 = vpop.f32.mrf.mxu1 }
 0x756   : > { %v2555_v4 = vadd.f32 %v2554_v45, %v2530_v1 }
 0x758   : > { %v2575_v0 = vadd.f32 %v2571_v17, %v2555_v4 }
 0x759   : > { %v2256_v35 = vpop.f32.mrf.mxu2 }
 0x75a   : > { %v2577_v41 = vsel %vm1702_vm4, %v2575_v0, 0.0 }
 0x75b   : > { %v2579_v40 = vadd.f32 %v2577_v41, %v1706_v34 }
 0x75d   : > { %v2581_v26 = vmul.f32 0.5, %v2579_v40  ;;  %v2556_v48 = vpop.f32.mrf.mxu1 }
 0x75e   : > { %v2557_v16 = vadd.f32 %v2556_v48, %v2535_v38 }
 0x75f   : > { %2583 = vst [vmem:[%s921_s6] sm:$0xff] %v2581_v26 }
 0x760   : > { %v2576_v44 = vadd.f32 %v2572_v57, %v2557_v16 }
 0x761   : > { %v2258_v30 = vpop.f32.mrf.mxu2 }
 0x762   : > { %v2578_v13 = vsel %vm1702_vm4, %v2576_v44, 0.0 }
 0x763   : > { %v2580_v31 = vadd.f32 %v2578_v13, %v1707_v55 }
 0x765   : > { %v2582_v49 = vmul.f32 0.5, %v2580_v31 }
 0x767   : > { %2584 = vst [vmem:[%s921_s6 + $0x8] sm:$0xff] %v2582_v49 }
 0x768 PF: > { %s36_s8 = sadd.s32 1, %s3254_s8   ;;  %s4346_s2 = sld [smem:[#allocation6_spill]] }
 0x769   : > { %p33_p10 = scmp.ge.s32.totalorder %s36_s8, 4   ;;  %s4347_s12 = sld [smem:[#allocation5_spill]] }
 0x76a   : > { %s4348_s27 = smov %s3242_s3  ;;  %s4350_s7 = smov %s3250_s28 }
 0x76b   :  { %35 = sbr.rel (!%p33_p10) target bundleno = 19 (0x13), region = 243 }
 0x76e   : > { %s4349_s3 = smov %s4346_s2 }
 0x76f   : > { %s4351_s28 = smov %s4347_s12 }

// kernel: hifigan_forward.11
= control target key start
LH: loop header
LB: loop body
LE: loop exit
PB: predicated region body
PF: predicated region fallthrough
CT: control target
= control target key end

     0   :  { %s779_s0 = inlined_call_operand.vmem [shape: f32[2,8,256], index: 0, kind: input, shape index: {}, may-alias: {0,1}]   ;;  %s780_s1 = inlined_call_operand.vmem [shape: f32[2,8,256], index: 1, kind: input, shape index: {}, may-alias: {0,1}]   ;;  %s781_s2 = inlined_call_operand.vmem [shape: bf16[1,56], index: 2, kind: input, shape index: {}]   ;;  %s782_s3 = inlined_call_operand.<no memory space> [shape: f32[1,1], index: 3, kind: input, shape index: {}]   ;;  %s783_s4 = inlined_call_operand.hbm [shape: f32[2,1,128], index: 4, kind: output, shape index: {}]  }
   0x1   :  { %v9_v0 = vstv %s782_s3 }
   0x2   :  { %10 = vst [vmem:[#allocation2] sm:$0x1] %v9_v0 }
   0x3   :  { %11 = vsyncpa [#allocation4], 0 }
   0x4   :  { %13 = vsyncpa [#allocation4 + $0x1], 0  ;;  %s676_s17 = smov 0   ;;  %s678_s18 = smov 0  }
   0x5   :  { %s680_s19 = smov 0   ;;  %s682_s20 = smov 0  }
   0x6   :  { %s684_s21 = smov 0   ;;  %s686_s22 = smov 0  }
   0x7 LB: > { %s450_s3 = sadd.s32 4294967295, %s639_s22   ;;  %s451_s23 = sadd.s32 4294967294, %s639_s22   ;;  %s639_s22 = sphi %s686_s22, %s19_s22   ;;  %s635_s21 = sphi %s684_s21, %s790_s21   ;;  %s631_s20 = sphi %s682_s20, %s789_s20   ;;  %s627_s19 = sphi %s680_s19, %s788_s19   ;;  %s623_s18 = sphi %s678_s18, %s787_s18   ;;  %s619_s17 = sphi %s676_s17, %s786_s17  }
   0x8   : > { %s28_s24 = sadd.s32 1, %s635_s21  ;;  %s140_s25 = sadd.s32 1, %s627_s19 }
   0x9   : > { %p29_p0 = scmp.ge.s32.totalorder %s28_s24, 2  ;;  %p150_p1 = scmp.ne.s32.totalorder %s627_s19, %s623_s18 }
   0xa   : > { %p151_p2 = scmp.eq.s32.totalorder %s450_s3, 1  ;;  %p156_p3 = scmp.ne.s32.totalorder %s623_s18, %s619_s17 }
   0xb   : > { %s792_s24 = smov (%p29_p0, %s28_s24), 0  ;;  %p157_p5 = scmp.eq.s32.totalorder %s451_s23, 1 }
   0xc   : > { %p716_p4 = por %p151_p2, %p150_p1  ;;  %s135_s27 = ssub.s32 %s635_s21, %s792_s24 }
   0xd   : > { %p454_p6 = scmp.ge.s32.totalorder %s639_s22, 1  ;;  %p138_p7 = scmp.eq.s32.totalorder %s135_s27, 0 }
   0xe   : > { %p723_p8 = por %p157_p5, %p156_p3  ;;  %p205_p9 = scmp.lt.s32.totalorder %s639_s22, 3 }
   0xf   : > { %s729_s29 = scalar_select %p138_p7, %s627_s19, %s140_s25  }
  0x10   : > { %p206_p10 = pnand %p454_p6, %p205_p9 }
  0x11   : > { %p242_p11 = scmp.lt.s32.totalorder (!%p206_p10), %s631_s20, 1  ;;  %s641_s13 = smov (!%p206_p10), 123  }
  0x12   : > { %209 = sbr.rel (%p206_p10) target bundleno = 311 (0x137), region = 36  ;;  %s642_s14 = smov (!%p206_p10), 122  }
  0x13   : > { %s643_s15 = smov (!%p206_p10), 125   ;;  %s644_s16 = smov (!%p206_p10), 126  }
  0x14   : > { %s645_s3 = smov (!%p206_p10), 124   ;;  %s646_s23 = smov (!%p206_p10), 127  }
  0x15   : > { %s358_s7 = scalar_lea.hbm (!%p206_p10), %s783_s4, %s631_s20 }
  0x16   : > { %s362_s10 = sshll.u32 (!%p206_p10), %s358_s7, 4  ;;  %s363_s10 = int_to_ptr.hbm [resolvable:$true] %s362_s10 }
  0x17   : > { %s243_s30 = scalar_select %p242_p11, %s631_s20, 1  ;;  %v318_v8 = vld [vmem:[#allocation2] sm:$0x1]  ;;  %v647_v9 = vmov 0   ;;  %vm310_vm2 = vcmask 998400   ;;  %vm329_vm3 = vcmask 1043456  }
  0x18   : > { %558 = vset.pattern.permute.xlu0 %v647_v9  ;;  %vm296_vm4 = vcmask 1014784   ;;  %vm303_vm5 = vcmask 1006592   ;;  %vm282_vm6 = vcmask 1031168   ;;  %vm289_vm7 = vcmask 1022976   ;;  %v313_v39 = vld [vmem:[%s781_s2] sm:$0x1] }
  0x19   : > { %s462_s5 = sshll.u32 %s243_s30, 4  ;;  %vm275_vm8 = vcmask 1039360   ;;  %vm325_vm9 = vcmask 457728   ;;  %s240_s30 = sand.u32 1, %s623_s18  }
  0x1a   : > { %s249_s8 = scalar_lea.vmem %s779_s0, %s462_s5  ;;  %s464_s9 = sadd.s32 8, %s462_s5 }
  0x1b   : > { %s258_s12 = scalar_lea.vmem %s780_s1, %s464_s9  ;;  %v261_v1 = vld [vmem:[%s249_s8] sm:$0xff]  ;;  %s241_s8 = scalar_lea.vmem [#allocation3], %s240_s30 }
  0x1c   : > { %v262_v2 = vld [vmem:[%s258_s12] sm:$0xff]  ;;  %vm263_vm0 = vcmp.ge.f32.partialorder %v261_v1, 0.0  ;;  %v265_v3 = vmul.f32 0.01, %v261_v1  ;;  %s360_s9 = sshll.u32 %s241_s8, 4  ;;  %s349_s11 = scalar_lea.sflag [#allocation4], %s240_s30  ;;  %s361_s9 = int_to_ptr.vmem [resolvable:$true] %s360_s9 }
  0x1d   : > { %vm264_vm1 = vcmp.ge.f32.partialorder %v262_v2, 0.0  ;;  %v266_v4 = vmul.f32 0.01, %v262_v2  ;;  %s575_s12 = sshra.s32 %s363_s10, 4  ;;  %s581_s20 = scalar_lea.hbm %s783_s4, 2  ;;  %s576_s12 = int_to_ptr.hbm [resolvable:$true] %s575_s12 }
  0x1e   : > { %v267_v5 = vsel %vm263_vm0, %v261_v1, %v265_v3  ;;  %p582_p1 = scmp.lt.s32.totalorder %s576_s12, %s783_s4 }
  0x1f   : > { %v268_v6 = vsel %vm264_vm1, %v262_v2, %v266_v4 }
  0x20   : > { %v538_v7 = vpack.i.bf16 %v268_v6, %v267_v5 }
  0x22   : > { %539 = vrot.lane.b32.xlu1 %v538_v7, %s641_s13  ;;  %529 = vrot.lane.b32.xlu0 %v538_v7, %s642_s14  ;;  %s577_s13 = scalar_lea.hbm %s576_s12, 1 }
  0x23   : > { %549 = vrot.lane.b32.xlu2 %v538_v7, %s643_s15  ;;  %p578_p12 = scmp.ne.s32.totalorder %s576_s12, %s577_s13  ;;  %p583_p2 = scmp.lt.s32.totalorder %s581_s20, %s577_s13 }
  0x25   : > { %p579_p13 = pnand %p578_p12, %p716_p4  ;;  %p584_p3 = por %p583_p2, %p582_p1 }
  0x27   : > { %p580_p0 = pneg %p579_p13 }
  0x29   : > { %p585_p5 = pnand %p584_p3, %p580_p0 }
  0x2a   : > { %544 = vrot.lane.b32.xlu1 %v538_v7, %s644_s16  ;;  %534 = vrot.lane.b32.xlu0 %v538_v7, %s645_s3 }
  0x2b   : > { %554 = vrot.lane.b32.xlu2 %v538_v7, %s646_s23 }
  0x32   : > { %321 = vperm.xlu0 %558, %v318_v8  }
  0x7d   : > { %v550_v10 = vpop.permute.xlu2 %549 }
  0x7e   : > { %v552_v21 = vunpack.i.h.bf16 %v550_v10  ;;  %v551_v22 = vunpack.i.l.bf16 %v550_v10 }
  0x80   : > { %v290_v35 = vsel %vm289_vm7, %v551_v22, %v552_v21 }
  0x85   : > { %v555_v20 = vpop.permute.xlu2 %554 }
  0x86   : > { %v557_v31 = vunpack.i.h.bf16 %v555_v20  ;;  %v556_v32 = vunpack.i.l.bf16 %v555_v20 }
  0x88   : > { %v276_v36 = vsel %vm275_vm8, %v556_v32, %v557_v31 }
  0x89   : > { %v314_v38 = vpack.c.bf16 %v276_v36, %v267_v5 }
  0x94   : > { %v540_v11 = vpop.permute.xlu1 %539  ;;  %v530_v12 = vpop.permute.xlu0 %529 }
  0x95   : > { %v532_v13 = vunpack.i.h.bf16 %v530_v12  ;;  %v531_v14 = vunpack.i.l.bf16 %v530_v12  ;;  %v542_v18 = vunpack.i.h.bf16 %v540_v11  ;;  %v541_v19 = vunpack.i.l.bf16 %v540_v11 }
  0x97   : > { %v311_v15 = vsel %vm310_vm2, %v531_v14, %v532_v13  ;;  %v304_v30 = vsel %vm303_vm5, %v541_v19, %v542_v18 }
  0x98   : > { %v317_v16 = vpack.c.bf16 %v311_v15, %v311_v15 }
  0x9a   : > { %v331_v17 = vsel %vm329_vm3, %v317_v16, 0 }
  0x9b   : > { %337 = vmatpush.bf16.msra.mxu0 %v331_v17 }
  0x9c   : > { %v545_v23 = vpop.permute.xlu1 %544  ;;  %v535_v24 = vpop.permute.xlu0 %534 }
  0x9d   : > { %v547_v25 = vunpack.i.h.bf16 %v545_v23  ;;  %v546_v26 = vunpack.i.l.bf16 %v545_v23  ;;  %v537_v27 = vunpack.i.h.bf16 %v535_v24  ;;  %v536_v28 = vunpack.i.l.bf16 %v535_v24 }
  0x9f   : > { %v297_v29 = vsel %vm296_vm4, %v536_v28, %v537_v27  ;;  %v283_v34 = vsel %vm282_vm6, %v546_v26, %v547_v25 }
  0xa0   : > { %v316_v33 = vpack.c.bf16 %v304_v30, %v297_v29  ;;  %v315_v37 = vpack.c.bf16 %v290_v35, %v283_v34 }
  0xa2   : > { %338 = vmatpush.bf16.msra.mxu0 %v316_v33 }
  0xa4   : > { %v322_v40 = vpop.permute.xlu0 %321 }
  0xa5   : > { %v324_v41 = vperm.slane %v322_v40, 0 }
  0xa6   : > { %339 = vmatpush.bf16.msra.mxu0 %v315_v37 }
  0xaa   : > { %340 = vmatpush.bf16.msra.mxu0 %v314_v38 }
  0xad   : > { %459 = vmatmul.msk.bf16.vlgmr.msra.gmra.mxu0 %vm325_vm9, %v313_v39 }
 0x12a   : > { %v342_v42 = vpop.f32.mrf.mxu0 }
 0x12b   : > { %v343_v43 = vadd.f32 %v342_v42, %v324_v41 }
 0x12d   : > { %559 = vtanh.f32 %v343_v43 }
 0x132   : > { %v344_v44 = vpop.f32.mrf.mxu0 }
 0x133   : > { %v560_v45 = vpop.eup %559 }
 0x134   : > { %347 = vst [vmem:[%s241_s8] sm:$0x1] %v560_v45 }
 0x135   : > { %588 = shalt.err (!%p585_p5)
}
 0x136   : > { %466 = dma.vmem_to_hbm [thread:$0]  (%p716_p4), %s361_s9, 16, %s363_s10, %s349_s11  }
 0x137 PF: > { %p472_p6 = scmp.ge.s32.totalorder %s639_s22, 2  ;;  %s374_s23 = sand.u32 1, %s619_s17  }
 0x138   : > { %s375_s25 = scalar_lea.sflag [#allocation4], %s374_s23 }
 0x139   : > { %p469_p7 = pnand %p472_p6, %p723_p8 }
 0x13b   : > { %p470_p9 = pneg %p469_p7 }
 0x13d   : > { %614 = dma.done.wait (%p470_p9), %s375_s25, 16  }
 0x13e   : > { %616 = vsyncadd (%p470_p9), %s375_s25, 4294967280  ;;  %s19_s22 = sadd.s32 1, %s639_s22   ;;  %s786_s17 = smov %s623_s18 }
 0x13f   : > { %p16_p10 = scmp.ge.s32.totalorder %s19_s22, 4   ;;  %s787_s18 = smov %s627_s19 }
 0x140   : > { %s788_s19 = smov %s729_s29  ;;  %s789_s20 = smov %s635_s21 }
 0x141   : > { %s790_s21 = smov %s792_s24  ;;  %18 = sbr.rel (!%p16_p10) target bundleno = 7 (0x7), region = 74 }
 0x146   :  { %380 = vsyncpa [#allocation4], 1 }
 0x147   :  { %382 = vsyncpa [#allocation4 + $0x1], 1 }

// kernel: hifigan_forward.10
= control target key start
LH: loop header
LB: loop body
LE: loop exit
PB: predicated region body
PF: predicated region fallthrough
CT: control target
= control target key end

     0   :  { %s2455_s27 = smov 0   ;;  %s2914_s0 = inlined_call_operand.vmem [shape: f32[2,8,256], index: 0, kind: input, shape index: {}, may-alias: {0,1}]   ;;  %s2915_s1 = inlined_call_operand.vmem [shape: f32[2,8,256], index: 1, kind: input, shape index: {}, may-alias: {0,1}]   ;;  %s2916_s2 = inlined_call_operand.vmem [shape: bf16[8,24], index: 2, kind: input, shape index: {}]   ;;  %s2917_s3 = inlined_call_operand.vmem [shape: f32[8,1], index: 3, kind: input, shape index: {}]   ;;  %s2918_s4 = inlined_call_operand.vmem [shape: bf16[8,24], index: 4, kind: input, shape index: {}]   ;;  %s2919_s5 = inlined_call_operand.vmem [shape: f32[8,1], index: 5, kind: input, shape index: {}]   ;;  %s2920_s6 = inlined_call_operand.vmem [shape: bf16[8,24], index: 6, kind: input, shape index: {}]   ;;  %s2921_s7 = inlined_call_operand.vmem [shape: f32[8,1], index: 7, kind: input, shape index: {}]   ;;  %s2922_s8 = inlined_call_operand.vmem [shape: bf16[8,24], index: 8, kind: input, shape index: {}]   ;;  %s2923_s9 = inlined_call_operand.vmem [shape: f32[8,1], index: 9, kind: input, shape index: {}]   ;;  %s2924_s10 = inlined_call_operand.vmem [shape: bf16[8,24], index: 10, kind: input, shape index: {}]   ;;  %s2925_s11 = inlined_call_operand.vmem [shape: f32[8,1], index: 11, kind: input, shape index: {}]   ;;  %s2926_s12 = inlined_call_operand.vmem [shape: bf16[8,24], index: 12, kind: input, shape index: {}]   ;;  %s2927_s13 = inlined_call_operand.vmem [shape: f32[8,1], index: 13, kind: input, shape index: {}]   ;;  %s2928_s14 = inlined_call_operand.vmem [shape: bf16[8,40], index: 14, kind: input, shape index: {}]   ;;  %s2929_s15 = inlined_call_operand.vmem [shape: f32[8,1], index: 15, kind: input, shape index: {}]   ;;  %s2930_s16 = inlined_call_operand.vmem [shape: bf16[8,40], index: 16, kind: input, shape index: {}]   ;;  %s2931_s17 = inlined_call_operand.vmem [shape: f32[8,1], index: 17, kind: input, shape index: {}]   ;;  %s2932_s18 = inlined_call_operand.vmem [shape: bf16[8,40], index: 18, kind: input, shape index: {}]   ;;  %s2933_s19 = inlined_call_operand.vmem [shape: f32[8,1], index: 19, kind: input, shape index: {}]   ;;  %s2934_s20 = inlined_call_operand.vmem [shape: bf16[8,40], index: 20, kind: input, shape index: {}]   ;;  %s2935_s21 = inlined_call_operand.vmem [shape: f32[8,1], index: 21, kind: input, shape index: {}]   ;;  %s2936_s22 = inlined_call_operand.vmem [shape: bf16[8,40], index: 22, kind: input, shape index: {}]   ;;  %s2937_s23 = inlined_call_operand.vmem [shape: f32[8,1], index: 23, kind: input, shape index: {}]   ;;  %s2938_s24 = inlined_call_operand.vmem [shape: bf16[8,40], index: 24, kind: input, shape index: {}]   ;;  %s2939_s25 = inlined_call_operand.vmem [shape: f32[8,1], index: 25, kind: input, shape index: {}]   ;;  %s2940_s26 = inlined_call_operand.vmem [shape: f32[2,8,128], index: 26, kind: output, shape index: {}]  }
   0x1   :  { %2954 = sst [smem:[#allocation2_spill]] %s2914_s0 }
   0x2   :  { %2955 = sst [smem:[#allocation3_spill]] %s2915_s1 }
   0x3   :  { %2956 = sst [smem:[#allocation4_spill]] %s2916_s2 }
   0x4   :  { %2957 = sst [smem:[#allocation5_spill]] %s2917_s3  ;;  %s2457_s3 = smov 0  }
   0x5   :  { %2958 = sst [smem:[#allocation6_spill]] %s2918_s4 }
   0x6   :  { %2959 = sst [smem:[#allocation7_spill]] %s2919_s5 }
   0x7   :  { %2960 = sst [smem:[#allocation8_spill]] %s2920_s6 }
   0x8   :  { %2961 = sst [smem:[#allocation9_spill]] %s2921_s7  ;;  %s2459_s7 = smov 0  }
   0x9   :  { %2962 = sst [smem:[#allocation10_spill]] %s2922_s8 }
   0xa   :  { %2963 = sst [smem:[#allocation11_spill]] %s2923_s9 }
   0xb   :  { %2964 = sst [smem:[#allocation12_spill]] %s2924_s10 }
   0xc LB: > { %s45_s28 = sadd.s32 1, %s2299_s3  ;;  %p2075_p0 = scmp.ge.s32.totalorder %s2303_s7, 1  ;;  %s2303_s7 = sphi %s2459_s7, %s36_s7   ;;  %s2299_s3 = sphi %s2457_s3, %s2984_s3   ;;  %s2295_s27 = sphi %s2455_s27, %s2983_s27  }
   0xd   : > { %p46_p1 = scmp.ge.s32.totalorder %s45_s28, 2  ;;  %p750_p2 = scmp.lt.s32.totalorder %s2303_s7, 3 }
   0xf   : > { %s2986_s28 = smov (%p46_p1, %s45_s28), 0  ;;  %p751_p3 = pnand %p2075_p0, %p750_p2 }
  0x10   : > { %s2941_s8 = smov (!%p751_p3), 126   ;;  %p834_p4 = scmp.lt.s32.totalorder (!%p751_p3), %s2295_s27, 1 }
  0x11   : > { %754 = sbr.rel (%p751_p3) target bundleno = 1759 (0x6df), region = 124  ;;  %s2965_s9 = sld [smem:[#allocation2_spill]] (!%p751_p3) }
  0x12   : > { %s2966_s6 = sld [smem:[#allocation3_spill]] (!%p751_p3)  ;;  %s2943_s29 = smov (!%p751_p3), 124  }
  0x13   : > { %s2953_s0 = smov (!%p751_p3), 125   ;;  %s2951_s5 = smov (!%p751_p3), 116  }
  0x14   : > { %s2945_s10 = smov (!%p751_p3), 118  }
  0x16   : > { %v2305_v0 = vmov 0.0   ;;  %s2988_s27 = smov (!%p834_p4, %s2295_s27), 1  ;;  %vm919_vm2 = vcmask 1043456   ;;  %vm1227_vm3 = vcmask 1014784   ;;  %vm915_vm4 = vcmask 195584   ;;  %v1419_v45 = vld [vmem:[%s2929_s15] sm:$0xff] }
  0x17   : > { %988 = vrot.lane.b32.xlu1 %v2305_v0, %s2941_s8  ;;  %1170 = vrot.lane.b32.xlu2 %v2305_v0, %s2941_s8  ;;  %s2105_s4 = sshll.u32 %s2988_s27, 4  ;;  %s2307_s8 = smov 127   ;;  %vm1079_vm5 = vcmask 1022976   ;;  %vm883_vm6 = vcmask 1031168   ;;  %v2310_v32 = vmov 0   ;;  %vm875_vm7 = vcmask 1039360  }
  0x18   : > { %s841_s30 = scalar_lea.vmem %s2965_s9, %s2105_s4  ;;  %s2107_s2 = sadd.s32 8, %s2105_s4  ;;  %2169 = vset.pattern.permute.xlu1 %v2310_v32  ;;  %2168 = vset.pattern.permute.xlu0 %v2310_v32  ;;  %v2565_v46 = vld [vmem:[%s2928_s14] sm:$0xf]  ;;  %vm1425_vm8 = vcmask 326656   ;;  %vm910_vm9 = vcmask 949248   ;;  %v953_v60 = vlaneseq }
  0x19   : > { %s850_s1 = scalar_lea.vmem %s2966_s6, %s2107_s2  ;;  %v2486_v1 = vld [vmem:[%s841_s30] sm:$0xff]  ;;  %s2967_s4 = smov 126   ;;  %2210 = vset.pattern.permute.xlu2 %v2310_v32 }
  0x1a   : > { %v2488_v2 = vld [vmem:[%s850_s1] sm:$0xff]  ;;  %vm863_vm0 = vcmp.ge.f32.partialorder %v2486_v1, 0.0  ;;  %v865_v3 = vmul.f32 0.1, %v2486_v1  ;;  %s2968_s2 = sld [smem:[#allocation6_spill]]  ;;  %s2949_s6 = smov 122  }
  0x1b   : > { %vm864_vm1 = vcmp.ge.f32.partialorder %v2488_v2, 0.0  ;;  %v866_v4 = vmul.f32 0.1, %v2488_v2  ;;  %s2969_s1 = sld [smem:[#allocation10_spill]]  ;;  %v2585_v61 = vand.u32 127, %v953_v60  ;;  %s2973_s9 = smov 124  }
  0x1c   : > { %v2499_v5 = vsel %vm863_vm0, %v2486_v1, %v865_v3  ;;  %s2970_s30 = sld [smem:[#allocation5_spill]] }
  0x1d   : > { %v868_v6 = vsel %vm864_vm1, %v2488_v2, %v866_v4  ;;  %v1463_v63 = vadd.s32 4294967274, %v2585_v61 }
  0x1e   : > { %v2148_v7 = vpack.i.bf16 %v868_v6, %v2499_v5 }
  0x1f   : > { %981 = vrot.lane.b32.xlu1 %v2305_v0, %s2307_s8  ;;  %1163 = vrot.lane.b32.xlu2 %v2305_v0, %s2307_s8  ;;  %vm1465_vm10 = vcmp.ge.s32.totalorder %v1463_v63, 0  ;;  %vm1467_vm11 = vcmp.lt.s32.totalorder %v1463_v63, 32 }
  0x20   : > { %2149 = vrot.lane.b32.xlu0 %v2148_v7, %s2967_s4  ;;  %v2530_v25 = vld [vmem:[%s2968_s2] sm:$0xf]  ;;  %vm1469_vm12 = vmand %vm1465_vm10, %vm1467_vm11  ;;  %vm1045_vm10 = vcmask 932864   ;;  %s2981_s2 = smov 116  }
  0x21   : > { %v2553_v44 = vld [vmem:[%s2969_s1] sm:$0xf]  ;;  %s2971_s1 = sld [smem:[#allocation4_spill]] }
  0x22   : > { %v892_v47 = vld [vmem:[%s2970_s30] sm:$0xff]  ;;  %s2947_s30 = smov 123  }
  0x27   : > { %2159 = vrot.lane.b32.xlu2 %v2148_v7, %s2943_s29  ;;  %v887_v56 = vld [vmem:[%s2971_s1] sm:$0xf]  ;;  %s2972_s29 = sld [smem:[#allocation7_spill]]  ;;  %s2978_s1 = smov 123  }
  0x28   : > { %2154 = vrot.lane.b32.xlu0 %v2148_v7, %s2307_s8 }
  0x2f   : > { %2164 = vrot.lane.b32.xlu2 %v2148_v7, %s2953_s0 }
  0x37   : > { %1085 = vrot.lane.b32.xlu2 %v2305_v0, %s2949_s6 }
  0x71   : > { %v2507_v8 = vpop.permute.xlu2 %1170 }
  0x72   : > { %v1179_v16 = vpack.c.bf16 %v2507_v8, %v2507_v8 }
  0x74   : > { %v1193_v21 = vsel %vm919_vm2, %v1179_v16, 0  ;;  %v1520_v16 = vld [vmem:[%s2931_s17] sm:$0xff] }
  0x79   : > { %v2509_v9 = vpop.permute.xlu2 %1163 }
  0x7a   : > { %v1177_v26 = vpack.c.bf16 %v2509_v9, %v2305_v0 }
  0x81   : > { %v2160_v10 = vpop.permute.xlu2 %2159 }
  0x82   : > { %v2515_v13 = vunpack.i.h.bf16 %v2160_v10  ;;  %v2161_v14 = vunpack.i.l.bf16 %v2160_v10 }
  0x84   : > { %v1411_v17 = vsel %vm1227_vm3, %v2161_v14, %v2515_v13 }
  0x85   : > { %v1417_v22 = vpack.c.bf16 %v1411_v17, %v1411_v17  ;;  %v957_v17 = vadd.s32 4294967285, %v2585_v61 }
  0x87   : > { %v1430_v30 = vsel %vm919_vm2, %v1417_v22, 0  ;;  %vm959_vm14 = vcmp.ge.s32.totalorder %v957_v17, 0  ;;  %vm961_vm15 = vcmp.lt.s32.totalorder %v957_v17, 32 }
  0x88   : > { %vm963_vm0 = vmand %vm959_vm14, %vm961_vm15 }
  0x89   : > { %v2511_v11 = vpop.permute.xlu1 %988  ;;  %v2165_v19 = vpop.permute.xlu2 %2164 }
  0x8a   : > { %v997_v12 = vpack.c.bf16 %v2511_v11, %v2511_v11  ;;  %v2167_v23 = vunpack.i.h.bf16 %v2165_v19  ;;  %v2166_v24 = vunpack.i.l.bf16 %v2165_v19 }
  0x8c   : > { %v1011_v15 = vsel %vm919_vm2, %v997_v12, 0  ;;  %v1404_v31 = vsel %vm1079_vm5, %v2166_v24, %v2167_v23 }
  0x8d   : > { %1032 = vmatpush.bf16.msra.mxu3 %v1011_v15  ;;  %v998_v15 = vld [vmem:[%s2972_s29] sm:$0xff]  ;;  %s2315_s29 = smov 114  }
  0x91   : > { %v2522_v18 = vpop.permute.xlu1 %981 }
  0x92   : > { %v995_v20 = vpack.c.bf16 %v2522_v18, %v2305_v0  ;;  %v2150_v27 = vpop.permute.xlu0 %2149 }
  0x93   : > { %v2152_v28 = vunpack.i.h.bf16 %v2150_v27  ;;  %v2151_v29 = vunpack.i.l.bf16 %v2150_v27 }
  0x94   : > { %1033 = vmatpush.bf16.msra.mxu3 %v995_v20 }
  0x95   : > { %v891_v33 = vpack.c.bf16 %v2152_v28, %v2152_v28  ;;  %v884_v34 = vsel %vm883_vm6, %v2151_v29, %v2152_v28  ;;  %v2539_v35 = vpack.c.bf16 %v2167_v23, %v2152_v28  ;;  %v2612_v29 = vpop.permute.xlu2 %1085 }
  0x96   : > { %v890_v36 = vpack.c.bf16 %v884_v34, %v884_v34  ;;  %v1415_v37 = vpack.c.bf16 %v1404_v31, %v884_v34 }
  0x97   : > { %2084 = vmatmul.msk.bf16.vlgmr.msra.gmra.mxu3 %vm915_vm4, %v2530_v25  ;;  %908 = vrot.lane.b32.xlu1 %v891_v33, %s2951_s5 }
  0x98   : > { %1214 = vmatpush.bf16.msrb.mxu3 %v1193_v21  ;;  %906 = vrot.lane.b32.xlu0 %v890_v36, %s2951_s5 }
  0x9a   : > { %v2155_v38 = vpop.permute.xlu0 %2154 }
  0x9b   : > { %v2157_v39 = vunpack.i.h.bf16 %v2155_v38  ;;  %v2156_v40 = vunpack.i.l.bf16 %v2155_v38 }
  0x9c   : > { %1215 = vmatpush.bf16.msrb.mxu3 %v1177_v26 }
  0x9d   : > { %v2543_v41 = vpack.c.bf16 %v2157_v39, %v868_v6  ;;  %v876_v42 = vsel %vm875_vm7, %v2156_v40, %v2157_v39 }
  0x9e   : > { %v888_v43 = vpack.c.bf16 %v876_v42, %v2499_v5 }
  0x9f   : > { %904 = vrot.lane.b32.xlu1 %v2543_v41, %s2951_s5 }
  0xa0   : > { %1440 = vmatpush.bf16.msra.mxu3 %v1430_v30  ;;  %902 = vrot.lane.b32.xlu0 %v888_v43, %s2951_s5  ;;  %v1095_v30 = vpack.c.bf16 %v2612_v29, %v2612_v29 }
  0xa2   : > { %v1109_v31 = vsel %vm919_vm2, %v1095_v30, 0 }
  0xa4   : > { %1441 = vmatpush.bf16.msra.mxu3 %v1415_v37 }
  0xa7   : > { %2088 = vmatmul.msk.bf16.vlgmr.msrb.gmra.mxu3 %vm915_vm4, %v2553_v44  ;;  %1422 = vperm.xlu1 %2169, %v1419_v45  }
  0xa8   : > { %1442 = vmatpush.bf16.msra.mxu3 %v888_v43  ;;  %895 = vperm.xlu0 %2168, %v892_v47  }
  0xaf   : > { %1077 = vrot.lane.b32.xlu1 %v2305_v0, %s2953_s0 }
  0xb7   : > { %2092 = vmatmul.msk.bf16.vlgmr.msra.gmra.mxu3 %vm1425_vm8, %v2565_v46  ;;  %1267 = vrot.lane.b32.xlu1 %v2305_v0, %s2945_s10  ;;  %s2976_s10 = sld [smem:[#allocation9_spill]] }
 0x109   : > { %v909_v48 = vpop.permute.xlu1 %908 }
 0x10a   : > { %v907_v49 = vpop.permute.xlu0 %906  ;;  %v924_v50 = vsel %vm919_vm2, %v909_v48, 0 }
 0x10b   : > { %945 = vmatpush.bf16.msra.mxu1 %v924_v50  ;;  %v912_v51 = vsel %vm910_vm9, %v907_v49, %v909_v48 }
 0x10c   : > { %v921_v52 = vsel %vm919_vm2, %v912_v51, 0 }
 0x10d   : > { %932 = vmatpush.bf16.msra.mxu0 %v921_v52 }
 0x111   : > { %v905_v53 = vpop.permute.xlu1 %904 }
 0x112   : > { %946 = vmatpush.bf16.msra.mxu1 %v905_v53  ;;  %v903_v54 = vpop.permute.xlu0 %902 }
 0x113   : > { %v911_v55 = vsel %vm910_vm9, %v903_v54, %v905_v53 }
 0x114   : > { %933 = vmatpush.bf16.msra.mxu0 %v911_v55 }
 0x115   : > { %2082 = vmatmul.msk.bf16.vlgmr.msra.gmra.mxu1 %vm915_vm4, %v887_v56 }
 0x116   : > { %1130 = vmatpush.bf16.msrb.mxu1 %v1109_v31 }
 0x117   : > { %2081 = vmatmul.msk.bf16.vlgmr.msra.gmra.mxu0 %vm915_vm4, %v887_v56 }
 0x119   : > { %v1423_v3 = vpop.permute.xlu1 %1422 }
 0x11a   : > { %v1035_v57 = vpop.f32.mrf.mxu3  ;;  %v896_v19 = vpop.permute.xlu0 %895 }
 0x121   : > { %v2617_v32 = vpop.permute.xlu1 %1077 }
 0x122   : > { %v1037_v58 = vpop.f32.mrf.mxu3  ;;  %v1093_v33 = vpack.c.bf16 %v2617_v32, %v2305_v0 }
 0x124   : > { %1131 = vmatpush.bf16.msrb.mxu1 %v1093_v33  ;;  %v1572_v33 = vadd.s32 4294967276, %v2585_v61 }
 0x126   : > { %vm1574_vm15 = vcmp.ge.s32.totalorder %v1572_v33, 0 }
 0x12a   : > { %v1217_v59 = vpop.f32.mrf.mxu3 }
 0x132   : > { %v1219_v62 = vpop.f32.mrf.mxu3 }
 0x13a   : > { %v1444_v4 = vpop.f32.mrf.mxu3 }
 0x13b   : > { %v1445_v5 = vadd.f32 %v1444_v4, %v1423_v3 }
 0x13d   : > { %v1475_v6 = vsel %vm1469_vm12, %v1445_v5, 0.0 }
 0x13e   : > { %vm1477_vm13 = vcmp.ge.f32.partialorder %v1475_v6, 0.0  ;;  %v1479_v7 = vmul.f32 0.1, %v1475_v6 }
 0x140   : > { %v2588_v10 = vsel %vm1477_vm13, %v1475_v6, %v1479_v7 }
 0x141   : > { %v2175_v12 = vpack.i.bf16 0.0, %v2588_v10 }
 0x142   : > { %v1446_v14 = vpop.f32.mrf.mxu3 }
 0x143   : > { %2176 = vrot.lane.b32.xlu1 %v2175_v12, %s2967_s4 }
 0x14b   : > { %1001 = vperm.xlu1 %2169, %v998_v15  }
 0x153   : > { %1523 = vperm.xlu1 %2169, %v1520_v16  }
 0x192   : > { %v948_v20 = vpop.f32.mrf.mxu1 }
 0x194   : > { %v935_v21 = vpop.f32.mrf.mxu0 }
 0x195   : > { %v936_v22 = vadd.f32 %v935_v21, %v896_v19  ;;  %v1053_v19 = vadd.s32 4294967286, %v2585_v61 }
 0x197   : > { %v969_v23 = vsel %vm963_vm0, %v936_v22, 0.0  ;;  %vm1055_vm11 = vcmp.ge.s32.totalorder %v1053_v19, 0  ;;  %vm1057_vm12 = vcmp.lt.s32.totalorder %v1053_v19, 32  ;;  %vm1576_vm0 = vcmp.lt.s32.totalorder %v1572_v33, 32 }
 0x198   : > { %v973_v24 = vmul.f32 0.1, %v969_v23  ;;  %vm971_vm1 = vcmp.ge.f32.partialorder %v969_v23, 0.0  ;;  %vm1059_vm13 = vmand %vm1055_vm11, %vm1057_vm12  ;;  %vm1087_vm11 = vcmask 998400   ;;  %vm1612_vm12 = vcmask 973824  }
 0x19a   : > { %v975_v26 = vsel %vm971_vm1, %v969_v23, %v973_v24  ;;  %v950_v27 = vpop.f32.mrf.mxu1  ;;  %vm1578_vm1 = vmand %vm1574_vm15, %vm1576_vm0 }
 0x19b   : > { %979 = vrot.lane.b32.xlu0 %v975_v26, %s2307_s8  ;;  %986 = vrot.lane.b32.xlu2 %v975_v26, %s2967_s4 }
 0x19c   : > { %v937_v28 = vpop.f32.mrf.mxu0 }
 0x1a3   : > { %2171 = vrot.lane.b32.xlu0 %v2175_v12, %s2973_s9  ;;  %1259 = vrot.lane.b32.xlu2 %v2305_v0, %s2947_s30  ;;  %s2319_s30 = smov 108  }
 0x1ab   : > { %2186 = vrot.lane.b32.xlu0 %v2175_v12, %s2307_s8  ;;  %2181 = vrot.lane.b32.xlu2 %v2175_v12, %s2953_s0  ;;  %v2671_v12 = vld [vmem:[%s2930_s16] sm:$0xf] }
 0x1b3   : > { %1043 = vrot.lane.b32.xlu0 %v2488_v2, %s2315_s29  ;;  %1041 = vrot.lane.b32.xlu2 %v2486_v1, %s2315_s29  ;;  %s2974_s29 = sld [smem:[#allocation8_spill]] }
 0x1bb   : > { %1563 = vrot.lane.b32.xlu0 %v2488_v2, %s2973_s9  ;;  %1561 = vrot.lane.b32.xlu2 %v2486_v1, %s2973_s9  ;;  %v2624_v2 = vld [vmem:[%s2974_s29] sm:$0xf]  ;;  %v2628_v1 = vpop.permute.xlu1 %1267  ;;  %s2975_s29 = sld [smem:[#allocation12_spill]] }
 0x1bc   : > { %2086 = vmatmul.msk.bf16.vlgmr.msrb.gmra.mxu1 %vm915_vm4, %v2624_v2  ;;  %v1277_v34 = vpack.c.bf16 %v2628_v1, %v2628_v1 }
 0x1be   : > { %v1291_v36 = vsel %vm919_vm2, %v1277_v34, 0 }
 0x1bf   : > { %1312 = vmatpush.bf16.msra.mxu1 %v1291_v36 }
 0x1c1   : > { %v2643_v45 = vld [vmem:[%s2975_s29] sm:$0xf]  ;;  %s2316_s29 = smov 119  }
 0x1c3   : > { %v2177_v47 = vpop.permute.xlu1 %2176 }
 0x1c4   : > { %v2178_v57 = vunpack.i.l.bf16 %v2177_v47 }
 0x1f5   : > { %v987_v37 = vpop.permute.xlu2 %986 }
 0x1f6   : > { %v990_v38 = vsel %vm883_vm6, %v987_v37, %v2511_v11  ;;  %v2179_v11 = vunpack.i.h.bf16 %v2177_v47 }
 0x1f7   : > { %v996_v39 = vpack.c.bf16 %v990_v38, %v990_v38 }
 0x1f8   : > { %v1496_v63 = vsel %vm883_vm6, %v2178_v57, %v2179_v11 }
 0x1f9   : > { %v1008_v40 = vsel %vm919_vm2, %v996_v39, 0 }
 0x1fa   : > { %1019 = vmatpush.bf16.msra.mxu2 %v1008_v40 }
 0x1fd   : > { %v2636_v42 = vpop.permute.xlu2 %1259 }
 0x1fe   : > { %v1275_v43 = vpack.c.bf16 %v2636_v42, %v2305_v0 }
 0x200   : > { %1313 = vmatpush.bf16.msra.mxu1 %v1275_v43 }
 0x203   : > { %2090 = vmatmul.msk.bf16.vlgmr.msra.gmra.mxu1 %vm915_vm4, %v2643_v45 }
 0x205   : > { %v2182_v48 = vpop.permute.xlu2 %2181 }
 0x206   : > { %v2184_v49 = vunpack.i.h.bf16 %v2182_v48  ;;  %v2183_v58 = vunpack.i.l.bf16 %v2182_v48 }
 0x208   : > { %v2647_v50 = vpack.c.bf16 %v2184_v49, %v2179_v11 }
 0x20d   : > { %v980_v51 = vpop.permute.xlu0 %979  ;;  %v1042_v21 = vpop.permute.xlu2 %1041 }
 0x20e   : > { %v983_v52 = vsel %vm875_vm7, %v980_v51, %v2522_v18  ;;  %v1503_v18 = vsel %vm1079_vm5, %v2183_v58, %v2184_v49  ;;  %v1631_v58 = vld [vmem:[%s2933_s19] sm:$0xff] }
 0x20f   : > { %v994_v53 = vpack.c.bf16 %v983_v52, %v975_v26  ;;  %v1516_v5 = vpack.c.bf16 %v1503_v18, %v1496_v63  ;;  %v1096_v52 = vld [vmem:[%s2976_s10] sm:$0xff]  ;;  %s2318_s10 = smov 113  }
 0x211   : > { %1020 = vmatpush.bf16.msra.mxu2 %v994_v53 }
 0x214   : > { %2083 = vmatmul.msk.bf16.vlgmr.msra.gmra.mxu2 %vm915_vm4, %v2530_v25 }
 0x215   : > { %v2172_v54 = vpop.permute.xlu0 %2171  ;;  %v1562_v36 = vpop.permute.xlu2 %1561 }
 0x216   : > { %v2653_v55 = vunpack.i.h.bf16 %v2172_v54  ;;  %v2173_v56 = vunpack.i.l.bf16 %v2172_v54 }
 0x218   : > { %v1510_v59 = vsel %vm1227_vm3, %v2173_v56, %v2653_v55 }
 0x219   : > { %v1518_v60 = vpack.c.bf16 %v1510_v59, %v1510_v59 }
 0x21b   : > { %v1530_v62 = vsel %vm919_vm2, %v1518_v60, 0 }
 0x21c   : > { %1540 = vmatpush.bf16.msrb.mxu1 %v1530_v62 }
 0x21d   : > { %v2660_v3 = vpop.permute.xlu0 %2186 }
 0x21e   : > { %v2189_v25 = vunpack.i.h.bf16 %v2660_v3  ;;  %v2188_v4 = vunpack.i.l.bf16 %v2660_v3 }
 0x220   : > { %1541 = vmatpush.bf16.msrb.mxu1 %v1516_v5  ;;  %v1489_v6 = vsel %vm875_vm7, %v2188_v4, %v2189_v25 }
 0x221   : > { %v1514_v7 = vpack.c.bf16 %v1489_v6, %v2588_v10  ;;  %v1002_v10 = vpop.permute.xlu1 %1001 }
 0x224   : > { %1542 = vmatpush.bf16.msrb.mxu1 %v1514_v7 }
 0x225   : > { %v1044_v20 = vpop.permute.xlu0 %1043 }
 0x226   : > { %v1046_v23 = vsel %vm1045_vm10, %v1042_v21, %v1044_v20 }
 0x227   : > { %2094 = vmatmul.msk.bf16.vlgmr.msrb.gmra.mxu1 %vm1425_vm8, %v2671_v12 }
 0x229   : > { %v1524_v37 = vpop.permute.xlu1 %1523 }
 0x22d   : > { %v1564_v34 = vpop.permute.xlu0 %1563 }
 0x22e   : > { %v1565_v39 = vsel %vm1227_vm3, %v1562_v36, %v1564_v34 }
 0x239   : > { %v1133_v14 = vpop.f32.mrf.mxu1 }
 0x241   : > { %v1135_v15 = vpop.f32.mrf.mxu1 }
 0x280   : > { %v1315_v16 = vpop.f32.mrf.mxu1 }
 0x288   : > { %v1317_v17 = vpop.f32.mrf.mxu1 }
 0x297   : > { %v1022_v22 = vpop.f32.mrf.mxu2 }
 0x298   : > { %v1023_v24 = vadd.f32 %v1022_v22, %v1002_v10 }
 0x29a   : > { %v1049_v26 = vadd.f32 %v1046_v23, %v1023_v24 }
 0x29c   : > { %v2676_v27 = vsel %vm1059_vm13, %v1049_v26, 0.0 }
 0x29d   : > { %vm1067_vm14 = vcmp.ge.f32.partialorder %v2676_v27, 0.0  ;;  %v1069_v28 = vmul.f32 0.1, %v2676_v27 }
 0x29f   : > { %v1024_v30 = vpop.f32.mrf.mxu2  ;;  %v1071_v31 = vsel %vm1067_vm14, %v2676_v27, %v1069_v28  ;;  %v2724_v28 = vld [vmem:[%s2932_s18] sm:$0xf] }
 0x2a0   : > { %1075 = vrot.lane.b32.xlu2 %v1071_v31, %s2953_s0  ;;  %1083 = vrot.lane.b32.xlu1 %v1071_v31, %s2949_s6  ;;  %v1139_v30 = vadd.s32 4294967289, %v2585_v61 }
 0x2a2   : > { %vm1141_vm13 = vcmp.ge.s32.totalorder %v1139_v30, 0  ;;  %vm1143_vm14 = vcmp.lt.s32.totalorder %v1139_v30, 32 }
 0x2a3   : > { %vm1145_vm15 = vmand %vm1141_vm13, %vm1143_vm14 }
 0x2a4   : > { %v1544_v38 = vpop.f32.mrf.mxu1 }
 0x2a5   : > { %v1545_v40 = vadd.f32 %v1544_v38, %v1524_v37 }
 0x2a7   : > { %v1568_v43 = vadd.f32 %v1565_v39, %v1545_v40  ;;  %v1674_v40 = vadd.s32 4294967282, %v2585_v61 }
 0x2a9   : > { %v2685_v47 = vsel %vm1578_vm1, %v1568_v43, 0.0  ;;  %vm1676_vm1 = vcmp.ge.s32.totalorder %v1674_v40, 0 }
 0x2aa   : > { %vm1586_vm10 = vcmp.ge.f32.partialorder %v2685_v47, 0.0  ;;  %v1588_v11 = vmul.f32 0.1, %v2685_v47 }
 0x2ac   : > { %v1590_v48 = vsel %vm1586_vm10, %v2685_v47, %v1588_v11  ;;  %v1546_v49 = vpop.f32.mrf.mxu1  ;;  %vm1678_vm10 = vcmp.lt.s32.totalorder %v1674_v40, 32 }
 0x2ad   : > { %v2200_v51 = vpack.i.bf16 0.0, %v1590_v48 }
 0x2af   : > { %2201 = vrot.lane.b32.xlu2 %v2200_v51, %s2316_s29  ;;  %2196 = vrot.lane.b32.xlu1 %v2200_v51, %s2949_s6  ;;  %s2977_s29 = sld [smem:[#allocation11_spill]]  ;;  %s2317_s6 = smov 120  }
 0x2b0   : > { %2191 = vrot.lane.b32.xlu0 %v2200_v51, %s2951_s5 }
 0x2b7   : > { %1099 = vperm.xlu1 %2169, %v1096_v52   ;;  %1634 = vperm.xlu2 %2210, %v1631_v58  }
 0x2b8   : > { %2206 = vrot.lane.b32.xlu0 %v2200_v51, %s2953_s0 }
 0x2fa   : > { %v1076_v54 = vpop.permute.xlu2 %1075 }
 0x2fb   : > { %v1080_v59 = vsel %vm1079_vm5, %v1076_v54, %v2617_v32 }
 0x2fc   : > { %v1092_v62 = vpack.c.bf16 %v1080_v59, %v1071_v31 }
 0x309   : > { %v2202_v63 = vpop.permute.xlu2 %2201 }
 0x30a   : > { %v2203_v16 = vunpack.i.l.bf16 %v2202_v63 }
 0x311   : > { %v1635_v43 = vpop.permute.xlu2 %1634 }
 0x312   : > { %v1084_v53 = vpop.permute.xlu1 %1083 }
 0x313   : > { %v1088_v56 = vsel %vm1087_vm11, %v1084_v53, %v2612_v29  ;;  %v2204_v29 = vunpack.i.h.bf16 %v2202_v63 }
 0x314   : > { %v1094_v57 = vpack.c.bf16 %v1088_v56, %v1088_v56  ;;  %v1180_v56 = vld [vmem:[%s2977_s29] sm:$0xff]  ;;  %s2979_s29 = smov 118  }
 0x315   : > { %v1613_v21 = vsel %vm1612_vm12, %v2203_v16, %v2204_v29  ;;  %vm1680_vm12 = vmand %vm1676_vm1, %vm1678_vm10  ;;  %vm1778_vm10 = vcmask 982016  }
 0x316   : > { %v1106_v60 = vsel %vm919_vm2, %v1094_v57, 0  ;;  %v1731_v57 = vld [vmem:[%s2935_s21] sm:$0xff] }
 0x317   : > { %1117 = vmatpush.bf16.msrb.mxu0 %v1106_v60 }
 0x31b   : > { %1118 = vmatpush.bf16.msrb.mxu0 %v1092_v62 }
 0x31e   : > { %2085 = vmatmul.msk.bf16.vlgmr.msrb.gmra.mxu0 %vm915_vm4, %v2624_v2 }
 0x321   : > { %v2197_v18 = vpop.permute.xlu1 %2196 }
 0x322   : > { %v2199_v4 = vunpack.i.h.bf16 %v2197_v18  ;;  %v2192_v5 = vpop.permute.xlu0 %2191  ;;  %v2198_v15 = vunpack.i.l.bf16 %v2197_v18 }
 0x323   : > { %v2706_v6 = vunpack.i.h.bf16 %v2192_v5  ;;  %v2193_v7 = vunpack.i.l.bf16 %v2192_v5 }
 0x324   : > { %v2708_v14 = vpack.c.bf16 %v2204_v29, %v2199_v4  ;;  %v1605_v2 = vsel %vm1087_vm11, %v2198_v15, %v2199_v4 }
 0x325   : > { %v1621_v32 = vsel %vm910_vm9, %v2193_v7, %v2706_v6  ;;  %v1627_v23 = vpack.c.bf16 %v1613_v21, %v1605_v2 }
 0x326   : > { %v1629_v17 = vpack.c.bf16 %v1621_v32, %v1621_v32 }
 0x328   : > { %v1641_v19 = vsel %vm919_vm2, %v1629_v17, 0 }
 0x329   : > { %1651 = vmatpush.bf16.msrb.mxu3 %v1641_v19  ;;  %v1100_v31 = vpop.permute.xlu1 %1099 }
 0x32a   : > { %v2714_v20 = vpop.permute.xlu0 %2206 }
 0x32b   : > { %v2209_v10 = vunpack.i.h.bf16 %v2714_v20  ;;  %v2208_v22 = vunpack.i.l.bf16 %v2714_v20 }
 0x32d   : > { %1652 = vmatpush.bf16.msrb.mxu3 %v1627_v23  ;;  %v1598_v24 = vsel %vm1079_vm5, %v2208_v22, %v2209_v10 }
 0x32e   : > { %v1625_v26 = vpack.c.bf16 %v1598_v24, %v1590_v48 }
 0x331   : > { %1653 = vmatpush.bf16.msrb.mxu3 %v1625_v26 }
 0x334   : > { %2096 = vmatmul.msk.bf16.vlgmr.msrb.gmra.mxu3 %vm1425_vm8, %v2724_v28 }
 0x39b   : > { %v1120_v33 = vpop.f32.mrf.mxu0 }
 0x39c   : > { %v1121_v34 = vadd.f32 %v1120_v33, %v1100_v31  ;;  %v2774_v33 = vld [vmem:[%s2934_s20] sm:$0xf] }
 0x39e   : > { %v1151_v36 = vsel %vm1145_vm15, %v1121_v34, 0.0  ;;  %v1235_v34 = vadd.s32 4294967290, %v2585_v61 }
 0x39f   : > { %v1155_v37 = vmul.f32 0.1, %v1151_v36  ;;  %vm1153_vm0 = vcmp.ge.f32.partialorder %v1151_v36, 0.0 }
 0x3a0   : > { %vm1237_vm14 = vcmp.ge.s32.totalorder %v1235_v34, 0  ;;  %vm1239_vm15 = vcmp.lt.s32.totalorder %v1235_v34, 32 }
 0x3a1   : > { %v1157_v38 = vsel %vm1153_vm0, %v1151_v36, %v1155_v37  ;;  %vm1241_vm0 = vmand %vm1237_vm14, %vm1239_vm15 }
 0x3a2   : > { %1161 = vrot.lane.b32.xlu1 %v1157_v38, %s2307_s8  ;;  %1168 = vrot.lane.b32.xlu0 %v1157_v38, %s2967_s4 }
 0x3a3   : > { %v1122_v39 = vpop.f32.mrf.mxu0 }
 0x3b7   : > { %v1655_v11 = vpop.f32.mrf.mxu3 }
 0x3b8   : > { %v1656_v48 = vadd.f32 %v1655_v11, %v1635_v43 }
 0x3ba   : > { %v1686_v49 = vsel %vm1680_vm12, %v1656_v48, 0.0 }
 0x3bb   : > { %vm1688_vm13 = vcmp.ge.f32.partialorder %v1686_v49, 0.0  ;;  %v1690_v51 = vmul.f32 0.1, %v1686_v49 }
 0x3bd   : > { %v1692_v52 = vsel %vm1688_vm13, %v1686_v49, %v1690_v51 }
 0x3be   : > { %v2221_v53 = vpack.i.bf16 0.0, %v1692_v52 }
 0x3bf   : > { %v1657_v54 = vpop.f32.mrf.mxu3 }
 0x3c0   : > { %2222 = vrot.lane.b32.xlu1 %v2221_v53, %s2953_s0  ;;  %2217 = vrot.lane.b32.xlu0 %v2221_v53, %s2967_s4 }
 0x3c1   : > { %2212 = vrot.lane.b32.xlu2 %v2221_v53, %s2973_s9 }
 0x3c8   : > { %1223 = vrot.lane.b32.xlu1 %v2676_v27, %s2973_s9  ;;  %1183 = vperm.xlu0 %2168, %v1180_v56  }
 0x3c9   : > { %2227 = vrot.lane.b32.xlu2 %v2221_v53, %s2307_s8  ;;  %v1786_v53 = vadd.s32 4294967284, %v2585_v61 }
 0x3cb   : > { %vm1788_vm12 = vcmp.ge.s32.totalorder %v1786_v53, 0  ;;  %vm1790_vm13 = vcmp.lt.s32.totalorder %v1786_v53, 32 }
 0x3cc   : > { %vm1792_vm14 = vmand %vm1788_vm12, %vm1790_vm13  ;;  %vm1826_vm12 = vcmask 924672  }
 0x3d0   : > { %1774 = vrot.lane.b32.xlu1 %v2685_v47, %s2317_s6  ;;  %1734 = vperm.xlu0 %2168, %v1731_v57  }
 0x3d1   : > { %1225 = vrot.lane.b32.xlu2 %v2305_v0, %s2973_s9 }
 0x3d9   : > { %1776 = vrot.lane.b32.xlu2 %v2305_v0, %s2317_s6 }
 0x414   : > { %v1169_v58 = vpop.permute.xlu0 %1168  ;;  %v1162_v59 = vpop.permute.xlu1 %1161 }
 0x415   : > { %v1172_v27 = vsel %vm883_vm6, %v1169_v58, %v2507_v8  ;;  %v1165_v62 = vsel %vm875_vm7, %v1162_v59, %v2509_v9 }
 0x416   : > { %v1178_v60 = vpack.c.bf16 %v1172_v27, %v1172_v27  ;;  %v1176_v47 = vpack.c.bf16 %v1165_v62, %v1157_v38 }
 0x418   : > { %v1190_v63 = vsel %vm919_vm2, %v1178_v60, 0 }
 0x419   : > { %1201 = vmatpush.bf16.msrb.mxu2 %v1190_v63 }
 0x41b   : > { %v2213_v18 = vpop.permute.xlu2 %2212 }
 0x41c   : > { %v2753_v29 = vunpack.i.h.bf16 %v2213_v18  ;;  %v2214_v4 = vunpack.i.l.bf16 %v2213_v18 }
 0x41d   : > { %1202 = vmatpush.bf16.msrb.mxu2 %v1176_v47 }
 0x41e   : > { %v1721_v5 = vsel %vm1227_vm3, %v2214_v4, %v2753_v29 }
 0x41f   : > { %v1729_v7 = vpack.c.bf16 %v1721_v5, %v1721_v5  ;;  %v1845_v5 = vld [vmem:[%s2937_s23] sm:$0xff] }
 0x420   : > { %2087 = vmatmul.msk.bf16.vlgmr.msrb.gmra.mxu2 %vm915_vm4, %v2553_v44 }
 0x421   : > { %v1741_v8 = vsel %vm919_vm2, %v1729_v7, 0  ;;  %v1278_v7 = vld [vmem:[%s2925_s11] sm:$0xff] }
 0x422   : > { %1751 = vmatpush.bf16.msra.mxu1 %v1741_v8 }
 0x423   : > { %v2760_v9 = vpop.permute.xlu2 %2227 }
 0x424   : > { %v2230_v15 = vunpack.i.h.bf16 %v2760_v9  ;;  %v2229_v32 = vunpack.i.l.bf16 %v2760_v9 }
 0x426   : > { %v1700_v30 = vsel %vm875_vm7, %v2229_v32, %v2230_v15 }
 0x427   : > { %v1725_v31 = vpack.c.bf16 %v1700_v30, %v1692_v52 }
 0x42b   : > { %v1226_v37 = vpop.permute.xlu2 %1225 }
 0x432   : > { %v2223_v16 = vpop.permute.xlu1 %2222  ;;  %v2218_v17 = vpop.permute.xlu0 %2217 }
 0x433   : > { %v2225_v19 = vunpack.i.h.bf16 %v2223_v16  ;;  %v2224_v2 = vunpack.i.l.bf16 %v2223_v16  ;;  %v2220_v21 = vunpack.i.h.bf16 %v2218_v17  ;;  %v2219_v22 = vunpack.i.l.bf16 %v2218_v17  ;;  %v1777_v56 = vpop.permute.xlu2 %1776 }
 0x435   : > { %v2764_v23 = vpack.c.bf16 %v2225_v19, %v2220_v21  ;;  %v1707_v24 = vsel %vm883_vm6, %v2219_v22, %v2220_v21  ;;  %v1714_v44 = vsel %vm1079_vm5, %v2224_v2, %v2225_v19  ;;  %v1418_v22 = vpack.c.bf16 %v2515_v13, %v2515_v13 }
 0x436   : > { %v1727_v26 = vpack.c.bf16 %v1714_v44, %v1707_v24 }
 0x438   : > { %1752 = vmatpush.bf16.msra.mxu1 %v1727_v26 }
 0x43a   : > { %v1224_v36 = vpop.permute.xlu1 %1223  ;;  %v1184_v38 = vpop.permute.xlu0 %1183 }
 0x43b   : > { %v1228_v43 = vsel %vm1227_vm3, %v1224_v36, %v1226_v37 }
 0x43c   : > { %1753 = vmatpush.bf16.msra.mxu1 %v1725_v31 }
 0x43f   : > { %2098 = vmatmul.msk.bf16.vlgmr.msra.gmra.mxu1 %vm1425_vm8, %v2774_v33 }
 0x442   : > { %v1775_v54 = vpop.permute.xlu1 %1774  ;;  %v1735_v57 = vpop.permute.xlu0 %1734 }
 0x443   : > { %v1779_v27 = vsel %vm1778_vm10, %v1775_v54, %v1777_v56  ;;  %vm1834_vm10 = vcmask 883712   ;;  %v1321_v56 = vadd.s32 4294967295, %v2585_v61 }
 0x445   : > { %vm1323_vm13 = vcmp.ge.s32.totalorder %v1321_v56, 0 }
 0x4a3   : > { %v1204_v39 = vpop.f32.mrf.mxu2 }
 0x4a4   : > { %v1205_v40 = vadd.f32 %v1204_v39, %v1184_v38  ;;  %v1626_v38 = vpack.c.bf16 %v2209_v10, %v2305_v0 }
 0x4a6   : > { %v1231_v11 = vadd.f32 %v1228_v43, %v1205_v40 }
 0x4a8   : > { %v2780_v48 = vsel %vm1241_vm0, %v1231_v11, 0.0  ;;  %vm1269_vm0 = vcmask 965632  }
 0x4a9   : > { %vm1249_vm1 = vcmp.ge.f32.partialorder %v2780_v48, 0.0  ;;  %v1251_v49 = vmul.f32 0.1, %v2780_v48 }
 0x4ab   : > { %v1206_v51 = vpop.f32.mrf.mxu2  ;;  %v1253_v52 = vsel %vm1249_vm1, %v2780_v48, %v1251_v49  ;;  %vm1261_vm1 = vcmask 1006592  }
 0x4ac   : > { %1257 = vrot.lane.b32.xlu1 %v1253_v52, %s2978_s1  ;;  %1265 = vrot.lane.b32.xlu0 %v1253_v52, %s2979_s29 }
 0x4bc   : > { %v1755_v58 = vpop.f32.mrf.mxu1 }
 0x4bd   : > { %v1756_v59 = vadd.f32 %v1755_v58, %v1735_v57 }
 0x4bf   : > { %v1782_v60 = vadd.f32 %v1779_v27, %v1756_v59 }
 0x4c1   : > { %v2788_v62 = vsel %vm1792_vm14, %v1782_v60, 0.0  ;;  %vm1325_vm14 = vcmp.lt.s32.totalorder %v1321_v56, 32 }
 0x4c2   : > { %vm1800_vm15 = vcmp.ge.f32.partialorder %v2788_v62, 0.0  ;;  %v1802_v63 = vmul.f32 0.1, %v2788_v62 }
 0x4c4   : > { %v2793_v18 = vsel %vm1800_vm15, %v2788_v62, %v1802_v63  ;;  %v1757_v47 = vpop.f32.mrf.mxu1  ;;  %vm1327_vm15 = vmand %vm1323_vm13, %vm1325_vm14 }
 0x4c5   : > { %v2241_v4 = vpack.i.bf16 0.0, %v2793_v18 }
 0x4c7   : > { %2242 = vrot.lane.b32.xlu1 %v2241_v4, %s2318_s10  ;;  %2237 = vrot.lane.b32.xlu0 %v2241_v4, %s2979_s29 }
 0x4c8   : > { %2232 = vrot.lane.b32.xlu2 %v2241_v4, %s2319_s30 }
 0x4cf   : > { %1848 = vperm.xlu1 %2169, %v1845_v5   ;;  %1281 = vperm.xlu0 %2168, %v1278_v7   ;;  %v1888_v5 = vadd.s32 4294967294, %v2585_v61 }
 0x4d0   : > { %2247 = vrot.lane.b32.xlu2 %v2241_v4, %s2978_s1  ;;  %s2980_s1 = smov 125  }
 0x51e   : > { %v1266_v8 = vpop.permute.xlu0 %1265  ;;  %v1258_v32 = vpop.permute.xlu1 %1257 }
 0x51f   : > { %v1270_v16 = vsel %vm1269_vm0, %v1266_v8, %v2628_v1  ;;  %v1262_v19 = vsel %vm1261_vm1, %v1258_v32, %v2636_v42  ;;  %v1433_v1 = vsel %vm919_vm2, %v1418_v22, 0  ;;  %v1630_v42 = vpack.c.bf16 %v2706_v6, %v2706_v6 }
 0x520   : > { %v1276_v17 = vpack.c.bf16 %v1270_v16, %v1270_v16  ;;  %v1274_v26 = vpack.c.bf16 %v1262_v19, %v1253_v52 }
 0x521   : > { %v1644_v13 = vsel %vm919_vm2, %v1630_v42, 0 }
 0x522   : > { %v2233_v2 = vpop.permute.xlu2 %2232  ;;  %v1288_v21 = vsel %vm919_vm2, %v1276_v17, 0 }
 0x523   : > { %v2235_v24 = vunpack.i.h.bf16 %v2233_v2  ;;  %v2234_v44 = vunpack.i.l.bf16 %v2233_v2  ;;  %1299 = vmatpush.bf16.msra.mxu0 %v1288_v21 }
 0x525   : > { %v1835_v30 = vsel %vm1834_vm10, %v2234_v44, %v2235_v24  ;;  %v1844_v36 = vpack.c.bf16 %v2235_v24, %v2235_v24  ;;  %vm1892_vm10 = vcmp.lt.s32.totalorder %v1888_v5, 32  ;;  %v1938_v44 = vld [vmem:[%s2939_s25] sm:$0xff] }
 0x526   : > { %v1843_v31 = vpack.c.bf16 %v1835_v30, %v1835_v30 }
 0x527   : > { %1300 = vmatpush.bf16.msra.mxu0 %v1274_v26  ;;  %v1358_v26 = vld [vmem:[%s2927_s13] sm:$0xff] }
 0x528   : > { %v1855_v34 = vsel %vm919_vm2, %v1843_v31, 0 }
 0x529   : > { %1865 = vmatpush.bf16.msra.mxu3 %v1855_v34 }
 0x52a   : > { %2089 = vmatmul.msk.bf16.vlgmr.msra.gmra.mxu0 %vm915_vm4, %v2643_v45  ;;  %v2248_v37 = vpop.permute.xlu2 %2247 }
 0x52b   : > { %1453 = vmatpush.bf16.msrb.mxu0 %v1433_v1  ;;  %v2250_v39 = vunpack.i.h.bf16 %v2248_v37  ;;  %v2249_v45 = vunpack.i.l.bf16 %v2248_v37 }
 0x52d   : > { %v1812_v52 = vsel %vm1261_vm1, %v2249_v45, %v2250_v39  ;;  %v1840_v53 = vpack.c.bf16 %v2250_v39, %v2305_v0  ;;  %vm1890_vm1 = vcmp.ge.s32.totalorder %v1888_v5, 0  ;;  %v1519_v45 = vpack.c.bf16 %v2653_v55, %v2653_v55 }
 0x52e   : > { %v1839_v54 = vpack.c.bf16 %v1812_v52, %v2793_v18  ;;  %v1515_v55 = vpack.c.bf16 %v2189_v25, %v2305_v0 }
 0x52f   : > { %1454 = vmatpush.bf16.msrb.mxu0 %v2539_v35  ;;  %v1858_v35 = vsel %vm919_vm2, %v1844_v36, 0 }
 0x533   : > { %1455 = vmatpush.bf16.msrb.mxu0 %v2543_v41 }
 0x537   : > { %1664 = vmatpush.bf16.msra.mxu0 %v1644_v13 }
 0x539   : > { %v2243_v40 = vpop.permute.xlu1 %2242  ;;  %v2238_v43 = vpop.permute.xlu0 %2237 }
 0x53a   : > { %v2245_v41 = vunpack.i.h.bf16 %v2243_v40  ;;  %v2244_v6 = vunpack.i.l.bf16 %v2243_v40  ;;  %v2240_v11 = vunpack.i.h.bf16 %v2238_v43  ;;  %v2239_v49 = vunpack.i.l.bf16 %v2238_v43  ;;  %2093 = vmatmul.msk.bf16.vlgmr.msrb.gmra.mxu0 %vm1425_vm8, %v2565_v46  ;;  %v1838_v46 = vld [vmem:[%s2936_s22] sm:$0xf] }
 0x53b   : > { %1665 = vmatpush.bf16.msra.mxu0 %v2708_v14  ;;  %v1533_v43 = vsel %vm919_vm2, %v1519_v45, 0 }
 0x53c   : > { %v1842_v14 = vpack.c.bf16 %v2245_v41, %v2240_v11  ;;  %v1819_v20 = vsel %vm1269_vm0, %v2239_v49, %v2240_v11  ;;  %v1827_v10 = vsel %vm1826_vm12, %v2244_v6, %v2245_v41  ;;  %vm1894_vm12 = vmand %vm1890_vm1, %vm1892_vm10  ;;  %v1730_v41 = vpack.c.bf16 %v2753_v29, %v2753_v29 }
 0x53d   : > { %v1841_v51 = vpack.c.bf16 %v1827_v10, %v1819_v20  ;;  %v1726_v11 = vpack.c.bf16 %v2230_v15, %v2305_v0 }
 0x53e   : > { %v1744_v6 = vsel %vm919_vm2, %v1730_v41, 0 }
 0x53f   : > { %1666 = vmatpush.bf16.msra.mxu0 %v1626_v38  ;;  %1866 = vmatpush.bf16.msra.mxu3 %v1841_v51 }
 0x541   : > { %v1282_v57 = vpop.permute.xlu0 %1281  ;;  %v1849_v8 = vpop.permute.xlu1 %1848 }
 0x543   : > { %1878 = vmatpush.bf16.msrb.mxu0 %v1858_v35  ;;  %1867 = vmatpush.bf16.msra.mxu3 %v1839_v54  ;;  %v1355_v35 = vld [vmem:[%s2926_s12] sm:$0xf] }
 0x546   : > { %2100 = vmatmul.msk.bf16.vlgmr.msra.gmra.mxu3 %vm1425_vm8, %v1838_v46 }
 0x547   : > { %1879 = vmatpush.bf16.msrb.mxu0 %v1842_v14 }
 0x54a   : > { %2097 = vmatmul.msk.bf16.vlgmr.msra.gmra.mxu0 %vm1425_vm8, %v2724_v28 }
 0x54b   : > { %1880 = vmatpush.bf16.msrb.mxu0 %v1840_v53 }
 0x55a   : > { %2101 = vmatmul.msk.bf16.vlgmr.msrb.gmra.mxu0 %vm1425_vm8, %v1838_v46 }
 0x5a7   : > { %v1302_v58 = vpop.f32.mrf.mxu0 }
 0x5a8   : > { %v1303_v59 = vadd.f32 %v1302_v58, %v1282_v57  ;;  %v1934_v58 = vld [vmem:[%s2938_s24] sm:$0xf] }
 0x5aa   : > { %v1333_v27 = vsel %vm1327_vm15, %v1303_v59, 0.0 }
 0x5ab   : > { %vm1335_vm0 = vcmp.ge.f32.partialorder %v1333_v27, 0.0  ;;  %v1337_v60 = vmul.f32 0.1, %v1333_v27 }
 0x5ad   : > { %v1339_v63 = vsel %vm1335_vm0, %v1333_v27, %v1337_v60 }
 0x5ae   : > { %v2256_v18 = vpack.i.bf16 0.0, %v1339_v63 }
 0x5af   : > { %v1304_v47 = vpop.f32.mrf.mxu0 }
 0x5b0   : > { %2257 = vrot.lane.b32.xlu0 %v2256_v18, %s2307_s8  ;;  %2252 = vrot.lane.b32.xlu2 %v2256_v18, %s2967_s4 }
 0x5b7   : > { %v1457_v28 = vpop.f32.mrf.mxu0 }
 0x5bf   : > { %v1459_v4 = vpop.f32.mrf.mxu0 }
 0x5c7   : > { %v1668_v7 = vpop.f32.mrf.mxu0 }
 0x5c9   : > { %v1869_v32 = vpop.f32.mrf.mxu3 }
 0x5ca   : > { %v1870_v16 = vadd.f32 %v1869_v32, %v1849_v8 }
 0x5cc   : > { %v1900_v17 = vsel %vm1894_vm12, %v1870_v16, 0.0 }
 0x5cd   : > { %vm1902_vm13 = vcmp.ge.f32.partialorder %v1900_v17, 0.0  ;;  %v1904_v19 = vmul.f32 0.1, %v1900_v17 }
 0x5cf   : > { %v2842_v2 = vsel %vm1902_vm13, %v1900_v17, %v1904_v19  ;;  %v1670_v21 = vpop.f32.mrf.mxu0 }
 0x5d0   : > { %v2271_v22 = vpack.i.bf16 0.0, %v2842_v2 }
 0x5d1   : > { %v1871_v24 = vpop.f32.mrf.mxu3 }
 0x5d2   : > { %2272 = vrot.lane.b32.xlu0 %v2271_v22, %s2980_s1  ;;  %2267 = vrot.lane.b32.xlu2 %v2271_v22, %s2967_s4  ;;  %s2982_s4 = smov 122   ;;  %s2080_s1 = sshll.u32 %s2988_s27, 3 }
 0x5d3   : > { %2262 = vrot.lane.b32.xlu1 %v2271_v22, %s2973_s9  ;;  %s858_s30 = scalar_lea.vmem %s2940_s26, %s2080_s1 }
 0x5d7   : > { %v1882_v30 = vpop.f32.mrf.mxu0 }
 0x5da   : > { %1941 = vperm.xlu0 %2168, %v1938_v44   ;;  %1361 = vperm.xlu2 %2210, %v1358_v26  }
 0x5db   : > { %2277 = vrot.lane.b32.xlu1 %v2271_v22, %s2307_s8 }
 0x5df   : > { %v1884_v31 = vpop.f32.mrf.mxu0 }
 0x5e2   : > { %1965 = vrot.lane.b32.xlu0 %v2788_v62, %s2981_s2  ;;  %1387 = vrot.lane.b32.xlu2 %v2305_v0, %s2982_s4 }
 0x5e3   : > { %1385 = vrot.lane.b32.xlu1 %v2780_v48, %s2982_s4 }
 0x5eb   : > { %1967 = vrot.lane.b32.xlu1 %v2305_v0, %s2981_s2 }
 0x60a   : > { %v2253_v1 = vpop.permute.xlu2 %2252 }
 0x60b   : > { %v2255_v34 = vunpack.i.h.bf16 %v2253_v1  ;;  %v2254_v42 = vunpack.i.l.bf16 %v2253_v1 }
 0x60d   : > { %v1353_v13 = vsel %vm883_vm6, %v2254_v42, %v2255_v34 }
 0x60e   : > { %v1357_v36 = vpack.c.bf16 %v1353_v13, %v1353_v13 }
 0x610   : > { %v1368_v37 = vsel %vm919_vm2, %v1357_v36, 0 }
 0x611   : > { %1376 = vmatpush.bf16.msra.mxu2 %v1368_v37 }
 0x622   : > { %v2258_v38 = vpop.permute.xlu0 %2257 }
 0x623   : > { %v2260_v62 = vunpack.i.h.bf16 %v2258_v38  ;;  %v2259_v39 = vunpack.i.l.bf16 %v2258_v38 }
 0x625   : > { %v1347_v48 = vsel %vm875_vm7, %v2259_v39, %v2260_v62 }
 0x626   : > { %v1356_v40 = vpack.c.bf16 %v1347_v48, %v1339_v63 }
 0x628   : > { %1377 = vmatpush.bf16.msra.mxu2 %v1356_v40 }
 0x62b   : > { %2091 = vmatmul.msk.bf16.vlgmr.msra.gmra.mxu2 %vm915_vm4, %v1355_v35 }
 0x62c   : > { %1553 = vmatpush.bf16.msrb.mxu2 %v1533_v43  ;;  %v2268_v49 = vpop.permute.xlu2 %2267 }
 0x62d   : > { %v2270_v51 = vunpack.i.h.bf16 %v2268_v49  ;;  %v2269_v52 = vunpack.i.l.bf16 %v2268_v49 }
 0x62f   : > { %v1920_v9 = vsel %vm883_vm6, %v2269_v52, %v2270_v51 }
 0x630   : > { %1554 = vmatpush.bf16.msrb.mxu2 %v2647_v50 }
 0x634   : > { %1555 = vmatpush.bf16.msrb.mxu2 %v1515_v55  ;;  %v1362_v63 = vpop.permute.xlu2 %1361 }
 0x638   : > { %1764 = vmatpush.bf16.msra.mxu2 %v1744_v6 }
 0x63b   : > { %2095 = vmatmul.msk.bf16.vlgmr.msrb.gmra.mxu2 %vm1425_vm8, %v2671_v12 }
 0x63c   : > { %1765 = vmatpush.bf16.msra.mxu2 %v2764_v23  ;;  %v1388_v4 = vpop.permute.xlu2 %1387 }
 0x640   : > { %1766 = vmatpush.bf16.msra.mxu2 %v1726_v11 }
 0x644   : > { %v2273_v29 = vpop.permute.xlu0 %2272 }
 0x645   : > { %v2263_v50 = vpop.permute.xlu1 %2262  ;;  %v2275_v25 = vunpack.i.h.bf16 %v2273_v29  ;;  %v2274_v20 = vunpack.i.l.bf16 %v2273_v29 }
 0x646   : > { %v2265_v14 = vunpack.i.h.bf16 %v2263_v50  ;;  %v2264_v3 = vunpack.i.l.bf16 %v2263_v50 }
 0x647   : > { %v1926_v0 = vsel %vm1079_vm5, %v2274_v20, %v2275_v25 }
 0x648   : > { %v1932_v10 = vsel %vm1227_vm3, %v2264_v3, %v2265_v14  ;;  %v1936_v46 = vpack.c.bf16 %v1926_v0, %v1920_v9 }
 0x649   : > { %v1937_v23 = vpack.c.bf16 %v1932_v10, %v1932_v10 }
 0x64b   : > { %v1948_v53 = vsel %vm919_vm2, %v1937_v23, 0  ;;  %2099 = vmatmul.msk.bf16.vlgmr.msra.gmra.mxu2 %vm1425_vm8, %v2774_v33  ;;  %vm1395_vm2 = vcmp.lt.s32.totalorder %v2585_v61, 32 }
 0x64c   : > { %1955 = vmatpush.bf16.msrb.mxu1 %v1948_v53  ;;  %v1942_v47 = vpop.permute.xlu0 %1941 }
 0x64d   : > { %v2278_v12 = vpop.permute.xlu1 %2277 }
 0x64e   : > { %v2280_v15 = vunpack.i.h.bf16 %v2278_v12  ;;  %v2279_v54 = vunpack.i.l.bf16 %v2278_v12 }
 0x650   : > { %1956 = vmatpush.bf16.msrb.mxu1 %v1936_v46  ;;  %v1914_v56 = vsel %vm875_vm7, %v2279_v54, %v2280_v15 }
 0x651   : > { %v1935_v57 = vpack.c.bf16 %v1914_v56, %v2842_v2 }
 0x654   : > { %1957 = vmatpush.bf16.msrb.mxu1 %v1935_v57  ;;  %v1966_v16 = vpop.permute.xlu0 %1965 }
 0x655   : > { %v1386_v18 = vpop.permute.xlu1 %1385 }
 0x656   : > { %v1389_v8 = vsel %vm1087_vm11, %v1386_v18, %v1388_v4 }
 0x657   : > { %2102 = vmatmul.msk.bf16.vlgmr.msrb.gmra.mxu1 %vm1425_vm8, %v1934_v58 }
 0x65d   : > { %v1968_v7 = vpop.permute.xlu1 %1967 }
 0x65e   : > { %v1969_v2 = vsel %vm910_vm9, %v1966_v16, %v1968_v7 }
 0x6ae   : > { %v1379_v33 = vpop.f32.mrf.mxu2 }
 0x6af   : > { %v1380_v5 = vadd.f32 %v1379_v33, %v1362_v63 }
 0x6b1   : > { %v1391_v17 = vadd.f32 %v1389_v8, %v1380_v5 }
 0x6b3   : > { %v1399_v24 = vsel %vm1395_vm2, %v1391_v17, 0.0 }
 0x6b6   : > { %v1381_v59 = vpop.f32.mrf.mxu2 }
 0x6be   : > { %v1557_v27 = vpop.f32.mrf.mxu2 }
 0x6c6   : > { %v1559_v60 = vpop.f32.mrf.mxu2 }
 0x6ce   : > { %v1768_v28 = vpop.f32.mrf.mxu2 }
 0x6d4   : > { %v1959_v32 = vpop.f32.mrf.mxu1 }
 0x6d5   : > { %v1960_v19 = vadd.f32 %v1959_v32, %v1942_v47 }
 0x6d6   : > { %v1770_v21 = vpop.f32.mrf.mxu2 }
 0x6d7   : > { %v1971_v22 = vadd.f32 %v1969_v2, %v1960_v19 }
 0x6d9   : > { %v1972_v44 = vsel %vm1395_vm2, %v1971_v22, 0.0 }
 0x6da   : > { %v1973_v26 = vadd.f32 %v1972_v44, %v1399_v24 }
 0x6dc   : > { %v1974_v30 = vmul.f32 0.5, %v1973_v26  ;;  %v1961_v31 = vpop.f32.mrf.mxu1 }
 0x6de   : > { %1975 = vst [vmem:[%s858_s30] sm:$0xff] %v1974_v30 }
 0x6df PF: > { %s36_s7 = sadd.s32 1, %s2303_s7   ;;  %s2983_s27 = smov %s2299_s3 }
 0x6e0   : > { %p33_p5 = scmp.ge.s32.totalorder %s36_s7, 4   ;;  %s2984_s3 = smov %s2986_s28 }
 0x6e2   :  { %35 = sbr.rel (!%p33_p5) target bundleno = 12 (0xc), region = 157 }

</bundles_post_ra>
